<compile_context>
chip_gen: v7x
topology: tpu7x:2x2x1
jax: 0.10.0
libtpu: 0.0.40
codegen_flags: <defaults>
</compile_context>

<pallas_src>
import math

import jax
import jax.numpy as jnp
from jax.experimental import pallas as pl
from jax.experimental.pallas import tpu as pltpu

INPUT_DIM = 4096
HIDDEN_DIM1 = 2048
HIDDEN_DIM2 = 1024
HIDDEN_DIM3 = 512
HIDDEN_DIM4 = 256
OUTPUT_DIM = 1

LEAKY_SLOPE = 0.01          # F.leaky_relu default negative_slope
TN = 512                    # layer-1 N tile -> 4 MiB bf16 weight slab per step
_N_TILES = HIDDEN_DIM1 // TN
_VMEM_LIMIT_BYTES = 32 * 1024 * 1024


# ---------------------------------------------------------------------------
# Fused kernel: streamed Linear1(+act) + streamed Linear2 reduction, epilogue
# with VMEM-resident Linear3/4/5.
# ---------------------------------------------------------------------------
def _fused_kernel(x_ref, w1_ref, b1_ref, w2_ref, b2_ref, w3_ref, b3_ref,
                  w4_ref, b4_ref, w5_ref, b5_ref, o_ref, acc2_ref):
    j = pl.program_id(0)

    @pl.when(j == 0)
    def _init():
        acc2_ref[...] = jnp.zeros_like(acc2_ref)

    # Layer 1 partial: columns [j*TN, (j+1)*TN) of h1 = leaky(x @ W1 + b1).
    h1 = jnp.dot(x_ref[...], w1_ref[...], preferred_element_type=jnp.float32)
    h1 = h1 + b1_ref[...]
    h1 = jnp.maximum(h1, LEAKY_SLOPE * h1)

    # Layer 2 partial reduction over the h1-column (K) axis.
    acc2_ref[...] += jnp.dot(h1.astype(jnp.bfloat16), w2_ref[...],
                             preferred_element_type=jnp.float32)

    @pl.when(j == pl.num_programs(0) - 1)
    def _epilogue():
        h2 = acc2_ref[...] + b2_ref[...]
        h2 = jnp.maximum(h2, LEAKY_SLOPE * h2)
        # Dropout(p=0.2) is identity at inference.
        # TODO(synk): training-mode dropout (random mask) not implemented.
        h3 = jnp.dot(h2.astype(jnp.bfloat16), w3_ref[...],
                     preferred_element_type=jnp.float32) + b3_ref[...]
        h3 = jnp.maximum(h3, LEAKY_SLOPE * h3)
        h4 = jnp.dot(h3.astype(jnp.bfloat16), w4_ref[...],
                     preferred_element_type=jnp.float32) + b4_ref[...]
        h4 = jnp.maximum(h4, LEAKY_SLOPE * h4)
        y = jnp.dot(h4.astype(jnp.bfloat16), w5_ref[...],
                    preferred_element_type=jnp.float32) + b5_ref[...]
        o_ref[...] = y.astype(o_ref.dtype)


def _forward_padded(xp, params):
    Mp = xp.shape[0]
    flops = 2 * Mp * (INPUT_DIM * HIDDEN_DIM1 + HIDDEN_DIM1 * HIDDEN_DIM2
                      + HIDDEN_DIM2 * HIDDEN_DIM3 + HIDDEN_DIM3 * HIDDEN_DIM4
                      + HIDDEN_DIM4 * OUTPUT_DIM)
    weight_bytes = 2 * (INPUT_DIM * HIDDEN_DIM1 + HIDDEN_DIM1 * HIDDEN_DIM2
                        + HIDDEN_DIM2 * HIDDEN_DIM3 + HIDDEN_DIM3 * HIDDEN_DIM4
                        + HIDDEN_DIM4 * OUTPUT_DIM)
    bytes_accessed = weight_bytes + 2 * Mp * INPUT_DIM + 4 * Mp * OUTPUT_DIM

    grid_spec = pltpu.PrefetchScalarGridSpec(
        num_scalar_prefetch=0,
        grid=(_N_TILES,),
        in_specs=[
            pl.BlockSpec((Mp, INPUT_DIM), lambda j: (0, 0)),            # x (resident)
            pl.BlockSpec((None, INPUT_DIM, TN), lambda j: (j, 0, 0)),   # w1 slab
            pl.BlockSpec((1, TN), lambda j: (0, j)),                    # b1 tile
            pl.BlockSpec((TN, HIDDEN_DIM2), lambda j: (j, 0)),          # w2 K-slab
            pl.BlockSpec((1, HIDDEN_DIM2), lambda j: (0, 0)),           # b2
            pl.BlockSpec((HIDDEN_DIM2, HIDDEN_DIM3), lambda j: (0, 0)), # w3 (resident)
            pl.BlockSpec((1, HIDDEN_DIM3), lambda j: (0, 0)),           # b3
            pl.BlockSpec((HIDDEN_DIM3, HIDDEN_DIM4), lambda j: (0, 0)), # w4 (resident)
            pl.BlockSpec((1, HIDDEN_DIM4), lambda j: (0, 0)),           # b4
            pl.BlockSpec((HIDDEN_DIM4, OUTPUT_DIM), lambda j: (0, 0)),  # w5 (resident)
            pl.BlockSpec((1, OUTPUT_DIM), lambda j: (0, 0)),            # b5
        ],
        out_specs=pl.BlockSpec((Mp, OUTPUT_DIM), lambda j: (0, 0)),
        scratch_shapes=[pltpu.VMEM((Mp, HIDDEN_DIM2), jnp.float32)],
    )
    return pl.pallas_call(
        _fused_kernel,
        out_shape=jax.ShapeDtypeStruct((Mp, OUTPUT_DIM), jnp.float32),
        grid_spec=grid_spec,
        compiler_params=pltpu.CompilerParams(
            # The grid axis carries the layer-2 accumulator -> sequential.
            dimension_semantics=("arbitrary",),
            vmem_limit_bytes=_VMEM_LIMIT_BYTES,
        ),
        cost_estimate=pl.CostEstimate(flops=flops, transcendentals=0,
                                      bytes_accessed=bytes_accessed),
    )(xp, params["w1_tiles"], params["b1"], params["w2"], params["b2"],
      params["w3"], params["b3"], params["w4"], params["b4"],
      params["w5"], params["b5"])


# ---------------------------------------------------------------------------
# Parameters / forward / reference
# ---------------------------------------------------------------------------
def init_params(key):
    """PyTorch nn.Linear default init: U(-1/sqrt(fan_in), +1/sqrt(fan_in)).

    Weights are stored transposed to (in, out) and cast once to bf16 (the
    model is weight-bandwidth bound); biases stay f32, shaped (1, out).
    w1 is additionally pre-tiled to (HIDDEN_DIM1//TN, INPUT_DIM, TN) so each
    grid step DMAs one contiguous 4 MiB slab.
    """
    dims = [INPUT_DIM, HIDDEN_DIM1, HIDDEN_DIM2, HIDDEN_DIM3, HIDDEN_DIM4,
            OUTPUT_DIM]
    ws, bs = [], []
    for i in range(len(dims) - 1):
        fan_in, fan_out = dims[i], dims[i + 1]
        key, kw, kb = jax.random.split(key, 3)
        bound = 1.0 / math.sqrt(fan_in)
        w = jax.random.uniform(kw, (fan_out, fan_in), jnp.float32,
                               minval=-bound, maxval=bound)
        b = jax.random.uniform(kb, (fan_out,), jnp.float32,
                               minval=-bound, maxval=bound)
        ws.append(w.T.astype(jnp.bfloat16))
        bs.append(b.reshape(1, fan_out))
    w1_tiles = ws[0].reshape(INPUT_DIM, _N_TILES, TN).transpose(1, 0, 2)
    return {
        "w1_tiles": w1_tiles, "b1": bs[0],
        "w2": ws[1], "b2": bs[1],
        "w3": ws[2], "b3": bs[2],
        "w4": ws[3], "b4": bs[3],
        "w5": ws[4], "b5": bs[4],
    }


@jax.jit
def correlation_net_forward(x, params):
    batch = x.shape[0]
    padded = ((batch + 15) // 16) * 16   # full (16,128) bf16 sublane packs
    if padded != batch:
        x = jnp.pad(x, ((0, padded - batch), (0, 0)))
    y = _forward_padded(x.astype(jnp.bfloat16), params)
    return y[:batch]


def reference_forward(x, params):
    """Pure-JAX reference with identical dtype semantics (bf16 weights and
    matmul inputs, f32 biases and accumulation) for a tight numerical check."""
    w1 = params["w1_tiles"].transpose(1, 0, 2).reshape(INPUT_DIM, HIDDEN_DIM1)

    def layer(h, w, b, act):
        y = jnp.dot(h.astype(jnp.bfloat16), w,
                    preferred_element_type=jnp.float32) + b
        return jnp.maximum(y, LEAKY_SLOPE * y) if act else y

    h = layer(x, w1, params["b1"], True)
    h = layer(h, params["w2"], params["b2"], True)   # dropout = identity (eval)
    h = layer(h, params["w3"], params["b3"], True)
    h = layer(h, params["w4"], params["b4"], True)
    return layer(h, params["w5"], params["b5"], False)


if __name__ == "__main__":
    key = jax.random.PRNGKey(0)
    kparams, kx = jax.random.split(key)

    batch = 8  # small batch; feature dims are fixed by the module definition
    params = init_params(kparams)
    x = jax.random.normal(kx, (batch, INPUT_DIM), jnp.float32)

    out = jax.block_until_ready(correlation_net_forward(x, params))
    assert out.shape == (batch, OUTPUT_DIM), out.shape

    ref = reference_forward(x, params)
    max_err = float(jnp.max(jnp.abs(out - ref)))
    assert jnp.allclose(out, ref, atol=3e-3, rtol=2e-2), max_err

    print("KERNEL_OK")
</pallas_src>

<mosaic_0001>
module attributes {stable_mosaic.version = 11 : i64} {
  func.func @_fused_kernel(%arg0: i32, %arg1: memref<16x4096xbf16, #tpu.memory_space<vmem>>, %arg2: memref<1x4096x512xbf16, #tpu.memory_space<vmem>>, %arg3: memref<1x512xf32, #tpu.memory_space<vmem>>, %arg4: memref<512x1024xbf16, #tpu.memory_space<vmem>>, %arg5: memref<1x1024xf32, #tpu.memory_space<vmem>>, %arg6: memref<1024x512xbf16, #tpu.memory_space<vmem>>, %arg7: memref<1x512xf32, #tpu.memory_space<vmem>>, %arg8: memref<512x256xbf16, #tpu.memory_space<vmem>>, %arg9: memref<1x256xf32, #tpu.memory_space<vmem>>, %arg10: memref<256x1xbf16, #tpu.memory_space<vmem>>, %arg11: memref<1x1xf32, #tpu.memory_space<vmem>>, %arg12: memref<16x1xf32, #tpu.memory_space<vmem>>, %arg13: memref<16x1024xf32, #tpu.memory_space<vmem>>) attributes {dimension_semantics = [#tpu.dimension_semantics<arbitrary>], iteration_bounds = array<i64: 4>, scalar_prefetch = 0 : i64, scratch_operands = 1 : i64, tpu.core_type = #tpu.core_type<tc>, window_params = [{pipeline_mode = #tpu.pipeline_mode<synchronous>, transform_indices = @transform_0, window_bounds = array<i64: 16, 4096>}, {transform_indices = @transform_1, window_bounds = array<i64: 1, 4096, 512>}, {transform_indices = @transform_2, window_bounds = array<i64: 1, 512>}, {transform_indices = @transform_3, window_bounds = array<i64: 512, 1024>}, {pipeline_mode = #tpu.pipeline_mode<synchronous>, transform_indices = @transform_4, window_bounds = array<i64: 1, 1024>}, {pipeline_mode = #tpu.pipeline_mode<synchronous>, transform_indices = @transform_5, window_bounds = array<i64: 1024, 512>}, {pipeline_mode = #tpu.pipeline_mode<synchronous>, transform_indices = @transform_6, window_bounds = array<i64: 1, 512>}, {pipeline_mode = #tpu.pipeline_mode<synchronous>, transform_indices = @transform_7, window_bounds = array<i64: 512, 256>}, {pipeline_mode = #tpu.pipeline_mode<synchronous>, transform_indices = @transform_8, window_bounds = array<i64: 1, 256>}, {pipeline_mode = #tpu.pipeline_mode<synchronous>, transform_indices = @transform_9, window_bounds = array<i64: 256, 1>}, {pipeline_mode = #tpu.pipeline_mode<synchronous>, transform_indices = @transform_10, window_bounds = array<i64: 1, 1>}, {pipeline_mode = #tpu.pipeline_mode<synchronous>, transform_indices = @transform_11, window_bounds = array<i64: 16, 1>}]} {
    %c0_i32 = arith.constant 0 : i32
    %0 = arith.cmpi eq, %arg0, %c0_i32 : i32
    %1 = arith.extui %0 : i1 to i32
    %c0_i32_0 = arith.constant 0 : i32
    %2 = arith.cmpi ne, %1, %c0_i32_0 : i32
    scf.if %2 {
      %cst_16 = arith.constant 0.000000e+00 : f32
      %22 = vector.broadcast %cst_16 : f32 to vector<16x1024xf32>
      %c0_17 = arith.constant 0 : index
      %c0_18 = arith.constant 0 : index
      %23 = vector.load %arg13[%c0_17, %c0_18] : memref<16x1024xf32, #tpu.memory_space<vmem>>, vector<16x1024xf32>
      tpu.vector_store %arg13[%c0_17, %c0_18], %22 {strides = array<i32>} : memref<16x1024xf32, #tpu.memory_space<vmem>>, vector<16x1024xf32>,
    } else {
    }
    %c0 = arith.constant 0 : index
    %c0_1 = arith.constant 0 : index
    %3 = vector.load %arg1[%c0, %c0_1] : memref<16x4096xbf16, #tpu.memory_space<vmem>>, vector<16x4096xbf16>
    %c0_2 = arith.constant 0 : index
    %c0_3 = arith.constant 0 : index
    %c0_4 = arith.constant 0 : index
    %4 = vector.load %arg2[%c0_2, %c0_3, %c0_4] : memref<1x4096x512xbf16, #tpu.memory_space<vmem>>, vector<1x4096x512xbf16>
    %5 = vector.shape_cast %4 : vector<1x4096x512xbf16> to vector<4096x512xbf16>
    %cst = arith.constant dense<0.000000e+00> : vector<16x512xf32>
    %6 = tpu.matmul %3, %5, %cst {dimension_numbers = #tpu.dot_dimension_numbers<[1], [0], [0], [1], [0, 0, 1, 1], [], []>} : vector<16x4096xbf16>, vector<4096x512xbf16>, vector<16x512xf32> -> vector<16x512xf32>
    %c0_5 = arith.constant 0 : index
    %c0_6 = arith.constant 0 : index
    %7 = vector.load %arg3[%c0_5, %c0_6] : memref<1x512xf32, #tpu.memory_space<vmem>>, vector<1x512xf32>
    %8 = vector.broadcast %7 : vector<1x512xf32> to vector<16x512xf32>
    %9 = arith.addf %6, %8 : vector<16x512xf32>
    %cst_7 = arith.constant 0.00999999977 : f32
    %10 = vector.broadcast %cst_7 : f32 to vector<16x512xf32>
    %11 = arith.mulf %10, %9 : vector<16x512xf32>
    %12 = arith.maximumf %9, %11 : vector<16x512xf32>
    %c0_8 = arith.constant 0 : index
    %c0_9 = arith.constant 0 : index
    %13 = vector.load %arg13[%c0_8, %c0_9] : memref<16x1024xf32, #tpu.memory_space<vmem>>, vector<16x1024xf32>
    %14 = arith.truncf %12 : vector<16x512xf32> to vector<16x512xbf16>
    %c0_10 = arith.constant 0 : index
    %c0_11 = arith.constant 0 : index
    %15 = vector.load %arg4[%c0_10, %c0_11] : memref<512x1024xbf16, #tpu.memory_space<vmem>>, vector<512x1024xbf16>
    %cst_12 = arith.constant dense<0.000000e+00> : vector<16x1024xf32>
    %16 = tpu.matmul %14, %15, %cst_12 {dimension_numbers = #tpu.dot_dimension_numbers<[1], [0], [0], [1], [0, 0, 1, 1], [], []>} : vector<16x512xbf16>, vector<512x1024xbf16>, vector<16x1024xf32> -> vector<16x1024xf32>
    %17 = arith.addf %13, %16 : vector<16x1024xf32>
    %c0_13 = arith.constant 0 : index
    %c0_14 = arith.constant 0 : index
    %18 = vector.load %arg13[%c0_13, %c0_14] : memref<16x1024xf32, #tpu.memory_space<vmem>>, vector<16x1024xf32>
    tpu.vector_store %arg13[%c0_13, %c0_14], %17 {strides = array<i32>} : memref<16x1024xf32, #tpu.memory_space<vmem>>, vector<16x1024xf32>,
    %c3_i32 = arith.constant 3 : i32
    %19 = arith.cmpi eq, %arg0, %c3_i32 : i32
    %20 = arith.extui %19 : i1 to i32
    %c0_i32_15 = arith.constant 0 : i32
    %21 = arith.cmpi ne, %20, %c0_i32_15 : i32
    scf.if %21 {
      %c0_16 = arith.constant 0 : index
      %c0_17 = arith.constant 0 : index
      %22 = vector.load %arg13[%c0_16, %c0_17] : memref<16x1024xf32, #tpu.memory_space<vmem>>, vector<16x1024xf32>
      %c0_18 = arith.constant 0 : index
      %c0_19 = arith.constant 0 : index
      %23 = vector.load %arg5[%c0_18, %c0_19] : memref<1x1024xf32, #tpu.memory_space<vmem>>, vector<1x1024xf32>
      %24 = vector.broadcast %23 : vector<1x1024xf32> to vector<16x1024xf32>
      %25 = arith.addf %22, %24 : vector<16x1024xf32>
      %cst_20 = arith.constant 0.00999999977 : f32
      %26 = vector.broadcast %cst_20 : f32 to vector<16x1024xf32>
      %27 = arith.mulf %26, %25 : vector<16x1024xf32>
      %28 = arith.maximumf %25, %27 : vector<16x1024xf32>
      %29 = arith.truncf %28 : vector<16x1024xf32> to vector<16x1024xbf16>
      %c0_21 = arith.constant 0 : index
      %c0_22 = arith.constant 0 : index
      %30 = vector.load %arg6[%c0_21, %c0_22] : memref<1024x512xbf16, #tpu.memory_space<vmem>>, vector<1024x512xbf16>
      %cst_23 = arith.constant dense<0.000000e+00> : vector<16x512xf32>
      %31 = tpu.matmul %29, %30, %cst_23 {dimension_numbers = #tpu.dot_dimension_numbers<[1], [0], [0], [1], [0, 0, 1, 1], [], []>} : vector<16x1024xbf16>, vector<1024x512xbf16>, vector<16x512xf32> -> vector<16x512xf32>
      %c0_24 = arith.constant 0 : index
      %c0_25 = arith.constant 0 : index
      %32 = vector.load %arg7[%c0_24, %c0_25] : memref<1x512xf32, #tpu.memory_space<vmem>>, vector<1x512xf32>
      %33 = vector.broadcast %32 : vector<1x512xf32> to vector<16x512xf32>
      %34 = arith.addf %31, %33 : vector<16x512xf32>
      %cst_26 = arith.constant 0.00999999977 : f32
      %35 = vector.broadcast %cst_26 : f32 to vector<16x512xf32>
      %36 = arith.mulf %35, %34 : vector<16x512xf32>
      %37 = arith.maximumf %34, %36 : vector<16x512xf32>
      %38 = arith.truncf %37 : vector<16x512xf32> to vector<16x512xbf16>
      %c0_27 = arith.constant 0 : index
      %c0_28 = arith.constant 0 : index
      %39 = vector.load %arg8[%c0_27, %c0_28] : memref<512x256xbf16, #tpu.memory_space<vmem>>, vector<512x256xbf16>
      %cst_29 = arith.constant dense<0.000000e+00> : vector<16x256xf32>
      %40 = tpu.matmul %38, %39, %cst_29 {dimension_numbers = #tpu.dot_dimension_numbers<[1], [0], [0], [1], [0, 0, 1, 1], [], []>} : vector<16x512xbf16>, vector<512x256xbf16>, vector<16x256xf32> -> vector<16x256xf32>
      %c0_30 = arith.constant 0 : index
      %c0_31 = arith.constant 0 : index
      %41 = vector.load %arg9[%c0_30, %c0_31] : memref<1x256xf32, #tpu.memory_space<vmem>>, vector<1x256xf32>
      %42 = vector.broadcast %41 : vector<1x256xf32> to vector<16x256xf32>
      %43 = arith.addf %40, %42 : vector<16x256xf32>
      %cst_32 = arith.constant 0.00999999977 : f32
      %44 = vector.broadcast %cst_32 : f32 to vector<16x256xf32>
      %45 = arith.mulf %44, %43 : vector<16x256xf32>
      %46 = arith.maximumf %43, %45 : vector<16x256xf32>
      %47 = arith.truncf %46 : vector<16x256xf32> to vector<16x256xbf16>
      %c0_33 = arith.constant 0 : index
      %c0_34 = arith.constant 0 : index
      %48 = vector.load %arg10[%c0_33, %c0_34] : memref<256x1xbf16, #tpu.memory_space<vmem>>, vector<256x1xbf16>
      %cst_35 = arith.constant dense<0.000000e+00> : vector<16x1xf32>
      %49 = tpu.matmul %47, %48, %cst_35 {dimension_numbers = #tpu.dot_dimension_numbers<[1], [0], [0], [1], [0, 0, 1, 1], [], []>} : vector<16x256xbf16>, vector<256x1xbf16>, vector<16x1xf32> -> vector<16x1xf32>
      %c0_36 = arith.constant 0 : index
      %c0_37 = arith.constant 0 : index
      %50 = vector.load %arg11[%c0_36, %c0_37] : memref<1x1xf32, #tpu.memory_space<vmem>>, vector<1x1xf32>
      %51 = vector.broadcast %50 : vector<1x1xf32> to vector<16x1xf32>
      %52 = arith.addf %49, %51 : vector<16x1xf32>
      %c0_38 = arith.constant 0 : index
      %c0_39 = arith.constant 0 : index
      %53 = vector.load %arg12[%c0_38, %c0_39] : memref<16x1xf32, #tpu.memory_space<vmem>>, vector<16x1xf32>
      tpu.vector_store %arg12[%c0_38, %c0_39], %52 {strides = array<i32>} : memref<16x1xf32, #tpu.memory_space<vmem>>, vector<16x1xf32>,
    } else {
    }
    return
  }
  func.func @transform_0(%arg0: i32) -> (i32, i32) {
    %c0_i32 = arith.constant 0 : i32
    %c0_i32_0 = arith.constant 0 : i32
    %c0_i32_1 = arith.constant 0 : i32
    return %c0_i32, %c0_i32_0 : i32, i32
  }
  func.func @transform_1(%arg0: i32) -> (i32, i32, i32) {
    %c0_i32 = arith.constant 0 : i32
    %c0_i32_0 = arith.constant 0 : i32
    %c0_i32_1 = arith.constant 0 : i32
    return %arg0, %c0_i32, %c0_i32_0 : i32, i32, i32
  }
  func.func @transform_2(%arg0: i32) -> (i32, i32) {
    %c0_i32 = arith.constant 0 : i32
    %c0_i32_0 = arith.constant 0 : i32
    return %c0_i32, %arg0 : i32, i32
  }
  func.func @transform_3(%arg0: i32) -> (i32, i32) {
    %c0_i32 = arith.constant 0 : i32
    %c0_i32_0 = arith.constant 0 : i32
    return %arg0, %c0_i32 : i32, i32
  }
  func.func @transform_4(%arg0: i32) -> (i32, i32) {
    %c0_i32 = arith.constant 0 : i32
    %c0_i32_0 = arith.constant 0 : i32
    %c0_i32_1 = arith.constant 0 : i32
    return %c0_i32, %c0_i32_0 : i32, i32
  }
  func.func @transform_5(%arg0: i32) -> (i32, i32) {
    %c0_i32 = arith.constant 0 : i32
    %c0_i32_0 = arith.constant 0 : i32
    %c0_i32_1 = arith.constant 0 : i32
    return %c0_i32, %c0_i32_0 : i32, i32
  }
  func.func @transform_6(%arg0: i32) -> (i32, i32) {
    %c0_i32 = arith.constant 0 : i32
    %c0_i32_0 = arith.constant 0 : i32
    %c0_i32_1 = arith.constant 0 : i32
    return %c0_i32, %c0_i32_0 : i32, i32
  }
  func.func @transform_7(%arg0: i32) -> (i32, i32) {
    %c0_i32 = arith.constant 0 : i32
    %c0_i32_0 = arith.constant 0 : i32
    %c0_i32_1 = arith.constant 0 : i32
    return %c0_i32, %c0_i32_0 : i32, i32
  }
  func.func @transform_8(%arg0: i32) -> (i32, i32) {
    %c0_i32 = arith.constant 0 : i32
    %c0_i32_0 = arith.constant 0 : i32
    %c0_i32_1 = arith.constant 0 : i32
    return %c0_i32, %c0_i32_0 : i32, i32
  }
  func.func @transform_9(%arg0: i32) -> (i32, i32) {
    %c0_i32 = arith.constant 0 : i32
    %c0_i32_0 = arith.constant 0 : i32
    %c0_i32_1 = arith.constant 0 : i32
    return %c0_i32, %c0_i32_0 : i32, i32
  }
  func.func @transform_10(%arg0: i32) -> (i32, i32) {
    %c0_i32 = arith.constant 0 : i32
    %c0_i32_0 = arith.constant 0 : i32
    %c0_i32_1 = arith.constant 0 : i32
    return %c0_i32, %c0_i32_0 : i32, i32
  }
  func.func @transform_11(%arg0: i32) -> (i32, i32) {
    %c0_i32 = arith.constant 0 : i32
    %c0_i32_0 = arith.constant 0 : i32
    %c0_i32_1 = arith.constant 0 : i32
    return %c0_i32, %c0_i32_0 : i32, i32
  }
}

</mosaic_0001>

<bundles_post_ra>
// kernel: correlation_net_forward.1
= control target key start
LH: loop header
LB: loop body
LE: loop exit
PB: predicated region body
PF: predicated region fallthrough
CT: control target
= control target key end

     0   :  { %s19473_s0 = inlined_call_operand.vmem [shape: bf16[16,4096], index: 0, kind: input, shape index: {}]   ;;  %s19474_s1 = inlined_call_operand.hbm [shape: bf16[4,4096,512], index: 1, kind: input, shape index: {}]   ;;  %s19475_s2 = inlined_call_operand.hbm [shape: f32[1,2048], index: 2, kind: input, shape index: {}]   ;;  %s19476_s3 = inlined_call_operand.hbm [shape: bf16[2048,1024], index: 3, kind: input, shape index: {}]   ;;  %s19477_s4 = inlined_call_operand.hbm [shape: f32[1,1024], index: 4, kind: input, shape index: {}]   ;;  %s19478_s5 = inlined_call_operand.hbm [shape: bf16[1024,512], index: 5, kind: input, shape index: {}]   ;;  %s19479_s6 = inlined_call_operand.hbm [shape: f32[1,512], index: 6, kind: input, shape index: {}]   ;;  %s19480_s7 = inlined_call_operand.hbm [shape: bf16[512,256], index: 7, kind: input, shape index: {}]   ;;  %s19481_s8 = inlined_call_operand.hbm [shape: f32[1,256], index: 8, kind: input, shape index: {}]   ;;  %s19482_s9 = inlined_call_operand.vmem [shape: bf16[256,1], index: 9, kind: input, shape index: {}]   ;;  %s19483_s10 = inlined_call_operand.<no memory space> [shape: f32[1,1], index: 10, kind: input, shape index: {}]   ;;  %s19484_s11 = inlined_call_operand.vmem [shape: f32[16,1], index: 11, kind: output, shape index: {}]  }
   0x1   :  { %19503 = sst [smem:[#allocation25_spill]] %s19475_s2  ;;  %v16_v0 = vstv %s19483_s10 }
   0x2   :  { %19504 = sst [smem:[#allocation26_spill]] %s19477_s4  ;;  %17 = vst [vmem:[#allocation3] sm:$0x1] %v16_v0 }
   0x3   :  { %19505 = sst [smem:[#allocation27_spill]] %s19478_s5 }
   0x4   :  { %19506 = sst [smem:[#allocation28_spill]] %s19479_s6 }
   0x5   :  { %19507 = sst [smem:[#allocation29_spill]] %s19482_s9 }
   0x6   :  { %19508 = sst [smem:[#allocation30_spill]] %s19484_s11 }
   0x7   :  { %18 = vsyncpa [#allocation5], 0 }
   0x8   :  { %20 = vsyncpa [#allocation5 + $0x1], 0 }
   0x9   :  { %21 = vsyncpa [#allocation7], 0 }
   0xa   :  { %23 = vsyncpa [#allocation7 + $0x1], 0 }
   0xb   :  { %24 = vsyncpa [#allocation10], 0 }
   0xc   :  { %25 = vsyncpa [#allocation13], 0 }
   0xd   :  { %26 = vsyncpa [#allocation16], 0  ;;  %s17473_s19 = smov 0   ;;  %s17475_s20 = smov 0  }
   0xe   :  { %s17477_s21 = smov 0   ;;  %s17479_s22 = smov 0  }
   0xf LB: > { %19509 = sst [smem:[#allocation22_spill]] %s17389_s21  ;;  %s17395_s10 = smov [#allocation9]   ;;  %s17393_s22 = sphi %s17479_s22, %s19541_s22   ;;  %s17389_s21 = sphi %s17477_s21, %s19543_s21   ;;  %s17385_s20 = sphi %s17475_s20, %s19545_s20   ;;  %s17381_s19 = sphi %s17473_s19, %s19544_s19  }
  0x10   : > { %s320_s23 = sshll.u32 %s17395_s10, 4  ;;  %s17494_s24 = sadd.s32 4294967295, %s17393_s22   ;;  %s321_s23 = int_to_ptr.vmem [resolvable:$true] %s320_s23 }
  0x11   : > { %p13084_p0 = scmp.ge.s32.totalorder %s17393_s22, 1  ;;  %p19485_p1 = scmp.eq.s32.totalorder %s17494_s24, 0 }
  0x12   : > { %p304_p2 = scmp.lt.s32.totalorder %s17393_s22, 5  ;;  %s17396_s26 = smov [#allocation12]  }
  0x13   : > { %s344_s27 = sshll.u32 %s17396_s26, 4  ;;  %s19512_s4 = sld [smem:[#allocation26_spill]]  ;;  %s17506_s27 = int_to_ptr.vmem [resolvable:$true] %s344_s27 }
  0x14   : > { %p17500_p4 = pnand %p13084_p0, %p304_p2 }
  0x16   : > { %s19510_s25 = scalar_select %p17500_p4, 1, 0 }
  0x17   : > { %p14999_p5 = pneg %p17500_p4 }
  0x19   : > { %p17510_p6 = pnand %p14999_p5, %p19485_p1  ;;  %s17113_s12 = scalar_lea.hbm %s19512_s4, 128 }
  0x1a   : > { %p17114_p7 = scmp.ne.s32.totalorder %s19512_s4, %s17113_s12  ;;  %p17120_p11 = scmp.lt.u32.totalorder %s17113_s12, %s19512_s4 }
  0x1b   : > { %s19511_s28 = scalar_select %p17510_p6, 1, 0 }
  0x1c   : > { %p17522_p8 = pneg %p17510_p6 }
  0x1e   : > { %s19513_s15 = scalar_select %p17522_p8, 1, 0 }
  0x1f   : > { %p17116_p9 = pnand %p17522_p8, %p17114_p7 }
  0x21   : > { %p17117_p10 = pneg %p17116_p9 }
  0x23   : > { %p17122_p12 = pnand %p17120_p11, %p17117_p10 }
  0x25   : > { %17125 = shalt.err (!%p17122_p12)
}
  0x26   : > { %s17126_s18 = scalar_lea.vmem %s321_s23, 128  ;;  %p17134_p5 = scmp.lt.s32.totalorder %s321_s23, %s321_s23 }
  0x27   : > { %p17127_p13 = scmp.ne.s32.totalorder %s321_s23, %s17126_s18  ;;  %p17135_p3 = scmp.lt.s32.totalorder %s17126_s18, %s17126_s18 }
  0x29   : > { %p17129_p0 = pnand %p17127_p13, %p17522_p8  ;;  %p17136_p1 = por %p17135_p3, %p17134_p5 }
  0x2b   : > { %p17130_p2 = pneg %p17129_p0 }
  0x2d   : > { %p17137_p4 = pnand %p17136_p1, %p17130_p2 }
  0x2f   : > { %17140 = shalt.err (!%p17137_p4)
}
  0x30   : > { %15002 = dma.hbm_to_vmem [thread:$0]  (!%p17510_p6), %s19512_s4, 128, %s321_s23, [#allocation10]  }
  0x31   : > { %s19514_s6 = sld [smem:[#allocation28_spill]] }
  0x37   : > { %s17141_s12 = scalar_lea.hbm %s19514_s6, 64 }
  0x38   : > { %p17142_p7 = scmp.ne.s32.totalorder %s19514_s6, %s17141_s12  ;;  %p17148_p1 = scmp.lt.u32.totalorder %s17141_s12, %s19514_s6 }
  0x3a   : > { %p17144_p9 = pnand %p17142_p7, %p17522_p8 }
  0x3c   : > { %p17145_p3 = pneg %p17144_p9 }
  0x3e   : > { %p17150_p4 = pnand %p17148_p1, %p17145_p3 }
  0x40   : > { %17153 = shalt.err (!%p17150_p4)
}
  0x41   : > { %s17154_s23 = scalar_lea.vmem %s17506_s27, 64  ;;  %p17162_p13 = scmp.lt.s32.totalorder %s17506_s27, %s17506_s27 }
  0x42   : > { %p17155_p10 = scmp.ne.s32.totalorder %s17506_s27, %s17154_s23  ;;  %p17163_p0 = scmp.lt.s32.totalorder %s17154_s23, %s17154_s23 }
  0x44   : > { %p17157_p11 = pnand %p17155_p10, %p17522_p8  ;;  %p17164_p2 = por %p17163_p0, %p17162_p13 }
  0x46   : > { %p17158_p12 = pneg %p17157_p11 }
  0x48   : > { %p17165_p5 = pnand %p17164_p2, %p17158_p12 }
  0x4a   : > { %17168 = shalt.err (!%p17165_p5)
}
  0x4b   : > { %15008 = dma.hbm_to_vmem [thread:$0]  (!%p17510_p6), %s19514_s6, 64, %s17506_s27, [#allocation13]  }
  0x4c   : > { %s17562_s26 = sadd.s32 1, %s17393_s22   ;;  %s60_s29 = sadd.s32 1, %s17389_s21 }
  0x4d   : > { %19515 = sst [smem:[#allocation23_spill]] %s17562_s26  ;;  %s57_s30 = ssub.s32 %s17393_s22, %s17562_s26 }
  0x4e   : > { %p67_p7 = scmp.ne.s32.totalorder %s17389_s21, %s17385_s20  ;;  %p58_p9 = scmp.eq.s32.totalorder %s57_s30, 0 }
  0x4f   : > { %p68_p3 = scmp.eq.s32.totalorder %s17393_s22, 0  ;;  %p73_p1 = scmp.ne.s32.totalorder %s17385_s20, %s17381_s19 }
  0x50   : > { %p15030_p4 = scmp.lt.s32.totalorder %s17393_s22, 4  ;;  %p19517_p11 = scmp.eq.s32.totalorder %s17494_s24, 0 }
  0x51   : > { %s17574_s12 = scalar_select %p58_p9, %s17389_s21, %s60_s29  }
  0x52   : > { %p69_p10 = por %p68_p3, %p67_p7  ;;  %p17578_p12 = por %p19517_p11, %p73_p1 }
  0x53   : > { %19516 = sst [smem:[#allocation24_spill]] %s17574_s12  ;;  %s17583_s27 = sand.u32 1, %s17389_s21  }
  0x54   : > { %s19518_s13 = scalar_select %p17578_p12, 1, 0 }
  0x55   : > { %s406_s14 = sand.u32 1, %s17393_s22   ;;  %p17586_p13 = pnand %p15030_p4, %p69_p10 }
  0x56   : > { %s13094_s19 = sshll.u32 %s17583_s27, 2  ;;  %s14764_s17 = sshll.u32 %s17393_s22, 6 }
  0x57   : > { %s19519_s16 = scalar_select %p17586_p13, 1, 0 }
  0x58   : > { %s19520_s2 = sld [smem:[#allocation25_spill]]  ;;  %s410_s29 = scalar_lea.vmem [#allocation6], %s13094_s19 }
  0x59   : > { %s418_s30 = sshll.u32 %s410_s29, 4  ;;  %s17600_s6 = scalar_lea.sflag [#allocation7], %s406_s14  ;;  %s17597_s30 = int_to_ptr.vmem [resolvable:$true] %s418_s30 }
  0x5a   : > { %p17606_p2 = pneg %p17586_p13 }
  0x5c   : > { %s19521_s21 = scalar_select %p17606_p2, 1, 0 }
  0x5e   : > { %s17595_s10 = scalar_lea.hbm %s19520_s2, %s14764_s17  ;;  %s17174_s19 = scalar_lea.hbm %s19520_s2, 256 }
  0x5f   : > { %s17169_s12 = scalar_lea.hbm %s17595_s10, 64  ;;  %p17175_p9 = scmp.lt.u32.totalorder %s17595_s10, %s19520_s2 }
  0x60   : > { %p17170_p0 = scmp.ne.s32.totalorder %s17595_s10, %s17169_s12  ;;  %p17176_p3 = scmp.lt.u32.totalorder %s17174_s19, %s17169_s12 }
  0x61   : > { %p17178_p4 = scmp.lt.u32.totalorder %s17169_s12, %s17595_s10 }
  0x62   : > { %p17172_p5 = pnand %p17606_p2, %p17170_p0  ;;  %p17177_p1 = por %p17176_p3, %p17175_p9 }
  0x64   : > { %p17173_p7 = pneg %p17172_p5  ;;  %p17179_p10 = por %p17178_p4, %p17177_p1 }
  0x66   : > { %p17180_p11 = pnand %p17179_p10, %p17173_p7 }
  0x68   : > { %17183 = shalt.err (!%p17180_p11)
}
  0x69   : > { %s17184_s14 = scalar_lea.vmem %s17597_s30, 64  ;;  %s17397_s17 = smov [#allocation6]  }
  0x6a   : > { %p17185_p0 = scmp.ne.s32.totalorder %s17597_s30, %s17184_s14  ;;  %s17189_s23 = sshll.u32 %s17397_s17, 4  ;;  %s17190_s23 = int_to_ptr.vmem [resolvable:$false] %s17189_s23 }
  0x6b   : > { %s17191_s18 = scalar_lea.vmem %s17190_s23, 128  ;;  %p17192_p6 = scmp.lt.s32.totalorder %s17597_s30, %s17190_s23 }
  0x6c   : > { %p17187_p5 = pnand %p17185_p0, %p17606_p2  ;;  %p17193_p8 = scmp.lt.s32.totalorder %s17191_s18, %s17184_s14 }
  0x6e   : > { %p17188_p12 = pneg %p17187_p5  ;;  %p17194_p9 = por %p17193_p8, %p17192_p6 }
  0x70   : > { %p17195_p3 = pnand %p17194_p9, %p17188_p12 }
  0x72   : > { %17198 = shalt.err (!%p17195_p3)
}
  0x73   : > { %15021 = dma.hbm_to_vmem [thread:$0]  (!%p17586_p13), %s17595_s10, 64, %s17597_s30, %s17600_s6  }
  0x74   : > { %s17398_s12 = smov [#allocation11]   ;;  %s19522_s5 = sld [smem:[#allocation27_spill]] }
  0x75   : > { %s330_s19 = sshll.u32 %s17398_s12, 4  ;;  %p19523_p8 = scmp.ne.s32.totalorder %s19513_s15, 0  ;;  %s331_s19 = int_to_ptr.vmem [resolvable:$true] %s330_s19 }
  0x7a   : > { %s17199_s17 = scalar_lea.hbm %s19522_s5, 32768 }
  0x7b   : > { %p17200_p6 = scmp.ne.s32.totalorder %s19522_s5, %s17199_s17  ;;  %p17206_p1 = scmp.lt.u32.totalorder %s17199_s17, %s19522_s5 }
  0x7d   : > { %p17202_p12 = pnand %p17200_p6, %p19523_p8 }
  0x7f   : > { %p17203_p7 = pneg %p17202_p12 }
  0x81   : > { %p17208_p4 = pnand %p17206_p1, %p17203_p7 }
  0x83   : > { %17211 = shalt.err (!%p17208_p4)
}
  0x84   : > { %s17212_s10 = scalar_lea.vmem %s331_s19, 32768  ;;  %p17220_p5 = scmp.lt.s32.totalorder %s331_s19, %s331_s19 }
  0x85   : > { %p17213_p10 = scmp.ne.s32.totalorder %s331_s19, %s17212_s10  ;;  %p17221_p9 = scmp.lt.s32.totalorder %s17212_s10, %s17212_s10 }
  0x87   : > { %p17215_p11 = pnand %p17213_p10, %p19523_p8  ;;  %p17222_p3 = por %p17221_p9, %p17220_p5 }
  0x89   : > { %p17216_p0 = pneg %p17215_p11 }
  0x8b   : > { %p17223_p13 = pnand %p17222_p3, %p17216_p0 }
  0x8d   : > { %17226 = shalt.err (!%p17223_p13)
}
  0x8e   : > { %s19501_s2 = smov 256   ;;  %s19502_s4 = smov 16  }
  0x8f   : > { %p19524_p6 = scmp.ne.s32.totalorder %s19511_s28, 0  ;;  %s17401_s29 = smov [#allocation14]  }
  0x90   : > { %s354_s17 = sshll.u32 %s17401_s29, 4  ;;  %s17227_s18 = scalar_lea.hbm %s19480_s7, 8192  ;;  %s355_s17 = int_to_ptr.vmem [resolvable:$true] %s354_s17 }
  0x91   : > { %15005 = dma.hbm_to_vmem [thread:$0]  (!%p19524_p6), %s19522_s5, 32768, %s331_s19, [#allocation10], %s19501_s2, %s19501_s2, %s19502_s4  }
  0x92   : > { %p17228_p13 = scmp.ne.s32.totalorder %s19480_s7, %s17227_s18  ;;  %p17234_p1 = scmp.lt.u32.totalorder %s17227_s18, %s19480_s7 }
  0x94   : > { %p17230_p12 = pnand %p17228_p13, %p19523_p8 }
  0x96   : > { %p17231_p7 = pneg %p17230_p12 }
  0x98   : > { %p17236_p4 = pnand %p17234_p1, %p17231_p7 }
  0x9a   : > { %17239 = shalt.err (!%p17236_p4)
}
  0x9b   : > { %s17240_s19 = scalar_lea.vmem %s355_s17, 8192  ;;  %p17248_p5 = scmp.lt.s32.totalorder %s355_s17, %s355_s17 }
  0x9c   : > { %p17241_p10 = scmp.ne.s32.totalorder %s355_s17, %s17240_s19  ;;  %p17249_p9 = scmp.lt.s32.totalorder %s17240_s19, %s17240_s19 }
  0x9e   : > { %p17243_p11 = pnand %p17241_p10, %p19523_p8  ;;  %p17250_p3 = por %p17249_p9, %p17248_p5 }
  0xa0   : > { %p17244_p0 = pneg %p17243_p11 }
  0xa2   : > { %p17251_p2 = pnand %p17250_p3, %p17244_p0 }
  0xa4   : > { %17254 = shalt.err (!%p17251_p2)
}
  0xa5   : > { %s17402_s26 = smov 128   ;;  %s17403_s30 = smov 8  }
  0xa6   : > { %15011 = dma.hbm_to_vmem [thread:$0]  (!%p19524_p6), %s19480_s7, 8192, %s355_s17, [#allocation13], %s17402_s26, %s17402_s26, %s17403_s30  }
  0xa7   : > { %s17404_s12 = smov [#allocation15]   ;;  %s13091_s23 = sshll.u32 %s17583_s27, 13 }
  0xa8   : > { %s368_s29 = sshll.u32 %s17404_s12, 4  ;;  %s17255_s10 = scalar_lea.hbm %s19481_s8, 32  ;;  %s369_s29 = int_to_ptr.vmem [resolvable:$true] %s368_s29 }
  0xa9   : > { %p17256_p2 = scmp.ne.s32.totalorder %s19481_s8, %s17255_s10  ;;  %p17262_p7 = scmp.lt.u32.totalorder %s17255_s10, %s19481_s8 }
  0xab   : > { %p17258_p13 = pnand %p17256_p2, %p19523_p8 }
  0xad   : > { %p17259_p12 = pneg %p17258_p13 }
  0xaf   : > { %p17264_p1 = pnand %p17262_p7, %p17259_p12 }
  0xb1   : > { %17267 = shalt.err (!%p17264_p1)
}
  0xb2   : > { %s17268_s17 = scalar_lea.vmem %s369_s29, 32  ;;  %p17276_p0 = scmp.lt.s32.totalorder %s369_s29, %s369_s29 }
  0xb3   : > { %p17269_p4 = scmp.ne.s32.totalorder %s369_s29, %s17268_s17  ;;  %p17277_p5 = scmp.lt.s32.totalorder %s17268_s17, %s17268_s17 }
  0xb5   : > { %p17271_p10 = pnand %p17269_p4, %p19523_p8  ;;  %p17278_p9 = por %p17277_p5, %p17276_p0 }
  0xb7   : > { %p17272_p11 = pneg %p17271_p10 }
  0xb9   : > { %p17279_p3 = pnand %p17278_p9, %p17272_p11 }
  0xbb   : > { %17282 = shalt.err (!%p17279_p3)
}
  0xbc   : > { %15014 = dma.hbm_to_vmem [thread:$0]  (!%p19524_p6), %s19481_s8, 32, %s369_s29, [#allocation16]  }
  0xbd   : > { %s14763_s5 = sshll.u32 %s17393_s22, 17  ;;  %s389_s4 = scalar_lea.vmem [#allocation4], %s13091_s23 }
  0xbe   : > { %s396_s30 = sshll.u32 %s389_s4, 4  ;;  %s17692_s11 = scalar_lea.hbm %s19474_s1, %s14763_s5  ;;  %s17694_s30 = int_to_ptr.vmem [resolvable:$true] %s396_s30 }
  0xbf   : > { %s386_s28 = scalar_lea.sflag [#allocation5], %s17583_s27  ;;  %s17283_s12 = scalar_lea.hbm %s17692_s11, 131072 }
  0xc0   : > { %p17284_p8 = scmp.ne.s32.totalorder %s17692_s11, %s17283_s12  ;;  %p19525_p2 = scmp.ne.s32.totalorder %s19521_s21, 0 }
  0xc1   : > { %s17288_s14 = scalar_lea.hbm %s19474_s1, 524288  ;;  %p17289_p12 = scmp.lt.u32.totalorder %s17692_s11, %s19474_s1 }
  0xc2   : > { %p17286_p13 = pnand %p17284_p8, %p19525_p2  ;;  %p17290_p7 = scmp.lt.u32.totalorder %s17288_s14, %s17283_s12 }
  0xc3   : > { %p17292_p4 = scmp.lt.u32.totalorder %s17283_s12, %s17692_s11 }
  0xc4   : > { %p17287_p6 = pneg %p17286_p13  ;;  %p17291_p1 = por %p17290_p7, %p17289_p12 }
  0xc6   : > { %p17293_p10 = por %p17292_p4, %p17291_p1 }
  0xc8   : > { %p17294_p11 = pnand %p17293_p10, %p17287_p6 }
  0xca   : > { %17297 = shalt.err (!%p17294_p11)
}
  0xcb   : > { %s17298_s19 = scalar_lea.vmem %s17694_s30, 131072  ;;  %s17405_s17 = smov [#allocation4]  }
  0xcc   : > { %p17299_p0 = scmp.ne.s32.totalorder %s17694_s30, %s17298_s19  ;;  %s17303_s2 = sshll.u32 %s17405_s17, 4  ;;  %s17304_s2 = int_to_ptr.vmem [resolvable:$false] %s17303_s2 }
  0xcd   : > { %s17305_s26 = scalar_lea.vmem %s17304_s2, 262144  ;;  %p17306_p3 = scmp.lt.s32.totalorder %s17694_s30, %s17304_s2 }
  0xce   : > { %p17301_p5 = pnand %p17299_p0, %p19525_p2  ;;  %p17307_p8 = scmp.lt.s32.totalorder %s17305_s26, %s17298_s19 }
  0xd0   : > { %p17302_p9 = pneg %p17301_p5  ;;  %p17308_p13 = por %p17307_p8, %p17306_p3 }
  0xd2   : > { %p17309_p12 = pnand %p17308_p13, %p17302_p9 }
  0xd4   : > { %17312 = shalt.err (!%p17309_p12)
}
  0xd5   : > { %p19526_p6 = scmp.ne.s32.totalorder %s19519_s16, 0  ;;  %s19527_s5 = smov 16  }
  0xd6   : > { %s19528_s4 = smov 256   ;;  %s14766_s15 = sshll.u32 %s17393_s22, 15 }
  0xd7   : > { %15018 = dma.hbm_to_vmem [thread:$0]  (!%p19526_p6), %s17692_s11, 131072, %s17694_s30, %s386_s28, %s19528_s4, %s19528_s4, %s19527_s5  }
  0xd8   : > { %s17727_s29 = scalar_lea.hbm %s19476_s3, %s14766_s15  ;;  %s19529_s23 = sshll.u32 %s17583_s27, 11 }
  0xd9   : > { %s429_s14 = scalar_lea.vmem [#allocation8], %s19529_s23  ;;  %s17313_s10 = scalar_lea.hbm %s17727_s29, 32768 }
  0xda   : > { %s437_s18 = sshll.u32 %s429_s14, 4  ;;  %p17314_p7 = scmp.ne.s32.totalorder %s17727_s29, %s17313_s10  ;;  %s17731_s18 = int_to_ptr.vmem [resolvable:$true] %s437_s18 }
  0xdb   : > { %s17318_s11 = scalar_lea.hbm %s19476_s3, 131072  ;;  %p17319_p10 = scmp.lt.u32.totalorder %s17727_s29, %s19476_s3 }
  0xdc   : > { %p17316_p1 = pnand %p17314_p7, %p19525_p2  ;;  %p17320_p11 = scmp.lt.u32.totalorder %s17318_s11, %s17313_s10 }
  0xdd   : > { %p17322_p5 = scmp.lt.u32.totalorder %s17313_s10, %s17727_s29 }
  0xde   : > { %p17317_p4 = pneg %p17316_p1  ;;  %p17321_p0 = por %p17320_p11, %p17319_p10 }
  0xe0   : > { %p17323_p9 = por %p17322_p5, %p17321_p0 }
  0xe2   : > { %p17324_p3 = pnand %p17323_p9, %p17317_p4 }
  0xe4   : > { %17327 = shalt.err (!%p17324_p3)
}
  0xe5   : > { %s17328_s27 = scalar_lea.vmem %s17731_s18, 32768  ;;  %s17406_s17 = smov [#allocation8]  }
  0xe6   : > { %p17329_p8 = scmp.ne.s32.totalorder %s17731_s18, %s17328_s27  ;;  %s17333_s2 = sshll.u32 %s17406_s17, 4  ;;  %s17334_s2 = int_to_ptr.vmem [resolvable:$false] %s17333_s2 }
  0xe7   : > { %s17335_s26 = scalar_lea.vmem %s17334_s2, 65536  ;;  %p17336_p7 = scmp.lt.s32.totalorder %s17731_s18, %s17334_s2 }
  0xe8   : > { %p17331_p13 = pnand %p17329_p8, %p19525_p2  ;;  %p17337_p1 = scmp.lt.s32.totalorder %s17335_s26, %s17328_s27 }
  0xea   : > { %p17332_p12 = pneg %p17331_p13  ;;  %p17338_p10 = por %p17337_p1, %p17336_p7 }
  0xec   : > { %p17339_p11 = pnand %p17338_p10, %p17332_p12 }
  0xee   : > { %17342 = shalt.err (!%p17339_p11)
}
  0xef   : > { %s17407_s5 = smov 512   ;;  %s17408_s4 = smov 32  }
  0xf0   : > { %15024 = dma.hbm_to_vmem [thread:$0]  (!%p19526_p6), %s17727_s29, 32768, %s17731_s18, %s17600_s6, %s17407_s5, %s17407_s5, %s17408_s4  }
  0xf1   : > { %p19530_p2 = scmp.ne.s32.totalorder %s19510_s25, 0 }
  0xf2   : > { %s451_s21 = sand.u32 (!%p19530_p2), 1, %s17385_s20   ;;  %p19531_p4 = scmp.ne.s32.totalorder (!%p19530_p2), %s19518_s13, 0 }
  0xf3   : > { %449 = sbr.rel (%p19530_p2) target bundleno = 2881 (0xb41), region = 64  ;;  %s13102_s15 = sshll.u32 (!%p19530_p2), %s451_s21, 13 }
  0xf4   : > { %s452_s9 = scalar_lea.sflag (!%p19530_p2), [#allocation5], %s451_s21  ;;  %s17758_s12 = scalar_lea.vmem (!%p19530_p2), [#allocation4], %s13102_s15 }
  0xfa   : > { %17360 = dma.done.wait (%p19531_p4), %s452_s9, 131072  }
  0xfb   : > { %17362 = vsyncadd (%p19531_p4), %s452_s9, 4294836224  ;;  %s460_s23 = sand.u32 1, %s17494_s24   ;;  %s13103_s16 = sshll.u32 %s451_s21, 2 }
  0xfc   : > { %s461_s6 = scalar_lea.sflag [#allocation7], %s460_s23  ;;  %s17765_s29 = scalar_lea.vmem [#allocation6], %s13103_s16 }
  0xfd   : > { %17364 = dma.done.wait (%p19531_p4), %s461_s6, 32832  }
  0xfe   : > { %17366 = vsyncadd (%p19531_p4), %s461_s6, 4294934464  ;;  %s13104_s25 = sshll.u32 %s451_s21, 11  ;;  %p19532_p6 = scmp.eq.s32.totalorder %s17494_s24, 0 }
  0xff   : > { %s17771_s14 = scalar_lea.vmem [#allocation8], %s13104_s25 }
 0x100   : > { %17368 = dma.done.wait (%p19532_p6), [#allocation10], 32896   ;;  %p19533_p0 = pmov %p19532_p6 }
 0x102   : > { %17370 = vsyncadd (%p19533_p0), [#allocation10], 4294934400  ;;  %p19534_p5 = pmov %p19533_p0 }
 0x103   : > { %p19535_p9 = pmov %p19533_p0 }
 0x104   : > { %17372 = dma.done.wait (%p19534_p5), [#allocation13], 8256  }
 0x105   : > { %17374 = vsyncadd (%p19535_p9), [#allocation13], 4294959040  ;;  %p19536_p3 = pmov %p19533_p0 }
 0x106   : > { %p19537_p8 = pmov %p19533_p0 }
 0x107   : > { %17376 = dma.done.wait (%p19536_p3), [#allocation16], 32  }
 0x108   : > { %17378 = vsyncadd (%p19537_p8), [#allocation16], 4294967264  ;;  %p19538_p13 = scmp.ne.s32.totalorder %s17494_s24, 0 }
 0x109   : > { %v17409_v1 = vmov (!%p19538_p13), 0.0  }
 0x10a   : > { %543 = sbr.rel (%p19538_p13) target bundleno = 274 (0x112), region = 100  ;;  %544 = vst [vmem:[#allocation2] sm:$0xff] (!%p19538_p13), %v17409_v1  ;;  %545 = vst [vmem:[#allocation2 + $0x8] sm:$0xff] (!%p19538_p13), %v17409_v1 }
 0x10b   : > { %546 = vst [vmem:[#allocation2 + $0x10] sm:$0xff] (!%p19538_p13), %v17409_v1  ;;  %547 = vst [vmem:[#allocation2 + $0x18] sm:$0xff] (!%p19538_p13), %v17409_v1 }
 0x10c   : > { %548 = vst [vmem:[#allocation2 + $0x20] sm:$0xff] (!%p19538_p13), %v17409_v1  ;;  %549 = vst [vmem:[#allocation2 + $0x28] sm:$0xff] (!%p19538_p13), %v17409_v1 }
 0x10d   : > { %550 = vst [vmem:[#allocation2 + $0x30] sm:$0xff] (!%p19538_p13), %v17409_v1  ;;  %551 = vst [vmem:[#allocation2 + $0x38] sm:$0xff] (!%p19538_p13), %v17409_v1 }
 0x10e   : > { %552 = vst [vmem:[#allocation2 + $0x40] sm:$0xff] (!%p19538_p13), %v17409_v1  ;;  %553 = vst [vmem:[#allocation2 + $0x48] sm:$0xff] (!%p19538_p13), %v17409_v1 }
 0x10f   : > { %554 = vst [vmem:[#allocation2 + $0x50] sm:$0xff] (!%p19538_p13), %v17409_v1  ;;  %555 = vst [vmem:[#allocation2 + $0x58] sm:$0xff] (!%p19538_p13), %v17409_v1 }
 0x110   : > { %556 = vst [vmem:[#allocation2 + $0x60] sm:$0xff] (!%p19538_p13), %v17409_v1  ;;  %557 = vst [vmem:[#allocation2 + $0x68] sm:$0xff] (!%p19538_p13), %v17409_v1 }
 0x111   : > { %558 = vst [vmem:[#allocation2 + $0x70] sm:$0xff] %v17409_v1  ;;  %559 = vst [vmem:[#allocation2 + $0x78] sm:$0xff] %v17409_v1 }
 0x112 PF: > { %v15080_v2 = vld [vmem:[%s17758_s12 + $0x4] ss:$16 sps:$4 sm:$0xff]   ;;  %v15082_v3 = vld [vmem:[%s17758_s12 + $0xc] ss:$16 sps:$4 sm:$0xff]   ;;  %v15084_v4 = vld [vmem:[%s17758_s12] ss:$16 sps:$4 sm:$0xff]  }
 0x113   : > { %6918 = vmatprep.subr.bf16.mxu0 %v15080_v2  ;;  %v15085_v5 = vld [vmem:[%s17758_s12 + $0x8] ss:$16 sps:$4 sm:$0xff]   ;;  %7606 = vmatprep.subr.bf16.mxu1 %v15082_v3  ;;  %v15086_v6 = vld [vmem:[%s17758_s12 + $0x24] ss:$16 sps:$4 sm:$0xff]   ;;  %v15088_v7 = vld [vmem:[%s17758_s12 + $0x2c] ss:$16 sps:$4 sm:$0xff]  }
 0x114   : > { %6919 = vmatpush1.bf16.msra.mxu0 %v15084_v4  ;;  %7607 = vmatpush1.bf16.msra.mxu1 %v15085_v5  ;;  %v15090_v8 = vld [vmem:[%s17758_s12 + $0x20] ss:$16 sps:$4 sm:$0xff]   ;;  %v15091_v9 = vld [vmem:[%s17758_s12 + $0x28] ss:$16 sps:$4 sm:$0xff]   ;;  %v15092_v10 = vld [vmem:[%s17758_s12 + $0x44] ss:$16 sps:$4 sm:$0xff]  }
 0x115   : > { %6920 = vmatprep.subr.bf16.mxu0 %v15086_v6  ;;  %7608 = vmatprep.subr.bf16.mxu1 %v15088_v7  ;;  %v15094_v11 = vld [vmem:[%s17758_s12 + $0x4c] ss:$16 sps:$4 sm:$0xff]   ;;  %v15096_v12 = vld [vmem:[%s17758_s12 + $0x40] ss:$16 sps:$4 sm:$0xff]   ;;  %v15097_v13 = vld [vmem:[%s17758_s12 + $0x48] ss:$16 sps:$4 sm:$0xff]  }
 0x116   : > { %v15098_v14 = vld [vmem:[%s17758_s12 + $0x64] ss:$16 sps:$4 sm:$0xff]   ;;  %v15100_v15 = vld [vmem:[%s17758_s12 + $0x6c] ss:$16 sps:$4 sm:$0xff]   ;;  %v15102_v16 = vld [vmem:[%s17758_s12 + $0x60] ss:$16 sps:$4 sm:$0xff]  }
 0x117   : > { %v15103_v17 = vld [vmem:[%s17758_s12 + $0x68] ss:$16 sps:$4 sm:$0xff]   ;;  %v15104_v18 = vld [vmem:[%s17758_s12 + $0x84] ss:$16 sps:$4 sm:$0xff]   ;;  %v15106_v19 = vld [vmem:[%s17758_s12 + $0x8c] ss:$16 sps:$4 sm:$0xff]  }
 0x118   : > { %6921 = vmatpush1.bf16.msra.mxu0 %v15090_v8  ;;  %7609 = vmatpush1.bf16.msra.mxu1 %v15091_v9  ;;  %v15108_v20 = vld [vmem:[%s17758_s12 + $0x80] ss:$16 sps:$4 sm:$0xff]   ;;  %v15109_v21 = vld [vmem:[%s17758_s12 + $0x88] ss:$16 sps:$4 sm:$0xff]   ;;  %v15110_v22 = vld [vmem:[%s17758_s12 + $0xa4] ss:$16 sps:$4 sm:$0xff]  }
 0x119   : > { %6922 = vmatprep.subr.bf16.mxu0 %v15092_v10  ;;  %7610 = vmatprep.subr.bf16.mxu1 %v15094_v11  ;;  %v15112_v23 = vld [vmem:[%s17758_s12 + $0xac] ss:$16 sps:$4 sm:$0xff]   ;;  %v15114_v24 = vld [vmem:[%s17758_s12 + $0xa0] ss:$16 sps:$4 sm:$0xff]   ;;  %v15115_v25 = vld [vmem:[%s17758_s12 + $0xa8] ss:$16 sps:$4 sm:$0xff]  }
 0x11a   : > { %v15116_v26 = vld [vmem:[%s17758_s12 + $0xc4] ss:$16 sps:$4 sm:$0xff]   ;;  %v15118_v27 = vld [vmem:[%s17758_s12 + $0xcc] ss:$16 sps:$4 sm:$0xff]   ;;  %v15120_v28 = vld [vmem:[%s17758_s12 + $0xc0] ss:$16 sps:$4 sm:$0xff]  }
 0x11b   : > { %v15121_v29 = vld [vmem:[%s17758_s12 + $0xc8] ss:$16 sps:$4 sm:$0xff]   ;;  %v15122_v30 = vld [vmem:[%s17758_s12 + $0xe4] ss:$16 sps:$4 sm:$0xff]   ;;  %v15124_v31 = vld [vmem:[%s17758_s12 + $0xec] ss:$16 sps:$4 sm:$0xff]  }
 0x11c   : > { %6923 = vmatpush1.bf16.msra.mxu0 %v15096_v12  ;;  %7611 = vmatpush1.bf16.msra.mxu1 %v15097_v13  ;;  %v15126_v32 = vld [vmem:[%s17758_s12 + $0xe0] ss:$16 sps:$4 sm:$0xff]   ;;  %v15127_v33 = vld [vmem:[%s17758_s12 + $0xe8] ss:$16 sps:$4 sm:$0xff]   ;;  %v15128_v34 = vld [vmem:[%s17758_s12 + $0x104] ss:$16 sps:$4 sm:$0xff]  }
 0x11d   : > { %6924 = vmatprep.subr.bf16.mxu0 %v15098_v14  ;;  %7612 = vmatprep.subr.bf16.mxu1 %v15100_v15  ;;  %v15130_v35 = vld [vmem:[%s17758_s12 + $0x10c] ss:$16 sps:$4 sm:$0xff]   ;;  %v15132_v36 = vld [vmem:[%s17758_s12 + $0x100] ss:$16 sps:$4 sm:$0xff]   ;;  %v15133_v37 = vld [vmem:[%s17758_s12 + $0x108] ss:$16 sps:$4 sm:$0xff]  }
 0x11e   : > { %v15134_v38 = vld [vmem:[%s17758_s12 + $0x124] ss:$16 sps:$4 sm:$0xff]   ;;  %v15136_v39 = vld [vmem:[%s17758_s12 + $0x12c] ss:$16 sps:$4 sm:$0xff]   ;;  %v15138_v40 = vld [vmem:[%s17758_s12 + $0x120] ss:$16 sps:$4 sm:$0xff]  }
 0x11f   : > { %v15139_v41 = vld [vmem:[%s17758_s12 + $0x128] ss:$16 sps:$4 sm:$0xff]   ;;  %v15140_v42 = vld [vmem:[%s17758_s12 + $0x144] ss:$16 sps:$4 sm:$0xff]   ;;  %v15142_v43 = vld [vmem:[%s17758_s12 + $0x14c] ss:$16 sps:$4 sm:$0xff]  }
 0x120   : > { %6925 = vmatpush1.bf16.msra.mxu0 %v15102_v16  ;;  %7613 = vmatpush1.bf16.msra.mxu1 %v15103_v17  ;;  %v15144_v44 = vld [vmem:[%s17758_s12 + $0x140] ss:$16 sps:$4 sm:$0xff]   ;;  %v15145_v45 = vld [vmem:[%s17758_s12 + $0x148] ss:$16 sps:$4 sm:$0xff]   ;;  %v15146_v46 = vld [vmem:[%s17758_s12 + $0x164] ss:$16 sps:$4 sm:$0xff]  }
 0x121   : > { %6926 = vmatprep.subr.bf16.mxu0 %v15104_v18  ;;  %7614 = vmatprep.subr.bf16.mxu1 %v15106_v19  ;;  %v15148_v47 = vld [vmem:[%s17758_s12 + $0x16c] ss:$16 sps:$4 sm:$0xff]   ;;  %v15150_v50 = vld [vmem:[%s17758_s12 + $0x160] ss:$16 sps:$4 sm:$0xff]   ;;  %v15151_v51 = vld [vmem:[%s17758_s12 + $0x168] ss:$16 sps:$4 sm:$0xff]  }
 0x122   : > { %v560_v48 = vld [vmem:[%s19473_s0] sm:$0xff]  ;;  %v15157_v56 = vld [vmem:[%s17758_s12 + $0x188] ss:$16 sps:$4 sm:$0xff]   ;;  %p14423_p12 = scmp.ne.s32.totalorder %s17494_s24, 3 }
 0x123   : > { %v576_v49 = vld [vmem:[%s19473_s0 + $0x80] sm:$0xff]  ;;  %v15163_v60 = vld [vmem:[%s17758_s12 + $0x1a8] ss:$16 sps:$4 sm:$0xff]   ;;  %vm12950_vm0 = vcmask (!%p14423_p12), 7168   ;;  %s19540_s27 = sld [smem:[#allocation30_spill]] (!%p14423_p12) }
 0x124   : > { %6927 = vmatpush1.bf16.msra.mxu0 %v15108_v20  ;;  %7615 = vmatpush1.bf16.msra.mxu1 %v15109_v21  ;;  %v13112_v52 = vcombine.high %v560_v48, %v576_v49  ;;  %v15152_v53 = vld [vmem:[%s17758_s12 + $0x184] ss:$16 sps:$4 sm:$0xff]   ;;  %v15154_v54 = vld [vmem:[%s17758_s12 + $0x18c] ss:$16 sps:$4 sm:$0xff]   ;;  %v15156_v55 = vld [vmem:[%s17758_s12 + $0x180] ss:$16 sps:$4 sm:$0xff]   ;;  %v13111_v7 = vcombine.low %v560_v48, %v576_v49 }
 0x125   : > { %6928 = vmatprep.subr.bf16.mxu0 %v15110_v22  ;;  %7616 = vmatprep.subr.bf16.mxu1 %v15112_v23  ;;  %v15158_v57 = vld [vmem:[%s17758_s12 + $0x1a4] ss:$16 sps:$4 sm:$0xff]   ;;  %v15160_v58 = vld [vmem:[%s17758_s12 + $0x1ac] ss:$16 sps:$4 sm:$0xff]   ;;  %v15162_v59 = vld [vmem:[%s17758_s12 + $0x1a0] ss:$16 sps:$4 sm:$0xff]  }
 0x126   : > { %6950 = vmatprep.mubr.bf16.mxu0 %v13112_v52  ;;  %7638 = vmatprep.mubr.bf16.mxu1 %v13112_v52  ;;  %v15164_v61 = vld [vmem:[%s17758_s12 + $0x1c4] ss:$16 sps:$4 sm:$0xff]   ;;  %v15166_v62 = vld [vmem:[%s17758_s12 + $0x1cc] ss:$16 sps:$4 sm:$0xff]   ;;  %v15168_v63 = vld [vmem:[%s17758_s12 + $0x1c0] ss:$16 sps:$4 sm:$0xff]  }
 0x127   : > { %v15169_v0 = vld [vmem:[%s17758_s12 + $0x1c8] ss:$16 sps:$4 sm:$0xff]   ;;  %v15170_v1 = vld [vmem:[%s17758_s12 + $0x1e4] ss:$16 sps:$4 sm:$0xff]   ;;  %v15172_v2 = vld [vmem:[%s17758_s12 + $0x1ec] ss:$16 sps:$4 sm:$0xff]  }
 0x128   : > { %6929 = vmatpush1.bf16.msra.mxu0 %v15114_v24  ;;  %7617 = vmatpush1.bf16.msra.mxu1 %v15115_v25  ;;  %v15174_v3 = vld [vmem:[%s17758_s12 + $0x1e0] ss:$16 sps:$4 sm:$0xff]   ;;  %v15175_v4 = vld [vmem:[%s17758_s12 + $0x1e8] ss:$16 sps:$4 sm:$0xff]   ;;  %v15178_v5 = vld [vmem:[%s17758_s12 + $0x204] ss:$16 sps:$4 sm:$0xff]  }
 0x129   : > { %6930 = vmatprep.subr.bf16.mxu0 %v15116_v26  ;;  %7618 = vmatprep.subr.bf16.mxu1 %v15118_v27  ;;  %v15181_v6 = vld [vmem:[%s17758_s12 + $0x20c] ss:$16 sps:$4 sm:$0xff]   ;;  %v15176_v8 = vld [vmem:[%s17758_s12 + $0x200] ss:$16 sps:$4 sm:$0xff]   ;;  %v15179_v9 = vld [vmem:[%s17758_s12 + $0x208] ss:$16 sps:$4 sm:$0xff]  }
 0x12a   : > { %v15184_v10 = vld [vmem:[%s17758_s12 + $0x224] ss:$16 sps:$4 sm:$0xff]   ;;  %v15187_v11 = vld [vmem:[%s17758_s12 + $0x22c] ss:$16 sps:$4 sm:$0xff]   ;;  %v15182_v12 = vld [vmem:[%s17758_s12 + $0x220] ss:$16 sps:$4 sm:$0xff]  }
 0x12b   : > { %v15185_v13 = vld [vmem:[%s17758_s12 + $0x228] ss:$16 sps:$4 sm:$0xff]   ;;  %v15190_v14 = vld [vmem:[%s17758_s12 + $0x244] ss:$16 sps:$4 sm:$0xff]   ;;  %v15193_v15 = vld [vmem:[%s17758_s12 + $0x24c] ss:$16 sps:$4 sm:$0xff]  }
 0x12c   : > { %6931 = vmatpush1.bf16.msra.mxu0 %v15120_v28  ;;  %7619 = vmatpush1.bf16.msra.mxu1 %v15121_v29  ;;  %v15188_v16 = vld [vmem:[%s17758_s12 + $0x240] ss:$16 sps:$4 sm:$0xff]   ;;  %v15191_v17 = vld [vmem:[%s17758_s12 + $0x248] ss:$16 sps:$4 sm:$0xff]   ;;  %v15196_v18 = vld [vmem:[%s17758_s12 + $0x264] ss:$16 sps:$4 sm:$0xff]  }
 0x12d   : > { %6932 = vmatprep.subr.bf16.mxu0 %v15122_v30  ;;  %7620 = vmatprep.subr.bf16.mxu1 %v15124_v31  ;;  %v15199_v19 = vld [vmem:[%s17758_s12 + $0x26c] ss:$16 sps:$4 sm:$0xff]   ;;  %v15194_v20 = vld [vmem:[%s17758_s12 + $0x260] ss:$16 sps:$4 sm:$0xff]   ;;  %v15197_v21 = vld [vmem:[%s17758_s12 + $0x268] ss:$16 sps:$4 sm:$0xff]  }
 0x12e   : > { %v15202_v22 = vld [vmem:[%s17758_s12 + $0x284] ss:$16 sps:$4 sm:$0xff]   ;;  %v15205_v23 = vld [vmem:[%s17758_s12 + $0x28c] ss:$16 sps:$4 sm:$0xff]   ;;  %v15200_v24 = vld [vmem:[%s17758_s12 + $0x280] ss:$16 sps:$4 sm:$0xff]  }
 0x12f   : > { %v15203_v25 = vld [vmem:[%s17758_s12 + $0x288] ss:$16 sps:$4 sm:$0xff]   ;;  %v15208_v26 = vld [vmem:[%s17758_s12 + $0x2a4] ss:$16 sps:$4 sm:$0xff]   ;;  %v15211_v27 = vld [vmem:[%s17758_s12 + $0x2ac] ss:$16 sps:$4 sm:$0xff]  }
 0x130   : > { %6933 = vmatpush1.bf16.msra.mxu0 %v15126_v32  ;;  %7621 = vmatpush1.bf16.msra.mxu1 %v15127_v33  ;;  %v15206_v28 = vld [vmem:[%s17758_s12 + $0x2a0] ss:$16 sps:$4 sm:$0xff]   ;;  %v15209_v29 = vld [vmem:[%s17758_s12 + $0x2a8] ss:$16 sps:$4 sm:$0xff]   ;;  %v15214_v30 = vld [vmem:[%s17758_s12 + $0x2c4] ss:$16 sps:$4 sm:$0xff]  }
 0x131   : > { %6934 = vmatprep.subr.bf16.mxu0 %v15128_v34  ;;  %7622 = vmatprep.subr.bf16.mxu1 %v15130_v35  ;;  %v15217_v31 = vld [vmem:[%s17758_s12 + $0x2cc] ss:$16 sps:$4 sm:$0xff]   ;;  %v15212_v34 = vld [vmem:[%s17758_s12 + $0x2c0] ss:$16 sps:$4 sm:$0xff]   ;;  %v15215_v35 = vld [vmem:[%s17758_s12 + $0x2c8] ss:$16 sps:$4 sm:$0xff]  }
 0x132   : > { %v17886_v32 = vld [vmem:[%s19473_s0 + $0x8] sm:$0xff] }
 0x133   : > { %v17891_v33 = vld [vmem:[%s19473_s0 + $0x88] sm:$0xff] }
 0x134   : > { %6935 = vmatpush1.bf16.msra.mxu0 %v15132_v36  ;;  %7623 = vmatpush1.bf16.msra.mxu1 %v15133_v37  ;;  %v13114_v36 = vcombine.high %v17886_v32, %v17891_v33  ;;  %v15220_v37 = vld [vmem:[%s17758_s12 + $0x2e4] ss:$16 sps:$4 sm:$0xff]   ;;  %v15233_v48 = vld [vmem:[%s17758_s12 + $0x328] ss:$16 sps:$4 sm:$0xff]  }
 0x135   : > { %6936 = vmatprep.subr.bf16.mxu0 %v15134_v38  ;;  %7624 = vmatprep.subr.bf16.mxu1 %v15136_v39  ;;  %v15223_v38 = vld [vmem:[%s17758_s12 + $0x2ec] ss:$16 sps:$4 sm:$0xff]   ;;  %v15218_v39 = vld [vmem:[%s17758_s12 + $0x2e0] ss:$16 sps:$4 sm:$0xff]   ;;  %v15238_v49 = vld [vmem:[%s17758_s12 + $0x344] ss:$16 sps:$4 sm:$0xff]  }
 0x136   : > { %v15239_v52 = vld [vmem:[%s17758_s12 + $0x348] ss:$16 sps:$4 sm:$0xff]  }
 0x138   : > { %6937 = vmatpush1.bf16.msra.mxu0 %v15138_v40  ;;  %7625 = vmatpush1.bf16.msra.mxu1 %v15139_v41  ;;  %v15221_v40 = vld [vmem:[%s17758_s12 + $0x2e8] ss:$16 sps:$4 sm:$0xff]   ;;  %v15226_v41 = vld [vmem:[%s17758_s12 + $0x304] ss:$16 sps:$4 sm:$0xff]  }
 0x139   : > { %6938 = vmatprep.subr.bf16.mxu0 %v15140_v42  ;;  %7626 = vmatprep.subr.bf16.mxu1 %v15142_v43  ;;  %v15229_v42 = vld [vmem:[%s17758_s12 + $0x30c] ss:$16 sps:$4 sm:$0xff]   ;;  %v15224_v43 = vld [vmem:[%s17758_s12 + $0x300] ss:$16 sps:$4 sm:$0xff]  }
 0x13c   : > { %6939 = vmatpush1.bf16.msra.mxu0 %v15144_v44  ;;  %7627 = vmatpush1.bf16.msra.mxu1 %v15145_v45  ;;  %v15227_v44 = vld [vmem:[%s17758_s12 + $0x308] ss:$16 sps:$4 sm:$0xff]   ;;  %v15232_v45 = vld [vmem:[%s17758_s12 + $0x324] ss:$16 sps:$4 sm:$0xff]  }
 0x13d   : > { %6940 = vmatprep.subr.bf16.mxu0 %v15146_v46  ;;  %7628 = vmatprep.subr.bf16.mxu1 %v15148_v47  ;;  %v15235_v46 = vld [vmem:[%s17758_s12 + $0x32c] ss:$16 sps:$4 sm:$0xff]   ;;  %v15230_v47 = vld [vmem:[%s17758_s12 + $0x320] ss:$16 sps:$4 sm:$0xff]  }
 0x140   : > { %6941 = vmatpush1.bf16.msra.mxu0 %v15150_v50  ;;  %7629 = vmatpush1.bf16.msra.mxu1 %v15151_v51  ;;  %v15241_v50 = vld [vmem:[%s17758_s12 + $0x34c] ss:$16 sps:$4 sm:$0xff]   ;;  %v15236_v51 = vld [vmem:[%s17758_s12 + $0x340] ss:$16 sps:$4 sm:$0xff]  }
 0x141   : > { %6942 = vmatprep.subr.bf16.mxu0 %v15152_v53  ;;  %7630 = vmatprep.subr.bf16.mxu1 %v15154_v54  ;;  %v15244_v53 = vld [vmem:[%s17758_s12 + $0x364] ss:$16 sps:$4 sm:$0xff]   ;;  %v15247_v54 = vld [vmem:[%s17758_s12 + $0x36c] ss:$16 sps:$4 sm:$0xff]  }
 0x144   : > { %6943 = vmatpush1.bf16.msra.mxu0 %v15156_v55  ;;  %7631 = vmatpush1.bf16.msra.mxu1 %v15157_v56  ;;  %v15242_v55 = vld [vmem:[%s17758_s12 + $0x360] ss:$16 sps:$4 sm:$0xff]   ;;  %v15245_v56 = vld [vmem:[%s17758_s12 + $0x368] ss:$16 sps:$4 sm:$0xff]  }
 0x145   : > { %6944 = vmatprep.subr.bf16.mxu0 %v15158_v57  ;;  %7632 = vmatprep.subr.bf16.mxu1 %v15160_v58  ;;  %v15250_v57 = vld [vmem:[%s17758_s12 + $0x384] ss:$16 sps:$4 sm:$0xff]   ;;  %v15253_v58 = vld [vmem:[%s17758_s12 + $0x38c] ss:$16 sps:$4 sm:$0xff]  }
 0x148   : > { %6945 = vmatpush1.bf16.msra.mxu0 %v15162_v59  ;;  %7633 = vmatpush1.bf16.msra.mxu1 %v15163_v60  ;;  %v15248_v59 = vld [vmem:[%s17758_s12 + $0x380] ss:$16 sps:$4 sm:$0xff]   ;;  %v15251_v60 = vld [vmem:[%s17758_s12 + $0x388] ss:$16 sps:$4 sm:$0xff]  }
 0x149   : > { %6946 = vmatprep.subr.bf16.mxu0 %v15164_v61  ;;  %7634 = vmatprep.subr.bf16.mxu1 %v15166_v62  ;;  %v15256_v61 = vld [vmem:[%s17758_s12 + $0x3a4] ss:$16 sps:$4 sm:$0xff]   ;;  %v15259_v62 = vld [vmem:[%s17758_s12 + $0x3ac] ss:$16 sps:$4 sm:$0xff]  }
 0x14c   : > { %6947 = vmatpush1.bf16.msra.mxu0 %v15168_v63  ;;  %7635 = vmatpush1.bf16.msra.mxu1 %v15169_v0  ;;  %v15254_v63 = vld [vmem:[%s17758_s12 + $0x3a0] ss:$16 sps:$4 sm:$0xff]   ;;  %v15257_v0 = vld [vmem:[%s17758_s12 + $0x3a8] ss:$16 sps:$4 sm:$0xff]  }
 0x14d   : > { %6948 = vmatprep.subr.bf16.mxu0 %v15170_v1  ;;  %7636 = vmatprep.subr.bf16.mxu1 %v15172_v2  ;;  %v15262_v1 = vld [vmem:[%s17758_s12 + $0x3c4] ss:$16 sps:$4 sm:$0xff]   ;;  %v15265_v2 = vld [vmem:[%s17758_s12 + $0x3cc] ss:$16 sps:$4 sm:$0xff]  }
 0x150   : > { %6949 = vmatpush1.bf16.msra.mxu0 %v15174_v3  ;;  %7637 = vmatpush1.bf16.msra.mxu1 %v15175_v4  ;;  %v15260_v3 = vld [vmem:[%s17758_s12 + $0x3c0] ss:$16 sps:$4 sm:$0xff]   ;;  %v15263_v4 = vld [vmem:[%s17758_s12 + $0x3c8] ss:$16 sps:$4 sm:$0xff]  }
 0x151   : > { %6961 = vmatprep.subr.bf16.mxu0 %v15178_v5  ;;  %7649 = vmatprep.subr.bf16.mxu1 %v15181_v6  ;;  %v15268_v5 = vld [vmem:[%s17758_s12 + $0x3e4] ss:$16 sps:$4 sm:$0xff]   ;;  %v15271_v6 = vld [vmem:[%s17758_s12 + $0x3ec] ss:$16 sps:$4 sm:$0xff]  }
 0x153   : > { %6951 = vmatmul.mubr.bf16.vlgmr.msra.gmra.mrb[0].mxu0 %v13111_v7  ;;  %7639 = vmatmul.mubr.bf16.vlgmr.msra.gmra.mrb[0].mxu1 %v13111_v7  ;;  %v15266_v7 = vld [vmem:[%s17758_s12 + $0x3e0] ss:$16 sps:$4 sm:$0xff]  }
 0x154   : > { %6962 = vmatpush1.bf16.msra.mxu0 %v15176_v8  ;;  %7650 = vmatpush1.bf16.msra.mxu1 %v15179_v9  ;;  %v15269_v8 = vld [vmem:[%s17758_s12 + $0x3e8] ss:$16 sps:$4 sm:$0xff]   ;;  %v15274_v9 = vld [vmem:[%s17758_s12 + $0x404] ss:$16 sps:$4 sm:$0xff]  }
 0x155   : > { %6963 = vmatprep.subr.bf16.mxu0 %v15184_v10  ;;  %7651 = vmatprep.subr.bf16.mxu1 %v15187_v11  ;;  %v15277_v10 = vld [vmem:[%s17758_s12 + $0x40c] ss:$16 sps:$4 sm:$0xff]   ;;  %v13113_v11 = vcombine.low %v17886_v32, %v17891_v33  ;;  %v15299_v32 = vld [vmem:[%s17758_s12 + $0x488] ss:$16 sps:$4 sm:$0xff]   ;;  %v15304_v33 = vld [vmem:[%s17758_s12 + $0x4a4] ss:$16 sps:$4 sm:$0xff]  }
 0x156   : > { %6993 = vmatprep.mubr.bf16.mxu0 %v13114_v36  ;;  %7681 = vmatprep.mubr.bf16.mxu1 %v13114_v36  ;;  %v15305_v36 = vld [vmem:[%s17758_s12 + $0x4a8] ss:$16 sps:$4 sm:$0xff]  }
 0x158   : > { %6964 = vmatpush1.bf16.msra.mxu0 %v15182_v12  ;;  %7652 = vmatpush1.bf16.msra.mxu1 %v15185_v13  ;;  %v15272_v12 = vld [vmem:[%s17758_s12 + $0x400] ss:$16 sps:$4 sm:$0xff]   ;;  %v15275_v13 = vld [vmem:[%s17758_s12 + $0x408] ss:$16 sps:$4 sm:$0xff]  }
 0x159   : > { %6965 = vmatprep.subr.bf16.mxu0 %v15190_v14  ;;  %7653 = vmatprep.subr.bf16.mxu1 %v15193_v15  ;;  %v15280_v14 = vld [vmem:[%s17758_s12 + $0x424] ss:$16 sps:$4 sm:$0xff]   ;;  %v15283_v15 = vld [vmem:[%s17758_s12 + $0x42c] ss:$16 sps:$4 sm:$0xff]  }
 0x15c   : > { %6966 = vmatpush1.bf16.msra.mxu0 %v15188_v16  ;;  %7654 = vmatpush1.bf16.msra.mxu1 %v15191_v17  ;;  %v17944_v16 = vld [vmem:[%s19473_s0 + $0x10] sm:$0xff] }
 0x15d   : > { %6967 = vmatprep.subr.bf16.mxu0 %v15196_v18  ;;  %7655 = vmatprep.subr.bf16.mxu1 %v15199_v19  ;;  %v17949_v17 = vld [vmem:[%s19473_s0 + $0x90] sm:$0xff] }
 0x15e   : > { %v13116_v18 = vcombine.high %v17944_v16, %v17949_v17  ;;  %v15278_v19 = vld [vmem:[%s17758_s12 + $0x420] ss:$16 sps:$4 sm:$0xff]  }
 0x160   : > { %6968 = vmatpush1.bf16.msra.mxu0 %v15194_v20  ;;  %7656 = vmatpush1.bf16.msra.mxu1 %v15197_v21  ;;  %v15281_v20 = vld [vmem:[%s17758_s12 + $0x428] ss:$16 sps:$4 sm:$0xff]   ;;  %v15286_v21 = vld [vmem:[%s17758_s12 + $0x444] ss:$16 sps:$4 sm:$0xff]  }
 0x161   : > { %6969 = vmatprep.subr.bf16.mxu0 %v15202_v22  ;;  %7657 = vmatprep.subr.bf16.mxu1 %v15205_v23  ;;  %v15289_v22 = vld [vmem:[%s17758_s12 + $0x44c] ss:$16 sps:$4 sm:$0xff]   ;;  %v15284_v23 = vld [vmem:[%s17758_s12 + $0x440] ss:$16 sps:$4 sm:$0xff]  }
 0x164   : > { %6970 = vmatpush1.bf16.msra.mxu0 %v15200_v24  ;;  %7658 = vmatpush1.bf16.msra.mxu1 %v15203_v25  ;;  %v15287_v24 = vld [vmem:[%s17758_s12 + $0x448] ss:$16 sps:$4 sm:$0xff]   ;;  %v15292_v25 = vld [vmem:[%s17758_s12 + $0x464] ss:$16 sps:$4 sm:$0xff]  }
 0x165   : > { %6971 = vmatprep.subr.bf16.mxu0 %v15208_v26  ;;  %7659 = vmatprep.subr.bf16.mxu1 %v15211_v27  ;;  %v15295_v26 = vld [vmem:[%s17758_s12 + $0x46c] ss:$16 sps:$4 sm:$0xff]   ;;  %v15290_v27 = vld [vmem:[%s17758_s12 + $0x460] ss:$16 sps:$4 sm:$0xff]  }
 0x168   : > { %6972 = vmatpush1.bf16.msra.mxu0 %v15206_v28  ;;  %7660 = vmatpush1.bf16.msra.mxu1 %v15209_v29  ;;  %v15293_v28 = vld [vmem:[%s17758_s12 + $0x468] ss:$16 sps:$4 sm:$0xff]   ;;  %v15298_v29 = vld [vmem:[%s17758_s12 + $0x484] ss:$16 sps:$4 sm:$0xff]  }
 0x169   : > { %6973 = vmatprep.subr.bf16.mxu0 %v15214_v30  ;;  %7661 = vmatprep.subr.bf16.mxu1 %v15217_v31  ;;  %v15301_v30 = vld [vmem:[%s17758_s12 + $0x48c] ss:$16 sps:$4 sm:$0xff]   ;;  %v15296_v31 = vld [vmem:[%s17758_s12 + $0x480] ss:$16 sps:$4 sm:$0xff]  }
 0x16c   : > { %6974 = vmatpush1.bf16.msra.mxu0 %v15212_v34  ;;  %7662 = vmatpush1.bf16.msra.mxu1 %v15215_v35  ;;  %v15307_v34 = vld [vmem:[%s17758_s12 + $0x4ac] ss:$16 sps:$4 sm:$0xff]   ;;  %v15302_v35 = vld [vmem:[%s17758_s12 + $0x4a0] ss:$16 sps:$4 sm:$0xff]  }
 0x16d   : > { %6975 = vmatprep.subr.bf16.mxu0 %v15220_v37  ;;  %7663 = vmatprep.subr.bf16.mxu1 %v15223_v38  ;;  %v15310_v37 = vld [vmem:[%s17758_s12 + $0x4c4] ss:$16 sps:$4 sm:$0xff]   ;;  %v15313_v38 = vld [vmem:[%s17758_s12 + $0x4cc] ss:$16 sps:$4 sm:$0xff]  }
 0x170   : > { %6976 = vmatpush1.bf16.msra.mxu0 %v15218_v39  ;;  %7664 = vmatpush1.bf16.msra.mxu1 %v15221_v40  ;;  %v15308_v39 = vld [vmem:[%s17758_s12 + $0x4c0] ss:$16 sps:$4 sm:$0xff]   ;;  %v15311_v40 = vld [vmem:[%s17758_s12 + $0x4c8] ss:$16 sps:$4 sm:$0xff]  }
 0x171   : > { %6977 = vmatprep.subr.bf16.mxu0 %v15226_v41  ;;  %7665 = vmatprep.subr.bf16.mxu1 %v15229_v42  ;;  %v15316_v41 = vld [vmem:[%s17758_s12 + $0x4e4] ss:$16 sps:$4 sm:$0xff]   ;;  %v15319_v42 = vld [vmem:[%s17758_s12 + $0x4ec] ss:$16 sps:$4 sm:$0xff]  }
 0x174   : > { %6978 = vmatpush1.bf16.msra.mxu0 %v15224_v43  ;;  %7666 = vmatpush1.bf16.msra.mxu1 %v15227_v44  ;;  %v15314_v43 = vld [vmem:[%s17758_s12 + $0x4e0] ss:$16 sps:$4 sm:$0xff]   ;;  %v15317_v44 = vld [vmem:[%s17758_s12 + $0x4e8] ss:$16 sps:$4 sm:$0xff]  }
 0x175   : > { %6979 = vmatprep.subr.bf16.mxu0 %v15232_v45  ;;  %7667 = vmatprep.subr.bf16.mxu1 %v15235_v46  ;;  %v15322_v45 = vld [vmem:[%s17758_s12 + $0x504] ss:$16 sps:$4 sm:$0xff]   ;;  %v15325_v46 = vld [vmem:[%s17758_s12 + $0x50c] ss:$16 sps:$4 sm:$0xff]  }
 0x178   : > { %6980 = vmatpush1.bf16.msra.mxu0 %v15230_v47  ;;  %7668 = vmatpush1.bf16.msra.mxu1 %v15233_v48  ;;  %v15320_v47 = vld [vmem:[%s17758_s12 + $0x500] ss:$16 sps:$4 sm:$0xff]   ;;  %v15323_v48 = vld [vmem:[%s17758_s12 + $0x508] ss:$16 sps:$4 sm:$0xff]  }
 0x179   : > { %6981 = vmatprep.subr.bf16.mxu0 %v15238_v49  ;;  %7669 = vmatprep.subr.bf16.mxu1 %v15241_v50  ;;  %v15328_v49 = vld [vmem:[%s17758_s12 + $0x524] ss:$16 sps:$4 sm:$0xff]   ;;  %v15331_v50 = vld [vmem:[%s17758_s12 + $0x52c] ss:$16 sps:$4 sm:$0xff]  }
 0x17c   : > { %6982 = vmatpush1.bf16.msra.mxu0 %v15236_v51  ;;  %7670 = vmatpush1.bf16.msra.mxu1 %v15239_v52  ;;  %v15326_v51 = vld [vmem:[%s17758_s12 + $0x520] ss:$16 sps:$4 sm:$0xff]   ;;  %v15329_v52 = vld [vmem:[%s17758_s12 + $0x528] ss:$16 sps:$4 sm:$0xff]  }
 0x17d   : > { %6983 = vmatprep.subr.bf16.mxu0 %v15244_v53  ;;  %7671 = vmatprep.subr.bf16.mxu1 %v15247_v54  ;;  %v15334_v53 = vld [vmem:[%s17758_s12 + $0x544] ss:$16 sps:$4 sm:$0xff]   ;;  %v15337_v54 = vld [vmem:[%s17758_s12 + $0x54c] ss:$16 sps:$4 sm:$0xff]  }
 0x180   : > { %6984 = vmatpush1.bf16.msra.mxu0 %v15242_v55  ;;  %7672 = vmatpush1.bf16.msra.mxu1 %v15245_v56  ;;  %v15332_v55 = vld [vmem:[%s17758_s12 + $0x540] ss:$16 sps:$4 sm:$0xff]   ;;  %v15335_v56 = vld [vmem:[%s17758_s12 + $0x548] ss:$16 sps:$4 sm:$0xff]  }
 0x181   : > { %6985 = vmatprep.subr.bf16.mxu0 %v15250_v57  ;;  %7673 = vmatprep.subr.bf16.mxu1 %v15253_v58  ;;  %v15340_v57 = vld [vmem:[%s17758_s12 + $0x564] ss:$16 sps:$4 sm:$0xff]   ;;  %v15343_v58 = vld [vmem:[%s17758_s12 + $0x56c] ss:$16 sps:$4 sm:$0xff]  }
 0x184   : > { %6986 = vmatpush1.bf16.msra.mxu0 %v15248_v59  ;;  %7674 = vmatpush1.bf16.msra.mxu1 %v15251_v60  ;;  %v15338_v59 = vld [vmem:[%s17758_s12 + $0x560] ss:$16 sps:$4 sm:$0xff]   ;;  %v15341_v60 = vld [vmem:[%s17758_s12 + $0x568] ss:$16 sps:$4 sm:$0xff]  }
 0x185   : > { %6987 = vmatprep.subr.bf16.mxu0 %v15256_v61  ;;  %7675 = vmatprep.subr.bf16.mxu1 %v15259_v62  ;;  %v15346_v61 = vld [vmem:[%s17758_s12 + $0x584] ss:$16 sps:$4 sm:$0xff]   ;;  %v15349_v62 = vld [vmem:[%s17758_s12 + $0x58c] ss:$16 sps:$4 sm:$0xff]  }
 0x188   : > { %6988 = vmatpush1.bf16.msra.mxu0 %v15254_v63  ;;  %7676 = vmatpush1.bf16.msra.mxu1 %v15257_v0  ;;  %v15344_v63 = vld [vmem:[%s17758_s12 + $0x580] ss:$16 sps:$4 sm:$0xff]   ;;  %v15347_v0 = vld [vmem:[%s17758_s12 + $0x588] ss:$16 sps:$4 sm:$0xff]  }
 0x189   : > { %6989 = vmatprep.subr.bf16.mxu0 %v15262_v1  ;;  %7677 = vmatprep.subr.bf16.mxu1 %v15265_v2  ;;  %v15352_v1 = vld [vmem:[%s17758_s12 + $0x5a4] ss:$16 sps:$4 sm:$0xff]   ;;  %v15355_v2 = vld [vmem:[%s17758_s12 + $0x5ac] ss:$16 sps:$4 sm:$0xff]  }
 0x18c   : > { %6990 = vmatpush1.bf16.msra.mxu0 %v15260_v3  ;;  %7678 = vmatpush1.bf16.msra.mxu1 %v15263_v4  ;;  %v15350_v3 = vld [vmem:[%s17758_s12 + $0x5a0] ss:$16 sps:$4 sm:$0xff]   ;;  %v15353_v4 = vld [vmem:[%s17758_s12 + $0x5a8] ss:$16 sps:$4 sm:$0xff]  }
 0x18d   : > { %6991 = vmatprep.subr.bf16.mxu0 %v15268_v5  ;;  %7679 = vmatprep.subr.bf16.mxu1 %v15271_v6  ;;  %v15358_v5 = vld [vmem:[%s17758_s12 + $0x5c4] ss:$16 sps:$4 sm:$0xff]   ;;  %v15361_v6 = vld [vmem:[%s17758_s12 + $0x5cc] ss:$16 sps:$4 sm:$0xff]  }
 0x190   : > { %6992 = vmatpush1.bf16.msra.mxu0 %v15266_v7  ;;  %7680 = vmatpush1.bf16.msra.mxu1 %v15269_v8  ;;  %v15356_v7 = vld [vmem:[%s17758_s12 + $0x5c0] ss:$16 sps:$4 sm:$0xff]   ;;  %v15359_v8 = vld [vmem:[%s17758_s12 + $0x5c8] ss:$16 sps:$4 sm:$0xff]  }
 0x191   : > { %7004 = vmatprep.subr.bf16.mxu0 %v15274_v9  ;;  %7692 = vmatprep.subr.bf16.mxu1 %v15277_v10  ;;  %v15364_v9 = vld [vmem:[%s17758_s12 + $0x5e4] ss:$16 sps:$4 sm:$0xff]   ;;  %v15367_v10 = vld [vmem:[%s17758_s12 + $0x5ec] ss:$16 sps:$4 sm:$0xff]  }
 0x193   : > { %6994 = vmatmul.mubr.bf16.vlgmr.msra.gmra.mrb[0].mxu0 %v13113_v11  ;;  %7682 = vmatmul.mubr.bf16.vlgmr.msra.gmra.mrb[0].mxu1 %v13113_v11  ;;  %v15362_v11 = vld [vmem:[%s17758_s12 + $0x5e0] ss:$16 sps:$4 sm:$0xff]  }
 0x194   : > { %7005 = vmatpush1.bf16.msra.mxu0 %v15272_v12  ;;  %7693 = vmatpush1.bf16.msra.mxu1 %v15275_v13  ;;  %v15365_v12 = vld [vmem:[%s17758_s12 + $0x5e8] ss:$16 sps:$4 sm:$0xff]   ;;  %v15370_v13 = vld [vmem:[%s17758_s12 + $0x604] ss:$16 sps:$4 sm:$0xff]  }
 0x195   : > { %7006 = vmatprep.subr.bf16.mxu0 %v15280_v14  ;;  %7694 = vmatprep.subr.bf16.mxu1 %v15283_v15  ;;  %v15373_v14 = vld [vmem:[%s17758_s12 + $0x60c] ss:$16 sps:$4 sm:$0xff]   ;;  %v15368_v15 = vld [vmem:[%s17758_s12 + $0x600] ss:$16 sps:$4 sm:$0xff]  }
 0x196   : > { %7036 = vmatprep.mubr.bf16.mxu0 %v13116_v18  ;;  %7724 = vmatprep.mubr.bf16.mxu1 %v13116_v18  ;;  %v15371_v18 = vld [vmem:[%s17758_s12 + $0x608] ss:$16 sps:$4 sm:$0xff]  }
 0x198   : > { %7007 = vmatpush1.bf16.msra.mxu0 %v15278_v19  ;;  %7695 = vmatpush1.bf16.msra.mxu1 %v15281_v20  ;;  %v13115_v19 = vcombine.low %v17944_v16, %v17949_v17  ;;  %v18020_v20 = vld [vmem:[%s19473_s0 + $0x18] sm:$0xff] }
 0x199   : > { %7008 = vmatprep.subr.bf16.mxu0 %v15286_v21  ;;  %7696 = vmatprep.subr.bf16.mxu1 %v15289_v22  ;;  %v18025_v21 = vld [vmem:[%s19473_s0 + $0x98] sm:$0xff] }
 0x19a   : > { %v15376_v22 = vld [vmem:[%s17758_s12 + $0x624] ss:$16 sps:$4 sm:$0xff]   ;;  %v15379_v16 = vld [vmem:[%s17758_s12 + $0x62c] ss:$16 sps:$4 sm:$0xff]   ;;  %v13118_v17 = vcombine.high %v18020_v20, %v18025_v21 }
 0x19c   : > { %7009 = vmatpush1.bf16.msra.mxu0 %v15284_v23  ;;  %7697 = vmatpush1.bf16.msra.mxu1 %v15287_v24  ;;  %v15374_v23 = vld [vmem:[%s17758_s12 + $0x620] ss:$16 sps:$4 sm:$0xff]   ;;  %v15377_v24 = vld [vmem:[%s17758_s12 + $0x628] ss:$16 sps:$4 sm:$0xff]  }
 0x19d   : > { %7010 = vmatprep.subr.bf16.mxu0 %v15292_v25  ;;  %7698 = vmatprep.subr.bf16.mxu1 %v15295_v26  ;;  %v15382_v25 = vld [vmem:[%s17758_s12 + $0x644] ss:$16 sps:$4 sm:$0xff]   ;;  %v15385_v26 = vld [vmem:[%s17758_s12 + $0x64c] ss:$16 sps:$4 sm:$0xff]  }
 0x1a0   : > { %7011 = vmatpush1.bf16.msra.mxu0 %v15290_v27  ;;  %7699 = vmatpush1.bf16.msra.mxu1 %v15293_v28  ;;  %v15380_v27 = vld [vmem:[%s17758_s12 + $0x640] ss:$16 sps:$4 sm:$0xff]   ;;  %v15383_v28 = vld [vmem:[%s17758_s12 + $0x648] ss:$16 sps:$4 sm:$0xff]  }
 0x1a1   : > { %7012 = vmatprep.subr.bf16.mxu0 %v15298_v29  ;;  %7700 = vmatprep.subr.bf16.mxu1 %v15301_v30  ;;  %v15388_v29 = vld [vmem:[%s17758_s12 + $0x664] ss:$16 sps:$4 sm:$0xff]   ;;  %v15391_v30 = vld [vmem:[%s17758_s12 + $0x66c] ss:$16 sps:$4 sm:$0xff]  }
 0x1a4   : > { %7013 = vmatpush1.bf16.msra.mxu0 %v15296_v31  ;;  %7701 = vmatpush1.bf16.msra.mxu1 %v15299_v32  ;;  %v15386_v31 = vld [vmem:[%s17758_s12 + $0x660] ss:$16 sps:$4 sm:$0xff]   ;;  %v15389_v32 = vld [vmem:[%s17758_s12 + $0x668] ss:$16 sps:$4 sm:$0xff]  }
 0x1a5   : > { %7014 = vmatprep.subr.bf16.mxu0 %v15304_v33  ;;  %7702 = vmatprep.subr.bf16.mxu1 %v15307_v34  ;;  %v15394_v33 = vld [vmem:[%s17758_s12 + $0x684] ss:$16 sps:$4 sm:$0xff]   ;;  %v15397_v34 = vld [vmem:[%s17758_s12 + $0x68c] ss:$16 sps:$4 sm:$0xff]  }
 0x1a8   : > { %7015 = vmatpush1.bf16.msra.mxu0 %v15302_v35  ;;  %7703 = vmatpush1.bf16.msra.mxu1 %v15305_v36  ;;  %v15392_v35 = vld [vmem:[%s17758_s12 + $0x680] ss:$16 sps:$4 sm:$0xff]   ;;  %v15395_v36 = vld [vmem:[%s17758_s12 + $0x688] ss:$16 sps:$4 sm:$0xff]  }
 0x1a9   : > { %7016 = vmatprep.subr.bf16.mxu0 %v15310_v37  ;;  %7704 = vmatprep.subr.bf16.mxu1 %v15313_v38  ;;  %v15400_v37 = vld [vmem:[%s17758_s12 + $0x6a4] ss:$16 sps:$4 sm:$0xff]   ;;  %v15403_v38 = vld [vmem:[%s17758_s12 + $0x6ac] ss:$16 sps:$4 sm:$0xff]  }
 0x1ac   : > { %7017 = vmatpush1.bf16.msra.mxu0 %v15308_v39  ;;  %7705 = vmatpush1.bf16.msra.mxu1 %v15311_v40  ;;  %v15398_v39 = vld [vmem:[%s17758_s12 + $0x6a0] ss:$16 sps:$4 sm:$0xff]   ;;  %v15401_v40 = vld [vmem:[%s17758_s12 + $0x6a8] ss:$16 sps:$4 sm:$0xff]  }
 0x1ad   : > { %7018 = vmatprep.subr.bf16.mxu0 %v15316_v41  ;;  %7706 = vmatprep.subr.bf16.mxu1 %v15319_v42  ;;  %v15406_v41 = vld [vmem:[%s17758_s12 + $0x6c4] ss:$16 sps:$4 sm:$0xff]   ;;  %v15409_v42 = vld [vmem:[%s17758_s12 + $0x6cc] ss:$16 sps:$4 sm:$0xff]  }
 0x1b0   : > { %7019 = vmatpush1.bf16.msra.mxu0 %v15314_v43  ;;  %7707 = vmatpush1.bf16.msra.mxu1 %v15317_v44  ;;  %v15404_v43 = vld [vmem:[%s17758_s12 + $0x6c0] ss:$16 sps:$4 sm:$0xff]   ;;  %v15407_v44 = vld [vmem:[%s17758_s12 + $0x6c8] ss:$16 sps:$4 sm:$0xff]  }
 0x1b1   : > { %7020 = vmatprep.subr.bf16.mxu0 %v15322_v45  ;;  %7708 = vmatprep.subr.bf16.mxu1 %v15325_v46  ;;  %v15412_v45 = vld [vmem:[%s17758_s12 + $0x6e4] ss:$16 sps:$4 sm:$0xff]   ;;  %v15415_v46 = vld [vmem:[%s17758_s12 + $0x6ec] ss:$16 sps:$4 sm:$0xff]  }
 0x1b4   : > { %7021 = vmatpush1.bf16.msra.mxu0 %v15320_v47  ;;  %7709 = vmatpush1.bf16.msra.mxu1 %v15323_v48  ;;  %v15410_v47 = vld [vmem:[%s17758_s12 + $0x6e0] ss:$16 sps:$4 sm:$0xff]   ;;  %v15413_v48 = vld [vmem:[%s17758_s12 + $0x6e8] ss:$16 sps:$4 sm:$0xff]  }
 0x1b5   : > { %7022 = vmatprep.subr.bf16.mxu0 %v15328_v49  ;;  %7710 = vmatprep.subr.bf16.mxu1 %v15331_v50  ;;  %v15418_v49 = vld [vmem:[%s17758_s12 + $0x704] ss:$16 sps:$4 sm:$0xff]   ;;  %v15421_v50 = vld [vmem:[%s17758_s12 + $0x70c] ss:$16 sps:$4 sm:$0xff]  }
 0x1b8   : > { %7023 = vmatpush1.bf16.msra.mxu0 %v15326_v51  ;;  %7711 = vmatpush1.bf16.msra.mxu1 %v15329_v52  ;;  %v15416_v51 = vld [vmem:[%s17758_s12 + $0x700] ss:$16 sps:$4 sm:$0xff]   ;;  %v15419_v52 = vld [vmem:[%s17758_s12 + $0x708] ss:$16 sps:$4 sm:$0xff]  }
 0x1b9   : > { %7024 = vmatprep.subr.bf16.mxu0 %v15334_v53  ;;  %7712 = vmatprep.subr.bf16.mxu1 %v15337_v54  ;;  %v15424_v53 = vld [vmem:[%s17758_s12 + $0x724] ss:$16 sps:$4 sm:$0xff]   ;;  %v15427_v54 = vld [vmem:[%s17758_s12 + $0x72c] ss:$16 sps:$4 sm:$0xff]  }
 0x1bc   : > { %7025 = vmatpush1.bf16.msra.mxu0 %v15332_v55  ;;  %7713 = vmatpush1.bf16.msra.mxu1 %v15335_v56  ;;  %v15422_v55 = vld [vmem:[%s17758_s12 + $0x720] ss:$16 sps:$4 sm:$0xff]   ;;  %v15425_v56 = vld [vmem:[%s17758_s12 + $0x728] ss:$16 sps:$4 sm:$0xff]  }
 0x1bd   : > { %7026 = vmatprep.subr.bf16.mxu0 %v15340_v57  ;;  %7714 = vmatprep.subr.bf16.mxu1 %v15343_v58  ;;  %v15430_v57 = vld [vmem:[%s17758_s12 + $0x744] ss:$16 sps:$4 sm:$0xff]   ;;  %v15433_v58 = vld [vmem:[%s17758_s12 + $0x74c] ss:$16 sps:$4 sm:$0xff]  }
 0x1c0   : > { %7027 = vmatpush1.bf16.msra.mxu0 %v15338_v59  ;;  %7715 = vmatpush1.bf16.msra.mxu1 %v15341_v60  ;;  %v15428_v59 = vld [vmem:[%s17758_s12 + $0x740] ss:$16 sps:$4 sm:$0xff]   ;;  %v15431_v60 = vld [vmem:[%s17758_s12 + $0x748] ss:$16 sps:$4 sm:$0xff]  }
 0x1c1   : > { %7028 = vmatprep.subr.bf16.mxu0 %v15346_v61  ;;  %7716 = vmatprep.subr.bf16.mxu1 %v15349_v62  ;;  %v15436_v61 = vld [vmem:[%s17758_s12 + $0x764] ss:$16 sps:$4 sm:$0xff]   ;;  %v15439_v62 = vld [vmem:[%s17758_s12 + $0x76c] ss:$16 sps:$4 sm:$0xff]  }
 0x1c4   : > { %7029 = vmatpush1.bf16.msra.mxu0 %v15344_v63  ;;  %7717 = vmatpush1.bf16.msra.mxu1 %v15347_v0  ;;  %v15434_v63 = vld [vmem:[%s17758_s12 + $0x760] ss:$16 sps:$4 sm:$0xff]   ;;  %v15437_v0 = vld [vmem:[%s17758_s12 + $0x768] ss:$16 sps:$4 sm:$0xff]  }
 0x1c5   : > { %7030 = vmatprep.subr.bf16.mxu0 %v15352_v1  ;;  %7718 = vmatprep.subr.bf16.mxu1 %v15355_v2  ;;  %v15442_v1 = vld [vmem:[%s17758_s12 + $0x784] ss:$16 sps:$4 sm:$0xff]   ;;  %v15445_v2 = vld [vmem:[%s17758_s12 + $0x78c] ss:$16 sps:$4 sm:$0xff]  }
 0x1c8   : > { %7031 = vmatpush1.bf16.msra.mxu0 %v15350_v3  ;;  %7719 = vmatpush1.bf16.msra.mxu1 %v15353_v4  ;;  %v15440_v3 = vld [vmem:[%s17758_s12 + $0x780] ss:$16 sps:$4 sm:$0xff]   ;;  %v15443_v4 = vld [vmem:[%s17758_s12 + $0x788] ss:$16 sps:$4 sm:$0xff]  }
 0x1c9   : > { %7032 = vmatprep.subr.bf16.mxu0 %v15358_v5  ;;  %7720 = vmatprep.subr.bf16.mxu1 %v15361_v6  ;;  %v15448_v5 = vld [vmem:[%s17758_s12 + $0x7a4] ss:$16 sps:$4 sm:$0xff]   ;;  %v15451_v6 = vld [vmem:[%s17758_s12 + $0x7ac] ss:$16 sps:$4 sm:$0xff]  }
 0x1cc   : > { %7033 = vmatpush1.bf16.msra.mxu0 %v15356_v7  ;;  %7721 = vmatpush1.bf16.msra.mxu1 %v15359_v8  ;;  %v15446_v7 = vld [vmem:[%s17758_s12 + $0x7a0] ss:$16 sps:$4 sm:$0xff]   ;;  %v15449_v8 = vld [vmem:[%s17758_s12 + $0x7a8] ss:$16 sps:$4 sm:$0xff]  }
 0x1cd   : > { %7034 = vmatprep.subr.bf16.mxu0 %v15364_v9  ;;  %7722 = vmatprep.subr.bf16.mxu1 %v15367_v10  ;;  %v15454_v9 = vld [vmem:[%s17758_s12 + $0x7c4] ss:$16 sps:$4 sm:$0xff]   ;;  %v15457_v10 = vld [vmem:[%s17758_s12 + $0x7cc] ss:$16 sps:$4 sm:$0xff]  }
 0x1d0   : > { %7035 = vmatpush1.bf16.msra.mxu0 %v15362_v11  ;;  %7723 = vmatpush1.bf16.msra.mxu1 %v15365_v12  ;;  %v15452_v11 = vld [vmem:[%s17758_s12 + $0x7c0] ss:$16 sps:$4 sm:$0xff]   ;;  %v15455_v12 = vld [vmem:[%s17758_s12 + $0x7c8] ss:$16 sps:$4 sm:$0xff]  }
 0x1d1   : > { %7047 = vmatprep.subr.bf16.mxu0 %v15370_v13  ;;  %7735 = vmatprep.subr.bf16.mxu1 %v15373_v14  ;;  %v15460_v13 = vld [vmem:[%s17758_s12 + $0x7e4] ss:$16 sps:$4 sm:$0xff]   ;;  %v15463_v14 = vld [vmem:[%s17758_s12 + $0x7ec] ss:$16 sps:$4 sm:$0xff]  }
 0x1d3   : > { %7037 = vmatmul.mubr.bf16.vlgmr.msra.gmra.mrb[0].mxu0 %v13115_v19  ;;  %7725 = vmatmul.mubr.bf16.vlgmr.msra.gmra.mrb[0].mxu1 %v13115_v19  ;;  %v15466_v19 = vld [vmem:[%s17758_s12 + $0x804] ss:$16 sps:$4 sm:$0xff]  }
 0x1d4   : > { %7048 = vmatpush1.bf16.msra.mxu0 %v15368_v15  ;;  %7736 = vmatpush1.bf16.msra.mxu1 %v15371_v18  ;;  %v15458_v15 = vld [vmem:[%s17758_s12 + $0x7e0] ss:$16 sps:$4 sm:$0xff]   ;;  %v15461_v18 = vld [vmem:[%s17758_s12 + $0x7e8] ss:$16 sps:$4 sm:$0xff]  }
 0x1d5   : > { %7049 = vmatprep.subr.bf16.mxu0 %v15376_v22  ;;  %7737 = vmatprep.subr.bf16.mxu1 %v15379_v16  ;;  %v15469_v22 = vld [vmem:[%s17758_s12 + $0x80c] ss:$16 sps:$4 sm:$0xff]  }
 0x1d6   : > { %7079 = vmatprep.mubr.bf16.mxu0 %v13118_v17  ;;  %7767 = vmatprep.mubr.bf16.mxu1 %v13118_v17  ;;  %v18094_v16 = vld [vmem:[%s19473_s0 + $0x20] sm:$0xff]  ;;  %v13117_v17 = vcombine.low %v18020_v20, %v18025_v21 }
 0x1d7   : > { %v15470_v21 = vld [vmem:[%s17758_s12 + $0x820] ss:$16 sps:$4 sm:$0xff]  }
 0x1d8   : > { %7050 = vmatpush1.bf16.msra.mxu0 %v15374_v23  ;;  %7738 = vmatpush1.bf16.msra.mxu1 %v15377_v24  ;;  %v18101_v23 = vld [vmem:[%s19473_s0 + $0xa0] sm:$0xff] }
 0x1d9   : > { %7051 = vmatprep.subr.bf16.mxu0 %v15382_v25  ;;  %7739 = vmatprep.subr.bf16.mxu1 %v15385_v26  ;;  %v15464_v24 = vld [vmem:[%s17758_s12 + $0x800] ss:$16 sps:$4 sm:$0xff]   ;;  %v15467_v25 = vld [vmem:[%s17758_s12 + $0x808] ss:$16 sps:$4 sm:$0xff]   ;;  %v15472_v26 = vld [vmem:[%s17758_s12 + $0x824] ss:$16 sps:$4 sm:$0xff]   ;;  %v13120_v20 = vcombine.high %v18094_v16, %v18101_v23 }
 0x1dc   : > { %7052 = vmatpush1.bf16.msra.mxu0 %v15380_v27  ;;  %7740 = vmatpush1.bf16.msra.mxu1 %v15383_v28  ;;  %v15475_v27 = vld [vmem:[%s17758_s12 + $0x82c] ss:$16 sps:$4 sm:$0xff]   ;;  %v15473_v28 = vld [vmem:[%s17758_s12 + $0x828] ss:$16 sps:$4 sm:$0xff]  }
 0x1dd   : > { %7053 = vmatprep.subr.bf16.mxu0 %v15388_v29  ;;  %7741 = vmatprep.subr.bf16.mxu1 %v15391_v30  ;;  %v15478_v29 = vld [vmem:[%s17758_s12 + $0x844] ss:$16 sps:$4 sm:$0xff]   ;;  %v15481_v30 = vld [vmem:[%s17758_s12 + $0x84c] ss:$16 sps:$4 sm:$0xff]  }
 0x1e0   : > { %7054 = vmatpush1.bf16.msra.mxu0 %v15386_v31  ;;  %7742 = vmatpush1.bf16.msra.mxu1 %v15389_v32  ;;  %v15476_v31 = vld [vmem:[%s17758_s12 + $0x840] ss:$16 sps:$4 sm:$0xff]   ;;  %v15479_v32 = vld [vmem:[%s17758_s12 + $0x848] ss:$16 sps:$4 sm:$0xff]  }
 0x1e1   : > { %7055 = vmatprep.subr.bf16.mxu0 %v15394_v33  ;;  %7743 = vmatprep.subr.bf16.mxu1 %v15397_v34  ;;  %v15484_v33 = vld [vmem:[%s17758_s12 + $0x864] ss:$16 sps:$4 sm:$0xff]   ;;  %v15487_v34 = vld [vmem:[%s17758_s12 + $0x86c] ss:$16 sps:$4 sm:$0xff]  }
 0x1e4   : > { %7056 = vmatpush1.bf16.msra.mxu0 %v15392_v35  ;;  %7744 = vmatpush1.bf16.msra.mxu1 %v15395_v36  ;;  %v15482_v35 = vld [vmem:[%s17758_s12 + $0x860] ss:$16 sps:$4 sm:$0xff]   ;;  %v15485_v36 = vld [vmem:[%s17758_s12 + $0x868] ss:$16 sps:$4 sm:$0xff]  }
 0x1e5   : > { %7057 = vmatprep.subr.bf16.mxu0 %v15400_v37  ;;  %7745 = vmatprep.subr.bf16.mxu1 %v15403_v38  ;;  %v15490_v37 = vld [vmem:[%s17758_s12 + $0x884] ss:$16 sps:$4 sm:$0xff]   ;;  %v15493_v38 = vld [vmem:[%s17758_s12 + $0x88c] ss:$16 sps:$4 sm:$0xff]  }
 0x1e8   : > { %7058 = vmatpush1.bf16.msra.mxu0 %v15398_v39  ;;  %7746 = vmatpush1.bf16.msra.mxu1 %v15401_v40  ;;  %v15488_v39 = vld [vmem:[%s17758_s12 + $0x880] ss:$16 sps:$4 sm:$0xff]   ;;  %v15491_v40 = vld [vmem:[%s17758_s12 + $0x888] ss:$16 sps:$4 sm:$0xff]  }
 0x1e9   : > { %7059 = vmatprep.subr.bf16.mxu0 %v15406_v41  ;;  %7747 = vmatprep.subr.bf16.mxu1 %v15409_v42  ;;  %v15496_v41 = vld [vmem:[%s17758_s12 + $0x8a4] ss:$16 sps:$4 sm:$0xff]   ;;  %v15499_v42 = vld [vmem:[%s17758_s12 + $0x8ac] ss:$16 sps:$4 sm:$0xff]  }
 0x1ec   : > { %7060 = vmatpush1.bf16.msra.mxu0 %v15404_v43  ;;  %7748 = vmatpush1.bf16.msra.mxu1 %v15407_v44  ;;  %v15494_v43 = vld [vmem:[%s17758_s12 + $0x8a0] ss:$16 sps:$4 sm:$0xff]   ;;  %v15497_v44 = vld [vmem:[%s17758_s12 + $0x8a8] ss:$16 sps:$4 sm:$0xff]  }
 0x1ed   : > { %7061 = vmatprep.subr.bf16.mxu0 %v15412_v45  ;;  %7749 = vmatprep.subr.bf16.mxu1 %v15415_v46  ;;  %v15502_v45 = vld [vmem:[%s17758_s12 + $0x8c4] ss:$16 sps:$4 sm:$0xff]   ;;  %v15505_v46 = vld [vmem:[%s17758_s12 + $0x8cc] ss:$16 sps:$4 sm:$0xff]  }
 0x1f0   : > { %7062 = vmatpush1.bf16.msra.mxu0 %v15410_v47  ;;  %7750 = vmatpush1.bf16.msra.mxu1 %v15413_v48  ;;  %v15500_v47 = vld [vmem:[%s17758_s12 + $0x8c0] ss:$16 sps:$4 sm:$0xff]   ;;  %v15503_v48 = vld [vmem:[%s17758_s12 + $0x8c8] ss:$16 sps:$4 sm:$0xff]  }
 0x1f1   : > { %7063 = vmatprep.subr.bf16.mxu0 %v15418_v49  ;;  %7751 = vmatprep.subr.bf16.mxu1 %v15421_v50  ;;  %v15508_v49 = vld [vmem:[%s17758_s12 + $0x8e4] ss:$16 sps:$4 sm:$0xff]   ;;  %v15511_v50 = vld [vmem:[%s17758_s12 + $0x8ec] ss:$16 sps:$4 sm:$0xff]  }
 0x1f4   : > { %7064 = vmatpush1.bf16.msra.mxu0 %v15416_v51  ;;  %7752 = vmatpush1.bf16.msra.mxu1 %v15419_v52  ;;  %v15506_v51 = vld [vmem:[%s17758_s12 + $0x8e0] ss:$16 sps:$4 sm:$0xff]   ;;  %v15509_v52 = vld [vmem:[%s17758_s12 + $0x8e8] ss:$16 sps:$4 sm:$0xff]  }
 0x1f5   : > { %7065 = vmatprep.subr.bf16.mxu0 %v15424_v53  ;;  %7753 = vmatprep.subr.bf16.mxu1 %v15427_v54  ;;  %v15514_v53 = vld [vmem:[%s17758_s12 + $0x904] ss:$16 sps:$4 sm:$0xff]   ;;  %v15517_v54 = vld [vmem:[%s17758_s12 + $0x90c] ss:$16 sps:$4 sm:$0xff]  }
 0x1f8   : > { %7066 = vmatpush1.bf16.msra.mxu0 %v15422_v55  ;;  %7754 = vmatpush1.bf16.msra.mxu1 %v15425_v56  ;;  %v15512_v55 = vld [vmem:[%s17758_s12 + $0x900] ss:$16 sps:$4 sm:$0xff]   ;;  %v15515_v56 = vld [vmem:[%s17758_s12 + $0x908] ss:$16 sps:$4 sm:$0xff]  }
 0x1f9   : > { %7067 = vmatprep.subr.bf16.mxu0 %v15430_v57  ;;  %7755 = vmatprep.subr.bf16.mxu1 %v15433_v58  ;;  %v15520_v57 = vld [vmem:[%s17758_s12 + $0x924] ss:$16 sps:$4 sm:$0xff]   ;;  %v15523_v58 = vld [vmem:[%s17758_s12 + $0x92c] ss:$16 sps:$4 sm:$0xff]  }
 0x1fc   : > { %7068 = vmatpush1.bf16.msra.mxu0 %v15428_v59  ;;  %7756 = vmatpush1.bf16.msra.mxu1 %v15431_v60  ;;  %v15518_v59 = vld [vmem:[%s17758_s12 + $0x920] ss:$16 sps:$4 sm:$0xff]   ;;  %v15521_v60 = vld [vmem:[%s17758_s12 + $0x928] ss:$16 sps:$4 sm:$0xff]  }
 0x1fd   : > { %7069 = vmatprep.subr.bf16.mxu0 %v15436_v61  ;;  %7757 = vmatprep.subr.bf16.mxu1 %v15439_v62  ;;  %v15526_v61 = vld [vmem:[%s17758_s12 + $0x944] ss:$16 sps:$4 sm:$0xff]   ;;  %v15529_v62 = vld [vmem:[%s17758_s12 + $0x94c] ss:$16 sps:$4 sm:$0xff]  }
 0x200   : > { %7070 = vmatpush1.bf16.msra.mxu0 %v15434_v63  ;;  %7758 = vmatpush1.bf16.msra.mxu1 %v15437_v0  ;;  %v15524_v63 = vld [vmem:[%s17758_s12 + $0x940] ss:$16 sps:$4 sm:$0xff]   ;;  %v15527_v0 = vld [vmem:[%s17758_s12 + $0x948] ss:$16 sps:$4 sm:$0xff]  }
 0x201   : > { %7071 = vmatprep.subr.bf16.mxu0 %v15442_v1  ;;  %7759 = vmatprep.subr.bf16.mxu1 %v15445_v2  ;;  %v15532_v1 = vld [vmem:[%s17758_s12 + $0x964] ss:$16 sps:$4 sm:$0xff]   ;;  %v15535_v2 = vld [vmem:[%s17758_s12 + $0x96c] ss:$16 sps:$4 sm:$0xff]  }
 0x204   : > { %7072 = vmatpush1.bf16.msra.mxu0 %v15440_v3  ;;  %7760 = vmatpush1.bf16.msra.mxu1 %v15443_v4  ;;  %v15530_v3 = vld [vmem:[%s17758_s12 + $0x960] ss:$16 sps:$4 sm:$0xff]   ;;  %v15533_v4 = vld [vmem:[%s17758_s12 + $0x968] ss:$16 sps:$4 sm:$0xff]  }
 0x205   : > { %7073 = vmatprep.subr.bf16.mxu0 %v15448_v5  ;;  %7761 = vmatprep.subr.bf16.mxu1 %v15451_v6  ;;  %v15538_v5 = vld [vmem:[%s17758_s12 + $0x984] ss:$16 sps:$4 sm:$0xff]   ;;  %v15541_v6 = vld [vmem:[%s17758_s12 + $0x98c] ss:$16 sps:$4 sm:$0xff]  }
 0x208   : > { %7074 = vmatpush1.bf16.msra.mxu0 %v15446_v7  ;;  %7762 = vmatpush1.bf16.msra.mxu1 %v15449_v8  ;;  %v15536_v7 = vld [vmem:[%s17758_s12 + $0x980] ss:$16 sps:$4 sm:$0xff]   ;;  %v15539_v8 = vld [vmem:[%s17758_s12 + $0x988] ss:$16 sps:$4 sm:$0xff]  }
 0x209   : > { %7075 = vmatprep.subr.bf16.mxu0 %v15454_v9  ;;  %7763 = vmatprep.subr.bf16.mxu1 %v15457_v10  ;;  %v15544_v9 = vld [vmem:[%s17758_s12 + $0x9a4] ss:$16 sps:$4 sm:$0xff]   ;;  %v15547_v10 = vld [vmem:[%s17758_s12 + $0x9ac] ss:$16 sps:$4 sm:$0xff]  }
 0x20c   : > { %7076 = vmatpush1.bf16.msra.mxu0 %v15452_v11  ;;  %7764 = vmatpush1.bf16.msra.mxu1 %v15455_v12  ;;  %v15542_v11 = vld [vmem:[%s17758_s12 + $0x9a0] ss:$16 sps:$4 sm:$0xff]   ;;  %v15545_v12 = vld [vmem:[%s17758_s12 + $0x9a8] ss:$16 sps:$4 sm:$0xff]  }
 0x20d   : > { %7077 = vmatprep.subr.bf16.mxu0 %v15460_v13  ;;  %7765 = vmatprep.subr.bf16.mxu1 %v15463_v14  ;;  %v15550_v13 = vld [vmem:[%s17758_s12 + $0x9c4] ss:$16 sps:$4 sm:$0xff]   ;;  %v15553_v14 = vld [vmem:[%s17758_s12 + $0x9cc] ss:$16 sps:$4 sm:$0xff]  }
 0x210   : > { %7078 = vmatpush1.bf16.msra.mxu0 %v15458_v15  ;;  %7766 = vmatpush1.bf16.msra.mxu1 %v15461_v18  ;;  %v15548_v15 = vld [vmem:[%s17758_s12 + $0x9c0] ss:$16 sps:$4 sm:$0xff]   ;;  %v15551_v18 = vld [vmem:[%s17758_s12 + $0x9c8] ss:$16 sps:$4 sm:$0xff]  }
 0x211   : > { %7090 = vmatprep.subr.bf16.mxu0 %v15466_v19  ;;  %7778 = vmatprep.subr.bf16.mxu1 %v15469_v22  ;;  %v15556_v19 = vld [vmem:[%s17758_s12 + $0x9e4] ss:$16 sps:$4 sm:$0xff]   ;;  %v15559_v22 = vld [vmem:[%s17758_s12 + $0x9ec] ss:$16 sps:$4 sm:$0xff]  }
 0x213   : > { %7080 = vmatmul.mubr.bf16.vlgmr.msra.gmra.mrb[0].mxu0 %v13117_v17  ;;  %7768 = vmatmul.mubr.bf16.vlgmr.msra.gmra.mrb[0].mxu1 %v13117_v17  ;;  %v15554_v17 = vld [vmem:[%s17758_s12 + $0x9e0] ss:$16 sps:$4 sm:$0xff]  }
 0x214   : > { %7091 = vmatpush1.bf16.msra.mxu0 %v15464_v24  ;;  %7779 = vmatpush1.bf16.msra.mxu1 %v15467_v25  ;;  %v15557_v24 = vld [vmem:[%s17758_s12 + $0x9e8] ss:$16 sps:$4 sm:$0xff]   ;;  %v15562_v25 = vld [vmem:[%s17758_s12 + $0xa04] ss:$16 sps:$4 sm:$0xff]  }
 0x215   : > { %7092 = vmatprep.subr.bf16.mxu0 %v15472_v26  ;;  %7780 = vmatprep.subr.bf16.mxu1 %v15475_v27  ;;  %v15565_v26 = vld [vmem:[%s17758_s12 + $0xa0c] ss:$16 sps:$4 sm:$0xff]  }
 0x216   : > { %7122 = vmatprep.mubr.bf16.mxu0 %v13120_v20  ;;  %7810 = vmatprep.mubr.bf16.mxu1 %v13120_v20  ;;  %v18172_v27 = vld [vmem:[%s19473_s0 + $0x28] sm:$0xff] }
 0x217   : > { %v18177_v20 = vld [vmem:[%s19473_s0 + $0xa8] sm:$0xff] }
 0x218   : > { %7093 = vmatpush1.bf16.msra.mxu0 %v15470_v21  ;;  %7781 = vmatpush1.bf16.msra.mxu1 %v15473_v28  ;;  %v13119_v21 = vcombine.low %v18094_v16, %v18101_v23  ;;  %v15560_v28 = vld [vmem:[%s17758_s12 + $0xa00] ss:$16 sps:$4 sm:$0xff]   ;;  %v15569_v23 = vld [vmem:[%s17758_s12 + $0xa28] ss:$16 sps:$4 sm:$0xff]  }
 0x219   : > { %7094 = vmatprep.subr.bf16.mxu0 %v15478_v29  ;;  %7782 = vmatprep.subr.bf16.mxu1 %v15481_v30  ;;  %v15563_v29 = vld [vmem:[%s17758_s12 + $0xa08] ss:$16 sps:$4 sm:$0xff]   ;;  %v15568_v30 = vld [vmem:[%s17758_s12 + $0xa24] ss:$16 sps:$4 sm:$0xff]   ;;  %v15566_v16 = vld [vmem:[%s17758_s12 + $0xa20] ss:$16 sps:$4 sm:$0xff]  }
 0x21c   : > { %7095 = vmatpush1.bf16.msra.mxu0 %v15476_v31  ;;  %7783 = vmatpush1.bf16.msra.mxu1 %v15479_v32  ;;  %v15571_v31 = vld [vmem:[%s17758_s12 + $0xa2c] ss:$16 sps:$4 sm:$0xff]   ;;  %v13122_v32 = vcombine.high %v18172_v27, %v18177_v20 }
 0x21d   : > { %7096 = vmatprep.subr.bf16.mxu0 %v15484_v33  ;;  %7784 = vmatprep.subr.bf16.mxu1 %v15487_v34  ;;  %v15574_v33 = vld [vmem:[%s17758_s12 + $0xa44] ss:$16 sps:$4 sm:$0xff]   ;;  %v15577_v34 = vld [vmem:[%s17758_s12 + $0xa4c] ss:$16 sps:$4 sm:$0xff]  }
 0x220   : > { %7097 = vmatpush1.bf16.msra.mxu0 %v15482_v35  ;;  %7785 = vmatpush1.bf16.msra.mxu1 %v15485_v36  ;;  %v15572_v35 = vld [vmem:[%s17758_s12 + $0xa40] ss:$16 sps:$4 sm:$0xff]   ;;  %v15575_v36 = vld [vmem:[%s17758_s12 + $0xa48] ss:$16 sps:$4 sm:$0xff]  }
 0x221   : > { %7098 = vmatprep.subr.bf16.mxu0 %v15490_v37  ;;  %7786 = vmatprep.subr.bf16.mxu1 %v15493_v38  ;;  %v15580_v37 = vld [vmem:[%s17758_s12 + $0xa64] ss:$16 sps:$4 sm:$0xff]   ;;  %v15583_v38 = vld [vmem:[%s17758_s12 + $0xa6c] ss:$16 sps:$4 sm:$0xff]  }
 0x224   : > { %7099 = vmatpush1.bf16.msra.mxu0 %v15488_v39  ;;  %7787 = vmatpush1.bf16.msra.mxu1 %v15491_v40  ;;  %v15578_v39 = vld [vmem:[%s17758_s12 + $0xa60] ss:$16 sps:$4 sm:$0xff]   ;;  %v15581_v40 = vld [vmem:[%s17758_s12 + $0xa68] ss:$16 sps:$4 sm:$0xff]  }
 0x225   : > { %7100 = vmatprep.subr.bf16.mxu0 %v15496_v41  ;;  %7788 = vmatprep.subr.bf16.mxu1 %v15499_v42  ;;  %v15586_v41 = vld [vmem:[%s17758_s12 + $0xa84] ss:$16 sps:$4 sm:$0xff]   ;;  %v15589_v42 = vld [vmem:[%s17758_s12 + $0xa8c] ss:$16 sps:$4 sm:$0xff]  }
 0x228   : > { %7101 = vmatpush1.bf16.msra.mxu0 %v15494_v43  ;;  %7789 = vmatpush1.bf16.msra.mxu1 %v15497_v44  ;;  %v15584_v43 = vld [vmem:[%s17758_s12 + $0xa80] ss:$16 sps:$4 sm:$0xff]   ;;  %v15587_v44 = vld [vmem:[%s17758_s12 + $0xa88] ss:$16 sps:$4 sm:$0xff]  }
 0x229   : > { %7102 = vmatprep.subr.bf16.mxu0 %v15502_v45  ;;  %7790 = vmatprep.subr.bf16.mxu1 %v15505_v46  ;;  %v15592_v45 = vld [vmem:[%s17758_s12 + $0xaa4] ss:$16 sps:$4 sm:$0xff]   ;;  %v15595_v46 = vld [vmem:[%s17758_s12 + $0xaac] ss:$16 sps:$4 sm:$0xff]  }
 0x22c   : > { %7103 = vmatpush1.bf16.msra.mxu0 %v15500_v47  ;;  %7791 = vmatpush1.bf16.msra.mxu1 %v15503_v48  ;;  %v15590_v47 = vld [vmem:[%s17758_s12 + $0xaa0] ss:$16 sps:$4 sm:$0xff]   ;;  %v15593_v48 = vld [vmem:[%s17758_s12 + $0xaa8] ss:$16 sps:$4 sm:$0xff]  }
 0x22d   : > { %7104 = vmatprep.subr.bf16.mxu0 %v15508_v49  ;;  %7792 = vmatprep.subr.bf16.mxu1 %v15511_v50  ;;  %v15598_v49 = vld [vmem:[%s17758_s12 + $0xac4] ss:$16 sps:$4 sm:$0xff]   ;;  %v15601_v50 = vld [vmem:[%s17758_s12 + $0xacc] ss:$16 sps:$4 sm:$0xff]  }
 0x230   : > { %7105 = vmatpush1.bf16.msra.mxu0 %v15506_v51  ;;  %7793 = vmatpush1.bf16.msra.mxu1 %v15509_v52  ;;  %v15596_v51 = vld [vmem:[%s17758_s12 + $0xac0] ss:$16 sps:$4 sm:$0xff]   ;;  %v15599_v52 = vld [vmem:[%s17758_s12 + $0xac8] ss:$16 sps:$4 sm:$0xff]  }
 0x231   : > { %7106 = vmatprep.subr.bf16.mxu0 %v15514_v53  ;;  %7794 = vmatprep.subr.bf16.mxu1 %v15517_v54  ;;  %v15604_v53 = vld [vmem:[%s17758_s12 + $0xae4] ss:$16 sps:$4 sm:$0xff]   ;;  %v15607_v54 = vld [vmem:[%s17758_s12 + $0xaec] ss:$16 sps:$4 sm:$0xff]  }
 0x234   : > { %7107 = vmatpush1.bf16.msra.mxu0 %v15512_v55  ;;  %7795 = vmatpush1.bf16.msra.mxu1 %v15515_v56  ;;  %v15602_v55 = vld [vmem:[%s17758_s12 + $0xae0] ss:$16 sps:$4 sm:$0xff]   ;;  %v15605_v56 = vld [vmem:[%s17758_s12 + $0xae8] ss:$16 sps:$4 sm:$0xff]  }
 0x235   : > { %7108 = vmatprep.subr.bf16.mxu0 %v15520_v57  ;;  %7796 = vmatprep.subr.bf16.mxu1 %v15523_v58  ;;  %v15610_v57 = vld [vmem:[%s17758_s12 + $0xb04] ss:$16 sps:$4 sm:$0xff]   ;;  %v15613_v58 = vld [vmem:[%s17758_s12 + $0xb0c] ss:$16 sps:$4 sm:$0xff]  }
 0x238   : > { %7109 = vmatpush1.bf16.msra.mxu0 %v15518_v59  ;;  %7797 = vmatpush1.bf16.msra.mxu1 %v15521_v60  ;;  %v15608_v59 = vld [vmem:[%s17758_s12 + $0xb00] ss:$16 sps:$4 sm:$0xff]   ;;  %v15611_v60 = vld [vmem:[%s17758_s12 + $0xb08] ss:$16 sps:$4 sm:$0xff]  }
 0x239   : > { %7110 = vmatprep.subr.bf16.mxu0 %v15526_v61  ;;  %7798 = vmatprep.subr.bf16.mxu1 %v15529_v62  ;;  %v15616_v61 = vld [vmem:[%s17758_s12 + $0xb24] ss:$16 sps:$4 sm:$0xff]   ;;  %v15619_v62 = vld [vmem:[%s17758_s12 + $0xb2c] ss:$16 sps:$4 sm:$0xff]  }
 0x23c   : > { %7111 = vmatpush1.bf16.msra.mxu0 %v15524_v63  ;;  %7799 = vmatpush1.bf16.msra.mxu1 %v15527_v0  ;;  %v15614_v63 = vld [vmem:[%s17758_s12 + $0xb20] ss:$16 sps:$4 sm:$0xff]   ;;  %v15617_v0 = vld [vmem:[%s17758_s12 + $0xb28] ss:$16 sps:$4 sm:$0xff]  }
 0x23d   : > { %7112 = vmatprep.subr.bf16.mxu0 %v15532_v1  ;;  %7800 = vmatprep.subr.bf16.mxu1 %v15535_v2  ;;  %v15622_v1 = vld [vmem:[%s17758_s12 + $0xb44] ss:$16 sps:$4 sm:$0xff]   ;;  %v15625_v2 = vld [vmem:[%s17758_s12 + $0xb4c] ss:$16 sps:$4 sm:$0xff]  }
 0x240   : > { %7113 = vmatpush1.bf16.msra.mxu0 %v15530_v3  ;;  %7801 = vmatpush1.bf16.msra.mxu1 %v15533_v4  ;;  %v15620_v3 = vld [vmem:[%s17758_s12 + $0xb40] ss:$16 sps:$4 sm:$0xff]   ;;  %v15623_v4 = vld [vmem:[%s17758_s12 + $0xb48] ss:$16 sps:$4 sm:$0xff]  }
 0x241   : > { %7114 = vmatprep.subr.bf16.mxu0 %v15538_v5  ;;  %7802 = vmatprep.subr.bf16.mxu1 %v15541_v6  ;;  %v15628_v5 = vld [vmem:[%s17758_s12 + $0xb64] ss:$16 sps:$4 sm:$0xff]   ;;  %v15631_v6 = vld [vmem:[%s17758_s12 + $0xb6c] ss:$16 sps:$4 sm:$0xff]  }
 0x244   : > { %7115 = vmatpush1.bf16.msra.mxu0 %v15536_v7  ;;  %7803 = vmatpush1.bf16.msra.mxu1 %v15539_v8  ;;  %v15626_v7 = vld [vmem:[%s17758_s12 + $0xb60] ss:$16 sps:$4 sm:$0xff]   ;;  %v15629_v8 = vld [vmem:[%s17758_s12 + $0xb68] ss:$16 sps:$4 sm:$0xff]  }
 0x245   : > { %7116 = vmatprep.subr.bf16.mxu0 %v15544_v9  ;;  %7804 = vmatprep.subr.bf16.mxu1 %v15547_v10  ;;  %v15634_v9 = vld [vmem:[%s17758_s12 + $0xb84] ss:$16 sps:$4 sm:$0xff]   ;;  %v15637_v10 = vld [vmem:[%s17758_s12 + $0xb8c] ss:$16 sps:$4 sm:$0xff]  }
 0x248   : > { %7117 = vmatpush1.bf16.msra.mxu0 %v15542_v11  ;;  %7805 = vmatpush1.bf16.msra.mxu1 %v15545_v12  ;;  %v15632_v11 = vld [vmem:[%s17758_s12 + $0xb80] ss:$16 sps:$4 sm:$0xff]   ;;  %v15635_v12 = vld [vmem:[%s17758_s12 + $0xb88] ss:$16 sps:$4 sm:$0xff]  }
 0x249   : > { %7118 = vmatprep.subr.bf16.mxu0 %v15550_v13  ;;  %7806 = vmatprep.subr.bf16.mxu1 %v15553_v14  ;;  %v15640_v13 = vld [vmem:[%s17758_s12 + $0xba4] ss:$16 sps:$4 sm:$0xff]   ;;  %v15643_v14 = vld [vmem:[%s17758_s12 + $0xbac] ss:$16 sps:$4 sm:$0xff]  }
 0x24c   : > { %7119 = vmatpush1.bf16.msra.mxu0 %v15548_v15  ;;  %7807 = vmatpush1.bf16.msra.mxu1 %v15551_v18  ;;  %v15638_v15 = vld [vmem:[%s17758_s12 + $0xba0] ss:$16 sps:$4 sm:$0xff]   ;;  %v15641_v18 = vld [vmem:[%s17758_s12 + $0xba8] ss:$16 sps:$4 sm:$0xff]  }
 0x24d   : > { %7120 = vmatprep.subr.bf16.mxu0 %v15556_v19  ;;  %7808 = vmatprep.subr.bf16.mxu1 %v15559_v22  ;;  %v15646_v19 = vld [vmem:[%s17758_s12 + $0xbc4] ss:$16 sps:$4 sm:$0xff]   ;;  %v15649_v22 = vld [vmem:[%s17758_s12 + $0xbcc] ss:$16 sps:$4 sm:$0xff]  }
 0x250   : > { %7121 = vmatpush1.bf16.msra.mxu0 %v15554_v17  ;;  %7809 = vmatpush1.bf16.msra.mxu1 %v15557_v24  ;;  %v15644_v17 = vld [vmem:[%s17758_s12 + $0xbc0] ss:$16 sps:$4 sm:$0xff]   ;;  %v15647_v24 = vld [vmem:[%s17758_s12 + $0xbc8] ss:$16 sps:$4 sm:$0xff]  }
 0x251   : > { %7133 = vmatprep.subr.bf16.mxu0 %v15562_v25  ;;  %7821 = vmatprep.subr.bf16.mxu1 %v15565_v26  ;;  %v15652_v25 = vld [vmem:[%s17758_s12 + $0xbe4] ss:$16 sps:$4 sm:$0xff]   ;;  %v15655_v26 = vld [vmem:[%s17758_s12 + $0xbec] ss:$16 sps:$4 sm:$0xff]  }
 0x253   : > { %7123 = vmatmul.mubr.bf16.vlgmr.msra.gmra.mrb[0].mxu0 %v13119_v21  ;;  %7811 = vmatmul.mubr.bf16.vlgmr.msra.gmra.mrb[0].mxu1 %v13119_v21  ;;  %v15650_v21 = vld [vmem:[%s17758_s12 + $0xbe0] ss:$16 sps:$4 sm:$0xff]  }
 0x254   : > { %7134 = vmatpush1.bf16.msra.mxu0 %v15560_v28  ;;  %7822 = vmatpush1.bf16.msra.mxu1 %v15563_v29  ;;  %v15653_v28 = vld [vmem:[%s17758_s12 + $0xbe8] ss:$16 sps:$4 sm:$0xff]   ;;  %v15658_v29 = vld [vmem:[%s17758_s12 + $0xc04] ss:$16 sps:$4 sm:$0xff]  }
 0x255   : > { %7135 = vmatprep.subr.bf16.mxu0 %v15568_v30  ;;  %7823 = vmatprep.subr.bf16.mxu1 %v15571_v31  ;;  %v15661_v30 = vld [vmem:[%s17758_s12 + $0xc0c] ss:$16 sps:$4 sm:$0xff]  }
 0x256   : > { %7165 = vmatprep.mubr.bf16.mxu0 %v13122_v32  ;;  %7853 = vmatprep.mubr.bf16.mxu1 %v13122_v32  ;;  %v18250_v31 = vld [vmem:[%s19473_s0 + $0x30] sm:$0xff] }
 0x257   : > { %v18255_v32 = vld [vmem:[%s19473_s0 + $0xb0] sm:$0xff] }
 0x258   : > { %7136 = vmatpush1.bf16.msra.mxu0 %v15566_v16  ;;  %7824 = vmatpush1.bf16.msra.mxu1 %v15569_v23  ;;  %v13121_v16 = vcombine.low %v18172_v27, %v18177_v20  ;;  %v15656_v23 = vld [vmem:[%s17758_s12 + $0xc00] ss:$16 sps:$4 sm:$0xff]   ;;  %v15665_v20 = vld [vmem:[%s17758_s12 + $0xc28] ss:$16 sps:$4 sm:$0xff]  }
 0x259   : > { %7137 = vmatprep.subr.bf16.mxu0 %v15574_v33  ;;  %7825 = vmatprep.subr.bf16.mxu1 %v15577_v34  ;;  %v15659_v33 = vld [vmem:[%s17758_s12 + $0xc08] ss:$16 sps:$4 sm:$0xff]   ;;  %v15664_v34 = vld [vmem:[%s17758_s12 + $0xc24] ss:$16 sps:$4 sm:$0xff]   ;;  %v15662_v27 = vld [vmem:[%s17758_s12 + $0xc20] ss:$16 sps:$4 sm:$0xff]  }
 0x25c   : > { %7138 = vmatpush1.bf16.msra.mxu0 %v15572_v35  ;;  %7826 = vmatpush1.bf16.msra.mxu1 %v15575_v36  ;;  %v15667_v35 = vld [vmem:[%s17758_s12 + $0xc2c] ss:$16 sps:$4 sm:$0xff]   ;;  %v13124_v36 = vcombine.high %v18250_v31, %v18255_v32 }
 0x25d   : > { %7139 = vmatprep.subr.bf16.mxu0 %v15580_v37  ;;  %7827 = vmatprep.subr.bf16.mxu1 %v15583_v38  ;;  %v15670_v37 = vld [vmem:[%s17758_s12 + $0xc44] ss:$16 sps:$4 sm:$0xff]   ;;  %v15673_v38 = vld [vmem:[%s17758_s12 + $0xc4c] ss:$16 sps:$4 sm:$0xff]  }
 0x260   : > { %7140 = vmatpush1.bf16.msra.mxu0 %v15578_v39  ;;  %7828 = vmatpush1.bf16.msra.mxu1 %v15581_v40  ;;  %v15668_v39 = vld [vmem:[%s17758_s12 + $0xc40] ss:$16 sps:$4 sm:$0xff]   ;;  %v15671_v40 = vld [vmem:[%s17758_s12 + $0xc48] ss:$16 sps:$4 sm:$0xff]  }
 0x261   : > { %7141 = vmatprep.subr.bf16.mxu0 %v15586_v41  ;;  %7829 = vmatprep.subr.bf16.mxu1 %v15589_v42  ;;  %v15676_v41 = vld [vmem:[%s17758_s12 + $0xc64] ss:$16 sps:$4 sm:$0xff]   ;;  %v15679_v42 = vld [vmem:[%s17758_s12 + $0xc6c] ss:$16 sps:$4 sm:$0xff]  }
 0x264   : > { %7142 = vmatpush1.bf16.msra.mxu0 %v15584_v43  ;;  %7830 = vmatpush1.bf16.msra.mxu1 %v15587_v44  ;;  %v15674_v43 = vld [vmem:[%s17758_s12 + $0xc60] ss:$16 sps:$4 sm:$0xff]   ;;  %v15677_v44 = vld [vmem:[%s17758_s12 + $0xc68] ss:$16 sps:$4 sm:$0xff]  }
 0x265   : > { %7143 = vmatprep.subr.bf16.mxu0 %v15592_v45  ;;  %7831 = vmatprep.subr.bf16.mxu1 %v15595_v46  ;;  %v15682_v45 = vld [vmem:[%s17758_s12 + $0xc84] ss:$16 sps:$4 sm:$0xff]   ;;  %v15685_v46 = vld [vmem:[%s17758_s12 + $0xc8c] ss:$16 sps:$4 sm:$0xff]  }
 0x268   : > { %7144 = vmatpush1.bf16.msra.mxu0 %v15590_v47  ;;  %7832 = vmatpush1.bf16.msra.mxu1 %v15593_v48  ;;  %v15680_v47 = vld [vmem:[%s17758_s12 + $0xc80] ss:$16 sps:$4 sm:$0xff]   ;;  %v15683_v48 = vld [vmem:[%s17758_s12 + $0xc88] ss:$16 sps:$4 sm:$0xff]  }
 0x269   : > { %7145 = vmatprep.subr.bf16.mxu0 %v15598_v49  ;;  %7833 = vmatprep.subr.bf16.mxu1 %v15601_v50  ;;  %v15688_v49 = vld [vmem:[%s17758_s12 + $0xca4] ss:$16 sps:$4 sm:$0xff]   ;;  %v15691_v50 = vld [vmem:[%s17758_s12 + $0xcac] ss:$16 sps:$4 sm:$0xff]  }
 0x26c   : > { %7146 = vmatpush1.bf16.msra.mxu0 %v15596_v51  ;;  %7834 = vmatpush1.bf16.msra.mxu1 %v15599_v52  ;;  %v15686_v51 = vld [vmem:[%s17758_s12 + $0xca0] ss:$16 sps:$4 sm:$0xff]   ;;  %v15689_v52 = vld [vmem:[%s17758_s12 + $0xca8] ss:$16 sps:$4 sm:$0xff]  }
 0x26d   : > { %7147 = vmatprep.subr.bf16.mxu0 %v15604_v53  ;;  %7835 = vmatprep.subr.bf16.mxu1 %v15607_v54  ;;  %v15694_v53 = vld [vmem:[%s17758_s12 + $0xcc4] ss:$16 sps:$4 sm:$0xff]   ;;  %v15697_v54 = vld [vmem:[%s17758_s12 + $0xccc] ss:$16 sps:$4 sm:$0xff]  }
 0x270   : > { %7148 = vmatpush1.bf16.msra.mxu0 %v15602_v55  ;;  %7836 = vmatpush1.bf16.msra.mxu1 %v15605_v56  ;;  %v15692_v55 = vld [vmem:[%s17758_s12 + $0xcc0] ss:$16 sps:$4 sm:$0xff]   ;;  %v15695_v56 = vld [vmem:[%s17758_s12 + $0xcc8] ss:$16 sps:$4 sm:$0xff]  }
 0x271   : > { %7149 = vmatprep.subr.bf16.mxu0 %v15610_v57  ;;  %7837 = vmatprep.subr.bf16.mxu1 %v15613_v58  ;;  %v15700_v57 = vld [vmem:[%s17758_s12 + $0xce4] ss:$16 sps:$4 sm:$0xff]   ;;  %v15703_v58 = vld [vmem:[%s17758_s12 + $0xcec] ss:$16 sps:$4 sm:$0xff]  }
 0x274   : > { %7150 = vmatpush1.bf16.msra.mxu0 %v15608_v59  ;;  %7838 = vmatpush1.bf16.msra.mxu1 %v15611_v60  ;;  %v15698_v59 = vld [vmem:[%s17758_s12 + $0xce0] ss:$16 sps:$4 sm:$0xff]   ;;  %v15701_v60 = vld [vmem:[%s17758_s12 + $0xce8] ss:$16 sps:$4 sm:$0xff]  }
 0x275   : > { %7151 = vmatprep.subr.bf16.mxu0 %v15616_v61  ;;  %7839 = vmatprep.subr.bf16.mxu1 %v15619_v62  ;;  %v15706_v61 = vld [vmem:[%s17758_s12 + $0xd04] ss:$16 sps:$4 sm:$0xff]   ;;  %v15709_v62 = vld [vmem:[%s17758_s12 + $0xd0c] ss:$16 sps:$4 sm:$0xff]  }
 0x278   : > { %7152 = vmatpush1.bf16.msra.mxu0 %v15614_v63  ;;  %7840 = vmatpush1.bf16.msra.mxu1 %v15617_v0  ;;  %v15704_v63 = vld [vmem:[%s17758_s12 + $0xd00] ss:$16 sps:$4 sm:$0xff]   ;;  %v15707_v0 = vld [vmem:[%s17758_s12 + $0xd08] ss:$16 sps:$4 sm:$0xff]  }
 0x279   : > { %7153 = vmatprep.subr.bf16.mxu0 %v15622_v1  ;;  %7841 = vmatprep.subr.bf16.mxu1 %v15625_v2  ;;  %v15712_v1 = vld [vmem:[%s17758_s12 + $0xd24] ss:$16 sps:$4 sm:$0xff]   ;;  %v15715_v2 = vld [vmem:[%s17758_s12 + $0xd2c] ss:$16 sps:$4 sm:$0xff]  }
 0x27c   : > { %7154 = vmatpush1.bf16.msra.mxu0 %v15620_v3  ;;  %7842 = vmatpush1.bf16.msra.mxu1 %v15623_v4  ;;  %v15710_v3 = vld [vmem:[%s17758_s12 + $0xd20] ss:$16 sps:$4 sm:$0xff]   ;;  %v15713_v4 = vld [vmem:[%s17758_s12 + $0xd28] ss:$16 sps:$4 sm:$0xff]  }
 0x27d   : > { %7155 = vmatprep.subr.bf16.mxu0 %v15628_v5  ;;  %7843 = vmatprep.subr.bf16.mxu1 %v15631_v6  ;;  %v15718_v5 = vld [vmem:[%s17758_s12 + $0xd44] ss:$16 sps:$4 sm:$0xff]   ;;  %v15721_v6 = vld [vmem:[%s17758_s12 + $0xd4c] ss:$16 sps:$4 sm:$0xff]  }
 0x280   : > { %7156 = vmatpush1.bf16.msra.mxu0 %v15626_v7  ;;  %7844 = vmatpush1.bf16.msra.mxu1 %v15629_v8  ;;  %v15716_v7 = vld [vmem:[%s17758_s12 + $0xd40] ss:$16 sps:$4 sm:$0xff]   ;;  %v15719_v8 = vld [vmem:[%s17758_s12 + $0xd48] ss:$16 sps:$4 sm:$0xff]  }
 0x281   : > { %7157 = vmatprep.subr.bf16.mxu0 %v15634_v9  ;;  %7845 = vmatprep.subr.bf16.mxu1 %v15637_v10  ;;  %v15724_v9 = vld [vmem:[%s17758_s12 + $0xd64] ss:$16 sps:$4 sm:$0xff]   ;;  %v15727_v10 = vld [vmem:[%s17758_s12 + $0xd6c] ss:$16 sps:$4 sm:$0xff]  }
 0x284   : > { %7158 = vmatpush1.bf16.msra.mxu0 %v15632_v11  ;;  %7846 = vmatpush1.bf16.msra.mxu1 %v15635_v12  ;;  %v15722_v11 = vld [vmem:[%s17758_s12 + $0xd60] ss:$16 sps:$4 sm:$0xff]   ;;  %v15725_v12 = vld [vmem:[%s17758_s12 + $0xd68] ss:$16 sps:$4 sm:$0xff]  }
 0x285   : > { %7159 = vmatprep.subr.bf16.mxu0 %v15640_v13  ;;  %7847 = vmatprep.subr.bf16.mxu1 %v15643_v14  ;;  %v15730_v13 = vld [vmem:[%s17758_s12 + $0xd84] ss:$16 sps:$4 sm:$0xff]   ;;  %v15733_v14 = vld [vmem:[%s17758_s12 + $0xd8c] ss:$16 sps:$4 sm:$0xff]  }
 0x288   : > { %7160 = vmatpush1.bf16.msra.mxu0 %v15638_v15  ;;  %7848 = vmatpush1.bf16.msra.mxu1 %v15641_v18  ;;  %v15728_v15 = vld [vmem:[%s17758_s12 + $0xd80] ss:$16 sps:$4 sm:$0xff]   ;;  %v15731_v18 = vld [vmem:[%s17758_s12 + $0xd88] ss:$16 sps:$4 sm:$0xff]  }
 0x289   : > { %7161 = vmatprep.subr.bf16.mxu0 %v15646_v19  ;;  %7849 = vmatprep.subr.bf16.mxu1 %v15649_v22  ;;  %v15736_v19 = vld [vmem:[%s17758_s12 + $0xda4] ss:$16 sps:$4 sm:$0xff]   ;;  %v15739_v22 = vld [vmem:[%s17758_s12 + $0xdac] ss:$16 sps:$4 sm:$0xff]  }
 0x28c   : > { %7162 = vmatpush1.bf16.msra.mxu0 %v15644_v17  ;;  %7850 = vmatpush1.bf16.msra.mxu1 %v15647_v24  ;;  %v15734_v17 = vld [vmem:[%s17758_s12 + $0xda0] ss:$16 sps:$4 sm:$0xff]   ;;  %v15737_v24 = vld [vmem:[%s17758_s12 + $0xda8] ss:$16 sps:$4 sm:$0xff]  }
 0x28d   : > { %7163 = vmatprep.subr.bf16.mxu0 %v15652_v25  ;;  %7851 = vmatprep.subr.bf16.mxu1 %v15655_v26  ;;  %v15742_v25 = vld [vmem:[%s17758_s12 + $0xdc4] ss:$16 sps:$4 sm:$0xff]   ;;  %v15745_v26 = vld [vmem:[%s17758_s12 + $0xdcc] ss:$16 sps:$4 sm:$0xff]  }
 0x290   : > { %7164 = vmatpush1.bf16.msra.mxu0 %v15650_v21  ;;  %7852 = vmatpush1.bf16.msra.mxu1 %v15653_v28  ;;  %v15740_v21 = vld [vmem:[%s17758_s12 + $0xdc0] ss:$16 sps:$4 sm:$0xff]   ;;  %v15743_v28 = vld [vmem:[%s17758_s12 + $0xdc8] ss:$16 sps:$4 sm:$0xff]  }
 0x291   : > { %7176 = vmatprep.subr.bf16.mxu0 %v15658_v29  ;;  %7864 = vmatprep.subr.bf16.mxu1 %v15661_v30  ;;  %v15748_v29 = vld [vmem:[%s17758_s12 + $0xde4] ss:$16 sps:$4 sm:$0xff]   ;;  %v15751_v30 = vld [vmem:[%s17758_s12 + $0xdec] ss:$16 sps:$4 sm:$0xff]  }
 0x293   : > { %7166 = vmatmul.mubr.bf16.vlgmr.msra.gmra.mrb[0].mxu0 %v13121_v16  ;;  %7854 = vmatmul.mubr.bf16.vlgmr.msra.gmra.mrb[0].mxu1 %v13121_v16  ;;  %v15746_v16 = vld [vmem:[%s17758_s12 + $0xde0] ss:$16 sps:$4 sm:$0xff]  }
 0x294   : > { %7177 = vmatpush1.bf16.msra.mxu0 %v15656_v23  ;;  %7865 = vmatpush1.bf16.msra.mxu1 %v15659_v33  ;;  %v15749_v23 = vld [vmem:[%s17758_s12 + $0xde8] ss:$16 sps:$4 sm:$0xff]   ;;  %v15754_v33 = vld [vmem:[%s17758_s12 + $0xe04] ss:$16 sps:$4 sm:$0xff]  }
 0x295   : > { %7178 = vmatprep.subr.bf16.mxu0 %v15664_v34  ;;  %7866 = vmatprep.subr.bf16.mxu1 %v15667_v35  ;;  %v15757_v34 = vld [vmem:[%s17758_s12 + $0xe0c] ss:$16 sps:$4 sm:$0xff]  }
 0x296   : > { %7208 = vmatprep.mubr.bf16.mxu0 %v13124_v36  ;;  %7896 = vmatprep.mubr.bf16.mxu1 %v13124_v36  ;;  %v18328_v35 = vld [vmem:[%s19473_s0 + $0x38] sm:$0xff] }
 0x297   : > { %v18333_v36 = vld [vmem:[%s19473_s0 + $0xb8] sm:$0xff] }
 0x298   : > { %7179 = vmatpush1.bf16.msra.mxu0 %v15662_v27  ;;  %7867 = vmatpush1.bf16.msra.mxu1 %v15665_v20  ;;  %v13123_v27 = vcombine.low %v18250_v31, %v18255_v32  ;;  %v15752_v20 = vld [vmem:[%s17758_s12 + $0xe00] ss:$16 sps:$4 sm:$0xff]   ;;  %v15761_v32 = vld [vmem:[%s17758_s12 + $0xe28] ss:$16 sps:$4 sm:$0xff]  }
 0x299   : > { %7180 = vmatprep.subr.bf16.mxu0 %v15670_v37  ;;  %7868 = vmatprep.subr.bf16.mxu1 %v15673_v38  ;;  %v15755_v37 = vld [vmem:[%s17758_s12 + $0xe08] ss:$16 sps:$4 sm:$0xff]   ;;  %v15760_v38 = vld [vmem:[%s17758_s12 + $0xe24] ss:$16 sps:$4 sm:$0xff]   ;;  %v15758_v31 = vld [vmem:[%s17758_s12 + $0xe20] ss:$16 sps:$4 sm:$0xff]  }
 0x29c   : > { %7181 = vmatpush1.bf16.msra.mxu0 %v15668_v39  ;;  %7869 = vmatpush1.bf16.msra.mxu1 %v15671_v40  ;;  %v15763_v39 = vld [vmem:[%s17758_s12 + $0xe2c] ss:$16 sps:$4 sm:$0xff]   ;;  %v13126_v40 = vcombine.high %v18328_v35, %v18333_v36 }
 0x29d   : > { %7182 = vmatprep.subr.bf16.mxu0 %v15676_v41  ;;  %7870 = vmatprep.subr.bf16.mxu1 %v15679_v42  ;;  %v15766_v41 = vld [vmem:[%s17758_s12 + $0xe44] ss:$16 sps:$4 sm:$0xff]   ;;  %v15769_v42 = vld [vmem:[%s17758_s12 + $0xe4c] ss:$16 sps:$4 sm:$0xff]  }
 0x2a0   : > { %7183 = vmatpush1.bf16.msra.mxu0 %v15674_v43  ;;  %7871 = vmatpush1.bf16.msra.mxu1 %v15677_v44  ;;  %v15764_v43 = vld [vmem:[%s17758_s12 + $0xe40] ss:$16 sps:$4 sm:$0xff]   ;;  %v15767_v44 = vld [vmem:[%s17758_s12 + $0xe48] ss:$16 sps:$4 sm:$0xff]  }
 0x2a1   : > { %7184 = vmatprep.subr.bf16.mxu0 %v15682_v45  ;;  %7872 = vmatprep.subr.bf16.mxu1 %v15685_v46  ;;  %v15772_v45 = vld [vmem:[%s17758_s12 + $0xe64] ss:$16 sps:$4 sm:$0xff]   ;;  %v15775_v46 = vld [vmem:[%s17758_s12 + $0xe6c] ss:$16 sps:$4 sm:$0xff]  }
 0x2a4   : > { %7185 = vmatpush1.bf16.msra.mxu0 %v15680_v47  ;;  %7873 = vmatpush1.bf16.msra.mxu1 %v15683_v48  ;;  %v15770_v47 = vld [vmem:[%s17758_s12 + $0xe60] ss:$16 sps:$4 sm:$0xff]   ;;  %v15773_v48 = vld [vmem:[%s17758_s12 + $0xe68] ss:$16 sps:$4 sm:$0xff]  }
 0x2a5   : > { %7186 = vmatprep.subr.bf16.mxu0 %v15688_v49  ;;  %7874 = vmatprep.subr.bf16.mxu1 %v15691_v50  ;;  %v15778_v49 = vld [vmem:[%s17758_s12 + $0xe84] ss:$16 sps:$4 sm:$0xff]   ;;  %v15781_v50 = vld [vmem:[%s17758_s12 + $0xe8c] ss:$16 sps:$4 sm:$0xff]  }
 0x2a8   : > { %7187 = vmatpush1.bf16.msra.mxu0 %v15686_v51  ;;  %7875 = vmatpush1.bf16.msra.mxu1 %v15689_v52  ;;  %v15776_v51 = vld [vmem:[%s17758_s12 + $0xe80] ss:$16 sps:$4 sm:$0xff]   ;;  %v15779_v52 = vld [vmem:[%s17758_s12 + $0xe88] ss:$16 sps:$4 sm:$0xff]  }
 0x2a9   : > { %7188 = vmatprep.subr.bf16.mxu0 %v15694_v53  ;;  %7876 = vmatprep.subr.bf16.mxu1 %v15697_v54  ;;  %v15784_v53 = vld [vmem:[%s17758_s12 + $0xea4] ss:$16 sps:$4 sm:$0xff]   ;;  %v15787_v54 = vld [vmem:[%s17758_s12 + $0xeac] ss:$16 sps:$4 sm:$0xff]  }
 0x2ac   : > { %7189 = vmatpush1.bf16.msra.mxu0 %v15692_v55  ;;  %7877 = vmatpush1.bf16.msra.mxu1 %v15695_v56  ;;  %v15782_v55 = vld [vmem:[%s17758_s12 + $0xea0] ss:$16 sps:$4 sm:$0xff]   ;;  %v15785_v56 = vld [vmem:[%s17758_s12 + $0xea8] ss:$16 sps:$4 sm:$0xff]  }
 0x2ad   : > { %7190 = vmatprep.subr.bf16.mxu0 %v15700_v57  ;;  %7878 = vmatprep.subr.bf16.mxu1 %v15703_v58  ;;  %v15790_v57 = vld [vmem:[%s17758_s12 + $0xec4] ss:$16 sps:$4 sm:$0xff]   ;;  %v15793_v58 = vld [vmem:[%s17758_s12 + $0xecc] ss:$16 sps:$4 sm:$0xff]  }
 0x2b0   : > { %7191 = vmatpush1.bf16.msra.mxu0 %v15698_v59  ;;  %7879 = vmatpush1.bf16.msra.mxu1 %v15701_v60  ;;  %v15788_v59 = vld [vmem:[%s17758_s12 + $0xec0] ss:$16 sps:$4 sm:$0xff]   ;;  %v15791_v60 = vld [vmem:[%s17758_s12 + $0xec8] ss:$16 sps:$4 sm:$0xff]  }
 0x2b1   : > { %7192 = vmatprep.subr.bf16.mxu0 %v15706_v61  ;;  %7880 = vmatprep.subr.bf16.mxu1 %v15709_v62  ;;  %v15796_v61 = vld [vmem:[%s17758_s12 + $0xee4] ss:$16 sps:$4 sm:$0xff]   ;;  %v15799_v62 = vld [vmem:[%s17758_s12 + $0xeec] ss:$16 sps:$4 sm:$0xff]  }
 0x2b4   : > { %7193 = vmatpush1.bf16.msra.mxu0 %v15704_v63  ;;  %7881 = vmatpush1.bf16.msra.mxu1 %v15707_v0  ;;  %v15794_v63 = vld [vmem:[%s17758_s12 + $0xee0] ss:$16 sps:$4 sm:$0xff]   ;;  %v15797_v0 = vld [vmem:[%s17758_s12 + $0xee8] ss:$16 sps:$4 sm:$0xff]  }
 0x2b5   : > { %7194 = vmatprep.subr.bf16.mxu0 %v15712_v1  ;;  %7882 = vmatprep.subr.bf16.mxu1 %v15715_v2  ;;  %v15802_v1 = vld [vmem:[%s17758_s12 + $0xf04] ss:$16 sps:$4 sm:$0xff]   ;;  %v15805_v2 = vld [vmem:[%s17758_s12 + $0xf0c] ss:$16 sps:$4 sm:$0xff]  }
 0x2b8   : > { %7195 = vmatpush1.bf16.msra.mxu0 %v15710_v3  ;;  %7883 = vmatpush1.bf16.msra.mxu1 %v15713_v4  ;;  %v15800_v3 = vld [vmem:[%s17758_s12 + $0xf00] ss:$16 sps:$4 sm:$0xff]   ;;  %v15803_v4 = vld [vmem:[%s17758_s12 + $0xf08] ss:$16 sps:$4 sm:$0xff]  }
 0x2b9   : > { %7196 = vmatprep.subr.bf16.mxu0 %v15718_v5  ;;  %7884 = vmatprep.subr.bf16.mxu1 %v15721_v6  ;;  %v15808_v5 = vld [vmem:[%s17758_s12 + $0xf24] ss:$16 sps:$4 sm:$0xff]   ;;  %v15811_v6 = vld [vmem:[%s17758_s12 + $0xf2c] ss:$16 sps:$4 sm:$0xff]  }
 0x2bc   : > { %7197 = vmatpush1.bf16.msra.mxu0 %v15716_v7  ;;  %7885 = vmatpush1.bf16.msra.mxu1 %v15719_v8  ;;  %v15806_v7 = vld [vmem:[%s17758_s12 + $0xf20] ss:$16 sps:$4 sm:$0xff]   ;;  %v15809_v8 = vld [vmem:[%s17758_s12 + $0xf28] ss:$16 sps:$4 sm:$0xff]  }
 0x2bd   : > { %7198 = vmatprep.subr.bf16.mxu0 %v15724_v9  ;;  %7886 = vmatprep.subr.bf16.mxu1 %v15727_v10  ;;  %v15814_v9 = vld [vmem:[%s17758_s12 + $0xf44] ss:$16 sps:$4 sm:$0xff]   ;;  %v15817_v10 = vld [vmem:[%s17758_s12 + $0xf4c] ss:$16 sps:$4 sm:$0xff]  }
 0x2c0   : > { %7199 = vmatpush1.bf16.msra.mxu0 %v15722_v11  ;;  %7887 = vmatpush1.bf16.msra.mxu1 %v15725_v12  ;;  %v15812_v11 = vld [vmem:[%s17758_s12 + $0xf40] ss:$16 sps:$4 sm:$0xff]   ;;  %v15815_v12 = vld [vmem:[%s17758_s12 + $0xf48] ss:$16 sps:$4 sm:$0xff]  }
 0x2c1   : > { %7200 = vmatprep.subr.bf16.mxu0 %v15730_v13  ;;  %7888 = vmatprep.subr.bf16.mxu1 %v15733_v14  ;;  %v15820_v13 = vld [vmem:[%s17758_s12 + $0xf64] ss:$16 sps:$4 sm:$0xff]   ;;  %v15823_v14 = vld [vmem:[%s17758_s12 + $0xf6c] ss:$16 sps:$4 sm:$0xff]  }
 0x2c4   : > { %7201 = vmatpush1.bf16.msra.mxu0 %v15728_v15  ;;  %7889 = vmatpush1.bf16.msra.mxu1 %v15731_v18  ;;  %v15818_v15 = vld [vmem:[%s17758_s12 + $0xf60] ss:$16 sps:$4 sm:$0xff]   ;;  %v15821_v18 = vld [vmem:[%s17758_s12 + $0xf68] ss:$16 sps:$4 sm:$0xff]  }
 0x2c5   : > { %7202 = vmatprep.subr.bf16.mxu0 %v15736_v19  ;;  %7890 = vmatprep.subr.bf16.mxu1 %v15739_v22  ;;  %v15826_v19 = vld [vmem:[%s17758_s12 + $0xf84] ss:$16 sps:$4 sm:$0xff]   ;;  %v15829_v22 = vld [vmem:[%s17758_s12 + $0xf8c] ss:$16 sps:$4 sm:$0xff]  }
 0x2c8   : > { %7203 = vmatpush1.bf16.msra.mxu0 %v15734_v17  ;;  %7891 = vmatpush1.bf16.msra.mxu1 %v15737_v24  ;;  %v15824_v17 = vld [vmem:[%s17758_s12 + $0xf80] ss:$16 sps:$4 sm:$0xff]   ;;  %v15827_v24 = vld [vmem:[%s17758_s12 + $0xf88] ss:$16 sps:$4 sm:$0xff]  }
 0x2c9   : > { %7204 = vmatprep.subr.bf16.mxu0 %v15742_v25  ;;  %7892 = vmatprep.subr.bf16.mxu1 %v15745_v26  ;;  %v15832_v25 = vld [vmem:[%s17758_s12 + $0xfa4] ss:$16 sps:$4 sm:$0xff]   ;;  %v15835_v26 = vld [vmem:[%s17758_s12 + $0xfac] ss:$16 sps:$4 sm:$0xff]  }
 0x2cc   : > { %7205 = vmatpush1.bf16.msra.mxu0 %v15740_v21  ;;  %7893 = vmatpush1.bf16.msra.mxu1 %v15743_v28  ;;  %v15830_v21 = vld [vmem:[%s17758_s12 + $0xfa0] ss:$16 sps:$4 sm:$0xff]   ;;  %v15833_v28 = vld [vmem:[%s17758_s12 + $0xfa8] ss:$16 sps:$4 sm:$0xff]  }
 0x2cd   : > { %7206 = vmatprep.subr.bf16.mxu0 %v15748_v29  ;;  %7894 = vmatprep.subr.bf16.mxu1 %v15751_v30  ;;  %v15838_v29 = vld [vmem:[%s17758_s12 + $0xfc4] ss:$16 sps:$4 sm:$0xff]   ;;  %v15841_v30 = vld [vmem:[%s17758_s12 + $0xfcc] ss:$16 sps:$4 sm:$0xff]  }
 0x2d0   : > { %7207 = vmatpush1.bf16.msra.mxu0 %v15746_v16  ;;  %7895 = vmatpush1.bf16.msra.mxu1 %v15749_v23  ;;  %v15836_v16 = vld [vmem:[%s17758_s12 + $0xfc0] ss:$16 sps:$4 sm:$0xff]   ;;  %v15839_v23 = vld [vmem:[%s17758_s12 + $0xfc8] ss:$16 sps:$4 sm:$0xff]  }
 0x2d1   : > { %7219 = vmatprep.subr.bf16.mxu0 %v15754_v33  ;;  %7907 = vmatprep.subr.bf16.mxu1 %v15757_v34  ;;  %v15844_v33 = vld [vmem:[%s17758_s12 + $0xfe4] ss:$16 sps:$4 sm:$0xff]   ;;  %v15847_v34 = vld [vmem:[%s17758_s12 + $0xfec] ss:$16 sps:$4 sm:$0xff]  }
 0x2d3   : > { %7209 = vmatmul.mubr.bf16.vlgmr.msra.gmra.mrb[0].mxu0 %v13123_v27  ;;  %7897 = vmatmul.mubr.bf16.vlgmr.msra.gmra.mrb[0].mxu1 %v13123_v27  ;;  %v15842_v27 = vld [vmem:[%s17758_s12 + $0xfe0] ss:$16 sps:$4 sm:$0xff]  }
 0x2d4   : > { %7220 = vmatpush1.bf16.msra.mxu0 %v15752_v20  ;;  %7908 = vmatpush1.bf16.msra.mxu1 %v15755_v37  ;;  %v15845_v20 = vld [vmem:[%s17758_s12 + $0xfe8] ss:$16 sps:$4 sm:$0xff]   ;;  %v15850_v37 = vld [vmem:[%s17758_s12 + $0x1004] ss:$16 sps:$4 sm:$0xff]  }
 0x2d5   : > { %7221 = vmatprep.subr.bf16.mxu0 %v15760_v38  ;;  %7909 = vmatprep.subr.bf16.mxu1 %v15763_v39  ;;  %v15853_v38 = vld [vmem:[%s17758_s12 + $0x100c] ss:$16 sps:$4 sm:$0xff]  }
 0x2d6   : > { %7251 = vmatprep.mubr.bf16.mxu0 %v13126_v40  ;;  %7939 = vmatprep.mubr.bf16.mxu1 %v13126_v40  ;;  %v18406_v39 = vld [vmem:[%s19473_s0 + $0x40] sm:$0xff] }
 0x2d7   : > { %v18411_v40 = vld [vmem:[%s19473_s0 + $0xc0] sm:$0xff] }
 0x2d8   : > { %7222 = vmatpush1.bf16.msra.mxu0 %v15758_v31  ;;  %7910 = vmatpush1.bf16.msra.mxu1 %v15761_v32  ;;  %v13125_v31 = vcombine.low %v18328_v35, %v18333_v36  ;;  %v15848_v32 = vld [vmem:[%s17758_s12 + $0x1000] ss:$16 sps:$4 sm:$0xff]   ;;  %v15857_v36 = vld [vmem:[%s17758_s12 + $0x1028] ss:$16 sps:$4 sm:$0xff]  }
 0x2d9   : > { %7223 = vmatprep.subr.bf16.mxu0 %v15766_v41  ;;  %7911 = vmatprep.subr.bf16.mxu1 %v15769_v42  ;;  %v15851_v41 = vld [vmem:[%s17758_s12 + $0x1008] ss:$16 sps:$4 sm:$0xff]   ;;  %v15856_v42 = vld [vmem:[%s17758_s12 + $0x1024] ss:$16 sps:$4 sm:$0xff]   ;;  %v15854_v35 = vld [vmem:[%s17758_s12 + $0x1020] ss:$16 sps:$4 sm:$0xff]  }
 0x2dc   : > { %7224 = vmatpush1.bf16.msra.mxu0 %v15764_v43  ;;  %7912 = vmatpush1.bf16.msra.mxu1 %v15767_v44  ;;  %v15859_v43 = vld [vmem:[%s17758_s12 + $0x102c] ss:$16 sps:$4 sm:$0xff]   ;;  %v13128_v44 = vcombine.high %v18406_v39, %v18411_v40 }
 0x2dd   : > { %7225 = vmatprep.subr.bf16.mxu0 %v15772_v45  ;;  %7913 = vmatprep.subr.bf16.mxu1 %v15775_v46  ;;  %v15862_v45 = vld [vmem:[%s17758_s12 + $0x1044] ss:$16 sps:$4 sm:$0xff]   ;;  %v15865_v46 = vld [vmem:[%s17758_s12 + $0x104c] ss:$16 sps:$4 sm:$0xff]  }
 0x2e0   : > { %7226 = vmatpush1.bf16.msra.mxu0 %v15770_v47  ;;  %7914 = vmatpush1.bf16.msra.mxu1 %v15773_v48  ;;  %v15860_v47 = vld [vmem:[%s17758_s12 + $0x1040] ss:$16 sps:$4 sm:$0xff]   ;;  %v15863_v48 = vld [vmem:[%s17758_s12 + $0x1048] ss:$16 sps:$4 sm:$0xff]  }
 0x2e1   : > { %7227 = vmatprep.subr.bf16.mxu0 %v15778_v49  ;;  %7915 = vmatprep.subr.bf16.mxu1 %v15781_v50  ;;  %v15868_v49 = vld [vmem:[%s17758_s12 + $0x1064] ss:$16 sps:$4 sm:$0xff]   ;;  %v15871_v50 = vld [vmem:[%s17758_s12 + $0x106c] ss:$16 sps:$4 sm:$0xff]  }
 0x2e4   : > { %7228 = vmatpush1.bf16.msra.mxu0 %v15776_v51  ;;  %7916 = vmatpush1.bf16.msra.mxu1 %v15779_v52  ;;  %v15866_v51 = vld [vmem:[%s17758_s12 + $0x1060] ss:$16 sps:$4 sm:$0xff]   ;;  %v15869_v52 = vld [vmem:[%s17758_s12 + $0x1068] ss:$16 sps:$4 sm:$0xff]  }
 0x2e5   : > { %7229 = vmatprep.subr.bf16.mxu0 %v15784_v53  ;;  %7917 = vmatprep.subr.bf16.mxu1 %v15787_v54  ;;  %v15874_v53 = vld [vmem:[%s17758_s12 + $0x1084] ss:$16 sps:$4 sm:$0xff]   ;;  %v15877_v54 = vld [vmem:[%s17758_s12 + $0x108c] ss:$16 sps:$4 sm:$0xff]  }
 0x2e8   : > { %7230 = vmatpush1.bf16.msra.mxu0 %v15782_v55  ;;  %7918 = vmatpush1.bf16.msra.mxu1 %v15785_v56  ;;  %v15872_v55 = vld [vmem:[%s17758_s12 + $0x1080] ss:$16 sps:$4 sm:$0xff]   ;;  %v15875_v56 = vld [vmem:[%s17758_s12 + $0x1088] ss:$16 sps:$4 sm:$0xff]  }
 0x2e9   : > { %7231 = vmatprep.subr.bf16.mxu0 %v15790_v57  ;;  %7919 = vmatprep.subr.bf16.mxu1 %v15793_v58  ;;  %v15880_v57 = vld [vmem:[%s17758_s12 + $0x10a4] ss:$16 sps:$4 sm:$0xff]   ;;  %v15883_v58 = vld [vmem:[%s17758_s12 + $0x10ac] ss:$16 sps:$4 sm:$0xff]  }
 0x2ec   : > { %7232 = vmatpush1.bf16.msra.mxu0 %v15788_v59  ;;  %7920 = vmatpush1.bf16.msra.mxu1 %v15791_v60  ;;  %v15878_v59 = vld [vmem:[%s17758_s12 + $0x10a0] ss:$16 sps:$4 sm:$0xff]   ;;  %v15881_v60 = vld [vmem:[%s17758_s12 + $0x10a8] ss:$16 sps:$4 sm:$0xff]  }
 0x2ed   : > { %7233 = vmatprep.subr.bf16.mxu0 %v15796_v61  ;;  %7921 = vmatprep.subr.bf16.mxu1 %v15799_v62  ;;  %v15886_v61 = vld [vmem:[%s17758_s12 + $0x10c4] ss:$16 sps:$4 sm:$0xff]   ;;  %v15889_v62 = vld [vmem:[%s17758_s12 + $0x10cc] ss:$16 sps:$4 sm:$0xff]  }
 0x2f0   : > { %7234 = vmatpush1.bf16.msra.mxu0 %v15794_v63  ;;  %7922 = vmatpush1.bf16.msra.mxu1 %v15797_v0  ;;  %v15884_v63 = vld [vmem:[%s17758_s12 + $0x10c0] ss:$16 sps:$4 sm:$0xff]   ;;  %v15887_v0 = vld [vmem:[%s17758_s12 + $0x10c8] ss:$16 sps:$4 sm:$0xff]  }
 0x2f1   : > { %7235 = vmatprep.subr.bf16.mxu0 %v15802_v1  ;;  %7923 = vmatprep.subr.bf16.mxu1 %v15805_v2  ;;  %v15892_v1 = vld [vmem:[%s17758_s12 + $0x10e4] ss:$16 sps:$4 sm:$0xff]   ;;  %v15895_v2 = vld [vmem:[%s17758_s12 + $0x10ec] ss:$16 sps:$4 sm:$0xff]  }
 0x2f4   : > { %7236 = vmatpush1.bf16.msra.mxu0 %v15800_v3  ;;  %7924 = vmatpush1.bf16.msra.mxu1 %v15803_v4  ;;  %v15890_v3 = vld [vmem:[%s17758_s12 + $0x10e0] ss:$16 sps:$4 sm:$0xff]   ;;  %v15893_v4 = vld [vmem:[%s17758_s12 + $0x10e8] ss:$16 sps:$4 sm:$0xff]  }
 0x2f5   : > { %7237 = vmatprep.subr.bf16.mxu0 %v15808_v5  ;;  %7925 = vmatprep.subr.bf16.mxu1 %v15811_v6  ;;  %v15898_v5 = vld [vmem:[%s17758_s12 + $0x1104] ss:$16 sps:$4 sm:$0xff]   ;;  %v15901_v6 = vld [vmem:[%s17758_s12 + $0x110c] ss:$16 sps:$4 sm:$0xff]  }
 0x2f8   : > { %7238 = vmatpush1.bf16.msra.mxu0 %v15806_v7  ;;  %7926 = vmatpush1.bf16.msra.mxu1 %v15809_v8  ;;  %v15896_v7 = vld [vmem:[%s17758_s12 + $0x1100] ss:$16 sps:$4 sm:$0xff]   ;;  %v15899_v8 = vld [vmem:[%s17758_s12 + $0x1108] ss:$16 sps:$4 sm:$0xff]  }
 0x2f9   : > { %7239 = vmatprep.subr.bf16.mxu0 %v15814_v9  ;;  %7927 = vmatprep.subr.bf16.mxu1 %v15817_v10  ;;  %v15904_v9 = vld [vmem:[%s17758_s12 + $0x1124] ss:$16 sps:$4 sm:$0xff]   ;;  %v15907_v10 = vld [vmem:[%s17758_s12 + $0x112c] ss:$16 sps:$4 sm:$0xff]  }
 0x2fc   : > { %7240 = vmatpush1.bf16.msra.mxu0 %v15812_v11  ;;  %7928 = vmatpush1.bf16.msra.mxu1 %v15815_v12  ;;  %v15902_v11 = vld [vmem:[%s17758_s12 + $0x1120] ss:$16 sps:$4 sm:$0xff]   ;;  %v15905_v12 = vld [vmem:[%s17758_s12 + $0x1128] ss:$16 sps:$4 sm:$0xff]  }
 0x2fd   : > { %7241 = vmatprep.subr.bf16.mxu0 %v15820_v13  ;;  %7929 = vmatprep.subr.bf16.mxu1 %v15823_v14  ;;  %v15910_v13 = vld [vmem:[%s17758_s12 + $0x1144] ss:$16 sps:$4 sm:$0xff]   ;;  %v15913_v14 = vld [vmem:[%s17758_s12 + $0x114c] ss:$16 sps:$4 sm:$0xff]  }
 0x300   : > { %7242 = vmatpush1.bf16.msra.mxu0 %v15818_v15  ;;  %7930 = vmatpush1.bf16.msra.mxu1 %v15821_v18  ;;  %v15908_v15 = vld [vmem:[%s17758_s12 + $0x1140] ss:$16 sps:$4 sm:$0xff]   ;;  %v15911_v18 = vld [vmem:[%s17758_s12 + $0x1148] ss:$16 sps:$4 sm:$0xff]  }
 0x301   : > { %7243 = vmatprep.subr.bf16.mxu0 %v15826_v19  ;;  %7931 = vmatprep.subr.bf16.mxu1 %v15829_v22  ;;  %v15916_v19 = vld [vmem:[%s17758_s12 + $0x1164] ss:$16 sps:$4 sm:$0xff]   ;;  %v15919_v22 = vld [vmem:[%s17758_s12 + $0x116c] ss:$16 sps:$4 sm:$0xff]  }
 0x304   : > { %7244 = vmatpush1.bf16.msra.mxu0 %v15824_v17  ;;  %7932 = vmatpush1.bf16.msra.mxu1 %v15827_v24  ;;  %v15914_v17 = vld [vmem:[%s17758_s12 + $0x1160] ss:$16 sps:$4 sm:$0xff]   ;;  %v15917_v24 = vld [vmem:[%s17758_s12 + $0x1168] ss:$16 sps:$4 sm:$0xff]  }
 0x305   : > { %7245 = vmatprep.subr.bf16.mxu0 %v15832_v25  ;;  %7933 = vmatprep.subr.bf16.mxu1 %v15835_v26  ;;  %v15922_v25 = vld [vmem:[%s17758_s12 + $0x1184] ss:$16 sps:$4 sm:$0xff]   ;;  %v15925_v26 = vld [vmem:[%s17758_s12 + $0x118c] ss:$16 sps:$4 sm:$0xff]  }
 0x308   : > { %7246 = vmatpush1.bf16.msra.mxu0 %v15830_v21  ;;  %7934 = vmatpush1.bf16.msra.mxu1 %v15833_v28  ;;  %v15920_v21 = vld [vmem:[%s17758_s12 + $0x1180] ss:$16 sps:$4 sm:$0xff]   ;;  %v15923_v28 = vld [vmem:[%s17758_s12 + $0x1188] ss:$16 sps:$4 sm:$0xff]  }
 0x309   : > { %7247 = vmatprep.subr.bf16.mxu0 %v15838_v29  ;;  %7935 = vmatprep.subr.bf16.mxu1 %v15841_v30  ;;  %v15928_v29 = vld [vmem:[%s17758_s12 + $0x11a4] ss:$16 sps:$4 sm:$0xff]   ;;  %v15931_v30 = vld [vmem:[%s17758_s12 + $0x11ac] ss:$16 sps:$4 sm:$0xff]  }
 0x30c   : > { %7248 = vmatpush1.bf16.msra.mxu0 %v15836_v16  ;;  %7936 = vmatpush1.bf16.msra.mxu1 %v15839_v23  ;;  %v15926_v16 = vld [vmem:[%s17758_s12 + $0x11a0] ss:$16 sps:$4 sm:$0xff]   ;;  %v15929_v23 = vld [vmem:[%s17758_s12 + $0x11a8] ss:$16 sps:$4 sm:$0xff]  }
 0x30d   : > { %7249 = vmatprep.subr.bf16.mxu0 %v15844_v33  ;;  %7937 = vmatprep.subr.bf16.mxu1 %v15847_v34  ;;  %v15934_v33 = vld [vmem:[%s17758_s12 + $0x11c4] ss:$16 sps:$4 sm:$0xff]   ;;  %v15937_v34 = vld [vmem:[%s17758_s12 + $0x11cc] ss:$16 sps:$4 sm:$0xff]  }
 0x310   : > { %7250 = vmatpush1.bf16.msra.mxu0 %v15842_v27  ;;  %7938 = vmatpush1.bf16.msra.mxu1 %v15845_v20  ;;  %v15932_v27 = vld [vmem:[%s17758_s12 + $0x11c0] ss:$16 sps:$4 sm:$0xff]   ;;  %v15935_v20 = vld [vmem:[%s17758_s12 + $0x11c8] ss:$16 sps:$4 sm:$0xff]  }
 0x311   : > { %7262 = vmatprep.subr.bf16.mxu0 %v15850_v37  ;;  %7950 = vmatprep.subr.bf16.mxu1 %v15853_v38  ;;  %v15940_v37 = vld [vmem:[%s17758_s12 + $0x11e4] ss:$16 sps:$4 sm:$0xff]   ;;  %v15943_v38 = vld [vmem:[%s17758_s12 + $0x11ec] ss:$16 sps:$4 sm:$0xff]  }
 0x313   : > { %7252 = vmatmul.mubr.bf16.vlgmr.msra.gmra.mrb[0].mxu0 %v13125_v31  ;;  %7940 = vmatmul.mubr.bf16.vlgmr.msra.gmra.mrb[0].mxu1 %v13125_v31  ;;  %v15938_v31 = vld [vmem:[%s17758_s12 + $0x11e0] ss:$16 sps:$4 sm:$0xff]  }
 0x314   : > { %7263 = vmatpush1.bf16.msra.mxu0 %v15848_v32  ;;  %7951 = vmatpush1.bf16.msra.mxu1 %v15851_v41  ;;  %v15941_v32 = vld [vmem:[%s17758_s12 + $0x11e8] ss:$16 sps:$4 sm:$0xff]   ;;  %v15946_v41 = vld [vmem:[%s17758_s12 + $0x1204] ss:$16 sps:$4 sm:$0xff]  }
 0x315   : > { %7264 = vmatprep.subr.bf16.mxu0 %v15856_v42  ;;  %7952 = vmatprep.subr.bf16.mxu1 %v15859_v43  ;;  %v15949_v42 = vld [vmem:[%s17758_s12 + $0x120c] ss:$16 sps:$4 sm:$0xff]  }
 0x316   : > { %7294 = vmatprep.mubr.bf16.mxu0 %v13128_v44  ;;  %7982 = vmatprep.mubr.bf16.mxu1 %v13128_v44  ;;  %v18484_v43 = vld [vmem:[%s19473_s0 + $0x48] sm:$0xff] }
 0x317   : > { %v18489_v44 = vld [vmem:[%s19473_s0 + $0xc8] sm:$0xff] }
 0x318   : > { %7265 = vmatpush1.bf16.msra.mxu0 %v15854_v35  ;;  %7953 = vmatpush1.bf16.msra.mxu1 %v15857_v36  ;;  %v13127_v35 = vcombine.low %v18406_v39, %v18411_v40  ;;  %v15944_v36 = vld [vmem:[%s17758_s12 + $0x1200] ss:$16 sps:$4 sm:$0xff]   ;;  %v15953_v40 = vld [vmem:[%s17758_s12 + $0x1228] ss:$16 sps:$4 sm:$0xff]  }
 0x319   : > { %7266 = vmatprep.subr.bf16.mxu0 %v15862_v45  ;;  %7954 = vmatprep.subr.bf16.mxu1 %v15865_v46  ;;  %v15947_v45 = vld [vmem:[%s17758_s12 + $0x1208] ss:$16 sps:$4 sm:$0xff]   ;;  %v15952_v46 = vld [vmem:[%s17758_s12 + $0x1224] ss:$16 sps:$4 sm:$0xff]   ;;  %v15950_v39 = vld [vmem:[%s17758_s12 + $0x1220] ss:$16 sps:$4 sm:$0xff]  }
 0x31c   : > { %7267 = vmatpush1.bf16.msra.mxu0 %v15860_v47  ;;  %7955 = vmatpush1.bf16.msra.mxu1 %v15863_v48  ;;  %v15955_v47 = vld [vmem:[%s17758_s12 + $0x122c] ss:$16 sps:$4 sm:$0xff]   ;;  %v13130_v48 = vcombine.high %v18484_v43, %v18489_v44 }
 0x31d   : > { %7268 = vmatprep.subr.bf16.mxu0 %v15868_v49  ;;  %7956 = vmatprep.subr.bf16.mxu1 %v15871_v50  ;;  %v15958_v49 = vld [vmem:[%s17758_s12 + $0x1244] ss:$16 sps:$4 sm:$0xff]   ;;  %v15961_v50 = vld [vmem:[%s17758_s12 + $0x124c] ss:$16 sps:$4 sm:$0xff]  }
 0x320   : > { %7269 = vmatpush1.bf16.msra.mxu0 %v15866_v51  ;;  %7957 = vmatpush1.bf16.msra.mxu1 %v15869_v52  ;;  %v15956_v51 = vld [vmem:[%s17758_s12 + $0x1240] ss:$16 sps:$4 sm:$0xff]   ;;  %v15959_v52 = vld [vmem:[%s17758_s12 + $0x1248] ss:$16 sps:$4 sm:$0xff]  }
 0x321   : > { %7270 = vmatprep.subr.bf16.mxu0 %v15874_v53  ;;  %7958 = vmatprep.subr.bf16.mxu1 %v15877_v54  ;;  %v15964_v53 = vld [vmem:[%s17758_s12 + $0x1264] ss:$16 sps:$4 sm:$0xff]   ;;  %v15967_v54 = vld [vmem:[%s17758_s12 + $0x126c] ss:$16 sps:$4 sm:$0xff]  }
 0x324   : > { %7271 = vmatpush1.bf16.msra.mxu0 %v15872_v55  ;;  %7959 = vmatpush1.bf16.msra.mxu1 %v15875_v56  ;;  %v15962_v55 = vld [vmem:[%s17758_s12 + $0x1260] ss:$16 sps:$4 sm:$0xff]   ;;  %v15965_v56 = vld [vmem:[%s17758_s12 + $0x1268] ss:$16 sps:$4 sm:$0xff]  }
 0x325   : > { %7272 = vmatprep.subr.bf16.mxu0 %v15880_v57  ;;  %7960 = vmatprep.subr.bf16.mxu1 %v15883_v58  ;;  %v15970_v57 = vld [vmem:[%s17758_s12 + $0x1284] ss:$16 sps:$4 sm:$0xff]   ;;  %v15973_v58 = vld [vmem:[%s17758_s12 + $0x128c] ss:$16 sps:$4 sm:$0xff]  }
 0x328   : > { %7273 = vmatpush1.bf16.msra.mxu0 %v15878_v59  ;;  %7961 = vmatpush1.bf16.msra.mxu1 %v15881_v60  ;;  %v15968_v59 = vld [vmem:[%s17758_s12 + $0x1280] ss:$16 sps:$4 sm:$0xff]   ;;  %v15971_v60 = vld [vmem:[%s17758_s12 + $0x1288] ss:$16 sps:$4 sm:$0xff]  }
 0x329   : > { %7274 = vmatprep.subr.bf16.mxu0 %v15886_v61  ;;  %7962 = vmatprep.subr.bf16.mxu1 %v15889_v62  ;;  %v15976_v61 = vld [vmem:[%s17758_s12 + $0x12a4] ss:$16 sps:$4 sm:$0xff]   ;;  %v15979_v62 = vld [vmem:[%s17758_s12 + $0x12ac] ss:$16 sps:$4 sm:$0xff]  }
 0x32c   : > { %7275 = vmatpush1.bf16.msra.mxu0 %v15884_v63  ;;  %7963 = vmatpush1.bf16.msra.mxu1 %v15887_v0  ;;  %v15974_v63 = vld [vmem:[%s17758_s12 + $0x12a0] ss:$16 sps:$4 sm:$0xff]   ;;  %v15977_v0 = vld [vmem:[%s17758_s12 + $0x12a8] ss:$16 sps:$4 sm:$0xff]  }
 0x32d   : > { %7276 = vmatprep.subr.bf16.mxu0 %v15892_v1  ;;  %7964 = vmatprep.subr.bf16.mxu1 %v15895_v2  ;;  %v15982_v1 = vld [vmem:[%s17758_s12 + $0x12c4] ss:$16 sps:$4 sm:$0xff]   ;;  %v15985_v2 = vld [vmem:[%s17758_s12 + $0x12cc] ss:$16 sps:$4 sm:$0xff]  }
 0x330   : > { %7277 = vmatpush1.bf16.msra.mxu0 %v15890_v3  ;;  %7965 = vmatpush1.bf16.msra.mxu1 %v15893_v4  ;;  %v15980_v3 = vld [vmem:[%s17758_s12 + $0x12c0] ss:$16 sps:$4 sm:$0xff]   ;;  %v15983_v4 = vld [vmem:[%s17758_s12 + $0x12c8] ss:$16 sps:$4 sm:$0xff]  }
 0x331   : > { %7278 = vmatprep.subr.bf16.mxu0 %v15898_v5  ;;  %7966 = vmatprep.subr.bf16.mxu1 %v15901_v6  ;;  %v15988_v5 = vld [vmem:[%s17758_s12 + $0x12e4] ss:$16 sps:$4 sm:$0xff]   ;;  %v15991_v6 = vld [vmem:[%s17758_s12 + $0x12ec] ss:$16 sps:$4 sm:$0xff]  }
 0x334   : > { %7279 = vmatpush1.bf16.msra.mxu0 %v15896_v7  ;;  %7967 = vmatpush1.bf16.msra.mxu1 %v15899_v8  ;;  %v15986_v7 = vld [vmem:[%s17758_s12 + $0x12e0] ss:$16 sps:$4 sm:$0xff]   ;;  %v15989_v8 = vld [vmem:[%s17758_s12 + $0x12e8] ss:$16 sps:$4 sm:$0xff]  }
 0x335   : > { %7280 = vmatprep.subr.bf16.mxu0 %v15904_v9  ;;  %7968 = vmatprep.subr.bf16.mxu1 %v15907_v10  ;;  %v15994_v9 = vld [vmem:[%s17758_s12 + $0x1304] ss:$16 sps:$4 sm:$0xff]   ;;  %v15997_v10 = vld [vmem:[%s17758_s12 + $0x130c] ss:$16 sps:$4 sm:$0xff]  }
 0x338   : > { %7281 = vmatpush1.bf16.msra.mxu0 %v15902_v11  ;;  %7969 = vmatpush1.bf16.msra.mxu1 %v15905_v12  ;;  %v15992_v11 = vld [vmem:[%s17758_s12 + $0x1300] ss:$16 sps:$4 sm:$0xff]   ;;  %v15995_v12 = vld [vmem:[%s17758_s12 + $0x1308] ss:$16 sps:$4 sm:$0xff]  }
 0x339   : > { %7282 = vmatprep.subr.bf16.mxu0 %v15910_v13  ;;  %7970 = vmatprep.subr.bf16.mxu1 %v15913_v14  ;;  %v16000_v13 = vld [vmem:[%s17758_s12 + $0x1324] ss:$16 sps:$4 sm:$0xff]   ;;  %v16003_v14 = vld [vmem:[%s17758_s12 + $0x132c] ss:$16 sps:$4 sm:$0xff]  }
 0x33c   : > { %7283 = vmatpush1.bf16.msra.mxu0 %v15908_v15  ;;  %7971 = vmatpush1.bf16.msra.mxu1 %v15911_v18  ;;  %v15998_v15 = vld [vmem:[%s17758_s12 + $0x1320] ss:$16 sps:$4 sm:$0xff]   ;;  %v16001_v18 = vld [vmem:[%s17758_s12 + $0x1328] ss:$16 sps:$4 sm:$0xff]  }
 0x33d   : > { %7284 = vmatprep.subr.bf16.mxu0 %v15916_v19  ;;  %7972 = vmatprep.subr.bf16.mxu1 %v15919_v22  ;;  %v16006_v19 = vld [vmem:[%s17758_s12 + $0x1344] ss:$16 sps:$4 sm:$0xff]   ;;  %v16009_v22 = vld [vmem:[%s17758_s12 + $0x134c] ss:$16 sps:$4 sm:$0xff]  }
 0x340   : > { %7285 = vmatpush1.bf16.msra.mxu0 %v15914_v17  ;;  %7973 = vmatpush1.bf16.msra.mxu1 %v15917_v24  ;;  %v16004_v17 = vld [vmem:[%s17758_s12 + $0x1340] ss:$16 sps:$4 sm:$0xff]   ;;  %v16007_v24 = vld [vmem:[%s17758_s12 + $0x1348] ss:$16 sps:$4 sm:$0xff]  }
 0x341   : > { %7286 = vmatprep.subr.bf16.mxu0 %v15922_v25  ;;  %7974 = vmatprep.subr.bf16.mxu1 %v15925_v26  ;;  %v16012_v25 = vld [vmem:[%s17758_s12 + $0x1364] ss:$16 sps:$4 sm:$0xff]   ;;  %v16015_v26 = vld [vmem:[%s17758_s12 + $0x136c] ss:$16 sps:$4 sm:$0xff]  }
 0x344   : > { %7287 = vmatpush1.bf16.msra.mxu0 %v15920_v21  ;;  %7975 = vmatpush1.bf16.msra.mxu1 %v15923_v28  ;;  %v16010_v21 = vld [vmem:[%s17758_s12 + $0x1360] ss:$16 sps:$4 sm:$0xff]   ;;  %v16013_v28 = vld [vmem:[%s17758_s12 + $0x1368] ss:$16 sps:$4 sm:$0xff]  }
 0x345   : > { %7288 = vmatprep.subr.bf16.mxu0 %v15928_v29  ;;  %7976 = vmatprep.subr.bf16.mxu1 %v15931_v30  ;;  %v16018_v29 = vld [vmem:[%s17758_s12 + $0x1384] ss:$16 sps:$4 sm:$0xff]   ;;  %v16021_v30 = vld [vmem:[%s17758_s12 + $0x138c] ss:$16 sps:$4 sm:$0xff]  }
 0x348   : > { %7289 = vmatpush1.bf16.msra.mxu0 %v15926_v16  ;;  %7977 = vmatpush1.bf16.msra.mxu1 %v15929_v23  ;;  %v16016_v16 = vld [vmem:[%s17758_s12 + $0x1380] ss:$16 sps:$4 sm:$0xff]   ;;  %v16019_v23 = vld [vmem:[%s17758_s12 + $0x1388] ss:$16 sps:$4 sm:$0xff]  }
 0x349   : > { %7290 = vmatprep.subr.bf16.mxu0 %v15934_v33  ;;  %7978 = vmatprep.subr.bf16.mxu1 %v15937_v34  ;;  %v16024_v33 = vld [vmem:[%s17758_s12 + $0x13a4] ss:$16 sps:$4 sm:$0xff]   ;;  %v16027_v34 = vld [vmem:[%s17758_s12 + $0x13ac] ss:$16 sps:$4 sm:$0xff]  }
 0x34c   : > { %7291 = vmatpush1.bf16.msra.mxu0 %v15932_v27  ;;  %7979 = vmatpush1.bf16.msra.mxu1 %v15935_v20  ;;  %v16022_v27 = vld [vmem:[%s17758_s12 + $0x13a0] ss:$16 sps:$4 sm:$0xff]   ;;  %v16025_v20 = vld [vmem:[%s17758_s12 + $0x13a8] ss:$16 sps:$4 sm:$0xff]  }
 0x34d   : > { %7292 = vmatprep.subr.bf16.mxu0 %v15940_v37  ;;  %7980 = vmatprep.subr.bf16.mxu1 %v15943_v38  ;;  %v16030_v37 = vld [vmem:[%s17758_s12 + $0x13c4] ss:$16 sps:$4 sm:$0xff]   ;;  %v16033_v38 = vld [vmem:[%s17758_s12 + $0x13cc] ss:$16 sps:$4 sm:$0xff]  }
 0x350   : > { %7293 = vmatpush1.bf16.msra.mxu0 %v15938_v31  ;;  %7981 = vmatpush1.bf16.msra.mxu1 %v15941_v32  ;;  %v16028_v31 = vld [vmem:[%s17758_s12 + $0x13c0] ss:$16 sps:$4 sm:$0xff]   ;;  %v16031_v32 = vld [vmem:[%s17758_s12 + $0x13c8] ss:$16 sps:$4 sm:$0xff]  }
 0x351   : > { %7305 = vmatprep.subr.bf16.mxu0 %v15946_v41  ;;  %7993 = vmatprep.subr.bf16.mxu1 %v15949_v42  ;;  %v16036_v41 = vld [vmem:[%s17758_s12 + $0x13e4] ss:$16 sps:$4 sm:$0xff]   ;;  %v16039_v42 = vld [vmem:[%s17758_s12 + $0x13ec] ss:$16 sps:$4 sm:$0xff]  }
 0x353   : > { %7295 = vmatmul.mubr.bf16.vlgmr.msra.gmra.mrb[0].mxu0 %v13127_v35  ;;  %7983 = vmatmul.mubr.bf16.vlgmr.msra.gmra.mrb[0].mxu1 %v13127_v35  ;;  %v16034_v35 = vld [vmem:[%s17758_s12 + $0x13e0] ss:$16 sps:$4 sm:$0xff]  }
 0x354   : > { %7306 = vmatpush1.bf16.msra.mxu0 %v15944_v36  ;;  %7994 = vmatpush1.bf16.msra.mxu1 %v15947_v45  ;;  %v16037_v36 = vld [vmem:[%s17758_s12 + $0x13e8] ss:$16 sps:$4 sm:$0xff]   ;;  %v16042_v45 = vld [vmem:[%s17758_s12 + $0x1404] ss:$16 sps:$4 sm:$0xff]  }
 0x355   : > { %7307 = vmatprep.subr.bf16.mxu0 %v15952_v46  ;;  %7995 = vmatprep.subr.bf16.mxu1 %v15955_v47  ;;  %v16045_v46 = vld [vmem:[%s17758_s12 + $0x140c] ss:$16 sps:$4 sm:$0xff]   ;;  %v13129_v47 = vcombine.low %v18484_v43, %v18489_v44  ;;  %v16048_v43 = vld [vmem:[%s17758_s12 + $0x1424] ss:$16 sps:$4 sm:$0xff]  }
 0x356   : > { %7337 = vmatprep.mubr.bf16.mxu0 %v13130_v48  ;;  %8025 = vmatprep.mubr.bf16.mxu1 %v13130_v48  ;;  %v18564_v48 = vld [vmem:[%s19473_s0 + $0x50] sm:$0xff] }
 0x357   : > { %v16051_v44 = vld [vmem:[%s17758_s12 + $0x142c] ss:$16 sps:$4 sm:$0xff]  }
 0x358   : > { %7308 = vmatpush1.bf16.msra.mxu0 %v15950_v39  ;;  %7996 = vmatpush1.bf16.msra.mxu1 %v15953_v40  ;;  %v18569_v39 = vld [vmem:[%s19473_s0 + $0xd0] sm:$0xff] }
 0x359   : > { %7309 = vmatprep.subr.bf16.mxu0 %v15958_v49  ;;  %7997 = vmatprep.subr.bf16.mxu1 %v15961_v50  ;;  %v16040_v40 = vld [vmem:[%s17758_s12 + $0x1400] ss:$16 sps:$4 sm:$0xff]   ;;  %v16043_v49 = vld [vmem:[%s17758_s12 + $0x1408] ss:$16 sps:$4 sm:$0xff]   ;;  %v13132_v50 = vcombine.high %v18564_v48, %v18569_v39 }
 0x35c   : > { %7310 = vmatpush1.bf16.msra.mxu0 %v15956_v51  ;;  %7998 = vmatpush1.bf16.msra.mxu1 %v15959_v52  ;;  %v16046_v51 = vld [vmem:[%s17758_s12 + $0x1420] ss:$16 sps:$4 sm:$0xff]   ;;  %v16049_v52 = vld [vmem:[%s17758_s12 + $0x1428] ss:$16 sps:$4 sm:$0xff]  }
 0x35d   : > { %7311 = vmatprep.subr.bf16.mxu0 %v15964_v53  ;;  %7999 = vmatprep.subr.bf16.mxu1 %v15967_v54  ;;  %v16054_v53 = vld [vmem:[%s17758_s12 + $0x1444] ss:$16 sps:$4 sm:$0xff]   ;;  %v16057_v54 = vld [vmem:[%s17758_s12 + $0x144c] ss:$16 sps:$4 sm:$0xff]  }
 0x360   : > { %7312 = vmatpush1.bf16.msra.mxu0 %v15962_v55  ;;  %8000 = vmatpush1.bf16.msra.mxu1 %v15965_v56  ;;  %v16052_v55 = vld [vmem:[%s17758_s12 + $0x1440] ss:$16 sps:$4 sm:$0xff]   ;;  %v16055_v56 = vld [vmem:[%s17758_s12 + $0x1448] ss:$16 sps:$4 sm:$0xff]  }
 0x361   : > { %7313 = vmatprep.subr.bf16.mxu0 %v15970_v57  ;;  %8001 = vmatprep.subr.bf16.mxu1 %v15973_v58  ;;  %v16060_v57 = vld [vmem:[%s17758_s12 + $0x1464] ss:$16 sps:$4 sm:$0xff]   ;;  %v16063_v58 = vld [vmem:[%s17758_s12 + $0x146c] ss:$16 sps:$4 sm:$0xff]  }
 0x364   : > { %7314 = vmatpush1.bf16.msra.mxu0 %v15968_v59  ;;  %8002 = vmatpush1.bf16.msra.mxu1 %v15971_v60  ;;  %v16058_v59 = vld [vmem:[%s17758_s12 + $0x1460] ss:$16 sps:$4 sm:$0xff]   ;;  %v16061_v60 = vld [vmem:[%s17758_s12 + $0x1468] ss:$16 sps:$4 sm:$0xff]  }
 0x365   : > { %7315 = vmatprep.subr.bf16.mxu0 %v15976_v61  ;;  %8003 = vmatprep.subr.bf16.mxu1 %v15979_v62  ;;  %v16066_v61 = vld [vmem:[%s17758_s12 + $0x1484] ss:$16 sps:$4 sm:$0xff]   ;;  %v16069_v62 = vld [vmem:[%s17758_s12 + $0x148c] ss:$16 sps:$4 sm:$0xff]  }
 0x368   : > { %7316 = vmatpush1.bf16.msra.mxu0 %v15974_v63  ;;  %8004 = vmatpush1.bf16.msra.mxu1 %v15977_v0  ;;  %v16064_v63 = vld [vmem:[%s17758_s12 + $0x1480] ss:$16 sps:$4 sm:$0xff]   ;;  %v16067_v0 = vld [vmem:[%s17758_s12 + $0x1488] ss:$16 sps:$4 sm:$0xff]  }
 0x369   : > { %7317 = vmatprep.subr.bf16.mxu0 %v15982_v1  ;;  %8005 = vmatprep.subr.bf16.mxu1 %v15985_v2  ;;  %v16072_v1 = vld [vmem:[%s17758_s12 + $0x14a4] ss:$16 sps:$4 sm:$0xff]   ;;  %v16075_v2 = vld [vmem:[%s17758_s12 + $0x14ac] ss:$16 sps:$4 sm:$0xff]  }
 0x36c   : > { %7318 = vmatpush1.bf16.msra.mxu0 %v15980_v3  ;;  %8006 = vmatpush1.bf16.msra.mxu1 %v15983_v4  ;;  %v16070_v3 = vld [vmem:[%s17758_s12 + $0x14a0] ss:$16 sps:$4 sm:$0xff]   ;;  %v16073_v4 = vld [vmem:[%s17758_s12 + $0x14a8] ss:$16 sps:$4 sm:$0xff]  }
 0x36d   : > { %7319 = vmatprep.subr.bf16.mxu0 %v15988_v5  ;;  %8007 = vmatprep.subr.bf16.mxu1 %v15991_v6  ;;  %v16078_v5 = vld [vmem:[%s17758_s12 + $0x14c4] ss:$16 sps:$4 sm:$0xff]   ;;  %v16081_v6 = vld [vmem:[%s17758_s12 + $0x14cc] ss:$16 sps:$4 sm:$0xff]  }
 0x370   : > { %7320 = vmatpush1.bf16.msra.mxu0 %v15986_v7  ;;  %8008 = vmatpush1.bf16.msra.mxu1 %v15989_v8  ;;  %v16076_v7 = vld [vmem:[%s17758_s12 + $0x14c0] ss:$16 sps:$4 sm:$0xff]   ;;  %v16079_v8 = vld [vmem:[%s17758_s12 + $0x14c8] ss:$16 sps:$4 sm:$0xff]  }
 0x371   : > { %7321 = vmatprep.subr.bf16.mxu0 %v15994_v9  ;;  %8009 = vmatprep.subr.bf16.mxu1 %v15997_v10  ;;  %v16084_v9 = vld [vmem:[%s17758_s12 + $0x14e4] ss:$16 sps:$4 sm:$0xff]   ;;  %v16087_v10 = vld [vmem:[%s17758_s12 + $0x14ec] ss:$16 sps:$4 sm:$0xff]  }
 0x374   : > { %7322 = vmatpush1.bf16.msra.mxu0 %v15992_v11  ;;  %8010 = vmatpush1.bf16.msra.mxu1 %v15995_v12  ;;  %v16082_v11 = vld [vmem:[%s17758_s12 + $0x14e0] ss:$16 sps:$4 sm:$0xff]   ;;  %v16085_v12 = vld [vmem:[%s17758_s12 + $0x14e8] ss:$16 sps:$4 sm:$0xff]  }
 0x375   : > { %7323 = vmatprep.subr.bf16.mxu0 %v16000_v13  ;;  %8011 = vmatprep.subr.bf16.mxu1 %v16003_v14  ;;  %v16090_v13 = vld [vmem:[%s17758_s12 + $0x1504] ss:$16 sps:$4 sm:$0xff]   ;;  %v16093_v14 = vld [vmem:[%s17758_s12 + $0x150c] ss:$16 sps:$4 sm:$0xff]  }
 0x378   : > { %7324 = vmatpush1.bf16.msra.mxu0 %v15998_v15  ;;  %8012 = vmatpush1.bf16.msra.mxu1 %v16001_v18  ;;  %v16088_v15 = vld [vmem:[%s17758_s12 + $0x1500] ss:$16 sps:$4 sm:$0xff]   ;;  %v16091_v18 = vld [vmem:[%s17758_s12 + $0x1508] ss:$16 sps:$4 sm:$0xff]  }
 0x379   : > { %7325 = vmatprep.subr.bf16.mxu0 %v16006_v19  ;;  %8013 = vmatprep.subr.bf16.mxu1 %v16009_v22  ;;  %v16096_v19 = vld [vmem:[%s17758_s12 + $0x1524] ss:$16 sps:$4 sm:$0xff]   ;;  %v16099_v22 = vld [vmem:[%s17758_s12 + $0x152c] ss:$16 sps:$4 sm:$0xff]  }
 0x37c   : > { %7326 = vmatpush1.bf16.msra.mxu0 %v16004_v17  ;;  %8014 = vmatpush1.bf16.msra.mxu1 %v16007_v24  ;;  %v16094_v17 = vld [vmem:[%s17758_s12 + $0x1520] ss:$16 sps:$4 sm:$0xff]   ;;  %v16097_v24 = vld [vmem:[%s17758_s12 + $0x1528] ss:$16 sps:$4 sm:$0xff]  }
 0x37d   : > { %7327 = vmatprep.subr.bf16.mxu0 %v16012_v25  ;;  %8015 = vmatprep.subr.bf16.mxu1 %v16015_v26  ;;  %v16102_v25 = vld [vmem:[%s17758_s12 + $0x1544] ss:$16 sps:$4 sm:$0xff]   ;;  %v16105_v26 = vld [vmem:[%s17758_s12 + $0x154c] ss:$16 sps:$4 sm:$0xff]  }
 0x380   : > { %7328 = vmatpush1.bf16.msra.mxu0 %v16010_v21  ;;  %8016 = vmatpush1.bf16.msra.mxu1 %v16013_v28  ;;  %v16100_v21 = vld [vmem:[%s17758_s12 + $0x1540] ss:$16 sps:$4 sm:$0xff]   ;;  %v16103_v28 = vld [vmem:[%s17758_s12 + $0x1548] ss:$16 sps:$4 sm:$0xff]  }
 0x381   : > { %7329 = vmatprep.subr.bf16.mxu0 %v16018_v29  ;;  %8017 = vmatprep.subr.bf16.mxu1 %v16021_v30  ;;  %v16108_v29 = vld [vmem:[%s17758_s12 + $0x1564] ss:$16 sps:$4 sm:$0xff]   ;;  %v16111_v30 = vld [vmem:[%s17758_s12 + $0x156c] ss:$16 sps:$4 sm:$0xff]  }
 0x384   : > { %7330 = vmatpush1.bf16.msra.mxu0 %v16016_v16  ;;  %8018 = vmatpush1.bf16.msra.mxu1 %v16019_v23  ;;  %v16106_v16 = vld [vmem:[%s17758_s12 + $0x1560] ss:$16 sps:$4 sm:$0xff]   ;;  %v16109_v23 = vld [vmem:[%s17758_s12 + $0x1568] ss:$16 sps:$4 sm:$0xff]  }
 0x385   : > { %7331 = vmatprep.subr.bf16.mxu0 %v16024_v33  ;;  %8019 = vmatprep.subr.bf16.mxu1 %v16027_v34  ;;  %v16114_v33 = vld [vmem:[%s17758_s12 + $0x1584] ss:$16 sps:$4 sm:$0xff]   ;;  %v16117_v34 = vld [vmem:[%s17758_s12 + $0x158c] ss:$16 sps:$4 sm:$0xff]  }
 0x388   : > { %7332 = vmatpush1.bf16.msra.mxu0 %v16022_v27  ;;  %8020 = vmatpush1.bf16.msra.mxu1 %v16025_v20  ;;  %v16112_v27 = vld [vmem:[%s17758_s12 + $0x1580] ss:$16 sps:$4 sm:$0xff]   ;;  %v16115_v20 = vld [vmem:[%s17758_s12 + $0x1588] ss:$16 sps:$4 sm:$0xff]  }
 0x389   : > { %7333 = vmatprep.subr.bf16.mxu0 %v16030_v37  ;;  %8021 = vmatprep.subr.bf16.mxu1 %v16033_v38  ;;  %v16120_v37 = vld [vmem:[%s17758_s12 + $0x15a4] ss:$16 sps:$4 sm:$0xff]   ;;  %v16123_v38 = vld [vmem:[%s17758_s12 + $0x15ac] ss:$16 sps:$4 sm:$0xff]  }
 0x38c   : > { %7334 = vmatpush1.bf16.msra.mxu0 %v16028_v31  ;;  %8022 = vmatpush1.bf16.msra.mxu1 %v16031_v32  ;;  %v16118_v31 = vld [vmem:[%s17758_s12 + $0x15a0] ss:$16 sps:$4 sm:$0xff]   ;;  %v16121_v32 = vld [vmem:[%s17758_s12 + $0x15a8] ss:$16 sps:$4 sm:$0xff]  }
 0x38d   : > { %7335 = vmatprep.subr.bf16.mxu0 %v16036_v41  ;;  %8023 = vmatprep.subr.bf16.mxu1 %v16039_v42  ;;  %v16126_v41 = vld [vmem:[%s17758_s12 + $0x15c4] ss:$16 sps:$4 sm:$0xff]   ;;  %v16129_v42 = vld [vmem:[%s17758_s12 + $0x15cc] ss:$16 sps:$4 sm:$0xff]  }
 0x390   : > { %7336 = vmatpush1.bf16.msra.mxu0 %v16034_v35  ;;  %8024 = vmatpush1.bf16.msra.mxu1 %v16037_v36  ;;  %v16124_v35 = vld [vmem:[%s17758_s12 + $0x15c0] ss:$16 sps:$4 sm:$0xff]   ;;  %v16127_v36 = vld [vmem:[%s17758_s12 + $0x15c8] ss:$16 sps:$4 sm:$0xff]  }
 0x391   : > { %7348 = vmatprep.subr.bf16.mxu0 %v16042_v45  ;;  %8036 = vmatprep.subr.bf16.mxu1 %v16045_v46  ;;  %v16132_v45 = vld [vmem:[%s17758_s12 + $0x15e4] ss:$16 sps:$4 sm:$0xff]   ;;  %v16135_v46 = vld [vmem:[%s17758_s12 + $0x15ec] ss:$16 sps:$4 sm:$0xff]  }
 0x393   : > { %7338 = vmatmul.mubr.bf16.vlgmr.msra.gmra.mrb[0].mxu0 %v13129_v47  ;;  %8026 = vmatmul.mubr.bf16.vlgmr.msra.gmra.mrb[0].mxu1 %v13129_v47  ;;  %v16130_v47 = vld [vmem:[%s17758_s12 + $0x15e0] ss:$16 sps:$4 sm:$0xff]  }
 0x394   : > { %7349 = vmatpush1.bf16.msra.mxu0 %v16040_v40  ;;  %8037 = vmatpush1.bf16.msra.mxu1 %v16043_v49  ;;  %v16133_v40 = vld [vmem:[%s17758_s12 + $0x15e8] ss:$16 sps:$4 sm:$0xff]   ;;  %v16138_v49 = vld [vmem:[%s17758_s12 + $0x1604] ss:$16 sps:$4 sm:$0xff]  }
 0x395   : > { %7350 = vmatprep.subr.bf16.mxu0 %v16048_v43  ;;  %8038 = vmatprep.subr.bf16.mxu1 %v16051_v44  ;;  %v16141_v43 = vld [vmem:[%s17758_s12 + $0x160c] ss:$16 sps:$4 sm:$0xff]   ;;  %v13131_v44 = vcombine.low %v18564_v48, %v18569_v39  ;;  %v16144_v48 = vld [vmem:[%s17758_s12 + $0x1624] ss:$16 sps:$4 sm:$0xff]  }
 0x396   : > { %7380 = vmatprep.mubr.bf16.mxu0 %v13132_v50  ;;  %8068 = vmatprep.mubr.bf16.mxu1 %v13132_v50  ;;  %v18642_v50 = vld [vmem:[%s19473_s0 + $0x58] sm:$0xff] }
 0x397   : > { %v16147_v39 = vld [vmem:[%s17758_s12 + $0x162c] ss:$16 sps:$4 sm:$0xff]  }
 0x398   : > { %7351 = vmatpush1.bf16.msra.mxu0 %v16046_v51  ;;  %8039 = vmatpush1.bf16.msra.mxu1 %v16049_v52  ;;  %v18647_v51 = vld [vmem:[%s19473_s0 + $0xd8] sm:$0xff]  ;;  %v16136_v52 = vld [vmem:[%s17758_s12 + $0x1600] ss:$16 sps:$4 sm:$0xff]  }
 0x399   : > { %7352 = vmatprep.subr.bf16.mxu0 %v16054_v53  ;;  %8040 = vmatprep.subr.bf16.mxu1 %v16057_v54  ;;  %v16139_v53 = vld [vmem:[%s17758_s12 + $0x1608] ss:$16 sps:$4 sm:$0xff]   ;;  %v13134_v54 = vcombine.high %v18642_v50, %v18647_v51 }
 0x39c   : > { %7353 = vmatpush1.bf16.msra.mxu0 %v16052_v55  ;;  %8041 = vmatpush1.bf16.msra.mxu1 %v16055_v56  ;;  %v16142_v55 = vld [vmem:[%s17758_s12 + $0x1620] ss:$16 sps:$4 sm:$0xff]   ;;  %v16145_v56 = vld [vmem:[%s17758_s12 + $0x1628] ss:$16 sps:$4 sm:$0xff]  }
 0x39d   : > { %7354 = vmatprep.subr.bf16.mxu0 %v16060_v57  ;;  %8042 = vmatprep.subr.bf16.mxu1 %v16063_v58  ;;  %v16150_v57 = vld [vmem:[%s17758_s12 + $0x1644] ss:$16 sps:$4 sm:$0xff]   ;;  %v16153_v58 = vld [vmem:[%s17758_s12 + $0x164c] ss:$16 sps:$4 sm:$0xff]  }
 0x3a0   : > { %7355 = vmatpush1.bf16.msra.mxu0 %v16058_v59  ;;  %8043 = vmatpush1.bf16.msra.mxu1 %v16061_v60  ;;  %v16148_v59 = vld [vmem:[%s17758_s12 + $0x1640] ss:$16 sps:$4 sm:$0xff]   ;;  %v16151_v60 = vld [vmem:[%s17758_s12 + $0x1648] ss:$16 sps:$4 sm:$0xff]  }
 0x3a1   : > { %7356 = vmatprep.subr.bf16.mxu0 %v16066_v61  ;;  %8044 = vmatprep.subr.bf16.mxu1 %v16069_v62  ;;  %v16156_v61 = vld [vmem:[%s17758_s12 + $0x1664] ss:$16 sps:$4 sm:$0xff]   ;;  %v16159_v62 = vld [vmem:[%s17758_s12 + $0x166c] ss:$16 sps:$4 sm:$0xff]  }
 0x3a4   : > { %7357 = vmatpush1.bf16.msra.mxu0 %v16064_v63  ;;  %8045 = vmatpush1.bf16.msra.mxu1 %v16067_v0  ;;  %v16154_v63 = vld [vmem:[%s17758_s12 + $0x1660] ss:$16 sps:$4 sm:$0xff]   ;;  %v16157_v0 = vld [vmem:[%s17758_s12 + $0x1668] ss:$16 sps:$4 sm:$0xff]  }
 0x3a5   : > { %7358 = vmatprep.subr.bf16.mxu0 %v16072_v1  ;;  %8046 = vmatprep.subr.bf16.mxu1 %v16075_v2  ;;  %v16162_v1 = vld [vmem:[%s17758_s12 + $0x1684] ss:$16 sps:$4 sm:$0xff]   ;;  %v16165_v2 = vld [vmem:[%s17758_s12 + $0x168c] ss:$16 sps:$4 sm:$0xff]  }
 0x3a8   : > { %7359 = vmatpush1.bf16.msra.mxu0 %v16070_v3  ;;  %8047 = vmatpush1.bf16.msra.mxu1 %v16073_v4  ;;  %v16160_v3 = vld [vmem:[%s17758_s12 + $0x1680] ss:$16 sps:$4 sm:$0xff]   ;;  %v16163_v4 = vld [vmem:[%s17758_s12 + $0x1688] ss:$16 sps:$4 sm:$0xff]  }
 0x3a9   : > { %7360 = vmatprep.subr.bf16.mxu0 %v16078_v5  ;;  %8048 = vmatprep.subr.bf16.mxu1 %v16081_v6  ;;  %v16168_v5 = vld [vmem:[%s17758_s12 + $0x16a4] ss:$16 sps:$4 sm:$0xff]   ;;  %v16171_v6 = vld [vmem:[%s17758_s12 + $0x16ac] ss:$16 sps:$4 sm:$0xff]  }
 0x3ac   : > { %7361 = vmatpush1.bf16.msra.mxu0 %v16076_v7  ;;  %8049 = vmatpush1.bf16.msra.mxu1 %v16079_v8  ;;  %v16166_v7 = vld [vmem:[%s17758_s12 + $0x16a0] ss:$16 sps:$4 sm:$0xff]   ;;  %v16169_v8 = vld [vmem:[%s17758_s12 + $0x16a8] ss:$16 sps:$4 sm:$0xff]  }
 0x3ad   : > { %7362 = vmatprep.subr.bf16.mxu0 %v16084_v9  ;;  %8050 = vmatprep.subr.bf16.mxu1 %v16087_v10  ;;  %v16174_v9 = vld [vmem:[%s17758_s12 + $0x16c4] ss:$16 sps:$4 sm:$0xff]   ;;  %v16177_v10 = vld [vmem:[%s17758_s12 + $0x16cc] ss:$16 sps:$4 sm:$0xff]  }
 0x3b0   : > { %7363 = vmatpush1.bf16.msra.mxu0 %v16082_v11  ;;  %8051 = vmatpush1.bf16.msra.mxu1 %v16085_v12  ;;  %v16172_v11 = vld [vmem:[%s17758_s12 + $0x16c0] ss:$16 sps:$4 sm:$0xff]   ;;  %v16175_v12 = vld [vmem:[%s17758_s12 + $0x16c8] ss:$16 sps:$4 sm:$0xff]  }
 0x3b1   : > { %7364 = vmatprep.subr.bf16.mxu0 %v16090_v13  ;;  %8052 = vmatprep.subr.bf16.mxu1 %v16093_v14  ;;  %v16180_v13 = vld [vmem:[%s17758_s12 + $0x16e4] ss:$16 sps:$4 sm:$0xff]   ;;  %v16183_v14 = vld [vmem:[%s17758_s12 + $0x16ec] ss:$16 sps:$4 sm:$0xff]  }
 0x3b4   : > { %7365 = vmatpush1.bf16.msra.mxu0 %v16088_v15  ;;  %8053 = vmatpush1.bf16.msra.mxu1 %v16091_v18  ;;  %v16178_v15 = vld [vmem:[%s17758_s12 + $0x16e0] ss:$16 sps:$4 sm:$0xff]   ;;  %v16181_v18 = vld [vmem:[%s17758_s12 + $0x16e8] ss:$16 sps:$4 sm:$0xff]  }
 0x3b5   : > { %7366 = vmatprep.subr.bf16.mxu0 %v16096_v19  ;;  %8054 = vmatprep.subr.bf16.mxu1 %v16099_v22  ;;  %v16186_v19 = vld [vmem:[%s17758_s12 + $0x1704] ss:$16 sps:$4 sm:$0xff]   ;;  %v16189_v22 = vld [vmem:[%s17758_s12 + $0x170c] ss:$16 sps:$4 sm:$0xff]  }
 0x3b8   : > { %7367 = vmatpush1.bf16.msra.mxu0 %v16094_v17  ;;  %8055 = vmatpush1.bf16.msra.mxu1 %v16097_v24  ;;  %v16184_v17 = vld [vmem:[%s17758_s12 + $0x1700] ss:$16 sps:$4 sm:$0xff]   ;;  %v16187_v24 = vld [vmem:[%s17758_s12 + $0x1708] ss:$16 sps:$4 sm:$0xff]  }
 0x3b9   : > { %7368 = vmatprep.subr.bf16.mxu0 %v16102_v25  ;;  %8056 = vmatprep.subr.bf16.mxu1 %v16105_v26  ;;  %v16192_v25 = vld [vmem:[%s17758_s12 + $0x1724] ss:$16 sps:$4 sm:$0xff]   ;;  %v16195_v26 = vld [vmem:[%s17758_s12 + $0x172c] ss:$16 sps:$4 sm:$0xff]  }
 0x3bc   : > { %7369 = vmatpush1.bf16.msra.mxu0 %v16100_v21  ;;  %8057 = vmatpush1.bf16.msra.mxu1 %v16103_v28  ;;  %v16190_v21 = vld [vmem:[%s17758_s12 + $0x1720] ss:$16 sps:$4 sm:$0xff]   ;;  %v16193_v28 = vld [vmem:[%s17758_s12 + $0x1728] ss:$16 sps:$4 sm:$0xff]  }
 0x3bd   : > { %7370 = vmatprep.subr.bf16.mxu0 %v16108_v29  ;;  %8058 = vmatprep.subr.bf16.mxu1 %v16111_v30  ;;  %v16198_v29 = vld [vmem:[%s17758_s12 + $0x1744] ss:$16 sps:$4 sm:$0xff]   ;;  %v16201_v30 = vld [vmem:[%s17758_s12 + $0x174c] ss:$16 sps:$4 sm:$0xff]  }
 0x3c0   : > { %7371 = vmatpush1.bf16.msra.mxu0 %v16106_v16  ;;  %8059 = vmatpush1.bf16.msra.mxu1 %v16109_v23  ;;  %v16196_v16 = vld [vmem:[%s17758_s12 + $0x1740] ss:$16 sps:$4 sm:$0xff]   ;;  %v16199_v23 = vld [vmem:[%s17758_s12 + $0x1748] ss:$16 sps:$4 sm:$0xff]  }
 0x3c1   : > { %7372 = vmatprep.subr.bf16.mxu0 %v16114_v33  ;;  %8060 = vmatprep.subr.bf16.mxu1 %v16117_v34  ;;  %v16204_v33 = vld [vmem:[%s17758_s12 + $0x1764] ss:$16 sps:$4 sm:$0xff]   ;;  %v16207_v34 = vld [vmem:[%s17758_s12 + $0x176c] ss:$16 sps:$4 sm:$0xff]  }
 0x3c4   : > { %7373 = vmatpush1.bf16.msra.mxu0 %v16112_v27  ;;  %8061 = vmatpush1.bf16.msra.mxu1 %v16115_v20  ;;  %v16202_v27 = vld [vmem:[%s17758_s12 + $0x1760] ss:$16 sps:$4 sm:$0xff]   ;;  %v16205_v20 = vld [vmem:[%s17758_s12 + $0x1768] ss:$16 sps:$4 sm:$0xff]  }
 0x3c5   : > { %7374 = vmatprep.subr.bf16.mxu0 %v16120_v37  ;;  %8062 = vmatprep.subr.bf16.mxu1 %v16123_v38  ;;  %v16210_v37 = vld [vmem:[%s17758_s12 + $0x1784] ss:$16 sps:$4 sm:$0xff]   ;;  %v16213_v38 = vld [vmem:[%s17758_s12 + $0x178c] ss:$16 sps:$4 sm:$0xff]  }
 0x3c8   : > { %7375 = vmatpush1.bf16.msra.mxu0 %v16118_v31  ;;  %8063 = vmatpush1.bf16.msra.mxu1 %v16121_v32  ;;  %v16208_v31 = vld [vmem:[%s17758_s12 + $0x1780] ss:$16 sps:$4 sm:$0xff]   ;;  %v16211_v32 = vld [vmem:[%s17758_s12 + $0x1788] ss:$16 sps:$4 sm:$0xff]  }
 0x3c9   : > { %7376 = vmatprep.subr.bf16.mxu0 %v16126_v41  ;;  %8064 = vmatprep.subr.bf16.mxu1 %v16129_v42  ;;  %v16216_v41 = vld [vmem:[%s17758_s12 + $0x17a4] ss:$16 sps:$4 sm:$0xff]   ;;  %v16219_v42 = vld [vmem:[%s17758_s12 + $0x17ac] ss:$16 sps:$4 sm:$0xff]  }
 0x3cc   : > { %7377 = vmatpush1.bf16.msra.mxu0 %v16124_v35  ;;  %8065 = vmatpush1.bf16.msra.mxu1 %v16127_v36  ;;  %v16214_v35 = vld [vmem:[%s17758_s12 + $0x17a0] ss:$16 sps:$4 sm:$0xff]   ;;  %v16217_v36 = vld [vmem:[%s17758_s12 + $0x17a8] ss:$16 sps:$4 sm:$0xff]  }
 0x3cd   : > { %7378 = vmatprep.subr.bf16.mxu0 %v16132_v45  ;;  %8066 = vmatprep.subr.bf16.mxu1 %v16135_v46  ;;  %v16222_v45 = vld [vmem:[%s17758_s12 + $0x17c4] ss:$16 sps:$4 sm:$0xff]   ;;  %v16225_v46 = vld [vmem:[%s17758_s12 + $0x17cc] ss:$16 sps:$4 sm:$0xff]  }
 0x3d0   : > { %7379 = vmatpush1.bf16.msra.mxu0 %v16130_v47  ;;  %8067 = vmatpush1.bf16.msra.mxu1 %v16133_v40  ;;  %v16220_v47 = vld [vmem:[%s17758_s12 + $0x17c0] ss:$16 sps:$4 sm:$0xff]   ;;  %v16223_v40 = vld [vmem:[%s17758_s12 + $0x17c8] ss:$16 sps:$4 sm:$0xff]  }
 0x3d1   : > { %7391 = vmatprep.subr.bf16.mxu0 %v16138_v49  ;;  %8079 = vmatprep.subr.bf16.mxu1 %v16141_v43  ;;  %v16228_v49 = vld [vmem:[%s17758_s12 + $0x17e4] ss:$16 sps:$4 sm:$0xff]   ;;  %v16231_v43 = vld [vmem:[%s17758_s12 + $0x17ec] ss:$16 sps:$4 sm:$0xff]  }
 0x3d3   : > { %7381 = vmatmul.mubr.bf16.vlgmr.msra.gmra.mrb[0].mxu0 %v13131_v44  ;;  %8069 = vmatmul.mubr.bf16.vlgmr.msra.gmra.mrb[0].mxu1 %v13131_v44  ;;  %v16226_v44 = vld [vmem:[%s17758_s12 + $0x17e0] ss:$16 sps:$4 sm:$0xff]  }
 0x3d4   : > { %7392 = vmatpush1.bf16.msra.mxu0 %v16136_v52  ;;  %8080 = vmatpush1.bf16.msra.mxu1 %v16139_v53  ;;  %v16229_v52 = vld [vmem:[%s17758_s12 + $0x17e8] ss:$16 sps:$4 sm:$0xff]   ;;  %v16234_v53 = vld [vmem:[%s17758_s12 + $0x1804] ss:$16 sps:$4 sm:$0xff]  }
 0x3d5   : > { %7393 = vmatprep.subr.bf16.mxu0 %v16144_v48  ;;  %8081 = vmatprep.subr.bf16.mxu1 %v16147_v39  ;;  %v16237_v48 = vld [vmem:[%s17758_s12 + $0x180c] ss:$16 sps:$4 sm:$0xff]   ;;  %v13133_v39 = vcombine.low %v18642_v50, %v18647_v51  ;;  %v16240_v50 = vld [vmem:[%s17758_s12 + $0x1824] ss:$16 sps:$4 sm:$0xff]  }
 0x3d6   : > { %7423 = vmatprep.mubr.bf16.mxu0 %v13134_v54  ;;  %8111 = vmatprep.mubr.bf16.mxu1 %v13134_v54  ;;  %v18720_v54 = vld [vmem:[%s19473_s0 + $0x60] sm:$0xff] }
 0x3d7   : > { %v16243_v51 = vld [vmem:[%s17758_s12 + $0x182c] ss:$16 sps:$4 sm:$0xff]  }
 0x3d8   : > { %7394 = vmatpush1.bf16.msra.mxu0 %v16142_v55  ;;  %8082 = vmatpush1.bf16.msra.mxu1 %v16145_v56  ;;  %v18725_v55 = vld [vmem:[%s19473_s0 + $0xe0] sm:$0xff] }
 0x3d9   : > { %7395 = vmatprep.subr.bf16.mxu0 %v16150_v57  ;;  %8083 = vmatprep.subr.bf16.mxu1 %v16153_v58  ;;  %v16232_v56 = vld [vmem:[%s17758_s12 + $0x1800] ss:$16 sps:$4 sm:$0xff]   ;;  %v16235_v57 = vld [vmem:[%s17758_s12 + $0x1808] ss:$16 sps:$4 sm:$0xff]   ;;  %v13136_v58 = vcombine.high %v18720_v54, %v18725_v55 }
 0x3dc   : > { %7396 = vmatpush1.bf16.msra.mxu0 %v16148_v59  ;;  %8084 = vmatpush1.bf16.msra.mxu1 %v16151_v60  ;;  %v16238_v59 = vld [vmem:[%s17758_s12 + $0x1820] ss:$16 sps:$4 sm:$0xff]   ;;  %v16241_v60 = vld [vmem:[%s17758_s12 + $0x1828] ss:$16 sps:$4 sm:$0xff]  }
 0x3dd   : > { %7397 = vmatprep.subr.bf16.mxu0 %v16156_v61  ;;  %8085 = vmatprep.subr.bf16.mxu1 %v16159_v62  ;;  %v16246_v61 = vld [vmem:[%s17758_s12 + $0x1844] ss:$16 sps:$4 sm:$0xff]   ;;  %v16249_v62 = vld [vmem:[%s17758_s12 + $0x184c] ss:$16 sps:$4 sm:$0xff]  }
 0x3e0   : > { %7398 = vmatpush1.bf16.msra.mxu0 %v16154_v63  ;;  %8086 = vmatpush1.bf16.msra.mxu1 %v16157_v0  ;;  %v16244_v63 = vld [vmem:[%s17758_s12 + $0x1840] ss:$16 sps:$4 sm:$0xff]   ;;  %v16247_v0 = vld [vmem:[%s17758_s12 + $0x1848] ss:$16 sps:$4 sm:$0xff]  }
 0x3e1   : > { %7399 = vmatprep.subr.bf16.mxu0 %v16162_v1  ;;  %8087 = vmatprep.subr.bf16.mxu1 %v16165_v2  ;;  %v16252_v1 = vld [vmem:[%s17758_s12 + $0x1864] ss:$16 sps:$4 sm:$0xff]   ;;  %v16255_v2 = vld [vmem:[%s17758_s12 + $0x186c] ss:$16 sps:$4 sm:$0xff]  }
 0x3e4   : > { %7400 = vmatpush1.bf16.msra.mxu0 %v16160_v3  ;;  %8088 = vmatpush1.bf16.msra.mxu1 %v16163_v4  ;;  %v16250_v3 = vld [vmem:[%s17758_s12 + $0x1860] ss:$16 sps:$4 sm:$0xff]   ;;  %v16253_v4 = vld [vmem:[%s17758_s12 + $0x1868] ss:$16 sps:$4 sm:$0xff]  }
 0x3e5   : > { %7401 = vmatprep.subr.bf16.mxu0 %v16168_v5  ;;  %8089 = vmatprep.subr.bf16.mxu1 %v16171_v6  ;;  %v16258_v5 = vld [vmem:[%s17758_s12 + $0x1884] ss:$16 sps:$4 sm:$0xff]   ;;  %v16261_v6 = vld [vmem:[%s17758_s12 + $0x188c] ss:$16 sps:$4 sm:$0xff]  }
 0x3e8   : > { %7402 = vmatpush1.bf16.msra.mxu0 %v16166_v7  ;;  %8090 = vmatpush1.bf16.msra.mxu1 %v16169_v8  ;;  %v16256_v7 = vld [vmem:[%s17758_s12 + $0x1880] ss:$16 sps:$4 sm:$0xff]   ;;  %v16259_v8 = vld [vmem:[%s17758_s12 + $0x1888] ss:$16 sps:$4 sm:$0xff]  }
 0x3e9   : > { %7403 = vmatprep.subr.bf16.mxu0 %v16174_v9  ;;  %8091 = vmatprep.subr.bf16.mxu1 %v16177_v10  ;;  %v16264_v9 = vld [vmem:[%s17758_s12 + $0x18a4] ss:$16 sps:$4 sm:$0xff]   ;;  %v16267_v10 = vld [vmem:[%s17758_s12 + $0x18ac] ss:$16 sps:$4 sm:$0xff]  }
 0x3ec   : > { %7404 = vmatpush1.bf16.msra.mxu0 %v16172_v11  ;;  %8092 = vmatpush1.bf16.msra.mxu1 %v16175_v12  ;;  %v16262_v11 = vld [vmem:[%s17758_s12 + $0x18a0] ss:$16 sps:$4 sm:$0xff]   ;;  %v16265_v12 = vld [vmem:[%s17758_s12 + $0x18a8] ss:$16 sps:$4 sm:$0xff]  }
 0x3ed   : > { %7405 = vmatprep.subr.bf16.mxu0 %v16180_v13  ;;  %8093 = vmatprep.subr.bf16.mxu1 %v16183_v14  ;;  %v16270_v13 = vld [vmem:[%s17758_s12 + $0x18c4] ss:$16 sps:$4 sm:$0xff]   ;;  %v16273_v14 = vld [vmem:[%s17758_s12 + $0x18cc] ss:$16 sps:$4 sm:$0xff]  }
 0x3f0   : > { %7406 = vmatpush1.bf16.msra.mxu0 %v16178_v15  ;;  %8094 = vmatpush1.bf16.msra.mxu1 %v16181_v18  ;;  %v16268_v15 = vld [vmem:[%s17758_s12 + $0x18c0] ss:$16 sps:$4 sm:$0xff]   ;;  %v16271_v18 = vld [vmem:[%s17758_s12 + $0x18c8] ss:$16 sps:$4 sm:$0xff]  }
 0x3f1   : > { %7407 = vmatprep.subr.bf16.mxu0 %v16186_v19  ;;  %8095 = vmatprep.subr.bf16.mxu1 %v16189_v22  ;;  %v16276_v19 = vld [vmem:[%s17758_s12 + $0x18e4] ss:$16 sps:$4 sm:$0xff]   ;;  %v16279_v22 = vld [vmem:[%s17758_s12 + $0x18ec] ss:$16 sps:$4 sm:$0xff]  }
 0x3f4   : > { %7408 = vmatpush1.bf16.msra.mxu0 %v16184_v17  ;;  %8096 = vmatpush1.bf16.msra.mxu1 %v16187_v24  ;;  %v16274_v17 = vld [vmem:[%s17758_s12 + $0x18e0] ss:$16 sps:$4 sm:$0xff]   ;;  %v16277_v24 = vld [vmem:[%s17758_s12 + $0x18e8] ss:$16 sps:$4 sm:$0xff]  }
 0x3f5   : > { %7409 = vmatprep.subr.bf16.mxu0 %v16192_v25  ;;  %8097 = vmatprep.subr.bf16.mxu1 %v16195_v26  ;;  %v16282_v25 = vld [vmem:[%s17758_s12 + $0x1904] ss:$16 sps:$4 sm:$0xff]   ;;  %v16285_v26 = vld [vmem:[%s17758_s12 + $0x190c] ss:$16 sps:$4 sm:$0xff]  }
 0x3f8   : > { %7410 = vmatpush1.bf16.msra.mxu0 %v16190_v21  ;;  %8098 = vmatpush1.bf16.msra.mxu1 %v16193_v28  ;;  %v16280_v21 = vld [vmem:[%s17758_s12 + $0x1900] ss:$16 sps:$4 sm:$0xff]   ;;  %v16283_v28 = vld [vmem:[%s17758_s12 + $0x1908] ss:$16 sps:$4 sm:$0xff]  }
 0x3f9   : > { %7411 = vmatprep.subr.bf16.mxu0 %v16198_v29  ;;  %8099 = vmatprep.subr.bf16.mxu1 %v16201_v30  ;;  %v16288_v29 = vld [vmem:[%s17758_s12 + $0x1924] ss:$16 sps:$4 sm:$0xff]   ;;  %v16291_v30 = vld [vmem:[%s17758_s12 + $0x192c] ss:$16 sps:$4 sm:$0xff]  }
 0x3fc   : > { %7412 = vmatpush1.bf16.msra.mxu0 %v16196_v16  ;;  %8100 = vmatpush1.bf16.msra.mxu1 %v16199_v23  ;;  %v16286_v16 = vld [vmem:[%s17758_s12 + $0x1920] ss:$16 sps:$4 sm:$0xff]   ;;  %v16289_v23 = vld [vmem:[%s17758_s12 + $0x1928] ss:$16 sps:$4 sm:$0xff]  }
 0x3fd   : > { %7413 = vmatprep.subr.bf16.mxu0 %v16204_v33  ;;  %8101 = vmatprep.subr.bf16.mxu1 %v16207_v34  ;;  %v16294_v33 = vld [vmem:[%s17758_s12 + $0x1944] ss:$16 sps:$4 sm:$0xff]   ;;  %v16297_v34 = vld [vmem:[%s17758_s12 + $0x194c] ss:$16 sps:$4 sm:$0xff]  }
 0x400   : > { %7414 = vmatpush1.bf16.msra.mxu0 %v16202_v27  ;;  %8102 = vmatpush1.bf16.msra.mxu1 %v16205_v20  ;;  %v16292_v27 = vld [vmem:[%s17758_s12 + $0x1940] ss:$16 sps:$4 sm:$0xff]   ;;  %v16295_v20 = vld [vmem:[%s17758_s12 + $0x1948] ss:$16 sps:$4 sm:$0xff]  }
 0x401   : > { %7415 = vmatprep.subr.bf16.mxu0 %v16210_v37  ;;  %8103 = vmatprep.subr.bf16.mxu1 %v16213_v38  ;;  %v16300_v37 = vld [vmem:[%s17758_s12 + $0x1964] ss:$16 sps:$4 sm:$0xff]   ;;  %v16303_v38 = vld [vmem:[%s17758_s12 + $0x196c] ss:$16 sps:$4 sm:$0xff]  }
 0x404   : > { %7416 = vmatpush1.bf16.msra.mxu0 %v16208_v31  ;;  %8104 = vmatpush1.bf16.msra.mxu1 %v16211_v32  ;;  %v16298_v31 = vld [vmem:[%s17758_s12 + $0x1960] ss:$16 sps:$4 sm:$0xff]   ;;  %v16301_v32 = vld [vmem:[%s17758_s12 + $0x1968] ss:$16 sps:$4 sm:$0xff]  }
 0x405   : > { %7417 = vmatprep.subr.bf16.mxu0 %v16216_v41  ;;  %8105 = vmatprep.subr.bf16.mxu1 %v16219_v42  ;;  %v16306_v41 = vld [vmem:[%s17758_s12 + $0x1984] ss:$16 sps:$4 sm:$0xff]   ;;  %v16309_v42 = vld [vmem:[%s17758_s12 + $0x198c] ss:$16 sps:$4 sm:$0xff]  }
 0x408   : > { %7418 = vmatpush1.bf16.msra.mxu0 %v16214_v35  ;;  %8106 = vmatpush1.bf16.msra.mxu1 %v16217_v36  ;;  %v16304_v35 = vld [vmem:[%s17758_s12 + $0x1980] ss:$16 sps:$4 sm:$0xff]   ;;  %v16307_v36 = vld [vmem:[%s17758_s12 + $0x1988] ss:$16 sps:$4 sm:$0xff]  }
 0x409   : > { %7419 = vmatprep.subr.bf16.mxu0 %v16222_v45  ;;  %8107 = vmatprep.subr.bf16.mxu1 %v16225_v46  ;;  %v16312_v45 = vld [vmem:[%s17758_s12 + $0x19a4] ss:$16 sps:$4 sm:$0xff]   ;;  %v16315_v46 = vld [vmem:[%s17758_s12 + $0x19ac] ss:$16 sps:$4 sm:$0xff]  }
 0x40c   : > { %7420 = vmatpush1.bf16.msra.mxu0 %v16220_v47  ;;  %8108 = vmatpush1.bf16.msra.mxu1 %v16223_v40  ;;  %v16310_v47 = vld [vmem:[%s17758_s12 + $0x19a0] ss:$16 sps:$4 sm:$0xff]   ;;  %v16313_v40 = vld [vmem:[%s17758_s12 + $0x19a8] ss:$16 sps:$4 sm:$0xff]  }
 0x40d   : > { %7421 = vmatprep.subr.bf16.mxu0 %v16228_v49  ;;  %8109 = vmatprep.subr.bf16.mxu1 %v16231_v43  ;;  %v16318_v49 = vld [vmem:[%s17758_s12 + $0x19c4] ss:$16 sps:$4 sm:$0xff]   ;;  %v16321_v43 = vld [vmem:[%s17758_s12 + $0x19cc] ss:$16 sps:$4 sm:$0xff]  }
 0x410   : > { %7422 = vmatpush1.bf16.msra.mxu0 %v16226_v44  ;;  %8110 = vmatpush1.bf16.msra.mxu1 %v16229_v52  ;;  %v16316_v44 = vld [vmem:[%s17758_s12 + $0x19c0] ss:$16 sps:$4 sm:$0xff]   ;;  %v16319_v52 = vld [vmem:[%s17758_s12 + $0x19c8] ss:$16 sps:$4 sm:$0xff]  }
 0x411   : > { %7434 = vmatprep.subr.bf16.mxu0 %v16234_v53  ;;  %8122 = vmatprep.subr.bf16.mxu1 %v16237_v48  ;;  %v16324_v53 = vld [vmem:[%s17758_s12 + $0x19e4] ss:$16 sps:$4 sm:$0xff]   ;;  %v16327_v48 = vld [vmem:[%s17758_s12 + $0x19ec] ss:$16 sps:$4 sm:$0xff]  }
 0x413   : > { %7424 = vmatmul.mubr.bf16.vlgmr.msra.gmra.mrb[0].mxu0 %v13133_v39  ;;  %8112 = vmatmul.mubr.bf16.vlgmr.msra.gmra.mrb[0].mxu1 %v13133_v39  ;;  %v16322_v39 = vld [vmem:[%s17758_s12 + $0x19e0] ss:$16 sps:$4 sm:$0xff]  }
 0x414   : > { %7435 = vmatpush1.bf16.msra.mxu0 %v16232_v56  ;;  %8123 = vmatpush1.bf16.msra.mxu1 %v16235_v57  ;;  %v16325_v56 = vld [vmem:[%s17758_s12 + $0x19e8] ss:$16 sps:$4 sm:$0xff]   ;;  %v16330_v57 = vld [vmem:[%s17758_s12 + $0x1a04] ss:$16 sps:$4 sm:$0xff]  }
 0x415   : > { %7436 = vmatprep.subr.bf16.mxu0 %v16240_v50  ;;  %8124 = vmatprep.subr.bf16.mxu1 %v16243_v51  ;;  %v16333_v50 = vld [vmem:[%s17758_s12 + $0x1a0c] ss:$16 sps:$4 sm:$0xff]   ;;  %v13135_v51 = vcombine.low %v18720_v54, %v18725_v55  ;;  %v16336_v54 = vld [vmem:[%s17758_s12 + $0x1a24] ss:$16 sps:$4 sm:$0xff]  }
 0x416   : > { %7466 = vmatprep.mubr.bf16.mxu0 %v13136_v58  ;;  %8154 = vmatprep.mubr.bf16.mxu1 %v13136_v58  ;;  %v18798_v58 = vld [vmem:[%s19473_s0 + $0x68] sm:$0xff] }
 0x417   : > { %v16339_v55 = vld [vmem:[%s17758_s12 + $0x1a2c] ss:$16 sps:$4 sm:$0xff]  }
 0x418   : > { %7437 = vmatpush1.bf16.msra.mxu0 %v16238_v59  ;;  %8125 = vmatpush1.bf16.msra.mxu1 %v16241_v60  ;;  %v18803_v59 = vld [vmem:[%s19473_s0 + $0xe8] sm:$0xff]  ;;  %v16328_v60 = vld [vmem:[%s17758_s12 + $0x1a00] ss:$16 sps:$4 sm:$0xff]  }
 0x419   : > { %7438 = vmatprep.subr.bf16.mxu0 %v16246_v61  ;;  %8126 = vmatprep.subr.bf16.mxu1 %v16249_v62  ;;  %v16331_v61 = vld [vmem:[%s17758_s12 + $0x1a08] ss:$16 sps:$4 sm:$0xff]   ;;  %v13138_v62 = vcombine.high %v18798_v58, %v18803_v59 }
 0x41c   : > { %7439 = vmatpush1.bf16.msra.mxu0 %v16244_v63  ;;  %8127 = vmatpush1.bf16.msra.mxu1 %v16247_v0  ;;  %v16334_v63 = vld [vmem:[%s17758_s12 + $0x1a20] ss:$16 sps:$4 sm:$0xff]   ;;  %v16337_v0 = vld [vmem:[%s17758_s12 + $0x1a28] ss:$16 sps:$4 sm:$0xff]  }
 0x41d   : > { %7440 = vmatprep.subr.bf16.mxu0 %v16252_v1  ;;  %8128 = vmatprep.subr.bf16.mxu1 %v16255_v2  ;;  %v16342_v1 = vld [vmem:[%s17758_s12 + $0x1a44] ss:$16 sps:$4 sm:$0xff]   ;;  %v16345_v2 = vld [vmem:[%s17758_s12 + $0x1a4c] ss:$16 sps:$4 sm:$0xff]  }
 0x420   : > { %7441 = vmatpush1.bf16.msra.mxu0 %v16250_v3  ;;  %8129 = vmatpush1.bf16.msra.mxu1 %v16253_v4  ;;  %v16340_v3 = vld [vmem:[%s17758_s12 + $0x1a40] ss:$16 sps:$4 sm:$0xff]   ;;  %v16343_v4 = vld [vmem:[%s17758_s12 + $0x1a48] ss:$16 sps:$4 sm:$0xff]  }
 0x421   : > { %7442 = vmatprep.subr.bf16.mxu0 %v16258_v5  ;;  %8130 = vmatprep.subr.bf16.mxu1 %v16261_v6  ;;  %v16348_v5 = vld [vmem:[%s17758_s12 + $0x1a64] ss:$16 sps:$4 sm:$0xff]   ;;  %v16351_v6 = vld [vmem:[%s17758_s12 + $0x1a6c] ss:$16 sps:$4 sm:$0xff]  }
 0x424   : > { %7443 = vmatpush1.bf16.msra.mxu0 %v16256_v7  ;;  %8131 = vmatpush1.bf16.msra.mxu1 %v16259_v8  ;;  %v16346_v7 = vld [vmem:[%s17758_s12 + $0x1a60] ss:$16 sps:$4 sm:$0xff]   ;;  %v16349_v8 = vld [vmem:[%s17758_s12 + $0x1a68] ss:$16 sps:$4 sm:$0xff]  }
 0x425   : > { %7444 = vmatprep.subr.bf16.mxu0 %v16264_v9  ;;  %8132 = vmatprep.subr.bf16.mxu1 %v16267_v10  ;;  %v16354_v9 = vld [vmem:[%s17758_s12 + $0x1a84] ss:$16 sps:$4 sm:$0xff]   ;;  %v16357_v10 = vld [vmem:[%s17758_s12 + $0x1a8c] ss:$16 sps:$4 sm:$0xff]  }
 0x428   : > { %7445 = vmatpush1.bf16.msra.mxu0 %v16262_v11  ;;  %8133 = vmatpush1.bf16.msra.mxu1 %v16265_v12  ;;  %v16352_v11 = vld [vmem:[%s17758_s12 + $0x1a80] ss:$16 sps:$4 sm:$0xff]   ;;  %v16355_v12 = vld [vmem:[%s17758_s12 + $0x1a88] ss:$16 sps:$4 sm:$0xff]  }
 0x429   : > { %7446 = vmatprep.subr.bf16.mxu0 %v16270_v13  ;;  %8134 = vmatprep.subr.bf16.mxu1 %v16273_v14  ;;  %v16360_v13 = vld [vmem:[%s17758_s12 + $0x1aa4] ss:$16 sps:$4 sm:$0xff]   ;;  %v16363_v14 = vld [vmem:[%s17758_s12 + $0x1aac] ss:$16 sps:$4 sm:$0xff]  }
 0x42c   : > { %7447 = vmatpush1.bf16.msra.mxu0 %v16268_v15  ;;  %8135 = vmatpush1.bf16.msra.mxu1 %v16271_v18  ;;  %v16358_v15 = vld [vmem:[%s17758_s12 + $0x1aa0] ss:$16 sps:$4 sm:$0xff]   ;;  %v16361_v18 = vld [vmem:[%s17758_s12 + $0x1aa8] ss:$16 sps:$4 sm:$0xff]  }
 0x42d   : > { %7448 = vmatprep.subr.bf16.mxu0 %v16276_v19  ;;  %8136 = vmatprep.subr.bf16.mxu1 %v16279_v22  ;;  %v16366_v19 = vld [vmem:[%s17758_s12 + $0x1ac4] ss:$16 sps:$4 sm:$0xff]   ;;  %v16369_v22 = vld [vmem:[%s17758_s12 + $0x1acc] ss:$16 sps:$4 sm:$0xff]  }
 0x430   : > { %7449 = vmatpush1.bf16.msra.mxu0 %v16274_v17  ;;  %8137 = vmatpush1.bf16.msra.mxu1 %v16277_v24  ;;  %v16364_v17 = vld [vmem:[%s17758_s12 + $0x1ac0] ss:$16 sps:$4 sm:$0xff]   ;;  %v16367_v24 = vld [vmem:[%s17758_s12 + $0x1ac8] ss:$16 sps:$4 sm:$0xff]  }
 0x431   : > { %7450 = vmatprep.subr.bf16.mxu0 %v16282_v25  ;;  %8138 = vmatprep.subr.bf16.mxu1 %v16285_v26  ;;  %v16372_v25 = vld [vmem:[%s17758_s12 + $0x1ae4] ss:$16 sps:$4 sm:$0xff]   ;;  %v16375_v26 = vld [vmem:[%s17758_s12 + $0x1aec] ss:$16 sps:$4 sm:$0xff]  }
 0x434   : > { %7451 = vmatpush1.bf16.msra.mxu0 %v16280_v21  ;;  %8139 = vmatpush1.bf16.msra.mxu1 %v16283_v28  ;;  %v16370_v21 = vld [vmem:[%s17758_s12 + $0x1ae0] ss:$16 sps:$4 sm:$0xff]   ;;  %v16373_v28 = vld [vmem:[%s17758_s12 + $0x1ae8] ss:$16 sps:$4 sm:$0xff]  }
 0x435   : > { %7452 = vmatprep.subr.bf16.mxu0 %v16288_v29  ;;  %8140 = vmatprep.subr.bf16.mxu1 %v16291_v30  ;;  %v16378_v29 = vld [vmem:[%s17758_s12 + $0x1b04] ss:$16 sps:$4 sm:$0xff]   ;;  %v16381_v30 = vld [vmem:[%s17758_s12 + $0x1b0c] ss:$16 sps:$4 sm:$0xff]  }
 0x438   : > { %7453 = vmatpush1.bf16.msra.mxu0 %v16286_v16  ;;  %8141 = vmatpush1.bf16.msra.mxu1 %v16289_v23  ;;  %v16376_v16 = vld [vmem:[%s17758_s12 + $0x1b00] ss:$16 sps:$4 sm:$0xff]   ;;  %v16379_v23 = vld [vmem:[%s17758_s12 + $0x1b08] ss:$16 sps:$4 sm:$0xff]  }
 0x439   : > { %7454 = vmatprep.subr.bf16.mxu0 %v16294_v33  ;;  %8142 = vmatprep.subr.bf16.mxu1 %v16297_v34  ;;  %v16384_v33 = vld [vmem:[%s17758_s12 + $0x1b24] ss:$16 sps:$4 sm:$0xff]   ;;  %v16387_v34 = vld [vmem:[%s17758_s12 + $0x1b2c] ss:$16 sps:$4 sm:$0xff]  }
 0x43c   : > { %7455 = vmatpush1.bf16.msra.mxu0 %v16292_v27  ;;  %8143 = vmatpush1.bf16.msra.mxu1 %v16295_v20  ;;  %v16382_v27 = vld [vmem:[%s17758_s12 + $0x1b20] ss:$16 sps:$4 sm:$0xff]   ;;  %v16385_v20 = vld [vmem:[%s17758_s12 + $0x1b28] ss:$16 sps:$4 sm:$0xff]  }
 0x43d   : > { %7456 = vmatprep.subr.bf16.mxu0 %v16300_v37  ;;  %8144 = vmatprep.subr.bf16.mxu1 %v16303_v38  ;;  %v16390_v37 = vld [vmem:[%s17758_s12 + $0x1b44] ss:$16 sps:$4 sm:$0xff]   ;;  %v16393_v38 = vld [vmem:[%s17758_s12 + $0x1b4c] ss:$16 sps:$4 sm:$0xff]  }
 0x440   : > { %7457 = vmatpush1.bf16.msra.mxu0 %v16298_v31  ;;  %8145 = vmatpush1.bf16.msra.mxu1 %v16301_v32  ;;  %v16388_v31 = vld [vmem:[%s17758_s12 + $0x1b40] ss:$16 sps:$4 sm:$0xff]   ;;  %v16391_v32 = vld [vmem:[%s17758_s12 + $0x1b48] ss:$16 sps:$4 sm:$0xff]  }
 0x441   : > { %7458 = vmatprep.subr.bf16.mxu0 %v16306_v41  ;;  %8146 = vmatprep.subr.bf16.mxu1 %v16309_v42  ;;  %v16396_v41 = vld [vmem:[%s17758_s12 + $0x1b64] ss:$16 sps:$4 sm:$0xff]   ;;  %v16399_v42 = vld [vmem:[%s17758_s12 + $0x1b6c] ss:$16 sps:$4 sm:$0xff]  }
 0x444   : > { %7459 = vmatpush1.bf16.msra.mxu0 %v16304_v35  ;;  %8147 = vmatpush1.bf16.msra.mxu1 %v16307_v36  ;;  %v16394_v35 = vld [vmem:[%s17758_s12 + $0x1b60] ss:$16 sps:$4 sm:$0xff]   ;;  %v16397_v36 = vld [vmem:[%s17758_s12 + $0x1b68] ss:$16 sps:$4 sm:$0xff]  }
 0x445   : > { %7460 = vmatprep.subr.bf16.mxu0 %v16312_v45  ;;  %8148 = vmatprep.subr.bf16.mxu1 %v16315_v46  ;;  %v16402_v45 = vld [vmem:[%s17758_s12 + $0x1b84] ss:$16 sps:$4 sm:$0xff]   ;;  %v16405_v46 = vld [vmem:[%s17758_s12 + $0x1b8c] ss:$16 sps:$4 sm:$0xff]  }
 0x448   : > { %7461 = vmatpush1.bf16.msra.mxu0 %v16310_v47  ;;  %8149 = vmatpush1.bf16.msra.mxu1 %v16313_v40  ;;  %v16400_v47 = vld [vmem:[%s17758_s12 + $0x1b80] ss:$16 sps:$4 sm:$0xff]   ;;  %v16403_v40 = vld [vmem:[%s17758_s12 + $0x1b88] ss:$16 sps:$4 sm:$0xff]  }
 0x449   : > { %7462 = vmatprep.subr.bf16.mxu0 %v16318_v49  ;;  %8150 = vmatprep.subr.bf16.mxu1 %v16321_v43  ;;  %v16408_v49 = vld [vmem:[%s17758_s12 + $0x1ba4] ss:$16 sps:$4 sm:$0xff]   ;;  %v16411_v43 = vld [vmem:[%s17758_s12 + $0x1bac] ss:$16 sps:$4 sm:$0xff]  }
 0x44c   : > { %7463 = vmatpush1.bf16.msra.mxu0 %v16316_v44  ;;  %8151 = vmatpush1.bf16.msra.mxu1 %v16319_v52  ;;  %v16406_v44 = vld [vmem:[%s17758_s12 + $0x1ba0] ss:$16 sps:$4 sm:$0xff]   ;;  %v16409_v52 = vld [vmem:[%s17758_s12 + $0x1ba8] ss:$16 sps:$4 sm:$0xff]  }
 0x44d   : > { %7464 = vmatprep.subr.bf16.mxu0 %v16324_v53  ;;  %8152 = vmatprep.subr.bf16.mxu1 %v16327_v48  ;;  %v16414_v53 = vld [vmem:[%s17758_s12 + $0x1bc4] ss:$16 sps:$4 sm:$0xff]   ;;  %v16417_v48 = vld [vmem:[%s17758_s12 + $0x1bcc] ss:$16 sps:$4 sm:$0xff]  }
 0x450   : > { %7465 = vmatpush1.bf16.msra.mxu0 %v16322_v39  ;;  %8153 = vmatpush1.bf16.msra.mxu1 %v16325_v56  ;;  %v16412_v39 = vld [vmem:[%s17758_s12 + $0x1bc0] ss:$16 sps:$4 sm:$0xff]   ;;  %v16415_v56 = vld [vmem:[%s17758_s12 + $0x1bc8] ss:$16 sps:$4 sm:$0xff]  }
 0x451   : > { %7477 = vmatprep.subr.bf16.mxu0 %v16330_v57  ;;  %8165 = vmatprep.subr.bf16.mxu1 %v16333_v50  ;;  %v16420_v57 = vld [vmem:[%s17758_s12 + $0x1be4] ss:$16 sps:$4 sm:$0xff]   ;;  %v16423_v50 = vld [vmem:[%s17758_s12 + $0x1bec] ss:$16 sps:$4 sm:$0xff]  }
 0x453   : > { %7467 = vmatmul.mubr.bf16.vlgmr.msra.gmra.mrb[0].mxu0 %v13135_v51  ;;  %8155 = vmatmul.mubr.bf16.vlgmr.msra.gmra.mrb[0].mxu1 %v13135_v51  ;;  %v16418_v51 = vld [vmem:[%s17758_s12 + $0x1be0] ss:$16 sps:$4 sm:$0xff]  }
 0x454   : > { %7478 = vmatpush1.bf16.msra.mxu0 %v16328_v60  ;;  %8166 = vmatpush1.bf16.msra.mxu1 %v16331_v61  ;;  %v16421_v60 = vld [vmem:[%s17758_s12 + $0x1be8] ss:$16 sps:$4 sm:$0xff]   ;;  %v16426_v61 = vld [vmem:[%s17758_s12 + $0x1c04] ss:$16 sps:$4 sm:$0xff]  }
 0x455   : > { %7479 = vmatprep.subr.bf16.mxu0 %v16336_v54  ;;  %8167 = vmatprep.subr.bf16.mxu1 %v16339_v55  ;;  %v16429_v54 = vld [vmem:[%s17758_s12 + $0x1c0c] ss:$16 sps:$4 sm:$0xff]   ;;  %v13137_v55 = vcombine.low %v18798_v58, %v18803_v59  ;;  %v16432_v58 = vld [vmem:[%s17758_s12 + $0x1c24] ss:$16 sps:$4 sm:$0xff]  }
 0x456   : > { %7509 = vmatprep.mubr.bf16.mxu0 %v13138_v62  ;;  %8197 = vmatprep.mubr.bf16.mxu1 %v13138_v62  ;;  %v18876_v62 = vld [vmem:[%s19473_s0 + $0x70] sm:$0xff] }
 0x457   : > { %v16435_v59 = vld [vmem:[%s17758_s12 + $0x1c2c] ss:$16 sps:$4 sm:$0xff]  }
 0x458   : > { %7480 = vmatpush1.bf16.msra.mxu0 %v16334_v63  ;;  %8168 = vmatpush1.bf16.msra.mxu1 %v16337_v0  ;;  %v18881_v63 = vld [vmem:[%s19473_s0 + $0xf0] sm:$0xff] }
 0x459   : > { %7481 = vmatprep.subr.bf16.mxu0 %v16342_v1  ;;  %8169 = vmatprep.subr.bf16.mxu1 %v16345_v2  ;;  %v16424_v0 = vld [vmem:[%s17758_s12 + $0x1c00] ss:$16 sps:$4 sm:$0xff]   ;;  %v16427_v1 = vld [vmem:[%s17758_s12 + $0x1c08] ss:$16 sps:$4 sm:$0xff]   ;;  %v13140_v2 = vcombine.high %v18876_v62, %v18881_v63 }
 0x45c   : > { %7482 = vmatpush1.bf16.msra.mxu0 %v16340_v3  ;;  %8170 = vmatpush1.bf16.msra.mxu1 %v16343_v4  ;;  %v16430_v3 = vld [vmem:[%s17758_s12 + $0x1c20] ss:$16 sps:$4 sm:$0xff]   ;;  %v16433_v4 = vld [vmem:[%s17758_s12 + $0x1c28] ss:$16 sps:$4 sm:$0xff]  }
 0x45d   : > { %7483 = vmatprep.subr.bf16.mxu0 %v16348_v5  ;;  %8171 = vmatprep.subr.bf16.mxu1 %v16351_v6  ;;  %v16438_v5 = vld [vmem:[%s17758_s12 + $0x1c44] ss:$16 sps:$4 sm:$0xff]   ;;  %v16441_v6 = vld [vmem:[%s17758_s12 + $0x1c4c] ss:$16 sps:$4 sm:$0xff]  }
 0x460   : > { %7484 = vmatpush1.bf16.msra.mxu0 %v16346_v7  ;;  %8172 = vmatpush1.bf16.msra.mxu1 %v16349_v8  ;;  %v16436_v7 = vld [vmem:[%s17758_s12 + $0x1c40] ss:$16 sps:$4 sm:$0xff]   ;;  %v16439_v8 = vld [vmem:[%s17758_s12 + $0x1c48] ss:$16 sps:$4 sm:$0xff]  }
 0x461   : > { %7485 = vmatprep.subr.bf16.mxu0 %v16354_v9  ;;  %8173 = vmatprep.subr.bf16.mxu1 %v16357_v10  ;;  %v16444_v9 = vld [vmem:[%s17758_s12 + $0x1c64] ss:$16 sps:$4 sm:$0xff]   ;;  %v16447_v10 = vld [vmem:[%s17758_s12 + $0x1c6c] ss:$16 sps:$4 sm:$0xff]  }
 0x464   : > { %7486 = vmatpush1.bf16.msra.mxu0 %v16352_v11  ;;  %8174 = vmatpush1.bf16.msra.mxu1 %v16355_v12  ;;  %v16442_v11 = vld [vmem:[%s17758_s12 + $0x1c60] ss:$16 sps:$4 sm:$0xff]   ;;  %v16445_v12 = vld [vmem:[%s17758_s12 + $0x1c68] ss:$16 sps:$4 sm:$0xff]  }
 0x465   : > { %7487 = vmatprep.subr.bf16.mxu0 %v16360_v13  ;;  %8175 = vmatprep.subr.bf16.mxu1 %v16363_v14  ;;  %v16450_v13 = vld [vmem:[%s17758_s12 + $0x1c84] ss:$16 sps:$4 sm:$0xff]   ;;  %v16453_v14 = vld [vmem:[%s17758_s12 + $0x1c8c] ss:$16 sps:$4 sm:$0xff]  }
 0x468   : > { %7488 = vmatpush1.bf16.msra.mxu0 %v16358_v15  ;;  %8176 = vmatpush1.bf16.msra.mxu1 %v16361_v18  ;;  %v16448_v15 = vld [vmem:[%s17758_s12 + $0x1c80] ss:$16 sps:$4 sm:$0xff]   ;;  %v16451_v18 = vld [vmem:[%s17758_s12 + $0x1c88] ss:$16 sps:$4 sm:$0xff]  }
 0x469   : > { %7489 = vmatprep.subr.bf16.mxu0 %v16366_v19  ;;  %8177 = vmatprep.subr.bf16.mxu1 %v16369_v22  ;;  %v16456_v19 = vld [vmem:[%s17758_s12 + $0x1ca4] ss:$16 sps:$4 sm:$0xff]   ;;  %v16459_v22 = vld [vmem:[%s17758_s12 + $0x1cac] ss:$16 sps:$4 sm:$0xff]  }
 0x46c   : > { %7490 = vmatpush1.bf16.msra.mxu0 %v16364_v17  ;;  %8178 = vmatpush1.bf16.msra.mxu1 %v16367_v24  ;;  %v16454_v17 = vld [vmem:[%s17758_s12 + $0x1ca0] ss:$16 sps:$4 sm:$0xff]   ;;  %v16457_v24 = vld [vmem:[%s17758_s12 + $0x1ca8] ss:$16 sps:$4 sm:$0xff]  }
 0x46d   : > { %7491 = vmatprep.subr.bf16.mxu0 %v16372_v25  ;;  %8179 = vmatprep.subr.bf16.mxu1 %v16375_v26  ;;  %v16462_v25 = vld [vmem:[%s17758_s12 + $0x1cc4] ss:$16 sps:$4 sm:$0xff]   ;;  %v16465_v26 = vld [vmem:[%s17758_s12 + $0x1ccc] ss:$16 sps:$4 sm:$0xff]  }
 0x470   : > { %7492 = vmatpush1.bf16.msra.mxu0 %v16370_v21  ;;  %8180 = vmatpush1.bf16.msra.mxu1 %v16373_v28  ;;  %v16460_v21 = vld [vmem:[%s17758_s12 + $0x1cc0] ss:$16 sps:$4 sm:$0xff]   ;;  %v16463_v28 = vld [vmem:[%s17758_s12 + $0x1cc8] ss:$16 sps:$4 sm:$0xff]  }
 0x471   : > { %7493 = vmatprep.subr.bf16.mxu0 %v16378_v29  ;;  %8181 = vmatprep.subr.bf16.mxu1 %v16381_v30  ;;  %v16468_v29 = vld [vmem:[%s17758_s12 + $0x1ce4] ss:$16 sps:$4 sm:$0xff]   ;;  %v16471_v30 = vld [vmem:[%s17758_s12 + $0x1cec] ss:$16 sps:$4 sm:$0xff]  }
 0x474   : > { %7494 = vmatpush1.bf16.msra.mxu0 %v16376_v16  ;;  %8182 = vmatpush1.bf16.msra.mxu1 %v16379_v23  ;;  %v16466_v16 = vld [vmem:[%s17758_s12 + $0x1ce0] ss:$16 sps:$4 sm:$0xff]   ;;  %v16469_v23 = vld [vmem:[%s17758_s12 + $0x1ce8] ss:$16 sps:$4 sm:$0xff]  }
 0x475   : > { %7495 = vmatprep.subr.bf16.mxu0 %v16384_v33  ;;  %8183 = vmatprep.subr.bf16.mxu1 %v16387_v34  ;;  %v16474_v33 = vld [vmem:[%s17758_s12 + $0x1d04] ss:$16 sps:$4 sm:$0xff]   ;;  %v16477_v34 = vld [vmem:[%s17758_s12 + $0x1d0c] ss:$16 sps:$4 sm:$0xff]  }
 0x478   : > { %7496 = vmatpush1.bf16.msra.mxu0 %v16382_v27  ;;  %8184 = vmatpush1.bf16.msra.mxu1 %v16385_v20  ;;  %v16472_v27 = vld [vmem:[%s17758_s12 + $0x1d00] ss:$16 sps:$4 sm:$0xff]   ;;  %v16475_v20 = vld [vmem:[%s17758_s12 + $0x1d08] ss:$16 sps:$4 sm:$0xff]  }
 0x479   : > { %7497 = vmatprep.subr.bf16.mxu0 %v16390_v37  ;;  %8185 = vmatprep.subr.bf16.mxu1 %v16393_v38  ;;  %v16480_v37 = vld [vmem:[%s17758_s12 + $0x1d24] ss:$16 sps:$4 sm:$0xff]   ;;  %v16483_v38 = vld [vmem:[%s17758_s12 + $0x1d2c] ss:$16 sps:$4 sm:$0xff]  }
 0x47c   : > { %7498 = vmatpush1.bf16.msra.mxu0 %v16388_v31  ;;  %8186 = vmatpush1.bf16.msra.mxu1 %v16391_v32  ;;  %v16478_v31 = vld [vmem:[%s17758_s12 + $0x1d20] ss:$16 sps:$4 sm:$0xff]   ;;  %v16481_v32 = vld [vmem:[%s17758_s12 + $0x1d28] ss:$16 sps:$4 sm:$0xff]  }
 0x47d   : > { %7499 = vmatprep.subr.bf16.mxu0 %v16396_v41  ;;  %8187 = vmatprep.subr.bf16.mxu1 %v16399_v42  ;;  %v16486_v41 = vld [vmem:[%s17758_s12 + $0x1d44] ss:$16 sps:$4 sm:$0xff]   ;;  %v16489_v42 = vld [vmem:[%s17758_s12 + $0x1d4c] ss:$16 sps:$4 sm:$0xff]  }
 0x480   : > { %7500 = vmatpush1.bf16.msra.mxu0 %v16394_v35  ;;  %8188 = vmatpush1.bf16.msra.mxu1 %v16397_v36  ;;  %v16484_v35 = vld [vmem:[%s17758_s12 + $0x1d40] ss:$16 sps:$4 sm:$0xff]   ;;  %v16487_v36 = vld [vmem:[%s17758_s12 + $0x1d48] ss:$16 sps:$4 sm:$0xff]  }
 0x481   : > { %7501 = vmatprep.subr.bf16.mxu0 %v16402_v45  ;;  %8189 = vmatprep.subr.bf16.mxu1 %v16405_v46  ;;  %v16492_v45 = vld [vmem:[%s17758_s12 + $0x1d64] ss:$16 sps:$4 sm:$0xff]   ;;  %v16495_v46 = vld [vmem:[%s17758_s12 + $0x1d6c] ss:$16 sps:$4 sm:$0xff]  }
 0x484   : > { %7502 = vmatpush1.bf16.msra.mxu0 %v16400_v47  ;;  %8190 = vmatpush1.bf16.msra.mxu1 %v16403_v40  ;;  %v16490_v47 = vld [vmem:[%s17758_s12 + $0x1d60] ss:$16 sps:$4 sm:$0xff]   ;;  %v16493_v40 = vld [vmem:[%s17758_s12 + $0x1d68] ss:$16 sps:$4 sm:$0xff]  }
 0x485   : > { %7503 = vmatprep.subr.bf16.mxu0 %v16408_v49  ;;  %8191 = vmatprep.subr.bf16.mxu1 %v16411_v43  ;;  %v16498_v49 = vld [vmem:[%s17758_s12 + $0x1d84] ss:$16 sps:$4 sm:$0xff]   ;;  %v16501_v43 = vld [vmem:[%s17758_s12 + $0x1d8c] ss:$16 sps:$4 sm:$0xff]  }
 0x488   : > { %7504 = vmatpush1.bf16.msra.mxu0 %v16406_v44  ;;  %8192 = vmatpush1.bf16.msra.mxu1 %v16409_v52  ;;  %v16496_v44 = vld [vmem:[%s17758_s12 + $0x1d80] ss:$16 sps:$4 sm:$0xff]   ;;  %v16499_v52 = vld [vmem:[%s17758_s12 + $0x1d88] ss:$16 sps:$4 sm:$0xff]  }
 0x489   : > { %7505 = vmatprep.subr.bf16.mxu0 %v16414_v53  ;;  %8193 = vmatprep.subr.bf16.mxu1 %v16417_v48  ;;  %v16504_v53 = vld [vmem:[%s17758_s12 + $0x1da4] ss:$16 sps:$4 sm:$0xff]   ;;  %v16507_v48 = vld [vmem:[%s17758_s12 + $0x1dac] ss:$16 sps:$4 sm:$0xff]  }
 0x48c   : > { %7506 = vmatpush1.bf16.msra.mxu0 %v16412_v39  ;;  %8194 = vmatpush1.bf16.msra.mxu1 %v16415_v56  ;;  %v16502_v39 = vld [vmem:[%s17758_s12 + $0x1da0] ss:$16 sps:$4 sm:$0xff]   ;;  %v16505_v56 = vld [vmem:[%s17758_s12 + $0x1da8] ss:$16 sps:$4 sm:$0xff]  }
 0x48d   : > { %7507 = vmatprep.subr.bf16.mxu0 %v16420_v57  ;;  %8195 = vmatprep.subr.bf16.mxu1 %v16423_v50  ;;  %v16510_v57 = vld [vmem:[%s17758_s12 + $0x1dc4] ss:$16 sps:$4 sm:$0xff]   ;;  %v16513_v50 = vld [vmem:[%s17758_s12 + $0x1dcc] ss:$16 sps:$4 sm:$0xff]  }
 0x490   : > { %7508 = vmatpush1.bf16.msra.mxu0 %v16418_v51  ;;  %8196 = vmatpush1.bf16.msra.mxu1 %v16421_v60  ;;  %v16508_v51 = vld [vmem:[%s17758_s12 + $0x1dc0] ss:$16 sps:$4 sm:$0xff]   ;;  %v16511_v60 = vld [vmem:[%s17758_s12 + $0x1dc8] ss:$16 sps:$4 sm:$0xff]  }
 0x491   : > { %7520 = vmatprep.subr.bf16.mxu0 %v16426_v61  ;;  %8208 = vmatprep.subr.bf16.mxu1 %v16429_v54  ;;  %v16516_v61 = vld [vmem:[%s17758_s12 + $0x1de4] ss:$16 sps:$4 sm:$0xff]   ;;  %v16519_v54 = vld [vmem:[%s17758_s12 + $0x1dec] ss:$16 sps:$4 sm:$0xff]  }
 0x493   : > { %7510 = vmatmul.mubr.bf16.vlgmr.msra.gmra.mrb[0].mxu0 %v13137_v55  ;;  %8198 = vmatmul.mubr.bf16.vlgmr.msra.gmra.mrb[0].mxu1 %v13137_v55  ;;  %v16514_v55 = vld [vmem:[%s17758_s12 + $0x1de0] ss:$16 sps:$4 sm:$0xff]  }
 0x494   : > { %7521 = vmatpush1.bf16.msra.mxu0 %v16424_v0  ;;  %8209 = vmatpush1.bf16.msra.mxu1 %v16427_v1  ;;  %v16517_v0 = vld [vmem:[%s17758_s12 + $0x1de8] ss:$16 sps:$4 sm:$0xff]   ;;  %v16522_v1 = vld [vmem:[%s17758_s12 + $0x1e04] ss:$16 sps:$4 sm:$0xff]  }
 0x495   : > { %7522 = vmatprep.subr.bf16.mxu0 %v16432_v58  ;;  %8210 = vmatprep.subr.bf16.mxu1 %v16435_v59  ;;  %v16525_v58 = vld [vmem:[%s17758_s12 + $0x1e0c] ss:$16 sps:$4 sm:$0xff]   ;;  %v13139_v59 = vcombine.low %v18876_v62, %v18881_v63  ;;  %v16528_v62 = vld [vmem:[%s17758_s12 + $0x1e24] ss:$16 sps:$4 sm:$0xff]  }
 0x496   : > { %7552 = vmatprep.mubr.bf16.mxu0 %v13140_v2  ;;  %8240 = vmatprep.mubr.bf16.mxu1 %v13140_v2  ;;  %v18954_v2 = vld [vmem:[%s19473_s0 + $0x78] sm:$0xff] }
 0x497   : > { %v16531_v63 = vld [vmem:[%s17758_s12 + $0x1e2c] ss:$16 sps:$4 sm:$0xff]  }
 0x498   : > { %7523 = vmatpush1.bf16.msra.mxu0 %v16430_v3  ;;  %8211 = vmatpush1.bf16.msra.mxu1 %v16433_v4  ;;  %v18959_v3 = vld [vmem:[%s19473_s0 + $0xf8] sm:$0xff]  ;;  %v16520_v4 = vld [vmem:[%s17758_s12 + $0x1e00] ss:$16 sps:$4 sm:$0xff]  }
 0x499   : > { %7524 = vmatprep.subr.bf16.mxu0 %v16438_v5  ;;  %8212 = vmatprep.subr.bf16.mxu1 %v16441_v6  ;;  %v16523_v5 = vld [vmem:[%s17758_s12 + $0x1e08] ss:$16 sps:$4 sm:$0xff]   ;;  %v13142_v6 = vcombine.high %v18954_v2, %v18959_v3 }
 0x49c   : > { %7525 = vmatpush1.bf16.msra.mxu0 %v16436_v7  ;;  %8213 = vmatpush1.bf16.msra.mxu1 %v16439_v8  ;;  %v16526_v7 = vld [vmem:[%s17758_s12 + $0x1e20] ss:$16 sps:$4 sm:$0xff]   ;;  %v16529_v8 = vld [vmem:[%s17758_s12 + $0x1e28] ss:$16 sps:$4 sm:$0xff]  }
 0x49d   : > { %7526 = vmatprep.subr.bf16.mxu0 %v16444_v9  ;;  %8214 = vmatprep.subr.bf16.mxu1 %v16447_v10  ;;  %v16534_v9 = vld [vmem:[%s17758_s12 + $0x1e44] ss:$16 sps:$4 sm:$0xff]   ;;  %v16537_v10 = vld [vmem:[%s17758_s12 + $0x1e4c] ss:$16 sps:$4 sm:$0xff]  }
 0x4a0   : > { %7527 = vmatpush1.bf16.msra.mxu0 %v16442_v11  ;;  %8215 = vmatpush1.bf16.msra.mxu1 %v16445_v12  ;;  %v16532_v11 = vld [vmem:[%s17758_s12 + $0x1e40] ss:$16 sps:$4 sm:$0xff]   ;;  %v16535_v12 = vld [vmem:[%s17758_s12 + $0x1e48] ss:$16 sps:$4 sm:$0xff]  }
 0x4a1   : > { %7528 = vmatprep.subr.bf16.mxu0 %v16450_v13  ;;  %8216 = vmatprep.subr.bf16.mxu1 %v16453_v14  ;;  %v16540_v13 = vld [vmem:[%s17758_s12 + $0x1e64] ss:$16 sps:$4 sm:$0xff]   ;;  %v16543_v14 = vld [vmem:[%s17758_s12 + $0x1e6c] ss:$16 sps:$4 sm:$0xff]  }
 0x4a4   : > { %7529 = vmatpush1.bf16.msra.mxu0 %v16448_v15  ;;  %8217 = vmatpush1.bf16.msra.mxu1 %v16451_v18  ;;  %v16538_v15 = vld [vmem:[%s17758_s12 + $0x1e60] ss:$16 sps:$4 sm:$0xff]   ;;  %v16541_v18 = vld [vmem:[%s17758_s12 + $0x1e68] ss:$16 sps:$4 sm:$0xff]  }
 0x4a5   : > { %7530 = vmatprep.subr.bf16.mxu0 %v16456_v19  ;;  %8218 = vmatprep.subr.bf16.mxu1 %v16459_v22  ;;  %v16546_v19 = vld [vmem:[%s17758_s12 + $0x1e84] ss:$16 sps:$4 sm:$0xff]   ;;  %v16549_v22 = vld [vmem:[%s17758_s12 + $0x1e8c] ss:$16 sps:$4 sm:$0xff]  }
 0x4a8   : > { %7531 = vmatpush1.bf16.msra.mxu0 %v16454_v17  ;;  %8219 = vmatpush1.bf16.msra.mxu1 %v16457_v24  ;;  %v16544_v17 = vld [vmem:[%s17758_s12 + $0x1e80] ss:$16 sps:$4 sm:$0xff]   ;;  %v16547_v24 = vld [vmem:[%s17758_s12 + $0x1e88] ss:$16 sps:$4 sm:$0xff]  }
 0x4a9   : > { %7532 = vmatprep.subr.bf16.mxu0 %v16462_v25  ;;  %8220 = vmatprep.subr.bf16.mxu1 %v16465_v26  ;;  %v16552_v25 = vld [vmem:[%s17758_s12 + $0x1ea4] ss:$16 sps:$4 sm:$0xff]   ;;  %v16555_v26 = vld [vmem:[%s17758_s12 + $0x1eac] ss:$16 sps:$4 sm:$0xff]  }
 0x4ac   : > { %7533 = vmatpush1.bf16.msra.mxu0 %v16460_v21  ;;  %8221 = vmatpush1.bf16.msra.mxu1 %v16463_v28  ;;  %v16550_v21 = vld [vmem:[%s17758_s12 + $0x1ea0] ss:$16 sps:$4 sm:$0xff]   ;;  %v16553_v28 = vld [vmem:[%s17758_s12 + $0x1ea8] ss:$16 sps:$4 sm:$0xff]  }
 0x4ad   : > { %7534 = vmatprep.subr.bf16.mxu0 %v16468_v29  ;;  %8222 = vmatprep.subr.bf16.mxu1 %v16471_v30  ;;  %v16558_v29 = vld [vmem:[%s17758_s12 + $0x1ec4] ss:$16 sps:$4 sm:$0xff]   ;;  %v16561_v30 = vld [vmem:[%s17758_s12 + $0x1ecc] ss:$16 sps:$4 sm:$0xff]  }
 0x4b0   : > { %7535 = vmatpush1.bf16.msra.mxu0 %v16466_v16  ;;  %8223 = vmatpush1.bf16.msra.mxu1 %v16469_v23  ;;  %v16556_v16 = vld [vmem:[%s17758_s12 + $0x1ec0] ss:$16 sps:$4 sm:$0xff]   ;;  %v16559_v23 = vld [vmem:[%s17758_s12 + $0x1ec8] ss:$16 sps:$4 sm:$0xff]  }
 0x4b1   : > { %7536 = vmatprep.subr.bf16.mxu0 %v16474_v33  ;;  %8224 = vmatprep.subr.bf16.mxu1 %v16477_v34  ;;  %v16564_v33 = vld [vmem:[%s17758_s12 + $0x1ee4] ss:$16 sps:$4 sm:$0xff]   ;;  %v16567_v34 = vld [vmem:[%s17758_s12 + $0x1eec] ss:$16 sps:$4 sm:$0xff]  }
 0x4b4   : > { %7537 = vmatpush1.bf16.msra.mxu0 %v16472_v27  ;;  %8225 = vmatpush1.bf16.msra.mxu1 %v16475_v20  ;;  %v16562_v27 = vld [vmem:[%s17758_s12 + $0x1ee0] ss:$16 sps:$4 sm:$0xff]   ;;  %v16565_v20 = vld [vmem:[%s17758_s12 + $0x1ee8] ss:$16 sps:$4 sm:$0xff]  }
 0x4b5   : > { %7538 = vmatprep.subr.bf16.mxu0 %v16480_v37  ;;  %8226 = vmatprep.subr.bf16.mxu1 %v16483_v38  ;;  %v16570_v37 = vld [vmem:[%s17758_s12 + $0x1f04] ss:$16 sps:$4 sm:$0xff]   ;;  %v16573_v38 = vld [vmem:[%s17758_s12 + $0x1f0c] ss:$16 sps:$4 sm:$0xff]  }
 0x4b8   : > { %7539 = vmatpush1.bf16.msra.mxu0 %v16478_v31  ;;  %8227 = vmatpush1.bf16.msra.mxu1 %v16481_v32  ;;  %v16568_v31 = vld [vmem:[%s17758_s12 + $0x1f00] ss:$16 sps:$4 sm:$0xff]   ;;  %v16571_v32 = vld [vmem:[%s17758_s12 + $0x1f08] ss:$16 sps:$4 sm:$0xff]  }
 0x4b9   : > { %7540 = vmatprep.subr.bf16.mxu0 %v16486_v41  ;;  %8228 = vmatprep.subr.bf16.mxu1 %v16489_v42  ;;  %v16576_v41 = vld [vmem:[%s17758_s12 + $0x1f24] ss:$16 sps:$4 sm:$0xff]   ;;  %v16579_v42 = vld [vmem:[%s17758_s12 + $0x1f2c] ss:$16 sps:$4 sm:$0xff]  }
 0x4bc   : > { %7541 = vmatpush1.bf16.msra.mxu0 %v16484_v35  ;;  %8229 = vmatpush1.bf16.msra.mxu1 %v16487_v36  ;;  %v16574_v35 = vld [vmem:[%s17758_s12 + $0x1f20] ss:$16 sps:$4 sm:$0xff]   ;;  %v16577_v36 = vld [vmem:[%s17758_s12 + $0x1f28] ss:$16 sps:$4 sm:$0xff]  }
 0x4bd   : > { %7542 = vmatprep.subr.bf16.mxu0 %v16492_v45  ;;  %8230 = vmatprep.subr.bf16.mxu1 %v16495_v46  ;;  %v16582_v45 = vld [vmem:[%s17758_s12 + $0x1f44] ss:$16 sps:$4 sm:$0xff]   ;;  %v16585_v46 = vld [vmem:[%s17758_s12 + $0x1f4c] ss:$16 sps:$4 sm:$0xff]  }
 0x4c0   : > { %7543 = vmatpush1.bf16.msra.mxu0 %v16490_v47  ;;  %8231 = vmatpush1.bf16.msra.mxu1 %v16493_v40  ;;  %v16580_v47 = vld [vmem:[%s17758_s12 + $0x1f40] ss:$16 sps:$4 sm:$0xff]   ;;  %v16583_v40 = vld [vmem:[%s17758_s12 + $0x1f48] ss:$16 sps:$4 sm:$0xff]  }
 0x4c1   : > { %7544 = vmatprep.subr.bf16.mxu0 %v16498_v49  ;;  %8232 = vmatprep.subr.bf16.mxu1 %v16501_v43  ;;  %v16588_v49 = vld [vmem:[%s17758_s12 + $0x1f64] ss:$16 sps:$4 sm:$0xff]   ;;  %v16591_v43 = vld [vmem:[%s17758_s12 + $0x1f6c] ss:$16 sps:$4 sm:$0xff]  }
 0x4c4   : > { %7545 = vmatpush1.bf16.msra.mxu0 %v16496_v44  ;;  %8233 = vmatpush1.bf16.msra.mxu1 %v16499_v52  ;;  %v16586_v44 = vld [vmem:[%s17758_s12 + $0x1f60] ss:$16 sps:$4 sm:$0xff]   ;;  %v16589_v52 = vld [vmem:[%s17758_s12 + $0x1f68] ss:$16 sps:$4 sm:$0xff]  }
 0x4c5   : > { %7546 = vmatprep.subr.bf16.mxu0 %v16504_v53  ;;  %8234 = vmatprep.subr.bf16.mxu1 %v16507_v48  ;;  %v16594_v53 = vld [vmem:[%s17758_s12 + $0x1f84] ss:$16 sps:$4 sm:$0xff]   ;;  %v16597_v48 = vld [vmem:[%s17758_s12 + $0x1f8c] ss:$16 sps:$4 sm:$0xff]  }
 0x4c8   : > { %7547 = vmatpush1.bf16.msra.mxu0 %v16502_v39  ;;  %8235 = vmatpush1.bf16.msra.mxu1 %v16505_v56  ;;  %v16592_v39 = vld [vmem:[%s17758_s12 + $0x1f80] ss:$16 sps:$4 sm:$0xff]   ;;  %v16595_v56 = vld [vmem:[%s17758_s12 + $0x1f88] ss:$16 sps:$4 sm:$0xff]  }
 0x4c9   : > { %7548 = vmatprep.subr.bf16.mxu0 %v16510_v57  ;;  %8236 = vmatprep.subr.bf16.mxu1 %v16513_v50  ;;  %v16600_v57 = vld [vmem:[%s17758_s12 + $0x1fa4] ss:$16 sps:$4 sm:$0xff]   ;;  %v16603_v50 = vld [vmem:[%s17758_s12 + $0x1fac] ss:$16 sps:$4 sm:$0xff]  }
 0x4cc   : > { %7549 = vmatpush1.bf16.msra.mxu0 %v16508_v51  ;;  %8237 = vmatpush1.bf16.msra.mxu1 %v16511_v60  ;;  %v16598_v51 = vld [vmem:[%s17758_s12 + $0x1fa0] ss:$16 sps:$4 sm:$0xff]   ;;  %v16601_v60 = vld [vmem:[%s17758_s12 + $0x1fa8] ss:$16 sps:$4 sm:$0xff]  }
 0x4cd   : > { %7550 = vmatprep.subr.bf16.mxu0 %v16516_v61  ;;  %8238 = vmatprep.subr.bf16.mxu1 %v16519_v54  ;;  %v16606_v61 = vld [vmem:[%s17758_s12 + $0x1fc4] ss:$16 sps:$4 sm:$0xff]   ;;  %v16609_v54 = vld [vmem:[%s17758_s12 + $0x1fcc] ss:$16 sps:$4 sm:$0xff]  }
 0x4d0   : > { %7551 = vmatpush1.bf16.msra.mxu0 %v16514_v55  ;;  %8239 = vmatpush1.bf16.msra.mxu1 %v16517_v0  ;;  %v16604_v55 = vld [vmem:[%s17758_s12 + $0x1fc0] ss:$16 sps:$4 sm:$0xff]   ;;  %v16607_v0 = vld [vmem:[%s17758_s12 + $0x1fc8] ss:$16 sps:$4 sm:$0xff]  }
 0x4d1   : > { %7563 = vmatprep.subr.bf16.mxu0 %v16522_v1  ;;  %8251 = vmatprep.subr.bf16.mxu1 %v16525_v58  ;;  %v16612_v1 = vld [vmem:[%s17758_s12 + $0x1fe4] ss:$16 sps:$4 sm:$0xff]   ;;  %v16615_v58 = vld [vmem:[%s17758_s12 + $0x1fec] ss:$16 sps:$4 sm:$0xff]  }
 0x4d3   : > { %7553 = vmatmul.mubr.bf16.vlgmr.msra.gmra.mrb[0].mxu0 %v13139_v59  ;;  %8241 = vmatmul.mubr.bf16.vlgmr.msra.gmra.mrb[0].mxu1 %v13139_v59  ;;  %v8330_v59 = vld [vmem:[%s17771_s14] sm:$0xff] }
 0x4d4   : > { %7564 = vmatpush1.bf16.msra.mxu0 %v16520_v4  ;;  %8252 = vmatpush1.bf16.msra.mxu1 %v16523_v5  ;;  %v8334_v4 = vld [vmem:[%s17771_s14 + $0x20] sm:$0xff]  ;;  %v8331_v5 = vld [vmem:[%s17771_s14 + $0x8] sm:$0xff] }
 0x4d5   : > { %7565 = vmatprep.subr.bf16.mxu0 %v16528_v62  ;;  %8253 = vmatprep.subr.bf16.mxu1 %v16531_v63  ;;  %v8335_v62 = vld [vmem:[%s17771_s14 + $0x28] sm:$0xff] }
 0x4d6   : > { %7595 = vmatprep.mubr.bf16.mxu0 %v13142_v6  ;;  %8283 = vmatprep.mubr.bf16.mxu1 %v13142_v6  ;;  %v16610_v63 = vld [vmem:[%s17758_s12 + $0x1fe0] ss:$16 sps:$4 sm:$0xff]   ;;  %v16613_v6 = vld [vmem:[%s17758_s12 + $0x1fe8] ss:$16 sps:$4 sm:$0xff]  }
 0x4d8   : > { %7566 = vmatpush1.bf16.msra.mxu0 %v16526_v7  ;;  %8254 = vmatpush1.bf16.msra.mxu1 %v16529_v8  ;;  %v14168_v7 = vcombine.high %v8330_v59, %v8334_v4  ;;  %v14170_v8 = vcombine.high %v8331_v5, %v8335_v62 }
 0x4d9   : > { %7567 = vmatprep.subr.bf16.mxu0 %v16534_v9  ;;  %8255 = vmatprep.subr.bf16.mxu1 %v16537_v10  ;;  %v8338_v9 = vld [vmem:[%s17771_s14 + $0x40] sm:$0xff] }
 0x4da   : > { %v8342_v10 = vld [vmem:[%s17771_s14 + $0x60] sm:$0xff] }
 0x4dc   : > { %7568 = vmatpush1.bf16.msra.mxu0 %v16532_v11  ;;  %8256 = vmatpush1.bf16.msra.mxu1 %v16535_v12  ;;  %v8339_v11 = vld [vmem:[%s17771_s14 + $0x48] sm:$0xff] }
 0x4dd   : > { %7569 = vmatprep.subr.bf16.mxu0 %v16540_v13  ;;  %8257 = vmatprep.subr.bf16.mxu1 %v16543_v14  ;;  %v8343_v12 = vld [vmem:[%s17771_s14 + $0x68] sm:$0xff]  ;;  %v13141_v13 = vcombine.low %v18954_v2, %v18959_v3  ;;  %v14167_v14 = vcombine.low %v8330_v59, %v8334_v4  ;;  %v14175_v2 = vcombine.low %v8338_v9, %v8342_v10  ;;  %v8394_v4 = vld [vmem:[%s17771_s14 + $0x200] sm:$0xff] }
 0x4de   : > { %v14177_v3 = vcombine.low %v8339_v11, %v8343_v12 }
 0x4e0   : > { %7570 = vmatpush1.bf16.msra.mxu0 %v16538_v15  ;;  %8258 = vmatpush1.bf16.msra.mxu1 %v16541_v18  ;;  %v14169_v15 = vcombine.low %v8331_v5, %v8335_v62  ;;  %v14176_v18 = vcombine.high %v8338_v9, %v8342_v10  ;;  %v8398_v5 = vld [vmem:[%s17771_s14 + $0x220] sm:$0xff]  ;;  %v8395_v62 = vld [vmem:[%s17771_s14 + $0x208] sm:$0xff] }
 0x4e1   : > { %7571 = vmatprep.subr.bf16.mxu0 %v16546_v19  ;;  %8259 = vmatprep.subr.bf16.mxu1 %v16549_v22  ;;  %v14178_v19 = vcombine.high %v8339_v11, %v8343_v12  ;;  %v8346_v22 = vld [vmem:[%s17771_s14 + $0x80] sm:$0xff]  ;;  %v8403_v12 = vld [vmem:[%s17771_s14 + $0x248] sm:$0xff] }
 0x4e2   : > { %v8402_v10 = vld [vmem:[%s17771_s14 + $0x240] sm:$0xff] }
 0x4e3   : > { %v8406_v11 = vld [vmem:[%s17771_s14 + $0x260] sm:$0xff] }
 0x4e4   : > { %7572 = vmatpush1.bf16.msra.mxu0 %v16544_v17  ;;  %8260 = vmatpush1.bf16.msra.mxu1 %v16547_v24  ;;  %v8350_v17 = vld [vmem:[%s17771_s14 + $0xa0] sm:$0xff]  ;;  %v8347_v24 = vld [vmem:[%s17771_s14 + $0x88] sm:$0xff] }
 0x4e5   : > { %7573 = vmatprep.subr.bf16.mxu0 %v16552_v25  ;;  %8261 = vmatprep.subr.bf16.mxu1 %v16555_v26  ;;  %v8351_v25 = vld [vmem:[%s17771_s14 + $0xa8] sm:$0xff]  ;;  %v14184_v26 = vcombine.high %v8346_v22, %v8350_v17 }
 0x4e8   : > { %7574 = vmatpush1.bf16.msra.mxu0 %v16550_v21  ;;  %8262 = vmatpush1.bf16.msra.mxu1 %v16553_v28  ;;  %v14186_v21 = vcombine.high %v8347_v24, %v8351_v25  ;;  %v8354_v28 = vld [vmem:[%s17771_s14 + $0xc0] sm:$0xff] }
 0x4e9   : > { %7575 = vmatprep.subr.bf16.mxu0 %v16558_v29  ;;  %8263 = vmatprep.subr.bf16.mxu1 %v16561_v30  ;;  %v8358_v29 = vld [vmem:[%s17771_s14 + $0xe0] sm:$0xff]  ;;  %v8355_v30 = vld [vmem:[%s17771_s14 + $0xc8] sm:$0xff] }
 0x4ec   : > { %7576 = vmatpush1.bf16.msra.mxu0 %v16556_v16  ;;  %8264 = vmatpush1.bf16.msra.mxu1 %v16559_v23  ;;  %v8359_v16 = vld [vmem:[%s17771_s14 + $0xe8] sm:$0xff]  ;;  %v14183_v23 = vcombine.low %v8346_v22, %v8350_v17  ;;  %v8410_v22 = vld [vmem:[%s17771_s14 + $0x280] sm:$0xff] }
 0x4ed   : > { %7577 = vmatprep.subr.bf16.mxu0 %v16564_v33  ;;  %8265 = vmatprep.subr.bf16.mxu1 %v16567_v34  ;;  %v14185_v33 = vcombine.low %v8347_v24, %v8351_v25  ;;  %v14192_v34 = vcombine.high %v8354_v28, %v8358_v29  ;;  %v8414_v17 = vld [vmem:[%s17771_s14 + $0x2a0] sm:$0xff]  ;;  %v8411_v24 = vld [vmem:[%s17771_s14 + $0x288] sm:$0xff] }
 0x4ee   : > { %v8415_v25 = vld [vmem:[%s17771_s14 + $0x2a8] sm:$0xff] }
 0x4f0   : > { %7578 = vmatpush1.bf16.msra.mxu0 %v16562_v27  ;;  %8266 = vmatpush1.bf16.msra.mxu1 %v16565_v20  ;;  %v14194_v27 = vcombine.high %v8355_v30, %v8359_v16  ;;  %v8362_v20 = vld [vmem:[%s17771_s14 + $0x100] sm:$0xff] }
 0x4f1   : > { %7579 = vmatprep.subr.bf16.mxu0 %v16570_v37  ;;  %8267 = vmatprep.subr.bf16.mxu1 %v16573_v38  ;;  %v8366_v37 = vld [vmem:[%s17771_s14 + $0x120] sm:$0xff]  ;;  %v8363_v38 = vld [vmem:[%s17771_s14 + $0x108] sm:$0xff] }
 0x4f4   : > { %7580 = vmatpush1.bf16.msra.mxu0 %v16568_v31  ;;  %8268 = vmatpush1.bf16.msra.mxu1 %v16571_v32  ;;  %v8367_v31 = vld [vmem:[%s17771_s14 + $0x128] sm:$0xff]  ;;  %v14191_v32 = vcombine.low %v8354_v28, %v8358_v29  ;;  %v8418_v28 = vld [vmem:[%s17771_s14 + $0x2c0] sm:$0xff] }
 0x4f5   : > { %7581 = vmatprep.subr.bf16.mxu0 %v16576_v41  ;;  %8269 = vmatprep.subr.bf16.mxu1 %v16579_v42  ;;  %v14193_v41 = vcombine.low %v8355_v30, %v8359_v16  ;;  %v14200_v42 = vcombine.high %v8362_v20, %v8366_v37  ;;  %v8422_v29 = vld [vmem:[%s17771_s14 + $0x2e0] sm:$0xff]  ;;  %v8419_v30 = vld [vmem:[%s17771_s14 + $0x2c8] sm:$0xff] }
 0x4f6   : > { %v8423_v16 = vld [vmem:[%s17771_s14 + $0x2e8] sm:$0xff] }
 0x4f8   : > { %7582 = vmatpush1.bf16.msra.mxu0 %v16574_v35  ;;  %8270 = vmatpush1.bf16.msra.mxu1 %v16577_v36  ;;  %v14202_v35 = vcombine.high %v8363_v38, %v8367_v31  ;;  %v8370_v36 = vld [vmem:[%s17771_s14 + $0x140] sm:$0xff] }
 0x4f9   : > { %7583 = vmatprep.subr.bf16.mxu0 %v16582_v45  ;;  %8271 = vmatprep.subr.bf16.mxu1 %v16585_v46  ;;  %v8374_v45 = vld [vmem:[%s17771_s14 + $0x160] sm:$0xff]  ;;  %v8371_v46 = vld [vmem:[%s17771_s14 + $0x148] sm:$0xff] }
 0x4fc   : > { %7584 = vmatpush1.bf16.msra.mxu0 %v16580_v47  ;;  %8272 = vmatpush1.bf16.msra.mxu1 %v16583_v40  ;;  %v8375_v47 = vld [vmem:[%s17771_s14 + $0x168] sm:$0xff]  ;;  %v14199_v40 = vcombine.low %v8362_v20, %v8366_v37  ;;  %v8426_v20 = vld [vmem:[%s17771_s14 + $0x300] sm:$0xff] }
 0x4fd   : > { %7585 = vmatprep.subr.bf16.mxu0 %v16588_v49  ;;  %8273 = vmatprep.subr.bf16.mxu1 %v16591_v43  ;;  %v14201_v49 = vcombine.low %v8363_v38, %v8367_v31  ;;  %v14208_v43 = vcombine.high %v8370_v36, %v8374_v45  ;;  %v8430_v37 = vld [vmem:[%s17771_s14 + $0x320] sm:$0xff]  ;;  %v8427_v38 = vld [vmem:[%s17771_s14 + $0x308] sm:$0xff] }
 0x4fe   : > { %v8431_v31 = vld [vmem:[%s17771_s14 + $0x328] sm:$0xff] }
 0x500   : > { %7586 = vmatpush1.bf16.msra.mxu0 %v16586_v44  ;;  %8274 = vmatpush1.bf16.msra.mxu1 %v16589_v52  ;;  %v14210_v44 = vcombine.high %v8371_v46, %v8375_v47  ;;  %v8378_v52 = vld [vmem:[%s17771_s14 + $0x180] sm:$0xff] }
 0x501   : > { %7587 = vmatprep.subr.bf16.mxu0 %v16594_v53  ;;  %8275 = vmatprep.subr.bf16.mxu1 %v16597_v48  ;;  %v8382_v53 = vld [vmem:[%s17771_s14 + $0x1a0] sm:$0xff]  ;;  %v8379_v48 = vld [vmem:[%s17771_s14 + $0x188] sm:$0xff] }
 0x504   : > { %7588 = vmatpush1.bf16.msra.mxu0 %v16592_v39  ;;  %8276 = vmatpush1.bf16.msra.mxu1 %v16595_v56  ;;  %v8383_v39 = vld [vmem:[%s17771_s14 + $0x1a8] sm:$0xff]  ;;  %v14207_v56 = vcombine.low %v8370_v36, %v8374_v45  ;;  %v14263_v36 = vcombine.low %v8426_v20, %v8430_v37  ;;  %v14265_v45 = vcombine.low %v8427_v38, %v8431_v31 }
 0x505   : > { %7589 = vmatprep.subr.bf16.mxu0 %v16600_v57  ;;  %8277 = vmatprep.subr.bf16.mxu1 %v16603_v50  ;;  %v14209_v57 = vcombine.low %v8371_v46, %v8375_v47  ;;  %v14216_v50 = vcombine.high %v8378_v52, %v8382_v53  ;;  %v8434_v46 = vld [vmem:[%s17771_s14 + $0x340] sm:$0xff] }
 0x506   : > { %v8438_v47 = vld [vmem:[%s17771_s14 + $0x360] sm:$0xff] }
 0x508   : > { %7590 = vmatpush1.bf16.msra.mxu0 %v16598_v51  ;;  %8278 = vmatpush1.bf16.msra.mxu1 %v16601_v60  ;;  %v14218_v51 = vcombine.high %v8379_v48, %v8383_v39  ;;  %v8386_v60 = vld [vmem:[%s17771_s14 + $0x1c0] sm:$0xff] }
 0x509   : > { %7591 = vmatprep.subr.bf16.mxu0 %v16606_v61  ;;  %8279 = vmatprep.subr.bf16.mxu1 %v16609_v54  ;;  %v8390_v61 = vld [vmem:[%s17771_s14 + $0x1e0] sm:$0xff]  ;;  %v8387_v54 = vld [vmem:[%s17771_s14 + $0x1c8] sm:$0xff] }
 0x50c   : > { %7592 = vmatpush1.bf16.msra.mxu0 %v16604_v55  ;;  %8280 = vmatpush1.bf16.msra.mxu1 %v16607_v0  ;;  %v8391_v55 = vld [vmem:[%s17771_s14 + $0x1e8] sm:$0xff]  ;;  %v14215_v0 = vcombine.low %v8378_v52, %v8382_v53 }
 0x50d   : > { %7593 = vmatprep.subr.bf16.mxu0 %v16612_v1  ;;  %8281 = vmatprep.subr.bf16.mxu1 %v16615_v58  ;;  %v14217_v1 = vcombine.low %v8379_v48, %v8383_v39  ;;  %v14224_v58 = vcombine.high %v8386_v60, %v8390_v61  ;;  %v14226_v59 = vcombine.high %v8387_v54, %v8391_v55  ;;  %v8442_v48 = vld [vmem:[%s17771_s14 + $0x380] sm:$0xff] }
 0x50e   : > { %v8446_v39 = vld [vmem:[%s17771_s14 + $0x3a0] sm:$0xff] }
 0x510   : > { %7594 = vmatpush1.bf16.msra.mxu0 %v16610_v63  ;;  %8282 = vmatpush1.bf16.msra.mxu1 %v16613_v6  ;;  %v8399_v63 = vld [vmem:[%s17771_s14 + $0x228] sm:$0xff]  ;;  %v14223_v6 = vcombine.low %v8386_v60, %v8390_v61 }
 0x511   : > { %9866 = vmatprep.subr.bf16.mxu0 %v14168_v7  ;;  %9952 = vmatprep.subr.bf16.mxu1 %v14170_v8  ;;  %v14225_v7 = vcombine.low %v8387_v54, %v8391_v55  ;;  %v14232_v8 = vcombine.high %v8394_v4, %v8398_v5  ;;  %v14234_v9 = vcombine.high %v8395_v62, %v8399_v63  ;;  %v8450_v54 = vld [vmem:[%s17771_s14 + $0x3c0] sm:$0xff] }
 0x512   : > { %v8454_v55 = vld [vmem:[%s17771_s14 + $0x3e0] sm:$0xff] }
 0x513   : > { %7596 = vmatmul.mubr.bf16.vlgmr.msra.gmra.mrb[0].mxu0 %v13141_v13  ;;  %8284 = vmatmul.mubr.bf16.vlgmr.msra.gmra.mrb[0].mxu1 %v13141_v13  ;;  %v8407_v13 = vld [vmem:[%s17771_s14 + $0x268] sm:$0xff] }
 0x514   : > { %9867 = vmatpush1.bf16.msra.mxu0 %v14167_v14  ;;  %9953 = vmatpush1.bf16.msra.mxu1 %v14169_v15  ;;  %v14231_v14 = vcombine.low %v8394_v4, %v8398_v5  ;;  %v14233_v15 = vcombine.low %v8395_v62, %v8399_v63  ;;  %v19092_v62 = vld [vmem:[%s17771_s14 + $0x400] sm:$0xff] }
 0x515   : > { %9868 = vmatprep.subr.bf16.mxu0 %v14176_v18  ;;  %9954 = vmatprep.subr.bf16.mxu1 %v14178_v19  ;;  %v14240_v18 = vcombine.high %v8402_v10, %v8406_v11  ;;  %v14242_v19 = vcombine.high %v8403_v12, %v8407_v13  ;;  %v19095_v63 = vld [vmem:[%s17771_s14 + $0x420] sm:$0xff] }
 0x518   : > { %9869 = vmatpush1.bf16.msra.mxu0 %v14175_v2  ;;  %9955 = vmatpush1.bf16.msra.mxu1 %v14177_v3  ;;  %v14239_v2 = vcombine.low %v8402_v10, %v8406_v11  ;;  %v14241_v3 = vcombine.low %v8403_v12, %v8407_v13  ;;  %v1618_v12 = vlaneseq }
 0x519   : > { %9870 = vmatprep.subr.bf16.mxu0 %v14184_v26  ;;  %9956 = vmatprep.subr.bf16.mxu1 %v14186_v21  ;;  %v14248_v26 = vcombine.high %v8410_v22, %v8414_v17  ;;  %v14250_v21 = vcombine.high %v8411_v24, %v8415_v25 }
 0x51a   : > { %v19111_v13 = vshrl.u32 %v1618_v12, 7 }
 0x51c   : > { %9871 = vmatpush1.bf16.msra.mxu0 %v14183_v23  ;;  %9957 = vmatpush1.bf16.msra.mxu1 %v14185_v33  ;;  %v14247_v23 = vcombine.low %v8410_v22, %v8414_v17  ;;  %v14249_v33 = vcombine.low %v8411_v24, %v8415_v25  ;;  %v19124_v22 = vsub.s32 3, %v19111_v13 }
 0x51d   : > { %9872 = vmatprep.subr.bf16.mxu0 %v14192_v34  ;;  %9958 = vmatprep.subr.bf16.mxu1 %v14194_v27  ;;  %v14256_v34 = vcombine.high %v8418_v28, %v8422_v29  ;;  %v14258_v27 = vcombine.high %v8419_v30, %v8423_v16 }
 0x520   : > { %9873 = vmatpush1.bf16.msra.mxu0 %v14191_v32  ;;  %9959 = vmatpush1.bf16.msra.mxu1 %v14193_v41  ;;  %v14255_v32 = vcombine.low %v8418_v28, %v8422_v29  ;;  %v14257_v41 = vcombine.low %v8419_v30, %v8423_v16 }
 0x521   : > { %9874 = vmatprep.subr.bf16.mxu0 %v14200_v42  ;;  %9960 = vmatprep.subr.bf16.mxu1 %v14202_v35  ;;  %v14264_v42 = vcombine.high %v8426_v20, %v8430_v37  ;;  %v14266_v35 = vcombine.high %v8427_v38, %v8431_v31 }
 0x524   : > { %9875 = vmatpush1.bf16.msra.mxu0 %v14199_v40  ;;  %9961 = vmatpush1.bf16.msra.mxu1 %v14201_v49  ;;  %v8435_v40 = vld [vmem:[%s17771_s14 + $0x348] sm:$0xff]  ;;  %v14272_v49 = vcombine.high %v8434_v46, %v8438_v47 }
 0x525   : > { %9876 = vmatprep.subr.bf16.mxu0 %v14208_v43  ;;  %9962 = vmatprep.subr.bf16.mxu1 %v14210_v44  ;;  %v8439_v43 = vld [vmem:[%s17771_s14 + $0x368] sm:$0xff]  ;;  %v14271_v44 = vcombine.low %v8434_v46, %v8438_v47 }
 0x526   : > { %v14273_v52 = vcombine.low %v8435_v40, %v8439_v43  ;;  %v14274_v53 = vcombine.high %v8435_v40, %v8439_v43 }
 0x528   : > { %9877 = vmatpush1.bf16.msra.mxu0 %v14207_v56  ;;  %9963 = vmatpush1.bf16.msra.mxu1 %v14209_v57  ;;  %v8443_v56 = vld [vmem:[%s17771_s14 + $0x388] sm:$0xff]  ;;  %v14280_v57 = vcombine.high %v8442_v48, %v8446_v39 }
 0x529   : > { %9878 = vmatprep.subr.bf16.mxu0 %v14216_v50  ;;  %9964 = vmatprep.subr.bf16.mxu1 %v14218_v51  ;;  %v8447_v50 = vld [vmem:[%s17771_s14 + $0x3a8] sm:$0xff]  ;;  %v14279_v51 = vcombine.low %v8442_v48, %v8446_v39 }
 0x52a   : > { %v14281_v60 = vcombine.low %v8443_v56, %v8447_v50  ;;  %v14282_v61 = vcombine.high %v8443_v56, %v8447_v50 }
 0x52c   : > { %9879 = vmatpush1.bf16.msra.mxu0 %v14215_v0  ;;  %9965 = vmatpush1.bf16.msra.mxu1 %v14217_v1  ;;  %v8451_v0 = vld [vmem:[%s17771_s14 + $0x3c8] sm:$0xff]  ;;  %v14288_v1 = vcombine.high %v8450_v54, %v8454_v55 }
 0x52d   : > { %9880 = vmatprep.subr.bf16.mxu0 %v14224_v58  ;;  %9966 = vmatprep.subr.bf16.mxu1 %v14226_v59  ;;  %v8455_v58 = vld [vmem:[%s17771_s14 + $0x3e8] sm:$0xff]  ;;  %v14287_v59 = vcombine.low %v8450_v54, %v8454_v55 }
 0x52e   : > { %v14289_v4 = vcombine.low %v8451_v0, %v8455_v58  ;;  %v14290_v5 = vcombine.high %v8451_v0, %v8455_v58  ;;  %v8471_v54 = vld [vmem:[%s17771_s14 + $0x468] sm:$0xff] }
 0x530   : > { %9881 = vmatpush1.bf16.msra.mxu0 %v14223_v6  ;;  %9967 = vmatpush1.bf16.msra.mxu1 %v14225_v7  ;;  %v19098_v6 = vld [vmem:[%s17771_s14 + $0x408] sm:$0xff]  ;;  %v14296_v7 = vcombine.high %v19092_v62, %v19095_v63 }
 0x531   : > { %9882 = vmatprep.subr.bf16.mxu0 %v14232_v8  ;;  %9968 = vmatprep.subr.bf16.mxu1 %v14234_v9  ;;  %v19103_v8 = vld [vmem:[%s17771_s14 + $0x428] sm:$0xff]  ;;  %v14295_v9 = vcombine.low %v19092_v62, %v19095_v63  ;;  %v8486_v62 = vld [vmem:[%s17771_s14 + $0x4e0] sm:$0xff] }
 0x532   : > { %v14297_v10 = vcombine.low %v19098_v6, %v19103_v8  ;;  %v14298_v11 = vcombine.high %v19098_v6, %v19103_v8  ;;  %v8483_v63 = vld [vmem:[%s17771_s14 + $0x4c8] sm:$0xff] }
 0x534   : > { %9883 = vmatpush1.bf16.msra.mxu0 %v14231_v14  ;;  %9969 = vmatpush1.bf16.msra.mxu1 %v14233_v15  ;;  %v19114_v14 = vsub.s32 0, %v19111_v13  ;;  %v19117_v15 = vsub.s32 2, %v19111_v13 }
 0x535   : > { %9884 = vmatprep.subr.bf16.mxu0 %v14240_v18  ;;  %9970 = vmatprep.subr.bf16.mxu1 %v14242_v19  ;;  %v1616_v18 = vld [vmem:[%s17765_s29] sm:$0xf]  ;;  %v19121_v19 = vsub.s32 1, %v19111_v13  ;;  %s19539_s29 = sld [smem:[#allocation29_spill]] (!%p14423_p12) }
 0x536   : > { %v1621_v17 = vrot.slane %v1616_v18, %v19114_v14  ;;  %v1629_v24 = vrot.slane %v1616_v18, %v19117_v15 }
 0x537   : > { %v1625_v25 = vrot.slane %v1616_v18, %v19121_v19 }
 0x538   : > { %9885 = vmatpush1.bf16.msra.mxu0 %v14239_v2  ;;  %9971 = vmatpush1.bf16.msra.mxu1 %v14241_v3  ;;  %v1633_v2 = vrot.slane %v1616_v18, %v19124_v22 }
 0x539   : > { %9886 = vmatprep.subr.bf16.mxu0 %v14248_v26  ;;  %9972 = vmatprep.subr.bf16.mxu1 %v14250_v21 }
 0x53c   : > { %9887 = vmatpush1.bf16.msra.mxu0 %v14247_v23  ;;  %9973 = vmatpush1.bf16.msra.mxu1 %v14249_v33 }
 0x53d   : > { %9888 = vmatprep.subr.bf16.mxu0 %v14256_v34  ;;  %9974 = vmatprep.subr.bf16.mxu1 %v14258_v27 }
 0x540   : > { %9889 = vmatpush1.bf16.msra.mxu0 %v14255_v32  ;;  %9975 = vmatpush1.bf16.msra.mxu1 %v14257_v41 }
 0x541   : > { %9890 = vmatprep.subr.bf16.mxu0 %v14264_v42  ;;  %9976 = vmatprep.subr.bf16.mxu1 %v14266_v35 }
 0x544   : > { %9891 = vmatpush1.bf16.msra.mxu0 %v14263_v36  ;;  %9977 = vmatpush1.bf16.msra.mxu1 %v14265_v45 }
 0x545   : > { %9892 = vmatprep.subr.bf16.mxu0 %v14272_v49  ;;  %9978 = vmatprep.subr.bf16.mxu1 %v14274_v53 }
 0x548   : > { %9893 = vmatpush1.bf16.msra.mxu0 %v14271_v44  ;;  %9979 = vmatpush1.bf16.msra.mxu1 %v14273_v52 }
 0x549   : > { %9894 = vmatprep.subr.bf16.mxu0 %v14280_v57  ;;  %9980 = vmatprep.subr.bf16.mxu1 %v14282_v61  ;;  %v8466_v57 = vld [vmem:[%s17771_s14 + $0x440] sm:$0xff]  ;;  %v8467_v61 = vld [vmem:[%s17771_s14 + $0x448] sm:$0xff] }
 0x54a   : > { %v14305_v12 = vcombine.low %v8467_v61, %v8471_v54 }
 0x54c   : > { %9895 = vmatpush1.bf16.msra.mxu0 %v14279_v51  ;;  %9981 = vmatpush1.bf16.msra.mxu1 %v14281_v60  ;;  %v8470_v60 = vld [vmem:[%s17771_s14 + $0x460] sm:$0xff] }
 0x54d   : > { %9896 = vmatprep.subr.bf16.mxu0 %v14288_v1  ;;  %9982 = vmatprep.subr.bf16.mxu1 %v14290_v5  ;;  %v8474_v1 = vld [vmem:[%s17771_s14 + $0x480] sm:$0xff]  ;;  %v14304_v58 = vcombine.high %v8466_v57, %v8470_v60  ;;  %v8475_v5 = vld [vmem:[%s17771_s14 + $0x488] sm:$0xff] }
 0x550   : > { %9897 = vmatpush1.bf16.msra.mxu0 %v14287_v59  ;;  %9983 = vmatpush1.bf16.msra.mxu1 %v14289_v4  ;;  %v14306_v59 = vcombine.high %v8467_v61, %v8471_v54  ;;  %v8478_v4 = vld [vmem:[%s17771_s14 + $0x4a0] sm:$0xff]  ;;  %v8527_v61 = vld [vmem:[%s17771_s14 + $0x628] sm:$0xff] }
 0x551   : > { %9909 = vmatprep.subr.bf16.mxu0 %v14296_v7  ;;  %9995 = vmatprep.subr.bf16.mxu1 %v14298_v11  ;;  %v8479_v7 = vld [vmem:[%s17771_s14 + $0x4a8] sm:$0xff]  ;;  %v14303_v11 = vcombine.low %v8466_v57, %v8470_v60  ;;  %v14312_v18 = vcombine.high %v8474_v1, %v8478_v4  ;;  %v14311_v6 = vcombine.low %v8474_v1, %v8478_v4  ;;  %v8526_v57 = vld [vmem:[%s17771_s14 + $0x620] sm:$0xff] }
 0x552   : > { %v14313_v8 = vcombine.low %v8475_v5, %v8479_v7  ;;  %v8523_v60 = vld [vmem:[%s17771_s14 + $0x608] sm:$0xff]  ;;  %v8530_v4 = vld [vmem:[%s17771_s14 + $0x640] sm:$0xff] }
 0x5e6   : > { %v7597_v3 = vpop.f32.mrb[0].mxu0  ;;  %v8285_v26 = vpop.f32.mrb[0].mxu1 }
 0x5e7   : > { %v14789_v21 = vadd.f32 %v7597_v3, %v1621_v17  ;;  %v14793_v28 = vadd.f32 %v8285_v26, %v1629_v24  ;;  %v7599_v29 = vpop.f32.mrb[1].mxu0  ;;  %v8287_v30 = vpop.f32.mrb[1].mxu1  ;;  %v8494_v3 = vld [vmem:[%s17771_s14 + $0x520] sm:$0xff]  ;;  %v8491_v26 = vld [vmem:[%s17771_s14 + $0x508] sm:$0xff] }
 0x5e8   : > { %v14790_v16 = vadd.f32 %v7599_v29, %v1625_v25  ;;  %v14794_v23 = vadd.f32 %v8287_v30, %v1633_v2  ;;  %v7601_v33 = vpop.f32.mrb[2].mxu0  ;;  %v8289_v34 = vpop.f32.mrb[2].mxu1 }
 0x5e9   : > { %v8294_v27 = vmul.f32 0.01, %v14789_v21  ;;  %v8296_v20 = vmul.f32 0.01, %v14793_v28  ;;  %v14791_v37 = vadd.f32 %v7601_v33, %v1621_v17  ;;  %v14795_v38 = vadd.f32 %v8289_v34, %v1629_v24  ;;  %v7603_v31 = vpop.f32.mrb[3].mxu0  ;;  %v8291_v32 = vpop.f32.mrb[3].mxu1 }
 0x5ea   : > { %v8295_v41 = vmul.f32 0.01, %v14790_v16  ;;  %v8297_v42 = vmul.f32 0.01, %v14794_v23  ;;  %v14792_v35 = vadd.f32 %v7603_v31, %v1625_v25  ;;  %v14796_v36 = vadd.f32 %v8291_v32, %v1633_v2  ;;  %v8482_v24 = vld [vmem:[%s17771_s14 + $0x4c0] sm:$0xff]  ;;  %v8499_v34 = vld [vmem:[%s17771_s14 + $0x548] sm:$0xff] }
 0x5eb   : > { %v8298_v45 = vmul.f32 0.01, %v14791_v37  ;;  %v8300_v46 = vmul.f32 0.01, %v14795_v38  ;;  %v8302_v49 = vmax.f32 %v14789_v21, %v8294_v27  ;;  %v8304_v43 = vmax.f32 %v14793_v28, %v8296_v20  ;;  %v8490_v2 = vld [vmem:[%s17771_s14 + $0x500] sm:$0xff]  ;;  %v8495_v21 = vld [vmem:[%s17771_s14 + $0x528] sm:$0xff] }
 0x5ec   : > { %v8299_v47 = vmul.f32 0.01, %v14792_v35  ;;  %v8301_v40 = vmul.f32 0.01, %v14796_v36  ;;  %v8303_v53 = vmax.f32 %v14790_v16, %v8295_v41  ;;  %v8305_v48 = vmax.f32 %v14794_v23, %v8297_v42  ;;  %v8498_v23 = vld [vmem:[%s17771_s14 + $0x540] sm:$0xff]  ;;  %v8503_v27 = vld [vmem:[%s17771_s14 + $0x568] sm:$0xff] }
 0x5ed   : > { %v8306_v44 = vmax.f32 %v14791_v37, %v8298_v45  ;;  %v8308_v52 = vmax.f32 %v14795_v38, %v8300_v46  ;;  %v14314_v17 = vcombine.high %v8475_v5, %v8479_v7  ;;  %v14319_v28 = vcombine.low %v8482_v24, %v8486_v62  ;;  %v8502_v33 = vld [vmem:[%s17771_s14 + $0x560] sm:$0xff]  ;;  %v8507_v42 = vld [vmem:[%s17771_s14 + $0x588] sm:$0xff] }
 0x5ee   : > { %v8307_v39 = vmax.f32 %v14792_v35, %v8299_v47  ;;  %v8309_v56 = vmax.f32 %v14796_v36, %v8301_v40  ;;  %v14328_v30 = vcombine.high %v8490_v2, %v8494_v3  ;;  %v14330_v16 = vcombine.high %v8491_v26, %v8495_v21  ;;  %v8506_v32 = vld [vmem:[%s17771_s14 + $0x580] sm:$0xff]  ;;  %v8511_v35 = vld [vmem:[%s17771_s14 + $0x5a8] sm:$0xff] }
 0x5ef   : > { %v19131_v50 = vpack.c.bf16 %v8306_v44, %v8302_v49  ;;  %v19133_v51 = vpack.c.bf16 %v8308_v52, %v8304_v43  ;;  %v14327_v20 = vcombine.low %v8490_v2, %v8494_v3  ;;  %v14329_v37 = vcombine.low %v8491_v26, %v8495_v21  ;;  %v8510_v41 = vld [vmem:[%s17771_s14 + $0x5a0] sm:$0xff]  ;;  %v8515_v43 = vld [vmem:[%s17771_s14 + $0x5c8] sm:$0xff] }
 0x5f0   : > { %v19138_v55 = vpack.c.bf16 %v8307_v39, %v8303_v53  ;;  %v19140_v0 = vpack.c.bf16 %v8309_v56, %v8305_v48  ;;  %v14336_v38 = vcombine.high %v8498_v23, %v8502_v33  ;;  %v14338_v31 = vcombine.high %v8499_v34, %v8503_v27  ;;  %v8514_v40 = vld [vmem:[%s17771_s14 + $0x5c0] sm:$0xff]  ;;  %v8519_v44 = vld [vmem:[%s17771_s14 + $0x5e8] sm:$0xff] }
 0x5f1   : > { %v14335_v36 = vcombine.low %v8498_v23, %v8502_v33  ;;  %v14337_v45 = vcombine.low %v8499_v34, %v8503_v27  ;;  %v14344_v46 = vcombine.high %v8506_v32, %v8510_v41  ;;  %v14346_v47 = vcombine.high %v8507_v42, %v8511_v35  ;;  %v8518_v49 = vld [vmem:[%s17771_s14 + $0x5e0] sm:$0xff]  ;;  %v8531_v7 = vld [vmem:[%s17771_s14 + $0x648] sm:$0xff] }
 0x5f2   : > { %9898 = vmatprep.mubr.bf16.mxu0 %v19138_v55  ;;  %9984 = vmatprep.mubr.bf16.mxu1 %v19138_v55  ;;  %v14343_v52 = vcombine.low %v8506_v32, %v8510_v41  ;;  %v14345_v53 = vcombine.low %v8507_v42, %v8511_v35  ;;  %v14352_v48 = vcombine.high %v8514_v40, %v8518_v49  ;;  %v8522_v56 = vld [vmem:[%s17771_s14 + $0x600] sm:$0xff]  ;;  %v8547_v21 = vld [vmem:[%s17771_s14 + $0x6c8] sm:$0xff] }
 0x5f3   : > { %9899 = vmatmul.mubr.bf16.vlgmr.msra.gmra.mrb[4].mxu0 %v19131_v50  ;;  %9985 = vmatmul.mubr.bf16.vlgmr.msra.gmra.mrb[4].mxu1 %v19131_v50  ;;  %v14354_v39 = vcombine.high %v8515_v43, %v8519_v44  ;;  %v14351_v54 = vcombine.low %v8514_v40, %v8518_v49  ;;  %v14353_v1 = vcombine.low %v8515_v43, %v8519_v44  ;;  %v8534_v5 = vld [vmem:[%s17771_s14 + $0x660] sm:$0xff]  ;;  %v8555_v27 = vld [vmem:[%s17771_s14 + $0x708] sm:$0xff] }
 0x5f4   : > { %9910 = vmatpush1.bf16.msra.mxu0 %v14295_v9  ;;  %9996 = vmatpush1.bf16.msra.mxu1 %v14297_v10  ;;  %v8487_v9 = vld [vmem:[%s17771_s14 + $0x4e8] sm:$0xff]  ;;  %v14320_v10 = vcombine.high %v8482_v24, %v8486_v62  ;;  %v8538_v62 = vld [vmem:[%s17771_s14 + $0x680] sm:$0xff] }
 0x5f5   : > { %9941 = vmatprep.mubr.bf16.mxu0 %v19140_v0  ;;  %10027 = vmatprep.mubr.bf16.mxu1 %v19140_v0  ;;  %v14322_v25 = vcombine.high %v8483_v63, %v8487_v9  ;;  %v14321_v29 = vcombine.low %v8483_v63, %v8487_v9  ;;  %v8542_v63 = vld [vmem:[%s17771_s14 + $0x6a0] sm:$0xff]  ;;  %v8539_v9 = vld [vmem:[%s17771_s14 + $0x688] sm:$0xff] }
 0x5f6   : > { %9911 = vmatprep.subr.bf16.mxu0 %v14304_v58  ;;  %9997 = vmatprep.subr.bf16.mxu1 %v14306_v59  ;;  %v14360_v58 = vcombine.high %v8522_v56, %v8526_v57  ;;  %v14362_v59 = vcombine.high %v8523_v60, %v8527_v61  ;;  %v8546_v3 = vld [vmem:[%s17771_s14 + $0x6c0] sm:$0xff]  ;;  %v8563_v35 = vld [vmem:[%s17771_s14 + $0x748] sm:$0xff] }
 0x5f7   : > { %v8550_v26 = vld [vmem:[%s17771_s14 + $0x6e0] sm:$0xff]  ;;  %v8571_v44 = vld [vmem:[%s17771_s14 + $0x788] sm:$0xff] }
 0x5f8   : > { %9912 = vmatpush1.bf16.msra.mxu0 %v14303_v11  ;;  %9998 = vmatpush1.bf16.msra.mxu1 %v14305_v12  ;;  %v8535_v11 = vld [vmem:[%s17771_s14 + $0x668] sm:$0xff]  ;;  %v14359_v12 = vcombine.low %v8522_v56, %v8526_v57  ;;  %v8554_v33 = vld [vmem:[%s17771_s14 + $0x700] sm:$0xff] }
 0x5f9   : > { %9913 = vmatprep.subr.bf16.mxu0 %v14312_v18  ;;  %9999 = vmatprep.subr.bf16.mxu1 %v14314_v17  ;;  %v14361_v18 = vcombine.low %v8523_v60, %v8527_v61  ;;  %v14368_v17 = vcombine.high %v8530_v4, %v8534_v5  ;;  %v14370_v24 = vcombine.high %v8531_v7, %v8535_v11  ;;  %v8558_v34 = vld [vmem:[%s17771_s14 + $0x720] sm:$0xff]  ;;  %v8579_v61 = vld [vmem:[%s17771_s14 + $0x7c8] sm:$0xff] }
 0x5fa   : > { %v8562_v41 = vld [vmem:[%s17771_s14 + $0x740] sm:$0xff] }
 0x5fb   : > { %v8566_v42 = vld [vmem:[%s17771_s14 + $0x760] sm:$0xff] }
 0x5fc   : > { %9914 = vmatpush1.bf16.msra.mxu0 %v14311_v6  ;;  %10000 = vmatpush1.bf16.msra.mxu1 %v14313_v8  ;;  %v8543_v6 = vld [vmem:[%s17771_s14 + $0x6a8] sm:$0xff]  ;;  %v14367_v8 = vcombine.low %v8530_v4, %v8534_v5  ;;  %v8570_v49 = vld [vmem:[%s17771_s14 + $0x780] sm:$0xff]  ;;  %v8332_v5 = vld [vmem:[%s17771_s14 + $0x10] sm:$0xff] }
 0x5fd   : > { %9915 = vmatprep.subr.bf16.mxu0 %v14320_v10  ;;  %10001 = vmatprep.subr.bf16.mxu1 %v14322_v25  ;;  %v14369_v10 = vcombine.low %v8531_v7, %v8535_v11  ;;  %v14376_v25 = vcombine.high %v8538_v62, %v8542_v63  ;;  %v14378_v2 = vcombine.high %v8539_v9, %v8543_v6  ;;  %v8574_v43 = vld [vmem:[%s17771_s14 + $0x7a0] sm:$0xff]  ;;  %v8336_v7 = vld [vmem:[%s17771_s14 + $0x30] sm:$0xff]  ;;  %v8333_v11 = vld [vmem:[%s17771_s14 + $0x18] sm:$0xff] }
 0x5fe   : > { %v8578_v57 = vld [vmem:[%s17771_s14 + $0x7c0] sm:$0xff] }
 0x5ff   : > { %v8582_v60 = vld [vmem:[%s17771_s14 + $0x7e0] sm:$0xff] }
 0x600   : > { %9916 = vmatpush1.bf16.msra.mxu0 %v14319_v28  ;;  %10002 = vmatpush1.bf16.msra.mxu1 %v14321_v29  ;;  %v8551_v28 = vld [vmem:[%s17771_s14 + $0x6e8] sm:$0xff]  ;;  %v14375_v29 = vcombine.low %v8538_v62, %v8542_v63  ;;  %v8340_v63 = vld [vmem:[%s17771_s14 + $0x50] sm:$0xff] }
 0x601   : > { %9917 = vmatprep.subr.bf16.mxu0 %v14328_v30  ;;  %10003 = vmatprep.subr.bf16.mxu1 %v14330_v16  ;;  %v14377_v30 = vcombine.low %v8539_v9, %v8543_v6  ;;  %v14384_v16 = vcombine.high %v8546_v3, %v8550_v26  ;;  %v14386_v23 = vcombine.high %v8547_v21, %v8551_v28  ;;  %v8344_v9 = vld [vmem:[%s17771_s14 + $0x70] sm:$0xff]  ;;  %v8341_v6 = vld [vmem:[%s17771_s14 + $0x58] sm:$0xff] }
 0x604   : > { %9918 = vmatpush1.bf16.msra.mxu0 %v14327_v20  ;;  %10004 = vmatpush1.bf16.msra.mxu1 %v14329_v37  ;;  %v8559_v20 = vld [vmem:[%s17771_s14 + $0x728] sm:$0xff]  ;;  %v14383_v37 = vcombine.low %v8546_v3, %v8550_v26  ;;  %v8348_v26 = vld [vmem:[%s17771_s14 + $0x90] sm:$0xff] }
 0x605   : > { %9919 = vmatprep.subr.bf16.mxu0 %v14336_v38  ;;  %10005 = vmatprep.subr.bf16.mxu1 %v14338_v31  ;;  %v14385_v38 = vcombine.low %v8547_v21, %v8551_v28  ;;  %v14392_v31 = vcombine.high %v8554_v33, %v8558_v34  ;;  %v14394_v32 = vcombine.high %v8555_v27, %v8559_v20  ;;  %v8352_v21 = vld [vmem:[%s17771_s14 + $0xb0] sm:$0xff]  ;;  %v8349_v28 = vld [vmem:[%s17771_s14 + $0x98] sm:$0xff] }
 0x608   : > { %9920 = vmatpush1.bf16.msra.mxu0 %v14335_v36  ;;  %10006 = vmatpush1.bf16.msra.mxu1 %v14337_v45  ;;  %v8567_v36 = vld [vmem:[%s17771_s14 + $0x768] sm:$0xff]  ;;  %v14391_v45 = vcombine.low %v8554_v33, %v8558_v34  ;;  %v8356_v34 = vld [vmem:[%s17771_s14 + $0xd0] sm:$0xff] }
 0x609   : > { %9921 = vmatprep.subr.bf16.mxu0 %v14344_v46  ;;  %10007 = vmatprep.subr.bf16.mxu1 %v14346_v47  ;;  %v14393_v46 = vcombine.low %v8555_v27, %v8559_v20  ;;  %v14400_v47 = vcombine.high %v8562_v41, %v8566_v42  ;;  %v14402_v40 = vcombine.high %v8563_v35, %v8567_v36  ;;  %v8360_v27 = vld [vmem:[%s17771_s14 + $0xf0] sm:$0xff]  ;;  %v8357_v20 = vld [vmem:[%s17771_s14 + $0xd8] sm:$0xff] }
 0x60c   : > { %9922 = vmatpush1.bf16.msra.mxu0 %v14343_v52  ;;  %10008 = vmatpush1.bf16.msra.mxu1 %v14345_v53  ;;  %v8575_v52 = vld [vmem:[%s17771_s14 + $0x7a8] sm:$0xff]  ;;  %v14399_v53 = vcombine.low %v8562_v41, %v8566_v42  ;;  %v8364_v41 = vld [vmem:[%s17771_s14 + $0x110] sm:$0xff] }
 0x60d   : > { %9923 = vmatprep.subr.bf16.mxu0 %v14352_v48  ;;  %10009 = vmatprep.subr.bf16.mxu1 %v14354_v39  ;;  %v14401_v48 = vcombine.low %v8563_v35, %v8567_v36  ;;  %v14408_v39 = vcombine.high %v8570_v49, %v8574_v43  ;;  %v14410_v56 = vcombine.high %v8571_v44, %v8575_v52  ;;  %v8368_v42 = vld [vmem:[%s17771_s14 + $0x130] sm:$0xff]  ;;  %v8365_v35 = vld [vmem:[%s17771_s14 + $0x118] sm:$0xff] }
 0x60e   : > { %v8369_v36 = vld [vmem:[%s17771_s14 + $0x138] sm:$0xff] }
 0x610   : > { %9924 = vmatpush1.bf16.msra.mxu0 %v14351_v54  ;;  %10010 = vmatpush1.bf16.msra.mxu1 %v14353_v1  ;;  %v8583_v54 = vld [vmem:[%s17771_s14 + $0x7e8] sm:$0xff]  ;;  %v14407_v1 = vcombine.low %v8570_v49, %v8574_v43  ;;  %v8372_v49 = vld [vmem:[%s17771_s14 + $0x150] sm:$0xff] }
 0x611   : > { %9925 = vmatprep.subr.bf16.mxu0 %v14360_v58  ;;  %10011 = vmatprep.subr.bf16.mxu1 %v14362_v59  ;;  %v14409_v58 = vcombine.low %v8571_v44, %v8575_v52  ;;  %v14416_v59 = vcombine.high %v8578_v57, %v8582_v60  ;;  %v14418_v4 = vcombine.high %v8579_v61, %v8583_v54  ;;  %v8376_v43 = vld [vmem:[%s17771_s14 + $0x170] sm:$0xff]  ;;  %v8373_v44 = vld [vmem:[%s17771_s14 + $0x158] sm:$0xff] }
 0x612   : > { %v8377_v52 = vld [vmem:[%s17771_s14 + $0x178] sm:$0xff] }
 0x614   : > { %9926 = vmatpush1.bf16.msra.mxu0 %v14359_v12  ;;  %10012 = vmatpush1.bf16.msra.mxu1 %v14361_v18  ;;  %v8337_v12 = vld [vmem:[%s17771_s14 + $0x38] sm:$0xff]  ;;  %v14415_v18 = vcombine.low %v8578_v57, %v8582_v60  ;;  %v8380_v57 = vld [vmem:[%s17771_s14 + $0x190] sm:$0xff] }
 0x615   : > { %9927 = vmatprep.subr.bf16.mxu0 %v14368_v17  ;;  %10013 = vmatprep.subr.bf16.mxu1 %v14370_v24  ;;  %v14417_v17 = vcombine.low %v8579_v61, %v8583_v54  ;;  %v14172_v24 = vcombine.high %v8332_v5, %v8336_v7  ;;  %v14174_v62 = vcombine.high %v8333_v11, %v8337_v12  ;;  %v8384_v60 = vld [vmem:[%s17771_s14 + $0x1b0] sm:$0xff]  ;;  %v8381_v61 = vld [vmem:[%s17771_s14 + $0x198] sm:$0xff] }
 0x616   : > { %v8385_v54 = vld [vmem:[%s17771_s14 + $0x1b8] sm:$0xff] }
 0x618   : > { %9928 = vmatpush1.bf16.msra.mxu0 %v14367_v8  ;;  %10014 = vmatpush1.bf16.msra.mxu1 %v14369_v10  ;;  %v8345_v8 = vld [vmem:[%s17771_s14 + $0x78] sm:$0xff]  ;;  %v14171_v10 = vcombine.low %v8332_v5, %v8336_v7  ;;  %v8388_v5 = vld [vmem:[%s17771_s14 + $0x1d0] sm:$0xff] }
 0x619   : > { %9929 = vmatprep.subr.bf16.mxu0 %v14376_v25  ;;  %10015 = vmatprep.subr.bf16.mxu1 %v14378_v2  ;;  %v14173_v25 = vcombine.low %v8333_v11, %v8337_v12  ;;  %v14180_v2 = vcombine.high %v8340_v63, %v8344_v9  ;;  %v14182_v3 = vcombine.high %v8341_v6, %v8345_v8  ;;  %v8392_v7 = vld [vmem:[%s17771_s14 + $0x1f0] sm:$0xff]  ;;  %v8389_v11 = vld [vmem:[%s17771_s14 + $0x1d8] sm:$0xff] }
 0x61a   : > { %v8393_v12 = vld [vmem:[%s17771_s14 + $0x1f8] sm:$0xff] }
 0x61c   : > { %9930 = vmatpush1.bf16.msra.mxu0 %v14375_v29  ;;  %10016 = vmatpush1.bf16.msra.mxu1 %v14377_v30  ;;  %v8353_v29 = vld [vmem:[%s17771_s14 + $0xb8] sm:$0xff]  ;;  %v14179_v30 = vcombine.low %v8340_v63, %v8344_v9  ;;  %v8396_v63 = vld [vmem:[%s17771_s14 + $0x210] sm:$0xff] }
 0x61d   : > { %9931 = vmatprep.subr.bf16.mxu0 %v14384_v16  ;;  %10017 = vmatprep.subr.bf16.mxu1 %v14386_v23  ;;  %v14181_v16 = vcombine.low %v8341_v6, %v8345_v8  ;;  %v14188_v23 = vcombine.high %v8348_v26, %v8352_v21  ;;  %v14190_v33 = vcombine.high %v8349_v28, %v8353_v29  ;;  %v8400_v9 = vld [vmem:[%s17771_s14 + $0x230] sm:$0xff]  ;;  %v8397_v6 = vld [vmem:[%s17771_s14 + $0x218] sm:$0xff] }
 0x61e   : > { %v8401_v8 = vld [vmem:[%s17771_s14 + $0x238] sm:$0xff] }
 0x620   : > { %9932 = vmatpush1.bf16.msra.mxu0 %v14383_v37  ;;  %10018 = vmatpush1.bf16.msra.mxu1 %v14385_v38  ;;  %v8361_v37 = vld [vmem:[%s17771_s14 + $0xf8] sm:$0xff]  ;;  %v14187_v38 = vcombine.low %v8348_v26, %v8352_v21  ;;  %v8404_v26 = vld [vmem:[%s17771_s14 + $0x250] sm:$0xff] }
 0x621   : > { %9933 = vmatprep.subr.bf16.mxu0 %v14392_v31  ;;  %10019 = vmatprep.subr.bf16.mxu1 %v14394_v32  ;;  %v14189_v31 = vcombine.low %v8349_v28, %v8353_v29  ;;  %v14198_v32 = vcombine.high %v8357_v20, %v8361_v37  ;;  %v8408_v21 = vld [vmem:[%s17771_s14 + $0x270] sm:$0xff]  ;;  %v8405_v28 = vld [vmem:[%s17771_s14 + $0x258] sm:$0xff] }
 0x622   : > { %v8409_v29 = vld [vmem:[%s17771_s14 + $0x278] sm:$0xff] }
 0x624   : > { %9934 = vmatpush1.bf16.msra.mxu0 %v14391_v45  ;;  %10020 = vmatpush1.bf16.msra.mxu1 %v14393_v46  ;;  %v14195_v45 = vcombine.low %v8356_v34, %v8360_v27  ;;  %v14197_v46 = vcombine.low %v8357_v20, %v8361_v37  ;;  %v8413_v20 = vld [vmem:[%s17771_s14 + $0x298] sm:$0xff] }
 0x625   : > { %9935 = vmatprep.subr.bf16.mxu0 %v14400_v47  ;;  %10021 = vmatprep.subr.bf16.mxu1 %v14402_v40  ;;  %v14204_v47 = vcombine.high %v8364_v41, %v8368_v42  ;;  %v14206_v40 = vcombine.high %v8365_v35, %v8369_v36  ;;  %v8417_v37 = vld [vmem:[%s17771_s14 + $0x2b8] sm:$0xff] }
 0x628   : > { %9936 = vmatpush1.bf16.msra.mxu0 %v14399_v53  ;;  %10022 = vmatpush1.bf16.msra.mxu1 %v14401_v48  ;;  %v14203_v53 = vcombine.low %v8364_v41, %v8368_v42  ;;  %v14205_v48 = vcombine.low %v8365_v35, %v8369_v36  ;;  %v8420_v41 = vld [vmem:[%s17771_s14 + $0x2d0] sm:$0xff]  ;;  %v8421_v35 = vld [vmem:[%s17771_s14 + $0x2d8] sm:$0xff] }
 0x629   : > { %9937 = vmatprep.subr.bf16.mxu0 %v14408_v39  ;;  %10023 = vmatprep.subr.bf16.mxu1 %v14410_v56  ;;  %v14212_v39 = vcombine.high %v8372_v49, %v8376_v43  ;;  %v14214_v56 = vcombine.high %v8373_v44, %v8377_v52  ;;  %v8424_v42 = vld [vmem:[%s17771_s14 + $0x2f0] sm:$0xff]  ;;  %v8425_v36 = vld [vmem:[%s17771_s14 + $0x2f8] sm:$0xff] }
 0x62c   : > { %9938 = vmatpush1.bf16.msra.mxu0 %v14407_v1  ;;  %10024 = vmatpush1.bf16.msra.mxu1 %v14409_v58  ;;  %v14211_v1 = vcombine.low %v8372_v49, %v8376_v43  ;;  %v14213_v58 = vcombine.low %v8373_v44, %v8377_v52  ;;  %v8428_v49 = vld [vmem:[%s17771_s14 + $0x310] sm:$0xff]  ;;  %v8429_v44 = vld [vmem:[%s17771_s14 + $0x318] sm:$0xff] }
 0x62d   : > { %9939 = vmatprep.subr.bf16.mxu0 %v14416_v59  ;;  %10025 = vmatprep.subr.bf16.mxu1 %v14418_v4  ;;  %v14220_v59 = vcombine.high %v8380_v57, %v8384_v60  ;;  %v14222_v4 = vcombine.high %v8381_v61, %v8385_v54  ;;  %v8432_v43 = vld [vmem:[%s17771_s14 + $0x330] sm:$0xff]  ;;  %v8433_v52 = vld [vmem:[%s17771_s14 + $0x338] sm:$0xff] }
 0x630   : > { %9940 = vmatpush1.bf16.msra.mxu0 %v14415_v18  ;;  %10026 = vmatpush1.bf16.msra.mxu1 %v14417_v17  ;;  %v14219_v18 = vcombine.low %v8380_v57, %v8384_v60  ;;  %v14221_v17 = vcombine.low %v8381_v61, %v8385_v54  ;;  %v8436_v57 = vld [vmem:[%s17771_s14 + $0x350] sm:$0xff]  ;;  %v8437_v61 = vld [vmem:[%s17771_s14 + $0x358] sm:$0xff] }
 0x631   : > { %10038 = vmatprep.subr.bf16.mxu0 %v14172_v24  ;;  %10124 = vmatprep.subr.bf16.mxu1 %v14174_v62  ;;  %v14228_v24 = vcombine.high %v8388_v5, %v8392_v7  ;;  %v14230_v62 = vcombine.high %v8389_v11, %v8393_v12  ;;  %v8440_v60 = vld [vmem:[%s17771_s14 + $0x370] sm:$0xff]  ;;  %v8441_v54 = vld [vmem:[%s17771_s14 + $0x378] sm:$0xff] }
 0x633   : > { %9942 = vmatmul.mubr.bf16.vlgmr.msra.gmra.mrb[4].mxu0 %v19133_v51  ;;  %10028 = vmatmul.mubr.bf16.vlgmr.msra.gmra.mrb[4].mxu1 %v19133_v51 }
 0x634   : > { %10039 = vmatpush1.bf16.msra.mxu0 %v14171_v10  ;;  %10070 = vmatprep.mubr.bf16.mxu0 %v19138_v55  ;;  %v14227_v10 = vcombine.low %v8388_v5, %v8392_v7  ;;  %v8444_v5 = vld [vmem:[%s17771_s14 + $0x390] sm:$0xff] }
 0x635   : > { %10125 = vmatpush1.bf16.msra.mxu1 %v14173_v25  ;;  %10156 = vmatprep.mubr.bf16.mxu1 %v19138_v55  ;;  %v14196_v55 = vcombine.high %v8356_v34, %v8360_v27  ;;  %v14229_v25 = vcombine.low %v8389_v11, %v8393_v12  ;;  %v8412_v34 = vld [vmem:[%s17771_s14 + $0x290] sm:$0xff]  ;;  %v8445_v11 = vld [vmem:[%s17771_s14 + $0x398] sm:$0xff] }
 0x636   : > { %10040 = vmatprep.subr.bf16.mxu0 %v14180_v2  ;;  %10126 = vmatprep.subr.bf16.mxu1 %v14182_v3  ;;  %v14236_v2 = vcombine.high %v8396_v63, %v8400_v9  ;;  %v14238_v3 = vcombine.high %v8397_v6, %v8401_v8  ;;  %v8416_v27 = vld [vmem:[%s17771_s14 + $0x2b0] sm:$0xff]  ;;  %v8449_v12 = vld [vmem:[%s17771_s14 + $0x3b8] sm:$0xff] }
 0x637   : > { %v8448_v7 = vld [vmem:[%s17771_s14 + $0x3b0] sm:$0xff] }
 0x638   : > { %10041 = vmatpush1.bf16.msra.mxu0 %v14179_v30  ;;  %v14235_v30 = vcombine.low %v8396_v63, %v8400_v9  ;;  %v8452_v63 = vld [vmem:[%s17771_s14 + $0x3d0] sm:$0xff] }
 0x639   : > { %10127 = vmatpush1.bf16.msra.mxu1 %v14181_v16  ;;  %10042 = vmatprep.subr.bf16.mxu0 %v14188_v23  ;;  %v14237_v16 = vcombine.low %v8397_v6, %v8401_v8  ;;  %v14244_v23 = vcombine.high %v8404_v26, %v8408_v21  ;;  %v8456_v9 = vld [vmem:[%s17771_s14 + $0x3f0] sm:$0xff]  ;;  %v8453_v6 = vld [vmem:[%s17771_s14 + $0x3d8] sm:$0xff] }
 0x63a   : > { %10128 = vmatprep.subr.bf16.mxu1 %v14190_v33  ;;  %v14246_v33 = vcombine.high %v8405_v28, %v8409_v29  ;;  %v8457_v8 = vld [vmem:[%s17771_s14 + $0x3f8] sm:$0xff] }
 0x63c   : > { %10043 = vmatpush1.bf16.msra.mxu0 %v14187_v38  ;;  %v14243_v38 = vcombine.low %v8404_v26, %v8408_v21  ;;  %v8460_v26 = vld [vmem:[%s17771_s14 + $0x410] sm:$0xff] }
 0x63d   : > { %10129 = vmatpush1.bf16.msra.mxu1 %v14189_v31  ;;  %10044 = vmatprep.subr.bf16.mxu0 %v14196_v55  ;;  %v14245_v31 = vcombine.low %v8405_v28, %v8409_v29  ;;  %v14252_v55 = vcombine.high %v8412_v34, %v8416_v27  ;;  %v8464_v21 = vld [vmem:[%s17771_s14 + $0x430] sm:$0xff]  ;;  %v8461_v28 = vld [vmem:[%s17771_s14 + $0x418] sm:$0xff] }
 0x63e   : > { %10130 = vmatprep.subr.bf16.mxu1 %v14198_v32  ;;  %v14254_v32 = vcombine.high %v8413_v20, %v8417_v37  ;;  %v8465_v29 = vld [vmem:[%s17771_s14 + $0x438] sm:$0xff] }
 0x640   : > { %10045 = vmatpush1.bf16.msra.mxu0 %v14195_v45  ;;  %v14251_v45 = vcombine.low %v8412_v34, %v8416_v27  ;;  %v8468_v34 = vld [vmem:[%s17771_s14 + $0x450] sm:$0xff] }
 0x641   : > { %10131 = vmatpush1.bf16.msra.mxu1 %v14197_v46  ;;  %10046 = vmatprep.subr.bf16.mxu0 %v14204_v47  ;;  %v14253_v46 = vcombine.low %v8413_v20, %v8417_v37  ;;  %v14260_v47 = vcombine.high %v8420_v41, %v8424_v42  ;;  %v8472_v27 = vld [vmem:[%s17771_s14 + $0x470] sm:$0xff]  ;;  %v14299_v20 = vcombine.low %v8460_v26, %v8464_v21  ;;  %v8469_v37 = vld [vmem:[%s17771_s14 + $0x458] sm:$0xff] }
 0x642   : > { %10132 = vmatprep.subr.bf16.mxu1 %v14206_v40  ;;  %v14262_v40 = vcombine.high %v8421_v35, %v8425_v36 }
 0x644   : > { %10047 = vmatpush1.bf16.msra.mxu0 %v14203_v53  ;;  %v14259_v53 = vcombine.low %v8420_v41, %v8424_v42  ;;  %v8480_v41 = vld [vmem:[%s17771_s14 + $0x4b0] sm:$0xff] }
 0x645   : > { %10133 = vmatpush1.bf16.msra.mxu1 %v14205_v48  ;;  %10048 = vmatprep.subr.bf16.mxu0 %v14212_v39  ;;  %v14261_v48 = vcombine.low %v8421_v35, %v8425_v36  ;;  %v14268_v39 = vcombine.high %v8428_v49, %v8432_v43  ;;  %v8477_v35 = vld [vmem:[%s17771_s14 + $0x498] sm:$0xff] }
 0x646   : > { %10134 = vmatprep.subr.bf16.mxu1 %v14214_v56  ;;  %v14270_v56 = vcombine.high %v8429_v44, %v8433_v52  ;;  %v8481_v36 = vld [vmem:[%s17771_s14 + $0x4b8] sm:$0xff] }
 0x648   : > { %10049 = vmatpush1.bf16.msra.mxu0 %v14211_v1  ;;  %v14267_v1 = vcombine.low %v8428_v49, %v8432_v43  ;;  %v8484_v49 = vld [vmem:[%s17771_s14 + $0x4d0] sm:$0xff] }
 0x649   : > { %10135 = vmatpush1.bf16.msra.mxu1 %v14213_v58  ;;  %10050 = vmatprep.subr.bf16.mxu0 %v14220_v59  ;;  %v14269_v58 = vcombine.low %v8429_v44, %v8433_v52  ;;  %v14276_v59 = vcombine.high %v8436_v57, %v8440_v60  ;;  %v8488_v43 = vld [vmem:[%s17771_s14 + $0x4f0] sm:$0xff]  ;;  %v8485_v44 = vld [vmem:[%s17771_s14 + $0x4d8] sm:$0xff] }
 0x64a   : > { %10136 = vmatprep.subr.bf16.mxu1 %v14222_v4  ;;  %v14278_v4 = vcombine.high %v8437_v61, %v8441_v54 }
 0x64c   : > { %10051 = vmatpush1.bf16.msra.mxu0 %v14219_v18  ;;  %v14275_v18 = vcombine.low %v8436_v57, %v8440_v60  ;;  %v8493_v57 = vld [vmem:[%s17771_s14 + $0x518] sm:$0xff] }
 0x64d   : > { %10137 = vmatpush1.bf16.msra.mxu1 %v14221_v17  ;;  %10052 = vmatprep.subr.bf16.mxu0 %v14228_v24  ;;  %v14277_v17 = vcombine.low %v8437_v61, %v8441_v54  ;;  %v14284_v24 = vcombine.high %v8444_v5, %v8448_v7  ;;  %v8497_v60 = vld [vmem:[%s17771_s14 + $0x538] sm:$0xff]  ;;  %v14323_v61 = vcombine.low %v8484_v49, %v8488_v43 }
 0x64e   : > { %10138 = vmatprep.subr.bf16.mxu1 %v14230_v62  ;;  %v14286_v62 = vcombine.high %v8445_v11, %v8449_v12 }
 0x650   : > { %10053 = vmatpush1.bf16.msra.mxu0 %v14227_v10  ;;  %v14283_v10 = vcombine.low %v8444_v5, %v8448_v7  ;;  %v8501_v5 = vld [vmem:[%s17771_s14 + $0x558] sm:$0xff] }
 0x651   : > { %10139 = vmatpush1.bf16.msra.mxu1 %v14229_v25  ;;  %10054 = vmatprep.subr.bf16.mxu0 %v14236_v2  ;;  %v14285_v25 = vcombine.low %v8445_v11, %v8449_v12  ;;  %v14292_v2 = vcombine.high %v8452_v63, %v8456_v9  ;;  %v8505_v7 = vld [vmem:[%s17771_s14 + $0x578] sm:$0xff]  ;;  %v14333_v12 = vcombine.low %v8493_v57, %v8497_v60 }
 0x652   : > { %10140 = vmatprep.subr.bf16.mxu1 %v14238_v3  ;;  %v14294_v3 = vcombine.high %v8453_v6, %v8457_v8 }
 0x654   : > { %10055 = vmatpush1.bf16.msra.mxu0 %v14235_v30  ;;  %v14291_v30 = vcombine.low %v8452_v63, %v8456_v9  ;;  %v8509_v63 = vld [vmem:[%s17771_s14 + $0x598] sm:$0xff] }
 0x655   : > { %10141 = vmatpush1.bf16.msra.mxu1 %v14237_v16  ;;  %10056 = vmatprep.subr.bf16.mxu0 %v14244_v23  ;;  %v14293_v16 = vcombine.low %v8453_v6, %v8457_v8  ;;  %v14300_v23 = vcombine.high %v8460_v26, %v8464_v21  ;;  %v8513_v9 = vld [vmem:[%s17771_s14 + $0x5b8] sm:$0xff]  ;;  %v14341_v8 = vcombine.low %v8501_v5, %v8505_v7 }
 0x656   : > { %10142 = vmatprep.subr.bf16.mxu1 %v14246_v33  ;;  %v14302_v33 = vcombine.high %v8461_v28, %v8465_v29  ;;  %v8517_v26 = vld [vmem:[%s17771_s14 + $0x5d8] sm:$0xff] }
 0x657   : > { %v8521_v21 = vld [vmem:[%s17771_s14 + $0x5f8] sm:$0xff] }
 0x658   : > { %10057 = vmatpush1.bf16.msra.mxu0 %v14243_v38  ;;  %v8473_v38 = vld [vmem:[%s17771_s14 + $0x478] sm:$0xff] }
 0x659   : > { %10143 = vmatpush1.bf16.msra.mxu1 %v14245_v31  ;;  %10058 = vmatprep.subr.bf16.mxu0 %v14252_v55  ;;  %v14301_v31 = vcombine.low %v8461_v28, %v8465_v29  ;;  %v14308_v55 = vcombine.high %v8468_v34, %v8472_v27  ;;  %v14310_v42 = vcombine.high %v8469_v37, %v8473_v38 }
 0x65a   : > { %10144 = vmatprep.subr.bf16.mxu1 %v14254_v32  ;;  %v8476_v32 = vld [vmem:[%s17771_s14 + $0x490] sm:$0xff]  ;;  %v14349_v29 = vcombine.low %v8509_v63, %v8513_v9 }
 0x65b   : > { %v14315_v52 = vcombine.low %v8476_v32, %v8480_v41 }
 0x65c   : > { %10059 = vmatpush1.bf16.msra.mxu0 %v14251_v45  ;;  %v14307_v45 = vcombine.low %v8468_v34, %v8472_v27  ;;  %v8525_v34 = vld [vmem:[%s17771_s14 + $0x618] sm:$0xff] }
 0x65d   : > { %10145 = vmatpush1.bf16.msra.mxu1 %v14253_v46  ;;  %10060 = vmatprep.subr.bf16.mxu0 %v14260_v47  ;;  %v14309_v46 = vcombine.low %v8469_v37, %v8473_v38  ;;  %v14316_v47 = vcombine.high %v8476_v32, %v8480_v41  ;;  %v8529_v27 = vld [vmem:[%s17771_s14 + $0x638] sm:$0xff]  ;;  %v14357_v37 = vcombine.low %v8517_v26, %v8521_v21  ;;  %v8536_v32 = vld [vmem:[%s17771_s14 + $0x670] sm:$0xff] }
 0x65e   : > { %10146 = vmatprep.subr.bf16.mxu1 %v14262_v40  ;;  %v14318_v40 = vcombine.high %v8477_v35, %v8481_v36  ;;  %v8533_v41 = vld [vmem:[%s17771_s14 + $0x658] sm:$0xff] }
 0x660   : > { %10061 = vmatpush1.bf16.msra.mxu0 %v14259_v53  ;;  %v14317_v53 = vcombine.low %v8477_v35, %v8481_v36  ;;  %v14365_v36 = vcombine.low %v8525_v34, %v8529_v27 }
 0x661   : > { %10147 = vmatpush1.bf16.msra.mxu1 %v14261_v48  ;;  %10062 = vmatprep.subr.bf16.mxu0 %v14268_v39  ;;  %v14324_v48 = vcombine.high %v8484_v49, %v8488_v43  ;;  %v8492_v39 = vld [vmem:[%s17771_s14 + $0x510] sm:$0xff]  ;;  %v8541_v49 = vld [vmem:[%s17771_s14 + $0x698] sm:$0xff] }
 0x662   : > { %10148 = vmatprep.subr.bf16.mxu1 %v14270_v56  ;;  %v8496_v56 = vld [vmem:[%s17771_s14 + $0x530] sm:$0xff]  ;;  %v8545_v43 = vld [vmem:[%s17771_s14 + $0x6b8] sm:$0xff] }
 0x663   : > { %v14331_v11 = vcombine.low %v8492_v39, %v8496_v56 }
 0x664   : > { %10063 = vmatpush1.bf16.msra.mxu0 %v14267_v1  ;;  %v14332_v1 = vcombine.high %v8492_v39, %v8496_v56  ;;  %v8549_v39 = vld [vmem:[%s17771_s14 + $0x6d8] sm:$0xff] }
 0x665   : > { %10149 = vmatpush1.bf16.msra.mxu1 %v14269_v58  ;;  %10064 = vmatprep.subr.bf16.mxu0 %v14276_v59  ;;  %v14334_v58 = vcombine.high %v8493_v57, %v8497_v60  ;;  %v8500_v59 = vld [vmem:[%s17771_s14 + $0x550] sm:$0xff]  ;;  %v8553_v56 = vld [vmem:[%s17771_s14 + $0x6f8] sm:$0xff]  ;;  %v14381_v60 = vcombine.low %v8541_v49, %v8545_v43 }
 0x666   : > { %10150 = vmatprep.subr.bf16.mxu1 %v14278_v4  ;;  %v8504_v4 = vld [vmem:[%s17771_s14 + $0x570] sm:$0xff] }
 0x667   : > { %v14339_v6 = vcombine.low %v8500_v59, %v8504_v4 }
 0x668   : > { %10065 = vmatpush1.bf16.msra.mxu0 %v14275_v18  ;;  %v14340_v18 = vcombine.high %v8500_v59, %v8504_v4  ;;  %v8557_v59 = vld [vmem:[%s17771_s14 + $0x718] sm:$0xff] }
 0x669   : > { %10151 = vmatpush1.bf16.msra.mxu1 %v14277_v17  ;;  %10066 = vmatprep.subr.bf16.mxu0 %v14284_v24  ;;  %v14342_v17 = vcombine.high %v8501_v5, %v8505_v7  ;;  %v8508_v24 = vld [vmem:[%s17771_s14 + $0x590] sm:$0xff]  ;;  %v8561_v4 = vld [vmem:[%s17771_s14 + $0x738] sm:$0xff]  ;;  %v14389_v7 = vcombine.low %v8549_v39, %v8553_v56 }
 0x66a   : > { %10152 = vmatprep.subr.bf16.mxu1 %v14286_v62  ;;  %v8512_v62 = vld [vmem:[%s17771_s14 + $0x5b0] sm:$0xff] }
 0x66b   : > { %v14347_v28 = vcombine.low %v8508_v24, %v8512_v62 }
 0x66c   : > { %10067 = vmatpush1.bf16.msra.mxu0 %v14283_v10  ;;  %v14348_v10 = vcombine.high %v8508_v24, %v8512_v62  ;;  %v8565_v24 = vld [vmem:[%s17771_s14 + $0x758] sm:$0xff] }
 0x66d   : > { %10153 = vmatpush1.bf16.msra.mxu1 %v14285_v25  ;;  %10068 = vmatprep.subr.bf16.mxu0 %v14292_v2  ;;  %v14350_v25 = vcombine.high %v8509_v63, %v8513_v9  ;;  %v8516_v2 = vld [vmem:[%s17771_s14 + $0x5d0] sm:$0xff]  ;;  %v8569_v62 = vld [vmem:[%s17771_s14 + $0x778] sm:$0xff]  ;;  %v14397_v9 = vcombine.low %v8557_v59, %v8561_v4 }
 0x66e   : > { %10154 = vmatprep.subr.bf16.mxu1 %v14294_v3  ;;  %v8520_v3 = vld [vmem:[%s17771_s14 + $0x5f0] sm:$0xff] }
 0x670   : > { %10069 = vmatpush1.bf16.msra.mxu0 %v14291_v30  ;;  %v14356_v30 = vcombine.high %v8516_v2, %v8520_v3 }
 0x671   : > { %10155 = vmatpush1.bf16.msra.mxu1 %v14293_v16  ;;  %10081 = vmatprep.subr.bf16.mxu0 %v14300_v23  ;;  %v14358_v16 = vcombine.high %v8517_v26, %v8521_v21  ;;  %v8524_v23 = vld [vmem:[%s17771_s14 + $0x610] sm:$0xff]  ;;  %v14405_v21 = vcombine.low %v8565_v24, %v8569_v62 }
 0x672   : > { %10167 = vmatprep.subr.bf16.mxu1 %v14302_v33  ;;  %v8528_v33 = vld [vmem:[%s17771_s14 + $0x630] sm:$0xff] }
 0x673   : > { %10071 = vmatmul.mubr.bf16.vlgmr.msra.gmra.mrb[8].mxu0 %v19131_v50  ;;  %v14364_v38 = vcombine.high %v8524_v23, %v8528_v33  ;;  %v14363_v35 = vcombine.low %v8524_v23, %v8528_v33  ;;  %v8581_v23 = vld [vmem:[%s17771_s14 + $0x7d8] sm:$0xff] }
 0x674   : > { %10157 = vmatmul.mubr.bf16.vlgmr.msra.gmra.mrb[8].mxu1 %v19131_v50  ;;  %10082 = vmatpush1.bf16.msra.mxu0 %v14299_v20  ;;  %v8489_v50 = vld [vmem:[%s17771_s14 + $0x4f8] sm:$0xff]  ;;  %v14355_v20 = vcombine.low %v8516_v2, %v8520_v3 }
 0x675   : > { %10113 = vmatprep.mubr.bf16.mxu0 %v19140_v0  ;;  %10168 = vmatpush1.bf16.msra.mxu1 %v14301_v31  ;;  %v14325_v54 = vcombine.low %v8485_v44, %v8489_v50  ;;  %v14366_v31 = vcombine.high %v8525_v34, %v8529_v27  ;;  %v8573_v2 = vld [vmem:[%s17771_s14 + $0x798] sm:$0xff] }
 0x676   : > { %10199 = vmatprep.mubr.bf16.mxu1 %v19140_v0  ;;  %10083 = vmatprep.subr.bf16.mxu0 %v14308_v55  ;;  %v14326_v0 = vcombine.high %v8485_v44, %v8489_v50  ;;  %v8532_v55 = vld [vmem:[%s17771_s14 + $0x650] sm:$0xff]  ;;  %v8577_v3 = vld [vmem:[%s17771_s14 + $0x7b8] sm:$0xff] }
 0x677   : > { %10169 = vmatprep.subr.bf16.mxu1 %v14310_v42  ;;  %v8537_v42 = vld [vmem:[%s17771_s14 + $0x678] sm:$0xff]  ;;  %v14371_v44 = vcombine.low %v8532_v55, %v8536_v32  ;;  %v14413_v27 = vcombine.low %v8573_v2, %v8577_v3 }
 0x678   : > { %10084 = vmatpush1.bf16.msra.mxu0 %v14307_v45  ;;  %v14372_v45 = vcombine.high %v8532_v55, %v8536_v32  ;;  %v14373_v50 = vcombine.low %v8533_v41, %v8537_v42  ;;  %v8585_v33 = vld [vmem:[%s17771_s14 + $0x7f8] sm:$0xff]  ;;  %v8312_v32 = vld [vmem:[#allocation2 + $0x10] sm:$0xff] }
 0x679   : > { %10170 = vmatpush1.bf16.msra.mxu1 %v14309_v46  ;;  %10085 = vmatprep.subr.bf16.mxu0 %v14316_v47  ;;  %v14374_v46 = vcombine.high %v8533_v41, %v8537_v42  ;;  %v8540_v47 = vld [vmem:[%s17771_s14 + $0x690] sm:$0xff]  ;;  %v8311_v41 = vld [vmem:[#allocation2 + $0x8] sm:$0xff] }
 0x67a   : > { %10171 = vmatprep.subr.bf16.mxu1 %v14318_v40  ;;  %v8544_v40 = vld [vmem:[%s17771_s14 + $0x6b0] sm:$0xff] }
 0x67b   : > { %v14379_v57 = vcombine.low %v8540_v47, %v8544_v40  ;;  %v8310_v55 = vld [vmem:[#allocation2] sm:$0xff]  ;;  %v8313_v42 = vld [vmem:[#allocation2 + $0x18] sm:$0xff] }
 0x67c   : > { %10086 = vmatpush1.bf16.msra.mxu0 %v14315_v52  ;;  %v14380_v52 = vcombine.high %v8540_v47, %v8544_v40 }
 0x67d   : > { %10172 = vmatpush1.bf16.msra.mxu1 %v14317_v53  ;;  %10087 = vmatprep.subr.bf16.mxu0 %v14324_v48  ;;  %v14382_v53 = vcombine.high %v8541_v49, %v8545_v43  ;;  %v8548_v48 = vld [vmem:[%s17771_s14 + $0x6d0] sm:$0xff] }
 0x67e   : > { %10173 = vmatprep.subr.bf16.mxu1 %v14326_v0  ;;  %v8552_v0 = vld [vmem:[%s17771_s14 + $0x6f0] sm:$0xff] }
 0x67f   : > { %v14387_v5 = vcombine.low %v8548_v48, %v8552_v0 }
 0x680   : > { %10088 = vmatpush1.bf16.msra.mxu0 %v14323_v61  ;;  %v14388_v61 = vcombine.high %v8548_v48, %v8552_v0 }
 0x681   : > { %10174 = vmatpush1.bf16.msra.mxu1 %v14325_v54  ;;  %10089 = vmatprep.subr.bf16.mxu0 %v14332_v1  ;;  %v14390_v54 = vcombine.high %v8549_v39, %v8553_v56  ;;  %v8556_v1 = vld [vmem:[%s17771_s14 + $0x710] sm:$0xff] }
 0x682   : > { %10175 = vmatprep.subr.bf16.mxu1 %v14334_v58  ;;  %v8560_v58 = vld [vmem:[%s17771_s14 + $0x730] sm:$0xff] }
 0x683   : > { %v14395_v63 = vcombine.low %v8556_v1, %v8560_v58 }
 0x684   : > { %10090 = vmatpush1.bf16.msra.mxu0 %v14331_v11  ;;  %v14396_v11 = vcombine.high %v8556_v1, %v8560_v58  ;;  %v8316_v1 = vld [vmem:[#allocation2 + $0x30] sm:$0xff]  ;;  %v8315_v58 = vld [vmem:[#allocation2 + $0x28] sm:$0xff] }
 0x685   : > { %10176 = vmatpush1.bf16.msra.mxu1 %v14333_v12  ;;  %10091 = vmatprep.subr.bf16.mxu0 %v14340_v18  ;;  %v14398_v12 = vcombine.high %v8557_v59, %v8561_v4  ;;  %v8564_v18 = vld [vmem:[%s17771_s14 + $0x750] sm:$0xff] }
 0x686   : > { %10177 = vmatprep.subr.bf16.mxu1 %v14342_v17  ;;  %v8568_v17 = vld [vmem:[%s17771_s14 + $0x770] sm:$0xff] }
 0x687   : > { %v14403_v26 = vcombine.low %v8564_v18, %v8568_v17  ;;  %v8317_v4 = vld [vmem:[#allocation2 + $0x38] sm:$0xff] }
 0x688   : > { %10092 = vmatpush1.bf16.msra.mxu0 %v14339_v6  ;;  %v14404_v6 = vcombine.high %v8564_v18, %v8568_v17  ;;  %v8324_v18 = vld [vmem:[#allocation2 + $0x70] sm:$0xff]  ;;  %v8323_v17 = vld [vmem:[#allocation2 + $0x68] sm:$0xff] }
 0x689   : > { %10178 = vmatpush1.bf16.msra.mxu1 %v14341_v8  ;;  %10093 = vmatprep.subr.bf16.mxu0 %v14348_v10  ;;  %v14406_v8 = vcombine.high %v8565_v24, %v8569_v62  ;;  %v8572_v10 = vld [vmem:[%s17771_s14 + $0x790] sm:$0xff] }
 0x68a   : > { %10179 = vmatprep.subr.bf16.mxu1 %v14350_v25  ;;  %v8576_v25 = vld [vmem:[%s17771_s14 + $0x7b0] sm:$0xff] }
 0x68b   : > { %v14411_v34 = vcombine.low %v8572_v10, %v8576_v25 }
 0x68c   : > { %10094 = vmatpush1.bf16.msra.mxu0 %v14347_v28  ;;  %v14412_v28 = vcombine.high %v8572_v10, %v8576_v25 }
 0x68d   : > { %10180 = vmatpush1.bf16.msra.mxu1 %v14349_v29  ;;  %10095 = vmatprep.subr.bf16.mxu0 %v14356_v30  ;;  %v14414_v29 = vcombine.high %v8573_v2, %v8577_v3  ;;  %v8580_v30 = vld [vmem:[%s17771_s14 + $0x7d0] sm:$0xff] }
 0x68e   : > { %10181 = vmatprep.subr.bf16.mxu1 %v14358_v16  ;;  %v8584_v16 = vld [vmem:[%s17771_s14 + $0x7f0] sm:$0xff] }
 0x690   : > { %10096 = vmatpush1.bf16.msra.mxu0 %v14355_v20  ;;  %v14420_v20 = vcombine.high %v8580_v30, %v8584_v16 }
 0x691   : > { %10182 = vmatpush1.bf16.msra.mxu1 %v14357_v37  ;;  %10097 = vmatprep.subr.bf16.mxu0 %v14364_v38  ;;  %v14422_v37 = vcombine.high %v8581_v23, %v8585_v33  ;;  %v14419_v38 = vcombine.low %v8580_v30, %v8584_v16  ;;  %v16618_v30 = vld [vmem:[#allocation11 + $0x204] ss:$16 sps:$4 sm:$0xff] (!%p14423_p12)   ;;  %v16620_v16 = vld [vmem:[#allocation11] ss:$16 sps:$4 sm:$0xff] (!%p14423_p12)  }
 0x692   : > { %10183 = vmatprep.subr.bf16.mxu1 %v14366_v31  ;;  %v14421_v31 = vcombine.low %v8581_v23, %v8585_v33  ;;  %v16621_v23 = vld [vmem:[#allocation11 + $0x200] ss:$16 sps:$4 sm:$0xff] (!%p14423_p12)   ;;  %v16622_v33 = vld [vmem:[#allocation11 + $0x24] ss:$16 sps:$4 sm:$0xff] (!%p14423_p12)  }
 0x694   : > { %10098 = vmatpush1.bf16.msra.mxu0 %v14363_v35 }
 0x695   : > { %10184 = vmatpush1.bf16.msra.mxu1 %v14365_v36  ;;  %10099 = vmatprep.subr.bf16.mxu0 %v14372_v45  ;;  %v8318_v45 = vld [vmem:[#allocation2 + $0x40] sm:$0xff] }
 0x696   : > { %10185 = vmatprep.subr.bf16.mxu1 %v14374_v46  ;;  %v8320_v46 = vld [vmem:[#allocation2 + $0x50] sm:$0xff] }
 0x698   : > { %10100 = vmatpush1.bf16.msra.mxu0 %v14371_v44  ;;  %v8319_v44 = vld [vmem:[#allocation2 + $0x48] sm:$0xff] }
 0x699   : > { %10186 = vmatpush1.bf16.msra.mxu1 %v14373_v50  ;;  %10101 = vmatprep.subr.bf16.mxu0 %v14380_v52  ;;  %v8321_v50 = vld [vmem:[#allocation2 + $0x58] sm:$0xff] }
 0x69a   : > { %10187 = vmatprep.subr.bf16.mxu1 %v14382_v53 }
 0x69c   : > { %10102 = vmatpush1.bf16.msra.mxu0 %v14379_v57 }
 0x69d   : > { %10188 = vmatpush1.bf16.msra.mxu1 %v14381_v60  ;;  %10103 = vmatprep.subr.bf16.mxu0 %v14388_v61 }
 0x69e   : > { %10189 = vmatprep.subr.bf16.mxu1 %v14390_v54  ;;  %v8314_v54 = vld [vmem:[#allocation2 + $0x20] sm:$0xff] }
 0x6a0   : > { %10104 = vmatpush1.bf16.msra.mxu0 %v14387_v5  ;;  %v8322_v5 = vld [vmem:[#allocation2 + $0x60] sm:$0xff] }
 0x6a1   : > { %10190 = vmatpush1.bf16.msra.mxu1 %v14389_v7  ;;  %10105 = vmatprep.subr.bf16.mxu0 %v14396_v11 }
 0x6a2   : > { %10191 = vmatprep.subr.bf16.mxu1 %v14398_v12 }
 0x6a4   : > { %10106 = vmatpush1.bf16.msra.mxu0 %v14395_v63 }
 0x6a5   : > { %10192 = vmatpush1.bf16.msra.mxu1 %v14397_v9  ;;  %10107 = vmatprep.subr.bf16.mxu0 %v14404_v6  ;;  %v8325_v6 = vld [vmem:[#allocation2 + $0x78] sm:$0xff] }
 0x6a6   : > { %10193 = vmatprep.subr.bf16.mxu1 %v14406_v8 }
 0x6a8   : > { %10108 = vmatpush1.bf16.msra.mxu0 %v14403_v26 }
 0x6a9   : > { %10194 = vmatpush1.bf16.msra.mxu1 %v14405_v21  ;;  %10109 = vmatprep.subr.bf16.mxu0 %v14412_v28 }
 0x6aa   : > { %10195 = vmatprep.subr.bf16.mxu1 %v14414_v29  ;;  %v16616_v29 = vld [vmem:[#allocation11 + $0x4] ss:$16 sps:$4 sm:$0xff] (!%p14423_p12)  }
 0x6ac   : > { %10110 = vmatpush1.bf16.msra.mxu0 %v14411_v34  ;;  %v16624_v34 = vld [vmem:[#allocation11 + $0x224] ss:$16 sps:$4 sm:$0xff] (!%p14423_p12)  }
 0x6ad   : > { %10196 = vmatpush1.bf16.msra.mxu1 %v14413_v27  ;;  %10111 = vmatprep.subr.bf16.mxu0 %v14420_v20  ;;  %v16626_v27 = vld [vmem:[#allocation11 + $0x20] ss:$16 sps:$4 sm:$0xff] (!%p14423_p12)  }
 0x6ae   : > { %10197 = vmatprep.subr.bf16.mxu1 %v14422_v37  ;;  %v16627_v20 = vld [vmem:[#allocation11 + $0x220] ss:$16 sps:$4 sm:$0xff] (!%p14423_p12)   ;;  %v16628_v37 = vld [vmem:[#allocation11 + $0x44] ss:$16 sps:$4 sm:$0xff] (!%p14423_p12)  }
 0x6b0   : > { %10112 = vmatpush1.bf16.msra.mxu0 %v14419_v38  ;;  %v16630_v38 = vld [vmem:[#allocation11 + $0x244] ss:$16 sps:$4 sm:$0xff] (!%p14423_p12)  }
 0x6b1   : > { %10198 = vmatpush1.bf16.msra.mxu1 %v14421_v31  ;;  %11961 = vmatprep.subr.bf16.mxu0 (!%p14423_p12), %v16618_v30  ;;  %v16632_v31 = vld [vmem:[#allocation11 + $0x40] ss:$16 sps:$4 sm:$0xff] (!%p14423_p12)  }
 0x6b2   : > { %11918 = vmatprep.subr.bf16.mxu1 (!%p14423_p12), %v16616_v29 }
 0x6b3   : > { %10114 = vmatmul.mubr.bf16.vlgmr.msra.gmra.mrb[8].mxu0 %v19133_v51 }
 0x6b4   : > { %10200 = vmatmul.mubr.bf16.vlgmr.msra.gmra.mrb[8].mxu1 %v19133_v51  ;;  %11962 = vmatpush1.bf16.msra.mxu0 (!%p14423_p12), %v16621_v23  ;;  %v16694_v23 = vld [vmem:[#allocation11 + $0x1a4] ss:$16 sps:$4 sm:$0xff] (!%p14423_p12)  }
 0x6b5   : > { %11919 = vmatpush1.bf16.msra.mxu1 (!%p14423_p12), %v16620_v16  ;;  %11963 = vmatprep.subr.bf16.mxu0 (!%p14423_p12), %v16624_v34 }
 0x6b6   : > { %11920 = vmatprep.subr.bf16.mxu1 (!%p14423_p12), %v16622_v33 }
 0x6b8   : > { %11964 = vmatpush1.bf16.msra.mxu0 (!%p14423_p12), %v16627_v20 }
 0x6b9   : > { %11921 = vmatpush1.bf16.msra.mxu1 (!%p14423_p12), %v16626_v27  ;;  %11965 = vmatprep.subr.bf16.mxu0 (!%p14423_p12), %v16630_v38 }
 0x6ba   : > { %11922 = vmatprep.subr.bf16.mxu1 (!%p14423_p12), %v16628_v37 }
 0x6bd   : > { %11923 = vmatpush1.bf16.msra.mxu1 (!%p14423_p12), %v16632_v31 }
 0x706   : > { %v9943_v35 = vpop.f32.mrb[4].mxu0  ;;  %v10029_v36 = vpop.f32.mrb[4].mxu1 }
 0x707   : > { %v10210_v47 = vadd.f32 %v9943_v35, %v8310_v55  ;;  %v10212_v40 = vadd.f32 %v10029_v36, %v8312_v32  ;;  %v9945_v49 = vpop.f32.mrb[5].mxu0  ;;  %v10031_v43 = vpop.f32.mrb[5].mxu1  ;;  %v16633_v55 = vld [vmem:[#allocation11 + $0x240] ss:$16 sps:$4 sm:$0xff] (!%p14423_p12)   ;;  %v16634_v32 = vld [vmem:[#allocation11 + $0x64] ss:$16 sps:$4 sm:$0xff] (!%p14423_p12)  }
 0x708   : > { %v10211_v52 = vadd.f32 %v9945_v49, %v8311_v41  ;;  %v10213_v53 = vadd.f32 %v10031_v43, %v8313_v42  ;;  %v9947_v48 = vpop.f32.mrb[6].mxu0  ;;  %v10033_v0 = vpop.f32.mrb[6].mxu1  ;;  %v16636_v41 = vld [vmem:[#allocation11 + $0x264] ss:$16 sps:$4 sm:$0xff] (!%p14423_p12)   ;;  %v16638_v42 = vld [vmem:[#allocation11 + $0x60] ss:$16 sps:$4 sm:$0xff] (!%p14423_p12)   ;;  %11966 = vmatpush1.bf16.msra.mxu0 (!%p14423_p12), %v16633_v55  ;;  %11924 = vmatprep.subr.bf16.mxu1 (!%p14423_p12), %v16634_v32 }
 0x709   : > { %10226 = vst [vmem:[#allocation2] sm:$0xff] %v10210_v47  ;;  %10228 = vst [vmem:[#allocation2 + $0x10] sm:$0xff] %v10212_v40  ;;  %v10218_v51 = vadd.f32 %v9947_v48, %v8318_v45  ;;  %v10220_v39 = vadd.f32 %v10033_v0, %v8320_v46  ;;  %v9949_v56 = vpop.f32.mrb[7].mxu0  ;;  %v10035_v57 = vpop.f32.mrb[7].mxu1  ;;  %v16639_v35 = vld [vmem:[#allocation11 + $0x260] ss:$16 sps:$4 sm:$0xff] (!%p14423_p12)   ;;  %11967 = vmatprep.subr.bf16.mxu0 (!%p14423_p12), %v16636_v41  ;;  %11925 = vmatpush1.bf16.msra.mxu1 (!%p14423_p12), %v16638_v42 }
 0x70a   : > { %10227 = vst [vmem:[#allocation2 + $0x8] sm:$0xff] %v10211_v52  ;;  %10229 = vst [vmem:[#allocation2 + $0x18] sm:$0xff] %v10213_v53  ;;  %v10219_v60 = vadd.f32 %v9949_v56, %v8319_v44  ;;  %v10221_v61 = vadd.f32 %v10035_v57, %v8321_v50  ;;  %v16640_v36 = vld [vmem:[#allocation11 + $0x84] ss:$16 sps:$4 sm:$0xff] (!%p14423_p12)   ;;  %v16644_v46 = vld [vmem:[#allocation11 + $0x80] ss:$16 sps:$4 sm:$0xff] (!%p14423_p12)  }
 0x70b   : > { %10234 = vst [vmem:[#allocation2 + $0x40] sm:$0xff] %v10218_v51  ;;  %10236 = vst [vmem:[#allocation2 + $0x50] sm:$0xff] %v10220_v39  ;;  %v16642_v45 = vld [vmem:[#allocation11 + $0x284] ss:$16 sps:$4 sm:$0xff] (!%p14423_p12)   ;;  %v16645_v47 = vld [vmem:[#allocation11 + $0x280] ss:$16 sps:$4 sm:$0xff] (!%p14423_p12)   ;;  %11926 = vmatprep.subr.bf16.mxu1 (!%p14423_p12), %v16640_v36 }
 0x70c   : > { %10235 = vst [vmem:[#allocation2 + $0x48] sm:$0xff] %v10219_v60  ;;  %10237 = vst [vmem:[#allocation2 + $0x58] sm:$0xff] %v10221_v61  ;;  %11968 = vmatpush1.bf16.msra.mxu0 (!%p14423_p12), %v16639_v35  ;;  %v16646_v40 = vld [vmem:[#allocation11 + $0xa4] ss:$16 sps:$4 sm:$0xff] (!%p14423_p12)   ;;  %v16650_v43 = vld [vmem:[#allocation11 + $0xa0] ss:$16 sps:$4 sm:$0xff] (!%p14423_p12)  }
 0x70d   : > { %11969 = vmatprep.subr.bf16.mxu0 (!%p14423_p12), %v16642_v45  ;;  %v16648_v49 = vld [vmem:[#allocation11 + $0x2a4] ss:$16 sps:$4 sm:$0xff] (!%p14423_p12)   ;;  %11927 = vmatpush1.bf16.msra.mxu1 (!%p14423_p12), %v16644_v46  ;;  %v16651_v44 = vld [vmem:[#allocation11 + $0x2a0] ss:$16 sps:$4 sm:$0xff] (!%p14423_p12)  }
 0x70e   : > { %v16652_v50 = vld [vmem:[#allocation11 + $0xc4] ss:$16 sps:$4 sm:$0xff] (!%p14423_p12)   ;;  %11928 = vmatprep.subr.bf16.mxu1 (!%p14423_p12), %v16646_v40  ;;  %v16656_v53 = vld [vmem:[#allocation11 + $0xc0] ss:$16 sps:$4 sm:$0xff] (!%p14423_p12)  }
 0x70f   : > { %v16654_v52 = vld [vmem:[#allocation11 + $0x2c4] ss:$16 sps:$4 sm:$0xff] (!%p14423_p12)   ;;  %v16657_v48 = vld [vmem:[#allocation11 + $0x2c0] ss:$16 sps:$4 sm:$0xff] (!%p14423_p12)  }
 0x710   : > { %11970 = vmatpush1.bf16.msra.mxu0 (!%p14423_p12), %v16645_v47  ;;  %v16658_v0 = vld [vmem:[#allocation11 + $0xe4] ss:$16 sps:$4 sm:$0xff] (!%p14423_p12)   ;;  %v16662_v39 = vld [vmem:[#allocation11 + $0xe0] ss:$16 sps:$4 sm:$0xff] (!%p14423_p12)  }
 0x711   : > { %11971 = vmatprep.subr.bf16.mxu0 (!%p14423_p12), %v16648_v49  ;;  %11929 = vmatpush1.bf16.msra.mxu1 (!%p14423_p12), %v16650_v43  ;;  %v16660_v51 = vld [vmem:[#allocation11 + $0x2e4] ss:$16 sps:$4 sm:$0xff] (!%p14423_p12)   ;;  %v16663_v56 = vld [vmem:[#allocation11 + $0x2e0] ss:$16 sps:$4 sm:$0xff] (!%p14423_p12)  }
 0x712   : > { %11930 = vmatprep.subr.bf16.mxu1 (!%p14423_p12), %v16652_v50  ;;  %v16664_v57 = vld [vmem:[#allocation11 + $0x104] ss:$16 sps:$4 sm:$0xff] (!%p14423_p12)   ;;  %v16668_v61 = vld [vmem:[#allocation11 + $0x100] ss:$16 sps:$4 sm:$0xff] (!%p14423_p12)  }
 0x713   : > { %v16666_v60 = vld [vmem:[#allocation11 + $0x304] ss:$16 sps:$4 sm:$0xff] (!%p14423_p12)   ;;  %v16698_v40 = vld [vmem:[#allocation11 + $0x1a0] ss:$16 sps:$4 sm:$0xff] (!%p14423_p12)  }
 0x714   : > { %11972 = vmatpush1.bf16.msra.mxu0 (!%p14423_p12), %v16651_v44  ;;  %v10246_v33 = vld [vmem:[#allocation2] sm:$0xff] (!%p14423_p12)  ;;  %v10248_v55 = vld [vmem:[#allocation2 + $0x10] sm:$0xff] (!%p14423_p12) }
 0x715   : > { %11973 = vmatprep.subr.bf16.mxu0 (!%p14423_p12), %v16654_v52  ;;  %11931 = vmatpush1.bf16.msra.mxu1 (!%p14423_p12), %v16656_v53  ;;  %v10254_v34 = vld [vmem:[#allocation2 + $0x40] sm:$0xff] (!%p14423_p12)  ;;  %v10256_v47 = vld [vmem:[#allocation2 + $0x50] sm:$0xff] (!%p14423_p12) }
 0x716   : > { %11932 = vmatprep.subr.bf16.mxu1 (!%p14423_p12), %v16658_v0  ;;  %v16696_v32 = vld [vmem:[#allocation11 + $0x3a4] ss:$16 sps:$4 sm:$0xff] (!%p14423_p12)   ;;  %v16699_v52 = vld [vmem:[#allocation11 + $0x3a0] ss:$16 sps:$4 sm:$0xff] (!%p14423_p12)  }
 0x717   : > { %v16700_v53 = vld [vmem:[#allocation11 + $0x1c4] ss:$16 sps:$4 sm:$0xff] (!%p14423_p12)  }
 0x718   : > { %11974 = vmatpush1.bf16.msra.mxu0 (!%p14423_p12), %v16657_v48  ;;  %v16702_v0 = vld [vmem:[#allocation11 + $0x3c4] ss:$16 sps:$4 sm:$0xff] (!%p14423_p12)  }
 0x719   : > { %11975 = vmatprep.subr.bf16.mxu0 (!%p14423_p12), %v16660_v51  ;;  %11933 = vmatpush1.bf16.msra.mxu1 (!%p14423_p12), %v16662_v39  ;;  %v16704_v39 = vld [vmem:[#allocation11 + $0x1c0] ss:$16 sps:$4 sm:$0xff] (!%p14423_p12)  }
 0x71a   : > { %11934 = vmatprep.subr.bf16.mxu1 (!%p14423_p12), %v16664_v57 }
 0x71c   : > { %11976 = vmatpush1.bf16.msra.mxu0 (!%p14423_p12), %v16663_v56 }
 0x71d   : > { %11977 = vmatprep.subr.bf16.mxu0 (!%p14423_p12), %v16666_v60  ;;  %11935 = vmatpush1.bf16.msra.mxu1 (!%p14423_p12), %v16668_v61 }
 0x786   : > { %v10115_v59 = vpop.f32.mrb[8].mxu0 }
 0x787   : > { %v10214_v7 = vadd.f32 %v10115_v59, %v8314_v54  ;;  %v10201_v11 = vpop.f32.mrb[8].mxu1  ;;  %v10117_v12 = vpop.f32.mrb[9].mxu0  ;;  %10245 = sbr.rel (%p14423_p12) target bundleno = 2881 (0xb41), region = 104  ;;  %v16669_v54 = vld [vmem:[#allocation11 + $0x300] ss:$16 sps:$4 sm:$0xff] (!%p14423_p12)  }
 0x788   : > { %v10216_v24 = vadd.f32 %v10201_v11, %v8316_v1  ;;  %v10215_v62 = vadd.f32 %v10117_v12, %v8315_v58  ;;  %v10203_v63 = vpop.f32.mrb[9].mxu1  ;;  %v10119_v9 = vpop.f32.mrb[10].mxu0  ;;  %v16670_v1 = vld [vmem:[#allocation11 + $0x124] ss:$16 sps:$4 sm:$0xff] (!%p14423_p12)   ;;  %v16674_v59 = vld [vmem:[#allocation11 + $0x120] ss:$16 sps:$4 sm:$0xff] (!%p14423_p12)   ;;  %11978 = vmatpush1.bf16.msra.mxu0 (!%p14423_p12), %v16669_v54 }
 0x789   : > { %10230 = vst [vmem:[#allocation2 + $0x20] sm:$0xff] %v10214_v7  ;;  %v10217_v8 = vadd.f32 %v10203_v63, %v8317_v4  ;;  %v10222_v10 = vadd.f32 %v10119_v9, %v8322_v5  ;;  %v10205_v25 = vpop.f32.mrb[10].mxu1  ;;  %v10121_v2 = vpop.f32.mrb[11].mxu0  ;;  %v16672_v58 = vld [vmem:[#allocation11 + $0x324] ss:$16 sps:$4 sm:$0xff] (!%p14423_p12)   ;;  %11936 = vmatprep.subr.bf16.mxu1 (!%p14423_p12), %v16670_v1 }
 0x78a   : > { %10232 = vst [vmem:[#allocation2 + $0x30] sm:$0xff] %v10216_v24  ;;  %10231 = vst [vmem:[#allocation2 + $0x28] sm:$0xff] %v10215_v62  ;;  %v10224_v3 = vadd.f32 %v10205_v25, %v8324_v18  ;;  %v10223_v26 = vadd.f32 %v10121_v2, %v8323_v17  ;;  %v10207_v21 = vpop.f32.mrb[11].mxu1  ;;  %v16675_v4 = vld [vmem:[#allocation11 + $0x320] ss:$16 sps:$4 sm:$0xff] (!%p14423_p12)   ;;  %11979 = vmatprep.subr.bf16.mxu0 (!%p14423_p12), %v16672_v58  ;;  %11937 = vmatpush1.bf16.msra.mxu1 (!%p14423_p12), %v16674_v59  ;;  %v10247_v63 = vld [vmem:[#allocation2 + $0x8] sm:$0xff] (!%p14423_p12) }
 0x78b   : > { %10233 = vst [vmem:[#allocation2 + $0x38] sm:$0xff] %v10217_v8  ;;  %10238 = vst [vmem:[#allocation2 + $0x60] sm:$0xff] %v10222_v10  ;;  %v10225_v28 = vadd.f32 %v10207_v21, %v8325_v6  ;;  %v16676_v5 = vld [vmem:[#allocation11 + $0x144] ss:$16 sps:$4 sm:$0xff] (!%p14423_p12)   ;;  %v16680_v11 = vld [vmem:[#allocation11 + $0x140] ss:$16 sps:$4 sm:$0xff] (!%p14423_p12)  }
 0x78c   : > { %10240 = vst [vmem:[#allocation2 + $0x70] sm:$0xff] %v10224_v3  ;;  %10239 = vst [vmem:[#allocation2 + $0x68] sm:$0xff] %v10223_v26  ;;  %v16678_v7 = vld [vmem:[#allocation11 + $0x344] ss:$16 sps:$4 sm:$0xff] (!%p14423_p12)   ;;  %v16681_v12 = vld [vmem:[#allocation11 + $0x340] ss:$16 sps:$4 sm:$0xff] (!%p14423_p12)   ;;  %11980 = vmatpush1.bf16.msra.mxu0 (!%p14423_p12), %v16675_v4  ;;  %11938 = vmatprep.subr.bf16.mxu1 (!%p14423_p12), %v16676_v5 }
 0x78d   : > { %10241 = vst [vmem:[#allocation2 + $0x78] sm:$0xff] %v10225_v28  ;;  %v16682_v18 = vld [vmem:[#allocation11 + $0x164] ss:$16 sps:$4 sm:$0xff] (!%p14423_p12)   ;;  %11981 = vmatprep.subr.bf16.mxu0 (!%p14423_p12), %v16678_v7  ;;  %v16686_v24 = vld [vmem:[#allocation11 + $0x160] ss:$16 sps:$4 sm:$0xff] (!%p14423_p12)   ;;  %v19349_v6 = vld [vmem:[#allocation9] sm:$0xff] (!%p14423_p12) }
 0x78e   : > { %v16684_v17 = vld [vmem:[#allocation11 + $0x364] ss:$16 sps:$4 sm:$0xff]   ;;  %v16687_v62 = vld [vmem:[#allocation11 + $0x360] ss:$16 sps:$4 sm:$0xff]   ;;  %11939 = vmatpush1.bf16.msra.mxu1 %v16680_v11  ;;  %v10271_v10 = vrot.slane %v19349_v6, %v19121_v19  ;;  %v10279_v3 = vrot.slane %v19349_v6, %v19124_v22  ;;  %v10267_v16 = vrot.slane %v19349_v6, %v19114_v14  ;;  %v10275_v37 = vrot.slane %v19349_v6, %v19117_v15 }
 0x78f   : > { %v10255_v9 = vld [vmem:[#allocation2 + $0x48] sm:$0xff]  ;;  %v10249_v25 = vld [vmem:[#allocation2 + $0x18] sm:$0xff]  ;;  %11940 = vmatprep.subr.bf16.mxu1 %v16682_v18  ;;  %v16692_v21 = vld [vmem:[#allocation11 + $0x180] ss:$16 sps:$4 sm:$0xff]  }
 0x790   : > { %11982 = vmatpush1.bf16.msra.mxu0 %v16681_v12  ;;  %v16688_v8 = vld [vmem:[#allocation11 + $0x184] ss:$16 sps:$4 sm:$0xff]   ;;  %v16693_v28 = vld [vmem:[#allocation11 + $0x380] ss:$16 sps:$4 sm:$0xff]   ;;  %v10305_v29 = vadd.f32 %v10271_v10, %v10247_v63  ;;  %v10313_v30 = vadd.f32 %v10271_v10, %v10255_v9  ;;  %v10307_v27 = vadd.f32 %v10279_v3, %v10249_v25  ;;  %v10304_v45 = vadd.f32 %v10267_v16, %v10246_v33  ;;  %v16715_v9 = vld [vmem:[#allocation11 + $0x8] ss:$16 sps:$4 sm:$0xff]  }
 0x791   : > { %v10257_v2 = vld [vmem:[#allocation2 + $0x58] sm:$0xff]  ;;  %11983 = vmatprep.subr.bf16.mxu0 %v16684_v17  ;;  %v10312_v46 = vadd.f32 %v10267_v16, %v10254_v34  ;;  %v10306_v44 = vadd.f32 %v10275_v37, %v10248_v55  ;;  %v10314_v50 = vadd.f32 %v10275_v37, %v10256_v47  ;;  %v16705_v54 = vld [vmem:[#allocation11 + $0x3c0] ss:$16 sps:$4 sm:$0xff]   ;;  %v10286_v55 = vsub.s32 5, %v19111_v13 }
 0x792   : > { %v16690_v26 = vld [vmem:[#allocation11 + $0x384] ss:$16 sps:$4 sm:$0xff]   ;;  %v10315_v20 = vadd.f32 %v10279_v3, %v10257_v2  ;;  %11941 = vmatpush1.bf16.msra.mxu1 %v16686_v24  ;;  %v10321_v38 = vmul.f32 0.01, %v10305_v29  ;;  %v10329_v31 = vmul.f32 0.01, %v10313_v30 }
 0x793   : > { %11942 = vmatprep.subr.bf16.mxu1 %v16688_v8  ;;  %v10323_v41 = vmul.f32 0.01, %v10307_v27  ;;  %v10320_v56 = vmul.f32 0.01, %v10304_v45  ;;  %v10328_v57 = vmul.f32 0.01, %v10312_v46 }
 0x794   : > { %11984 = vmatpush1.bf16.msra.mxu0 %v16687_v62  ;;  %v10331_v42 = vmul.f32 0.01, %v10315_v20  ;;  %v10337_v35 = vmax.f32 %v10305_v29, %v10321_v38  ;;  %v10345_v36 = vmax.f32 %v10313_v30, %v10329_v31  ;;  %v10322_v60 = vmul.f32 0.01, %v10306_v44  ;;  %v16706_v1 = vld [vmem:[#allocation11 + $0x1e4] ss:$16 sps:$4 sm:$0xff]  }
 0x795   : > { %11985 = vmatprep.subr.bf16.mxu0 %v16690_v26  ;;  %v10339_v49 = vmax.f32 %v10307_v27, %v10323_v41  ;;  %v10330_v61 = vmul.f32 0.01, %v10314_v50  ;;  %v16708_v58 = vld [vmem:[#allocation11 + $0x3e4] ss:$16 sps:$4 sm:$0xff]   ;;  %v16710_v59 = vld [vmem:[#allocation11 + $0x1e0] ss:$16 sps:$4 sm:$0xff]   ;;  %v10336_v4 = vmax.f32 %v10304_v45, %v10320_v56  ;;  %v10344_v5 = vmax.f32 %v10312_v46, %v10328_v57 }
 0x796   : > { %v10347_v43 = vmax.f32 %v10315_v20, %v10331_v42  ;;  %11943 = vmatpush1.bf16.msra.mxu1 %v16692_v21  ;;  %v10353_v48 = vpack.c.bf16 %v10345_v36, %v10337_v35  ;;  %v10338_v7 = vmax.f32 %v10306_v44, %v10322_v60  ;;  %v16711_v12 = vld [vmem:[#allocation11 + $0x3e0] ss:$16 sps:$4 sm:$0xff]   ;;  %v16714_v18 = vld [vmem:[#allocation11 + $0x404] ss:$16 sps:$4 sm:$0xff]   ;;  %v16717_v17 = vld [vmem:[#allocation11 + $0xc] ss:$16 sps:$4 sm:$0xff]   ;;  %v10287_v36 = vrot.slane %v19349_v6, %v10286_v55 }
 0x797   : > { %11944 = vmatprep.subr.bf16.mxu1 %v16694_v23  ;;  %v10346_v11 = vmax.f32 %v10314_v50, %v10330_v61  ;;  %v19362_v24 = vpack.c.bf16 %v10344_v5, %v10336_v4  ;;  %v16712_v62 = vld [vmem:[#allocation11 + $0x400] ss:$16 sps:$4 sm:$0xff]   ;;  %v16720_v8 = vld [vmem:[#allocation11 + $0x424] ss:$16 sps:$4 sm:$0xff]   ;;  %v16723_v10 = vld [vmem:[#allocation11 + $0x2c] ss:$16 sps:$4 sm:$0xff]  }
 0x798   : > { %11986 = vmatpush1.bf16.msra.mxu0 %v16693_v28  ;;  %v19359_v51 = vpack.c.bf16 %v10347_v43, %v10339_v49  ;;  %11950 = vmatprep.mubr.bf16.mxu1 %v10353_v48  ;;  %v16718_v25 = vld [vmem:[#allocation11 + $0x420] ss:$16 sps:$4 sm:$0xff]   ;;  %v16721_v2 = vld [vmem:[#allocation11 + $0x28] ss:$16 sps:$4 sm:$0xff]   ;;  %v16726_v3 = vld [vmem:[#allocation11 + $0x444] ss:$16 sps:$4 sm:$0xff]  }
 0x799   : > { %11987 = vmatprep.subr.bf16.mxu0 %v16696_v32  ;;  %v19364_v63 = vpack.c.bf16 %v10346_v11, %v10338_v7  ;;  %v16729_v26 = vld [vmem:[#allocation11 + $0x4c] ss:$16 sps:$4 sm:$0xff]   ;;  %v16724_v21 = vld [vmem:[#allocation11 + $0x440] ss:$16 sps:$4 sm:$0xff]   ;;  %v16727_v28 = vld [vmem:[#allocation11 + $0x48] ss:$16 sps:$4 sm:$0xff]  }
 0x79a   : > { %11993 = vmatprep.mubr.bf16.mxu0 %v19359_v51  ;;  %11945 = vmatpush1.bf16.msra.mxu1 %v16698_v40  ;;  %v16732_v29 = vld [vmem:[#allocation11 + $0x464] ss:$16 sps:$4 sm:$0xff]   ;;  %v16735_v30 = vld [vmem:[#allocation11 + $0x6c] ss:$16 sps:$4 sm:$0xff]   ;;  %v16730_v16 = vld [vmem:[#allocation11 + $0x460] ss:$16 sps:$4 sm:$0xff]  }
 0x79b   : > { %11946 = vmatprep.subr.bf16.mxu1 %v16700_v53  ;;  %v16733_v23 = vld [vmem:[#allocation11 + $0x68] ss:$16 sps:$4 sm:$0xff]   ;;  %v16738_v33 = vld [vmem:[#allocation11 + $0x484] ss:$16 sps:$4 sm:$0xff]   ;;  %v16741_v34 = vld [vmem:[#allocation11 + $0x8c] ss:$16 sps:$4 sm:$0xff]  }
 0x79c   : > { %11988 = vmatpush1.bf16.msra.mxu0 %v16699_v52  ;;  %v16736_v27 = vld [vmem:[#allocation11 + $0x480] ss:$16 sps:$4 sm:$0xff]   ;;  %v16739_v20 = vld [vmem:[#allocation11 + $0x88] ss:$16 sps:$4 sm:$0xff]   ;;  %v16744_v37 = vld [vmem:[#allocation11 + $0x4a4] ss:$16 sps:$4 sm:$0xff]  }
 0x79d   : > { %11989 = vmatprep.subr.bf16.mxu0 %v16702_v0  ;;  %v16747_v38 = vld [vmem:[#allocation11 + $0xac] ss:$16 sps:$4 sm:$0xff]   ;;  %v16742_v31 = vld [vmem:[#allocation11 + $0x4a0] ss:$16 sps:$4 sm:$0xff]   ;;  %v16745_v32 = vld [vmem:[#allocation11 + $0xa8] ss:$16 sps:$4 sm:$0xff]  }
 0x79e   : > { %11947 = vmatpush1.bf16.msra.mxu1 %v16704_v39  ;;  %v16750_v41 = vld [vmem:[#allocation11 + $0x4c4] ss:$16 sps:$4 sm:$0xff]   ;;  %v16753_v42 = vld [vmem:[#allocation11 + $0xcc] ss:$16 sps:$4 sm:$0xff]   ;;  %v16748_v35 = vld [vmem:[#allocation11 + $0x4c0] ss:$16 sps:$4 sm:$0xff]  }
 0x79f   : > { %11948 = vmatprep.subr.bf16.mxu1 %v16706_v1  ;;  %v16751_v45 = vld [vmem:[#allocation11 + $0xc8] ss:$16 sps:$4 sm:$0xff]   ;;  %v16756_v46 = vld [vmem:[#allocation11 + $0x4e4] ss:$16 sps:$4 sm:$0xff]   ;;  %v16759_v47 = vld [vmem:[#allocation11 + $0xec] ss:$16 sps:$4 sm:$0xff]  }
 0x7a0   : > { %11990 = vmatpush1.bf16.msra.mxu0 %v16705_v54  ;;  %v16754_v40 = vld [vmem:[#allocation11 + $0x4e0] ss:$16 sps:$4 sm:$0xff]   ;;  %v10251_v49 = vld [vmem:[#allocation2 + $0x28] sm:$0xff] }
 0x7a1   : > { %11991 = vmatprep.subr.bf16.mxu0 %v16708_v58  ;;  %v10259_v43 = vld [vmem:[#allocation2 + $0x68] sm:$0xff]  ;;  %v10309_v50 = vadd.f32 %v10287_v36, %v10251_v49  ;;  %v16760_v56 = vld [vmem:[#allocation11 + $0x500] ss:$16 sps:$4 sm:$0xff]  }
 0x7a2   : > { %11949 = vmatpush1.bf16.msra.mxu1 %v16710_v59  ;;  %v16757_v44 = vld [vmem:[#allocation11 + $0xe8] ss:$16 sps:$4 sm:$0xff]   ;;  %v10317_v52 = vadd.f32 %v10287_v36, %v10259_v43  ;;  %v16762_v53 = vld [vmem:[#allocation11 + $0x504] ss:$16 sps:$4 sm:$0xff]   ;;  %v16771_v1 = vld [vmem:[#allocation11 + $0x12c] ss:$16 sps:$4 sm:$0xff]  }
 0x7a3   : > { %12090 = vmatprep.subr.bf16.mxu1 %v16717_v17  ;;  %v10325_v0 = vmul.f32 0.01, %v10309_v50  ;;  %v16763_v61 = vld [vmem:[#allocation11 + $0x108] ss:$16 sps:$4 sm:$0xff]   ;;  %v16768_v54 = vld [vmem:[#allocation11 + $0x524] ss:$16 sps:$4 sm:$0xff]  }
 0x7a4   : > { %11992 = vmatpush1.bf16.msra.mxu0 %v16711_v12  ;;  %v10333_v39 = vmul.f32 0.01, %v10317_v52  ;;  %v16766_v59 = vld [vmem:[#allocation11 + $0x520] ss:$16 sps:$4 sm:$0xff]   ;;  %v16769_v4 = vld [vmem:[#allocation11 + $0x128] ss:$16 sps:$4 sm:$0xff]  }
 0x7a5   : > { %12004 = vmatprep.subr.bf16.mxu0 %v16714_v18  ;;  %11951 = vmatmul.mubr.bf16.vlgmr.msra.gmra.mrb[0].mxu1 %v19362_v24  ;;  %v10341_v57 = vmax.f32 %v10309_v50, %v10325_v0  ;;  %v16774_v5 = vld [vmem:[#allocation11 + $0x544] ss:$16 sps:$4 sm:$0xff]   ;;  %v16777_v7 = vld [vmem:[#allocation11 + $0x14c] ss:$16 sps:$4 sm:$0xff]   ;;  %v16772_v11 = vld [vmem:[#allocation11 + $0x540] ss:$16 sps:$4 sm:$0xff]  }
 0x7a6   : > { %12091 = vmatpush1.bf16.msra.mxu1 %v16715_v9  ;;  %12122 = vmatprep.mubr.bf16.mxu1 %v10353_v48  ;;  %v16765_v48 = vld [vmem:[#allocation11 + $0x10c] ss:$16 sps:$4 sm:$0xff]   ;;  %v10349_v60 = vmax.f32 %v10317_v52, %v10333_v39  ;;  %v16775_v12 = vld [vmem:[#allocation11 + $0x148] ss:$16 sps:$4 sm:$0xff]   ;;  %v16780_v18 = vld [vmem:[#allocation11 + $0x564] ss:$16 sps:$4 sm:$0xff]  }
 0x7a7   : > { %11994 = vmatmul.mubr.bf16.vlgmr.msra.gmra.mrb[0].mxu0 %v19364_v63  ;;  %12092 = vmatprep.subr.bf16.mxu1 %v16723_v10  ;;  %v16783_v17 = vld [vmem:[#allocation11 + $0x16c] ss:$16 sps:$4 sm:$0xff]   ;;  %v10282_v9 = vsub.s32 4, %v19111_v13  ;;  %v16786_v10 = vld [vmem:[#allocation11 + $0x584] ss:$16 sps:$4 sm:$0xff]   ;;  %v10294_v50 = vsub.s32 7, %v19111_v13 }
 0x7a8   : > { %12005 = vmatpush1.bf16.msra.mxu0 %v16712_v62  ;;  %v19370_v58 = vpack.c.bf16 %v10349_v60, %v10341_v57  ;;  %v16778_v62 = vld [vmem:[#allocation11 + $0x560] ss:$16 sps:$4 sm:$0xff]   ;;  %v16799_v55 = vld [vmem:[#allocation11 + $0x1c8] ss:$16 sps:$4 sm:$0xff]   ;;  %v16819_v52 = vld [vmem:[#allocation11 + $0x22c] ss:$16 sps:$4 sm:$0xff]  }
 0x7a9   : > { %12006 = vmatprep.subr.bf16.mxu0 %v16720_v8  ;;  %v16781_v8 = vld [vmem:[#allocation11 + $0x168] ss:$16 sps:$4 sm:$0xff]   ;;  %v16822_v0 = vld [vmem:[#allocation11 + $0x644] ss:$16 sps:$4 sm:$0xff]   ;;  %v10295_v39 = vrot.slane %v19349_v6, %v10294_v50  ;;  %v16820_v57 = vld [vmem:[#allocation11 + $0x640] ss:$16 sps:$4 sm:$0xff]  }
 0x7aa   : > { %12093 = vmatpush1.bf16.msra.mxu1 %v16721_v2  ;;  %12036 = vmatprep.mubr.bf16.mxu0 %v19370_v58  ;;  %v16784_v2 = vld [vmem:[#allocation11 + $0x580] ss:$16 sps:$4 sm:$0xff]   ;;  %v16811_v43 = vld [vmem:[#allocation11 + $0x208] ss:$16 sps:$4 sm:$0xff]   ;;  %v16885_v50 = vld [vmem:[#allocation11 + $0x38c] ss:$16 sps:$4 sm:$0xff]  }
 0x7ab   : > { %12094 = vmatprep.subr.bf16.mxu1 %v16729_v26  ;;  %v16792_v26 = vld [vmem:[#allocation11 + $0x5a4] ss:$16 sps:$4 sm:$0xff]  }
 0x7ac   : > { %12007 = vmatpush1.bf16.msra.mxu0 %v16718_v25  ;;  %v16789_v25 = vld [vmem:[#allocation11 + $0x18c] ss:$16 sps:$4 sm:$0xff]  }
 0x7ad   : > { %12008 = vmatprep.subr.bf16.mxu0 %v16726_v3  ;;  %v16787_v3 = vld [vmem:[#allocation11 + $0x188] ss:$16 sps:$4 sm:$0xff]  }
 0x7ae   : > { %12095 = vmatpush1.bf16.msra.mxu1 %v16727_v28  ;;  %v10250_v28 = vld [vmem:[#allocation2 + $0x20] sm:$0xff]  ;;  %v10253_v60 = vld [vmem:[#allocation2 + $0x38] sm:$0xff] }
 0x7af   : > { %12096 = vmatprep.subr.bf16.mxu1 %v16735_v30  ;;  %v16795_v30 = vld [vmem:[#allocation11 + $0x1ac] ss:$16 sps:$4 sm:$0xff]  }
 0x7b0   : > { %12009 = vmatpush1.bf16.msra.mxu0 %v16724_v21  ;;  %v10283_v21 = vrot.slane %v19349_v6, %v10282_v9  ;;  %v16826_v6 = vld [vmem:[#allocation11 + $0x660] ss:$16 sps:$4 sm:$0xff]  }
 0x7b1   : > { %12010 = vmatprep.subr.bf16.mxu0 %v16732_v29  ;;  %v10258_v29 = vld [vmem:[#allocation2 + $0x60] sm:$0xff] }
 0x7b2   : > { %12097 = vmatpush1.bf16.msra.mxu1 %v16733_v23  ;;  %v10308_v23 = vadd.f32 %v10283_v21, %v10250_v28  ;;  %v16832_v9 = vld [vmem:[#allocation11 + $0x680] ss:$16 sps:$4 sm:$0xff]  }
 0x7b3   : > { %12098 = vmatprep.subr.bf16.mxu1 %v16741_v34  ;;  %v16793_v34 = vld [vmem:[#allocation11 + $0x1a8] ss:$16 sps:$4 sm:$0xff]   ;;  %v16844_v28 = vld [vmem:[#allocation11 + $0x6c0] ss:$16 sps:$4 sm:$0xff]  }
 0x7b4   : > { %12011 = vmatpush1.bf16.msra.mxu0 %v16730_v16  ;;  %v16790_v16 = vld [vmem:[#allocation11 + $0x5a0] ss:$16 sps:$4 sm:$0xff]  }
 0x7b5   : > { %12012 = vmatprep.subr.bf16.mxu0 %v16738_v33  ;;  %v10316_v33 = vadd.f32 %v10283_v21, %v10258_v29  ;;  %v16849_v21 = vld [vmem:[#allocation11 + $0x2cc] ss:$16 sps:$4 sm:$0xff]   ;;  %v16847_v29 = vld [vmem:[#allocation11 + $0x2c8] ss:$16 sps:$4 sm:$0xff]  }
 0x7b6   : > { %12099 = vmatpush1.bf16.msra.mxu1 %v16739_v20  ;;  %v16801_v20 = vld [vmem:[#allocation11 + $0x1cc] ss:$16 sps:$4 sm:$0xff]  }
 0x7b7   : > { %12100 = vmatprep.subr.bf16.mxu1 %v16747_v38  ;;  %v10324_v38 = vmul.f32 0.01, %v10308_v23 }
 0x7b8   : > { %12013 = vmatpush1.bf16.msra.mxu0 %v16736_v27  ;;  %v16798_v27 = vld [vmem:[#allocation11 + $0x5c4] ss:$16 sps:$4 sm:$0xff]  }
 0x7b9   : > { %12014 = vmatprep.subr.bf16.mxu0 %v16744_v37  ;;  %v16796_v37 = vld [vmem:[#allocation11 + $0x5c0] ss:$16 sps:$4 sm:$0xff]  }
 0x7ba   : > { %12101 = vmatpush1.bf16.msra.mxu1 %v16745_v32  ;;  %v16804_v32 = vld [vmem:[#allocation11 + $0x5e4] ss:$16 sps:$4 sm:$0xff]  }
 0x7bb   : > { %12102 = vmatprep.subr.bf16.mxu1 %v16753_v42  ;;  %v16802_v42 = vld [vmem:[#allocation11 + $0x5e0] ss:$16 sps:$4 sm:$0xff]  }
 0x7bc   : > { %12015 = vmatpush1.bf16.msra.mxu0 %v16742_v31  ;;  %v10332_v31 = vmul.f32 0.01, %v10316_v33 }
 0x7bd   : > { %12016 = vmatprep.subr.bf16.mxu0 %v16750_v41  ;;  %v16807_v41 = vld [vmem:[#allocation11 + $0x1ec] ss:$16 sps:$4 sm:$0xff]  }
 0x7be   : > { %12103 = vmatpush1.bf16.msra.mxu1 %v16751_v45  ;;  %v10348_v36 = vmax.f32 %v10316_v33, %v10332_v31  ;;  %v16805_v45 = vld [vmem:[#allocation11 + $0x1e8] ss:$16 sps:$4 sm:$0xff]   ;;  %v16867_v31 = vld [vmem:[#allocation11 + $0x32c] ss:$16 sps:$4 sm:$0xff]  }
 0x7bf   : > { %12104 = vmatprep.subr.bf16.mxu1 %v16759_v47  ;;  %v16813_v47 = vld [vmem:[#allocation11 + $0x20c] ss:$16 sps:$4 sm:$0xff]   ;;  %v16853_v33 = vld [vmem:[#allocation11 + $0x2e8] ss:$16 sps:$4 sm:$0xff]  }
 0x7c0   : > { %12017 = vmatpush1.bf16.msra.mxu0 %v16748_v35  ;;  %v10340_v35 = vmax.f32 %v10308_v23, %v10324_v38  ;;  %v16850_v23 = vld [vmem:[#allocation11 + $0x6e0] ss:$16 sps:$4 sm:$0xff]   ;;  %v16864_v38 = vld [vmem:[#allocation11 + $0x724] ss:$16 sps:$4 sm:$0xff]  }
 0x7c1   : > { %12018 = vmatprep.subr.bf16.mxu0 %v16756_v46  ;;  %v16810_v46 = vld [vmem:[#allocation11 + $0x604] ss:$16 sps:$4 sm:$0xff]  }
 0x7c2   : > { %12105 = vmatpush1.bf16.msra.mxu1 %v16757_v44  ;;  %v19375_v49 = vpack.c.bf16 %v10348_v36, %v10340_v35  ;;  %v16816_v44 = vld [vmem:[#allocation11 + $0x624] ss:$16 sps:$4 sm:$0xff]   ;;  %v16868_v35 = vld [vmem:[#allocation11 + $0x740] ss:$16 sps:$4 sm:$0xff]   ;;  %v16871_v36 = vld [vmem:[#allocation11 + $0x348] ss:$16 sps:$4 sm:$0xff]  }
 0x7c3   : > { %12106 = vmatprep.subr.bf16.mxu1 %v16765_v48  ;;  %v16817_v48 = vld [vmem:[#allocation11 + $0x228] ss:$16 sps:$4 sm:$0xff]  }
 0x7c4   : > { %12019 = vmatpush1.bf16.msra.mxu0 %v16754_v40  ;;  %v16808_v40 = vld [vmem:[#allocation11 + $0x600] ss:$16 sps:$4 sm:$0xff]  }
 0x7c5   : > { %12020 = vmatprep.subr.bf16.mxu0 %v16762_v53  ;;  %v16814_v53 = vld [vmem:[#allocation11 + $0x620] ss:$16 sps:$4 sm:$0xff]  }
 0x7c6   : > { %12107 = vmatpush1.bf16.msra.mxu1 %v16763_v61  ;;  %v16823_v61 = vld [vmem:[#allocation11 + $0x248] ss:$16 sps:$4 sm:$0xff]  }
 0x7c7   : > { %12108 = vmatprep.subr.bf16.mxu1 %v16771_v1  ;;  %v10261_v1 = vld [vmem:[#allocation2 + $0x78] sm:$0xff] }
 0x7c8   : > { %12021 = vmatpush1.bf16.msra.mxu0 %v16760_v56  ;;  %v16825_v56 = vld [vmem:[#allocation11 + $0x24c] ss:$16 sps:$4 sm:$0xff]  }
 0x7c9   : > { %12022 = vmatprep.subr.bf16.mxu0 %v16768_v54  ;;  %v16828_v54 = vld [vmem:[#allocation11 + $0x664] ss:$16 sps:$4 sm:$0xff]  }
 0x7ca   : > { %12109 = vmatpush1.bf16.msra.mxu1 %v16769_v4  ;;  %v10319_v4 = vadd.f32 %v10295_v39, %v10261_v1 }
 0x7cb   : > { %12110 = vmatprep.subr.bf16.mxu1 %v16777_v7 }
 0x7cc   : > { %12023 = vmatpush1.bf16.msra.mxu0 %v16766_v59  ;;  %v16831_v59 = vld [vmem:[#allocation11 + $0x26c] ss:$16 sps:$4 sm:$0xff]   ;;  %v10335_v7 = vmul.f32 0.01, %v10319_v4 }
 0x7cd   : > { %12024 = vmatprep.subr.bf16.mxu0 %v16774_v5 }
 0x7ce   : > { %12111 = vmatpush1.bf16.msra.mxu1 %v16775_v12 }
 0x7cf   : > { %12112 = vmatprep.subr.bf16.mxu1 %v16783_v17  ;;  %v10351_v17 = vmax.f32 %v10319_v4, %v10335_v7  ;;  %v16892_v4 = vld [vmem:[#allocation11 + $0x7c0] ss:$16 sps:$4 sm:$0xff]  }
 0x7d0   : > { %12025 = vmatpush1.bf16.msra.mxu0 %v16772_v11  ;;  %v16829_v11 = vld [vmem:[#allocation11 + $0x268] ss:$16 sps:$4 sm:$0xff]  }
 0x7d1   : > { %12026 = vmatprep.subr.bf16.mxu0 %v16780_v18  ;;  %v16837_v18 = vld [vmem:[#allocation11 + $0x28c] ss:$16 sps:$4 sm:$0xff]  }
 0x7d2   : > { %12113 = vmatpush1.bf16.msra.mxu1 %v16781_v8  ;;  %v16835_v8 = vld [vmem:[#allocation11 + $0x288] ss:$16 sps:$4 sm:$0xff]  }
 0x7d3   : > { %12114 = vmatprep.subr.bf16.mxu1 %v16789_v25  ;;  %v16843_v25 = vld [vmem:[#allocation11 + $0x2ac] ss:$16 sps:$4 sm:$0xff]  }
 0x7d4   : > { %12027 = vmatpush1.bf16.msra.mxu0 %v16778_v62 }
 0x7d5   : > { %12028 = vmatprep.subr.bf16.mxu0 %v16786_v10  ;;  %v16840_v10 = vld [vmem:[#allocation11 + $0x6a4] ss:$16 sps:$4 sm:$0xff]  }
 0x7d6   : > { %12115 = vmatpush1.bf16.msra.mxu1 %v16787_v3  ;;  %v16841_v3 = vld [vmem:[#allocation11 + $0x2a8] ss:$16 sps:$4 sm:$0xff]  }
 0x7d7   : > { %12116 = vmatprep.subr.bf16.mxu1 %v16795_v30  ;;  %v16852_v30 = vld [vmem:[#allocation11 + $0x6e4] ss:$16 sps:$4 sm:$0xff]  }
 0x7d8   : > { %12029 = vmatpush1.bf16.msra.mxu0 %v16784_v2  ;;  %v16838_v2 = vld [vmem:[#allocation11 + $0x6a0] ss:$16 sps:$4 sm:$0xff]  }
 0x7d9   : > { %12030 = vmatprep.subr.bf16.mxu0 %v16792_v26  ;;  %v16846_v26 = vld [vmem:[#allocation11 + $0x6c4] ss:$16 sps:$4 sm:$0xff]  }
 0x7da   : > { %12117 = vmatpush1.bf16.msra.mxu1 %v16793_v34  ;;  %v16858_v34 = vld [vmem:[#allocation11 + $0x704] ss:$16 sps:$4 sm:$0xff]  }
 0x7db   : > { %12118 = vmatprep.subr.bf16.mxu1 %v16801_v20  ;;  %v16856_v20 = vld [vmem:[#allocation11 + $0x700] ss:$16 sps:$4 sm:$0xff]  }
 0x7dc   : > { %12031 = vmatpush1.bf16.msra.mxu0 %v16790_v16  ;;  %v16855_v16 = vld [vmem:[#allocation11 + $0x2ec] ss:$16 sps:$4 sm:$0xff]  }
 0x7dd   : > { %12032 = vmatprep.subr.bf16.mxu0 %v16798_v27  ;;  %v16861_v27 = vld [vmem:[#allocation11 + $0x30c] ss:$16 sps:$4 sm:$0xff]  }
 0x7de   : > { %12119 = vmatpush1.bf16.msra.mxu1 %v16799_v55  ;;  %v16862_v55 = vld [vmem:[#allocation11 + $0x720] ss:$16 sps:$4 sm:$0xff]  }
 0x7df   : > { %12120 = vmatprep.subr.bf16.mxu1 %v16807_v41  ;;  %v16870_v41 = vld [vmem:[#allocation11 + $0x744] ss:$16 sps:$4 sm:$0xff]  }
 0x7e0   : > { %12033 = vmatpush1.bf16.msra.mxu0 %v16796_v37  ;;  %v16859_v37 = vld [vmem:[#allocation11 + $0x308] ss:$16 sps:$4 sm:$0xff]  }
 0x7e1   : > { %12034 = vmatprep.subr.bf16.mxu0 %v16804_v32  ;;  %v16865_v32 = vld [vmem:[#allocation11 + $0x328] ss:$16 sps:$4 sm:$0xff]  }
 0x7e2   : > { %12121 = vmatpush1.bf16.msra.mxu1 %v16805_v45  ;;  %v16876_v45 = vld [vmem:[#allocation11 + $0x764] ss:$16 sps:$4 sm:$0xff]  }
 0x7e3   : > { %12133 = vmatprep.subr.bf16.mxu1 %v16813_v47  ;;  %v10290_v47 = vsub.s32 6, %v19111_v13  ;;  %v16886_v13 = vld [vmem:[#allocation11 + $0x7a0] ss:$16 sps:$4 sm:$0xff]  }
 0x7e4   : > { %12035 = vmatpush1.bf16.msra.mxu0 %v16802_v42  ;;  %v16873_v42 = vld [vmem:[#allocation11 + $0x34c] ss:$16 sps:$4 sm:$0xff]  }
 0x7e5   : > { %12047 = vmatprep.subr.bf16.mxu0 %v16810_v46  ;;  %12123 = vmatmul.mubr.bf16.vlgmr.msra.gmra.mrb[4].mxu1 %v19362_v24  ;;  %v10311_v24 = vadd.f32 %v10295_v39, %v10253_v60  ;;  %v16879_v46 = vld [vmem:[#allocation11 + $0x36c] ss:$16 sps:$4 sm:$0xff]   ;;  %v16888_v39 = vld [vmem:[#allocation11 + $0x7a4] ss:$16 sps:$4 sm:$0xff]  }
 0x7e6   : > { %12134 = vmatpush1.bf16.msra.mxu1 %v16811_v43  ;;  %12165 = vmatprep.mubr.bf16.mxu1 %v19359_v51  ;;  %v16834_v51 = vld [vmem:[#allocation11 + $0x684] ss:$16 sps:$4 sm:$0xff]   ;;  %v16877_v43 = vld [vmem:[#allocation11 + $0x368] ss:$16 sps:$4 sm:$0xff]  }
 0x7e7   : > { %12037 = vmatmul.mubr.bf16.vlgmr.msra.gmra.mrb[0].mxu0 %v19375_v49  ;;  %12135 = vmatprep.subr.bf16.mxu1 %v16819_v52  ;;  %v10327_v5 = vmul.f32 0.01, %v10311_v24  ;;  %v16880_v52 = vld [vmem:[#allocation11 + $0x780] ss:$16 sps:$4 sm:$0xff]  }
 0x7e8   : > { %12048 = vmatpush1.bf16.msra.mxu0 %v16808_v40  ;;  %v16874_v40 = vld [vmem:[#allocation11 + $0x760] ss:$16 sps:$4 sm:$0xff]  }
 0x7e9   : > { %12049 = vmatprep.subr.bf16.mxu0 %v16816_v44  ;;  %v10343_v12 = vmax.f32 %v10311_v24, %v10327_v5  ;;  %v16882_v44 = vld [vmem:[#allocation11 + $0x784] ss:$16 sps:$4 sm:$0xff]   ;;  %v16895_v5 = vld [vmem:[#allocation11 + $0x3c8] ss:$16 sps:$4 sm:$0xff]  }
 0x7ea   : > { %12136 = vmatpush1.bf16.msra.mxu1 %v16817_v48  ;;  %v17112_v48 = vld [vmem:[#allocation9] sm:$0xff]  ;;  %v16894_v24 = vld [vmem:[#allocation11 + $0x7c4] ss:$16 sps:$4 sm:$0xff]  }
 0x7eb   : > { %12137 = vmatprep.subr.bf16.mxu1 %v16825_v56  ;;  %v19382_v62 = vpack.c.bf16 %v10351_v17, %v10343_v12  ;;  %v10252_v56 = vld [vmem:[#allocation2 + $0x30] sm:$0xff] }
 0x7ec   : > { %12050 = vmatpush1.bf16.msra.mxu0 %v16814_v53  ;;  %v16883_v53 = vld [vmem:[#allocation11 + $0x388] ss:$16 sps:$4 sm:$0xff]   ;;  %v10260_v60 = vld [vmem:[#allocation2 + $0x70] sm:$0xff] }
 0x7ed   : > { %12051 = vmatprep.subr.bf16.mxu0 %v16822_v0  ;;  %12079 = vmatprep.mubr.bf16.mxu0 %v19382_v62  ;;  %v10291_v0 = vrot.slane %v17112_v48, %v10290_v47  ;;  %v16903_v12 = vld [vmem:[#allocation11 + $0x3ec] ss:$16 sps:$4 sm:$0xff]  }
 0x7ee   : > { %12138 = vmatpush1.bf16.msra.mxu1 %v16823_v61  ;;  %v16889_v61 = vld [vmem:[#allocation11 + $0x3a8] ss:$16 sps:$4 sm:$0xff]   ;;  %v17018_v47 = vld [vmem:[#allocation14 + $0x60] ss:$8 sps:$4 sm:$0xff]  }
 0x7ef   : > { %12139 = vmatprep.subr.bf16.mxu1 %v16831_v59  ;;  %v10318_v1 = vadd.f32 %v10291_v0, %v10260_v60  ;;  %v16897_v59 = vld [vmem:[#allocation11 + $0x3cc] ss:$16 sps:$4 sm:$0xff]  }
 0x7f0   : > { %12052 = vmatpush1.bf16.msra.mxu0 %v16820_v57  ;;  %v16891_v57 = vld [vmem:[#allocation11 + $0x3ac] ss:$16 sps:$4 sm:$0xff]  }
 0x7f1   : > { %12053 = vmatprep.subr.bf16.mxu0 %v16828_v54  ;;  %v10310_v54 = vadd.f32 %v10291_v0, %v10252_v56  ;;  %v16933_v48 = vld [vmem:[#allocation11 + $0x52c] ss:$16 sps:$4 sm:$0xff]   ;;  %v16931_v56 = vld [vmem:[#allocation11 + $0x528] ss:$16 sps:$4 sm:$0xff]  }
 0x7f2   : > { %12140 = vmatpush1.bf16.msra.mxu1 %v16829_v11  ;;  %v16900_v11 = vld [vmem:[#allocation11 + $0x7e4] ss:$16 sps:$4 sm:$0xff]  }
 0x7f3   : > { %12141 = vmatprep.subr.bf16.mxu1 %v16837_v18  ;;  %v10326_v7 = vmul.f32 0.01, %v10310_v54  ;;  %v17024_v0 = vld [vmem:[#allocation14 + $0x80] ss:$8 sps:$4 sm:$0xff]   ;;  %v17027_v60 = vld [vmem:[#allocation14 + $0x90] ss:$8 sps:$4 sm:$0xff]  }
 0x7f4   : > { %12054 = vmatpush1.bf16.msra.mxu0 %v16826_v6  ;;  %v10334_v6 = vmul.f32 0.01, %v10318_v1 }
 0x7f5   : > { %12055 = vmatprep.subr.bf16.mxu0 %v16834_v51  ;;  %v16898_v51 = vld [vmem:[#allocation11 + $0x7e0] ss:$16 sps:$4 sm:$0xff]   ;;  %v10342_v18 = vmax.f32 %v10310_v54, %v10326_v7  ;;  %v16939_v54 = vld [vmem:[#allocation11 + $0x56c] ss:$16 sps:$4 sm:$0xff]  }
 0x7f6   : > { %12142 = vmatpush1.bf16.msra.mxu1 %v16835_v8  ;;  %v10350_v17 = vmax.f32 %v10318_v1, %v10334_v6  ;;  %v16906_v8 = vld [vmem:[#allocation11 + $0x40c] ss:$16 sps:$4 sm:$0xff]   ;;  %v17038_v7 = vld [vmem:[#allocation14 + $0xc4] ss:$8 sps:$4 sm:$0xff]  }
 0x7f7   : > { %12143 = vmatprep.subr.bf16.mxu1 %v16843_v25  ;;  %v17030_v1 = vld [vmem:[#allocation14 + $0xa0] ss:$8 sps:$4 sm:$0xff]   ;;  %v16940_v6 = vld [vmem:[#allocation11 + $0x588] ss:$16 sps:$4 sm:$0xff]  }
 0x7f8   : > { %12056 = vmatpush1.bf16.msra.mxu0 %v16832_v9  ;;  %v16901_v9 = vld [vmem:[#allocation11 + $0x3e8] ss:$16 sps:$4 sm:$0xff]   ;;  %v19386_v25 = vpack.c.bf16 %v10350_v17, %v10342_v18  ;;  %v16948_v18 = vld [vmem:[#allocation11 + $0x5cc] ss:$16 sps:$4 sm:$0xff]  }
 0x7f9   : > { %12057 = vmatprep.subr.bf16.mxu0 %v16840_v10  ;;  %v16904_v10 = vld [vmem:[#allocation11 + $0x408] ss:$16 sps:$4 sm:$0xff]  }
 0x7fa   : > { %12144 = vmatpush1.bf16.msra.mxu1 %v16841_v3  ;;  %v17000_v3 = vld [vmem:[#allocation14] ss:$8 sps:$4 sm:$0xff]   ;;  %v16946_v17 = vld [vmem:[#allocation11 + $0x5c8] ss:$16 sps:$4 sm:$0xff]  }
 0x7fb   : > { %12145 = vmatprep.subr.bf16.mxu1 %v16849_v21  ;;  %v16907_v21 = vld [vmem:[#allocation11 + $0x428] ss:$16 sps:$4 sm:$0xff]  }
 0x7fc   : > { %12058 = vmatpush1.bf16.msra.mxu0 %v16838_v2  ;;  %v16909_v2 = vld [vmem:[#allocation11 + $0x42c] ss:$16 sps:$4 sm:$0xff]  }
 0x7fd   : > { %12059 = vmatprep.subr.bf16.mxu0 %v16846_v26  ;;  %v17002_v26 = vld [vmem:[#allocation14 + $0x4] ss:$8 sps:$4 sm:$0xff]  }
 0x7fe   : > { %12146 = vmatpush1.bf16.msra.mxu1 %v16847_v29  ;;  %v16912_v29 = vld [vmem:[#allocation11 + $0x44c] ss:$16 sps:$4 sm:$0xff]  }
 0x7ff   : > { %12147 = vmatprep.subr.bf16.mxu1 %v16855_v16  ;;  %v17008_v16 = vld [vmem:[#allocation14 + $0x24] ss:$8 sps:$4 sm:$0xff]  }
 0x800   : > { %12060 = vmatpush1.bf16.msra.mxu0 %v16844_v28  ;;  %v17005_v28 = vld [vmem:[#allocation14 + $0x14] ss:$8 sps:$4 sm:$0xff]  }
 0x801   : > { %12061 = vmatprep.subr.bf16.mxu0 %v16852_v30  ;;  %v17003_v30 = vld [vmem:[#allocation14 + $0x10] ss:$8 sps:$4 sm:$0xff]  }
 0x802   : > { %12148 = vmatpush1.bf16.msra.mxu1 %v16853_v33  ;;  %v16915_v33 = vld [vmem:[#allocation11 + $0x46c] ss:$16 sps:$4 sm:$0xff]  }
 0x803   : > { %12149 = vmatprep.subr.bf16.mxu1 %v16861_v27  ;;  %v16918_v27 = vld [vmem:[#allocation11 + $0x48c] ss:$16 sps:$4 sm:$0xff]  }
 0x804   : > { %12062 = vmatpush1.bf16.msra.mxu0 %v16850_v23  ;;  %v16910_v23 = vld [vmem:[#allocation11 + $0x448] ss:$16 sps:$4 sm:$0xff]  }
 0x805   : > { %12063 = vmatprep.subr.bf16.mxu0 %v16858_v34  ;;  %v16913_v34 = vld [vmem:[#allocation11 + $0x468] ss:$16 sps:$4 sm:$0xff]  }
 0x806   : > { %12150 = vmatpush1.bf16.msra.mxu1 %v16859_v37  ;;  %v17014_v37 = vld [vmem:[#allocation14 + $0x44] ss:$8 sps:$4 sm:$0xff]  }
 0x807   : > { %12151 = vmatprep.subr.bf16.mxu1 %v16867_v31  ;;  %v16921_v31 = vld [vmem:[#allocation11 + $0x4ac] ss:$16 sps:$4 sm:$0xff]  }
 0x808   : > { %12064 = vmatpush1.bf16.msra.mxu0 %v16856_v20  ;;  %v17011_v20 = vld [vmem:[#allocation14 + $0x34] ss:$8 sps:$4 sm:$0xff]  }
 0x809   : > { %12065 = vmatprep.subr.bf16.mxu0 %v16864_v38  ;;  %v16916_v38 = vld [vmem:[#allocation11 + $0x488] ss:$16 sps:$4 sm:$0xff]  }
 0x80a   : > { %12152 = vmatpush1.bf16.msra.mxu1 %v16865_v32  ;;  %v17017_v32 = vld [vmem:[#allocation14 + $0x54] ss:$8 sps:$4 sm:$0xff]  }
 0x80b   : > { %12153 = vmatprep.subr.bf16.mxu1 %v16873_v42  ;;  %v16924_v42 = vld [vmem:[#allocation11 + $0x4cc] ss:$16 sps:$4 sm:$0xff]  }
 0x80c   : > { %12066 = vmatpush1.bf16.msra.mxu0 %v16862_v55  ;;  %v17012_v55 = vld [vmem:[#allocation14 + $0x40] ss:$8 sps:$4 sm:$0xff]  }
 0x80d   : > { %12067 = vmatprep.subr.bf16.mxu0 %v16870_v41  ;;  %v16919_v41 = vld [vmem:[#allocation11 + $0x4a8] ss:$16 sps:$4 sm:$0xff]  }
 0x80e   : > { %12154 = vmatpush1.bf16.msra.mxu1 %v16871_v36  ;;  %v17020_v36 = vld [vmem:[#allocation14 + $0x64] ss:$8 sps:$4 sm:$0xff]  }
 0x80f   : > { %12155 = vmatprep.subr.bf16.mxu1 %v16879_v46  ;;  %v16927_v46 = vld [vmem:[#allocation11 + $0x4ec] ss:$16 sps:$4 sm:$0xff]  }
 0x810   : > { %12068 = vmatpush1.bf16.msra.mxu0 %v16868_v35  ;;  %v17015_v35 = vld [vmem:[#allocation14 + $0x50] ss:$8 sps:$4 sm:$0xff]  }
 0x811   : > { %12069 = vmatprep.subr.bf16.mxu0 %v16876_v45  ;;  %v16922_v45 = vld [vmem:[#allocation11 + $0x4c8] ss:$16 sps:$4 sm:$0xff]  }
 0x812   : > { %12156 = vmatpush1.bf16.msra.mxu1 %v16877_v43  ;;  %v16925_v43 = vld [vmem:[#allocation11 + $0x4e8] ss:$16 sps:$4 sm:$0xff]  }
 0x813   : > { %12157 = vmatprep.subr.bf16.mxu1 %v16885_v50  ;;  %v17021_v50 = vld [vmem:[#allocation14 + $0x70] ss:$8 sps:$4 sm:$0xff]  }
 0x814   : > { %12070 = vmatpush1.bf16.msra.mxu0 %v16874_v40  ;;  %v17023_v40 = vld [vmem:[#allocation14 + $0x74] ss:$8 sps:$4 sm:$0xff]  }
 0x815   : > { %12071 = vmatprep.subr.bf16.mxu0 %v16882_v44  ;;  %v16930_v44 = vld [vmem:[#allocation11 + $0x50c] ss:$16 sps:$4 sm:$0xff]  }
 0x816   : > { %12158 = vmatpush1.bf16.msra.mxu1 %v16883_v53  ;;  %v16928_v53 = vld [vmem:[#allocation11 + $0x508] ss:$16 sps:$4 sm:$0xff]  }
 0x817   : > { %12159 = vmatprep.subr.bf16.mxu1 %v16891_v57  ;;  %v16936_v57 = vld [vmem:[#allocation11 + $0x54c] ss:$16 sps:$4 sm:$0xff]  }
 0x818   : > { %12072 = vmatpush1.bf16.msra.mxu0 %v16880_v52  ;;  %v17026_v52 = vld [vmem:[#allocation14 + $0x84] ss:$8 sps:$4 sm:$0xff]  }
 0x819   : > { %12073 = vmatprep.subr.bf16.mxu0 %v16888_v39  ;;  %v17029_v39 = vld [vmem:[#allocation14 + $0x94] ss:$8 sps:$4 sm:$0xff]  }
 0x81a   : > { %12160 = vmatpush1.bf16.msra.mxu1 %v16889_v61  ;;  %v16934_v61 = vld [vmem:[#allocation11 + $0x548] ss:$16 sps:$4 sm:$0xff]  }
 0x81b   : > { %12161 = vmatprep.subr.bf16.mxu1 %v16897_v59  ;;  %v16937_v59 = vld [vmem:[#allocation11 + $0x568] ss:$16 sps:$4 sm:$0xff]  }
 0x81c   : > { %12074 = vmatpush1.bf16.msra.mxu0 %v16886_v13  ;;  %v17032_v13 = vld [vmem:[#allocation14 + $0xa4] ss:$8 sps:$4 sm:$0xff]  }
 0x81d   : > { %12075 = vmatprep.subr.bf16.mxu0 %v16894_v24  ;;  %v17035_v24 = vld [vmem:[#allocation14 + $0xb4] ss:$8 sps:$4 sm:$0xff]  }
 0x81e   : > { %12162 = vmatpush1.bf16.msra.mxu1 %v16895_v5  ;;  %v17033_v5 = vld [vmem:[#allocation14 + $0xb0] ss:$8 sps:$4 sm:$0xff]  }
 0x81f   : > { %12163 = vmatprep.subr.bf16.mxu1 %v16903_v12  ;;  %v17036_v12 = vld [vmem:[#allocation14 + $0xc0] ss:$8 sps:$4 sm:$0xff]  }
 0x820   : > { %12076 = vmatpush1.bf16.msra.mxu0 %v16892_v4  ;;  %v16942_v4 = vld [vmem:[#allocation11 + $0x58c] ss:$16 sps:$4 sm:$0xff]  }
 0x821   : > { %12077 = vmatprep.subr.bf16.mxu0 %v16900_v11  ;;  %v16945_v11 = vld [vmem:[#allocation11 + $0x5ac] ss:$16 sps:$4 sm:$0xff]  }
 0x822   : > { %12164 = vmatpush1.bf16.msra.mxu1 %v16901_v9  ;;  %v16951_v9 = vld [vmem:[#allocation11 + $0x5ec] ss:$16 sps:$4 sm:$0xff]  }
 0x823   : > { %12176 = vmatprep.subr.bf16.mxu1 %v16906_v8  ;;  %v16949_v8 = vld [vmem:[#allocation11 + $0x5e8] ss:$16 sps:$4 sm:$0xff]  }
 0x824   : > { %12078 = vmatpush1.bf16.msra.mxu0 %v16898_v51  ;;  %v16943_v51 = vld [vmem:[#allocation11 + $0x5a8] ss:$16 sps:$4 sm:$0xff]  }
 0x825   : > { %12166 = vmatmul.mubr.bf16.vlgmr.msra.gmra.mrb[4].mxu1 %v19364_v63  ;;  %12678 = vmatprep.subr.bf16.mxu0 %v17002_v26  ;;  %v17006_v63 = vld [vmem:[#allocation14 + $0x20] ss:$8 sps:$4 sm:$0xff]   ;;  %v16955_v26 = vld [vmem:[#allocation11 + $0x628] ss:$16 sps:$4 sm:$0xff]  }
 0x826   : > { %12177 = vmatpush1.bf16.msra.mxu1 %v16904_v10  ;;  %12208 = vmatprep.mubr.bf16.mxu1 %v19370_v58  ;;  %v17009_v58 = vld [vmem:[#allocation14 + $0x30] ss:$8 sps:$4 sm:$0xff]  }
 0x827   : > { %12080 = vmatmul.mubr.bf16.vlgmr.msra.gmra.mrb[0].mxu0 %v19386_v25  ;;  %12178 = vmatprep.subr.bf16.mxu1 %v16909_v2  ;;  %v16954_v10 = vld [vmem:[#allocation11 + $0x60c] ss:$16 sps:$4 sm:$0xff]   ;;  %v16952_v2 = vld [vmem:[#allocation11 + $0x608] ss:$16 sps:$4 sm:$0xff]  }
 0x828   : > { %12679 = vmatpush1.bf16.msra.mxu0 %v17000_v3  ;;  %v16957_v3 = vld [vmem:[#allocation11 + $0x62c] ss:$16 sps:$4 sm:$0xff]  }
 0x829   : > { %12680 = vmatprep.subr.bf16.mxu0 %v17005_v28  ;;  %v16958_v28 = vld [vmem:[#allocation11 + $0x648] ss:$16 sps:$4 sm:$0xff]  }
 0x82a   : > { %12179 = vmatpush1.bf16.msra.mxu1 %v16907_v21  ;;  %v16960_v21 = vld [vmem:[#allocation11 + $0x64c] ss:$16 sps:$4 sm:$0xff]  }
 0x82b   : > { %12180 = vmatprep.subr.bf16.mxu1 %v16912_v29  ;;  %v16963_v29 = vld [vmem:[#allocation11 + $0x66c] ss:$16 sps:$4 sm:$0xff]  }
 0x82c   : > { %12681 = vmatpush1.bf16.msra.mxu0 %v17003_v30  ;;  %v16961_v30 = vld [vmem:[#allocation11 + $0x668] ss:$16 sps:$4 sm:$0xff]  }
 0x82d   : > { %12682 = vmatprep.subr.bf16.mxu0 %v17008_v16  ;;  %v16966_v16 = vld [vmem:[#allocation11 + $0x68c] ss:$16 sps:$4 sm:$0xff]  }
 0x82e   : > { %12181 = vmatpush1.bf16.msra.mxu1 %v16910_v23  ;;  %v16964_v23 = vld [vmem:[#allocation11 + $0x688] ss:$16 sps:$4 sm:$0xff]  }
 0x82f   : > { %12182 = vmatprep.subr.bf16.mxu1 %v16915_v33  ;;  %v16969_v33 = vld [vmem:[#allocation11 + $0x6ac] ss:$16 sps:$4 sm:$0xff]  }
 0x830   : > { %12683 = vmatpush1.bf16.msra.mxu0 %v17006_v63  ;;  %v17041_v63 = vld [vmem:[#allocation14 + $0xd4] ss:$8 sps:$4 sm:$0xff]  }
 0x831   : > { %12684 = vmatprep.subr.bf16.mxu0 %v17011_v20 }
 0x832   : > { %12183 = vmatpush1.bf16.msra.mxu1 %v16913_v34  ;;  %v16972_v34 = vld [vmem:[#allocation11 + $0x6cc] ss:$16 sps:$4 sm:$0xff]  }
 0x833   : > { %12184 = vmatprep.subr.bf16.mxu1 %v16918_v27  ;;  %v17039_v27 = vld [vmem:[#allocation14 + $0xd0] ss:$8 sps:$4 sm:$0xff]  }
 0x834   : > { %12685 = vmatpush1.bf16.msra.mxu0 %v17009_v58 }
 0x835   : > { %12686 = vmatprep.subr.bf16.mxu0 %v17014_v37  ;;  %v16970_v37 = vld [vmem:[#allocation11 + $0x6c8] ss:$16 sps:$4 sm:$0xff]  }
 0x836   : > { %12185 = vmatpush1.bf16.msra.mxu1 %v16916_v38 }
 0x837   : > { %12186 = vmatprep.subr.bf16.mxu1 %v16921_v31  ;;  %v16975_v31 = vld [vmem:[#allocation11 + $0x6ec] ss:$16 sps:$4 sm:$0xff]  }
 0x838   : > { %12687 = vmatpush1.bf16.msra.mxu0 %v17012_v55  ;;  %v17044_v55 = vld [vmem:[#allocation14 + $0xe4] ss:$8 sps:$4 sm:$0xff]  }
 0x839   : > { %12688 = vmatprep.subr.bf16.mxu0 %v17017_v32  ;;  %v17042_v32 = vld [vmem:[#allocation14 + $0xe0] ss:$8 sps:$4 sm:$0xff]  }
 0x83a   : > { %12187 = vmatpush1.bf16.msra.mxu1 %v16919_v41  ;;  %v16973_v41 = vld [vmem:[#allocation11 + $0x6e8] ss:$16 sps:$4 sm:$0xff]  }
 0x83b   : > { %12188 = vmatprep.subr.bf16.mxu1 %v16924_v42  ;;  %v16978_v42 = vld [vmem:[#allocation11 + $0x70c] ss:$16 sps:$4 sm:$0xff]  }
 0x83c   : > { %12689 = vmatpush1.bf16.msra.mxu0 %v17015_v35  ;;  %v17047_v35 = vld [vmem:[#allocation14 + $0xf4] ss:$8 sps:$4 sm:$0xff]  }
 0x83d   : > { %12690 = vmatprep.subr.bf16.mxu0 %v17020_v36  ;;  %v17045_v36 = vld [vmem:[#allocation14 + $0xf0] ss:$8 sps:$4 sm:$0xff]  }
 0x83e   : > { %12189 = vmatpush1.bf16.msra.mxu1 %v16922_v45  ;;  %v16976_v45 = vld [vmem:[#allocation11 + $0x708] ss:$16 sps:$4 sm:$0xff]  }
 0x83f   : > { %12190 = vmatprep.subr.bf16.mxu1 %v16927_v46  ;;  %v16981_v46 = vld [vmem:[#allocation11 + $0x72c] ss:$16 sps:$4 sm:$0xff]  }
 0x840   : > { %12691 = vmatpush1.bf16.msra.mxu0 %v17018_v47  ;;  %v17050_v47 = vld [vmem:[#allocation14 + $0x104] ss:$8 sps:$4 sm:$0xff]  }
 0x841   : > { %12692 = vmatprep.subr.bf16.mxu0 %v17023_v40  ;;  %v16979_v40 = vld [vmem:[#allocation11 + $0x728] ss:$16 sps:$4 sm:$0xff]  }
 0x842   : > { %12191 = vmatpush1.bf16.msra.mxu1 %v16925_v43  ;;  %v16984_v43 = vld [vmem:[#allocation11 + $0x74c] ss:$16 sps:$4 sm:$0xff]  }
 0x843   : > { %12192 = vmatprep.subr.bf16.mxu1 %v16930_v44  ;;  %v16982_v44 = vld [vmem:[#allocation11 + $0x748] ss:$16 sps:$4 sm:$0xff]  }
 0x844   : > { %12693 = vmatpush1.bf16.msra.mxu0 %v17021_v50  ;;  %v16987_v50 = vld [vmem:[#allocation11 + $0x76c] ss:$16 sps:$4 sm:$0xff]  }
 0x845   : > { %12694 = vmatprep.subr.bf16.mxu0 %v17026_v52  ;;  %v16985_v52 = vld [vmem:[#allocation11 + $0x768] ss:$16 sps:$4 sm:$0xff]  }
 0x846   : > { %12193 = vmatpush1.bf16.msra.mxu1 %v16928_v53  ;;  %v16990_v53 = vld [vmem:[#allocation11 + $0x78c] ss:$16 sps:$4 sm:$0xff]  }
 0x847   : > { %12194 = vmatprep.subr.bf16.mxu1 %v16933_v48  ;;  %v16988_v48 = vld [vmem:[#allocation11 + $0x788] ss:$16 sps:$4 sm:$0xff]  }
 0x848   : > { %12695 = vmatpush1.bf16.msra.mxu0 %v17024_v0  ;;  %v16993_v0 = vld [vmem:[#allocation11 + $0x7ac] ss:$16 sps:$4 sm:$0xff]  }
 0x849   : > { %12696 = vmatprep.subr.bf16.mxu0 %v17029_v39  ;;  %v16991_v39 = vld [vmem:[#allocation11 + $0x7a8] ss:$16 sps:$4 sm:$0xff]  }
 0x84a   : > { %12195 = vmatpush1.bf16.msra.mxu1 %v16931_v56  ;;  %v16996_v56 = vld [vmem:[#allocation11 + $0x7cc] ss:$16 sps:$4 sm:$0xff]  }
 0x84b   : > { %12196 = vmatprep.subr.bf16.mxu1 %v16936_v57  ;;  %v16994_v57 = vld [vmem:[#allocation11 + $0x7c8] ss:$16 sps:$4 sm:$0xff]  }
 0x84c   : > { %12697 = vmatpush1.bf16.msra.mxu0 %v17027_v60  ;;  %v16999_v60 = vld [vmem:[#allocation11 + $0x7ec] ss:$16 sps:$4 sm:$0xff]  }
 0x84d   : > { %12698 = vmatprep.subr.bf16.mxu0 %v17032_v13  ;;  %v16997_v13 = vld [vmem:[#allocation11 + $0x7e8] ss:$16 sps:$4 sm:$0xff]  }
 0x84e   : > { %12197 = vmatpush1.bf16.msra.mxu1 %v16934_v61  ;;  %v19394_v61 = vld [vmem:[#allocation12] sm:$0xf] }
 0x84f   : > { %12198 = vmatprep.subr.bf16.mxu1 %v16939_v54  ;;  %v10621_v54 = vrot.slane %v19394_v61, %v19114_v14 }
 0x850   : > { %12699 = vmatpush1.bf16.msra.mxu0 %v17030_v1  ;;  %v10625_v1 = vrot.slane %v19394_v61, %v19121_v19 }
 0x851   : > { %12700 = vmatprep.subr.bf16.mxu0 %v17035_v24 }
 0x852   : > { %12199 = vmatpush1.bf16.msra.mxu1 %v16937_v59 }
 0x853   : > { %12200 = vmatprep.subr.bf16.mxu1 %v16942_v4 }
 0x854   : > { %12701 = vmatpush1.bf16.msra.mxu0 %v17033_v5 }
 0x855   : > { %12702 = vmatprep.subr.bf16.mxu0 %v17038_v7 }
 0x856   : > { %12201 = vmatpush1.bf16.msra.mxu1 %v16940_v6 }
 0x857   : > { %12202 = vmatprep.subr.bf16.mxu1 %v16945_v11 }
 0x858   : > { %12703 = vmatpush1.bf16.msra.mxu0 %v17036_v12 }
 0x859   : > { %12704 = vmatprep.subr.bf16.mxu0 %v17041_v63  ;;  %v17051_v63 = vld [vmem:[#allocation14 + $0x110] ss:$8 sps:$4 sm:$0xff]  }
 0x85a   : > { %12203 = vmatpush1.bf16.msra.mxu1 %v16943_v51 }
 0x85b   : > { %12204 = vmatprep.subr.bf16.mxu1 %v16948_v18 }
 0x85c   : > { %12705 = vmatpush1.bf16.msra.mxu0 %v17039_v27  ;;  %v17099_v27 = vld [vmem:[%s19539_s29 + $0x8] sm:$0xff]  }
 0x85d   : > { %12706 = vmatprep.subr.bf16.mxu0 %v17044_v55  ;;  %v17057_v55 = vld [vmem:[#allocation14 + $0x130] ss:$8 sps:$4 sm:$0xff]  }
 0x85e   : > { %12205 = vmatpush1.bf16.msra.mxu1 %v16946_v17 }
 0x85f   : > { %12206 = vmatprep.subr.bf16.mxu1 %v16951_v9 }
 0x860   : > { %12707 = vmatpush1.bf16.msra.mxu0 %v17042_v32  ;;  %v17062_v32 = vld [vmem:[#allocation14 + $0x144] ss:$8 sps:$4 sm:$0xff]  }
 0x861   : > { %12708 = vmatprep.subr.bf16.mxu0 %v17047_v35  ;;  %v17060_v35 = vld [vmem:[#allocation14 + $0x140] ss:$8 sps:$4 sm:$0xff]  }
 0x862   : > { %12207 = vmatpush1.bf16.msra.mxu1 %v16949_v8 }
 0x863   : > { %12219 = vmatprep.subr.bf16.mxu1 %v16954_v10 }
 0x864   : > { %12709 = vmatpush1.bf16.msra.mxu0 %v17045_v36  ;;  %v17065_v36 = vld [vmem:[#allocation14 + $0x154] ss:$8 sps:$4 sm:$0xff]  }
 0x865   : > { %12209 = vmatmul.mubr.bf16.vlgmr.msra.gmra.mrb[4].mxu1 %v19375_v49  ;;  %v16967_v49 = vld [vmem:[#allocation11 + $0x6a8] ss:$16 sps:$4 sm:$0xff]   ;;  %12721 = vmatprep.subr.bf16.mxu0 %v17050_v47 }
 0x866   : > { %12220 = vmatpush1.bf16.msra.mxu1 %v16952_v2  ;;  %12251 = vmatprep.mubr.bf16.mxu1 %v19382_v62  ;;  %v17068_v47 = vld [vmem:[#allocation14 + $0x164] ss:$8 sps:$4 sm:$0xff]  }
 0x867   : > { %12221 = vmatprep.subr.bf16.mxu1 %v16957_v3 }
 0x86a   : > { %12222 = vmatpush1.bf16.msra.mxu1 %v16955_v26 }
 0x86b   : > { %12223 = vmatprep.subr.bf16.mxu1 %v16960_v21 }
 0x86e   : > { %12224 = vmatpush1.bf16.msra.mxu1 %v16958_v28 }
 0x86f   : > { %12225 = vmatprep.subr.bf16.mxu1 %v16963_v29 }
 0x872   : > { %12226 = vmatpush1.bf16.msra.mxu1 %v16961_v30 }
 0x873   : > { %12227 = vmatprep.subr.bf16.mxu1 %v16966_v16  ;;  %v17048_v16 = vld [vmem:[#allocation14 + $0x100] ss:$8 sps:$4 sm:$0xff]  }
 0x876   : > { %12228 = vmatpush1.bf16.msra.mxu1 %v16964_v23  ;;  %v17053_v23 = vld [vmem:[#allocation14 + $0x114] ss:$8 sps:$4 sm:$0xff]  }
 0x877   : > { %12229 = vmatprep.subr.bf16.mxu1 %v16969_v33  ;;  %v17096_v33 = vld [vmem:[%s19539_s29 + $0x40] sm:$0xff]  }
 0x878   : > { %v11952_v62 = vpop.f32.mrb[0].mxu1 }
 0x879   : > { %v11954_v20 = vpop.f32.mrb[1].mxu1  ;;  %v11953_v24 = vadd.f32 %v11952_v62, %v10621_v54  ;;  %v17056_v62 = vld [vmem:[#allocation14 + $0x124] ss:$8 sps:$4 sm:$0xff]  }
 0x87a   : > { %v11956_v58 = vpop.f32.mrb[2].mxu1  ;;  %12230 = vmatpush1.bf16.msra.mxu1 %v16967_v49  ;;  %v11955_v59 = vadd.f32 %v11954_v20, %v10625_v1  ;;  %v17097_v49 = vld [vmem:[%s19539_s29] sm:$0xff]   ;;  %v17100_v20 = vld [vmem:[%s19539_s29 + $0x50] sm:$0xff]  }
 0x87b   : > { %v11958_v38 = vpop.f32.mrb[3].mxu1  ;;  %12231 = vmatprep.subr.bf16.mxu1 %v16972_v34  ;;  %v11957_v5 = vadd.f32 %v11956_v58, %v10621_v54  ;;  %v17098_v34 = vld [vmem:[%s19539_s29 + $0x48] sm:$0xff]   ;;  %v17054_v58 = vld [vmem:[#allocation14 + $0x120] ss:$8 sps:$4 sm:$0xff]  }
 0x87c   : > { %v11959_v11 = vadd.f32 %v11958_v38, %v10625_v1  ;;  %v17101_v38 = vld [vmem:[%s19539_s29 + $0x10] sm:$0xff]  }
 0x87d   : > { %v17089_v54 = vld [vmem:[#allocation14 + $0x1d4] ss:$8 sps:$4 sm:$0xff]   ;;  %v17087_v1 = vld [vmem:[#allocation14 + $0x1d0] ss:$8 sps:$4 sm:$0xff]  }
 0x87e   : > { %12232 = vmatpush1.bf16.msra.mxu1 %v16970_v37  ;;  %v17059_v37 = vld [vmem:[#allocation14 + $0x134] ss:$8 sps:$4 sm:$0xff]  }
 0x87f   : > { %12233 = vmatprep.subr.bf16.mxu1 %v16975_v31  ;;  %v17102_v31 = vld [vmem:[%s19539_s29 + $0x58] sm:$0xff]  }
 0x882   : > { %12234 = vmatpush1.bf16.msra.mxu1 %v16973_v41  ;;  %v17103_v41 = vld [vmem:[%s19539_s29 + $0x18] sm:$0xff]  }
 0x883   : > { %12235 = vmatprep.subr.bf16.mxu1 %v16978_v42  ;;  %v17104_v42 = vld [vmem:[%s19539_s29 + $0x60] sm:$0xff]  }
 0x886   : > { %12236 = vmatpush1.bf16.msra.mxu1 %v16976_v45  ;;  %v17105_v45 = vld [vmem:[%s19539_s29 + $0x20] sm:$0xff]  }
 0x887   : > { %12237 = vmatprep.subr.bf16.mxu1 %v16981_v46  ;;  %v17063_v46 = vld [vmem:[#allocation14 + $0x150] ss:$8 sps:$4 sm:$0xff]  }
 0x88a   : > { %12238 = vmatpush1.bf16.msra.mxu1 %v16979_v40  ;;  %v17066_v40 = vld [vmem:[#allocation14 + $0x160] ss:$8 sps:$4 sm:$0xff]  }
 0x88b   : > { %12239 = vmatprep.subr.bf16.mxu1 %v16984_v43  ;;  %v17071_v43 = vld [vmem:[#allocation14 + $0x174] ss:$8 sps:$4 sm:$0xff]  }
 0x88e   : > { %12240 = vmatpush1.bf16.msra.mxu1 %v16982_v44  ;;  %v17069_v44 = vld [vmem:[#allocation14 + $0x170] ss:$8 sps:$4 sm:$0xff]  }
 0x88f   : > { %12241 = vmatprep.subr.bf16.mxu1 %v16987_v50  ;;  %v17074_v50 = vld [vmem:[#allocation14 + $0x184] ss:$8 sps:$4 sm:$0xff]  }
 0x892   : > { %12242 = vmatpush1.bf16.msra.mxu1 %v16985_v52  ;;  %v17072_v52 = vld [vmem:[#allocation14 + $0x180] ss:$8 sps:$4 sm:$0xff]  }
 0x893   : > { %12243 = vmatprep.subr.bf16.mxu1 %v16990_v53  ;;  %v17077_v53 = vld [vmem:[#allocation14 + $0x194] ss:$8 sps:$4 sm:$0xff]  }
 0x896   : > { %12244 = vmatpush1.bf16.msra.mxu1 %v16988_v48  ;;  %v17075_v48 = vld [vmem:[#allocation14 + $0x190] ss:$8 sps:$4 sm:$0xff]  }
 0x897   : > { %12245 = vmatprep.subr.bf16.mxu1 %v16993_v0  ;;  %v17080_v0 = vld [vmem:[#allocation14 + $0x1a4] ss:$8 sps:$4 sm:$0xff]  }
 0x89a   : > { %12246 = vmatpush1.bf16.msra.mxu1 %v16991_v39  ;;  %v17078_v39 = vld [vmem:[#allocation14 + $0x1a0] ss:$8 sps:$4 sm:$0xff]  }
 0x89b   : > { %12247 = vmatprep.subr.bf16.mxu1 %v16996_v56  ;;  %v17083_v56 = vld [vmem:[#allocation14 + $0x1b4] ss:$8 sps:$4 sm:$0xff]  }
 0x89e   : > { %12248 = vmatpush1.bf16.msra.mxu1 %v16994_v57  ;;  %v17081_v57 = vld [vmem:[#allocation14 + $0x1b0] ss:$8 sps:$4 sm:$0xff]  }
 0x89f   : > { %12249 = vmatprep.subr.bf16.mxu1 %v16999_v60  ;;  %v17086_v60 = vld [vmem:[#allocation14 + $0x1c4] ss:$8 sps:$4 sm:$0xff]  }
 0x8a2   : > { %12250 = vmatpush1.bf16.msra.mxu1 %v16997_v13  ;;  %v17084_v13 = vld [vmem:[#allocation14 + $0x1c0] ss:$8 sps:$4 sm:$0xff]  }
 0x8a3   : > { %14767 = vmatprep.subr.bf16.mxu1 %v17096_v33  ;;  %v17109_v33 = vld [vmem:[%s19539_s29 + $0x30] sm:$0xff]  }
 0x8a5   : > { %12252 = vmatmul.mubr.bf16.vlgmr.msra.gmra.mrb[4].mxu1 %v19386_v25 }
 0x8a6   : > { %14768 = vmatpush3.bf16.msra.mxu1 %v17097_v49  ;;  %v17110_v49 = vld [vmem:[%s19539_s29 + $0x78] sm:$0xff]  }
 0x8a7   : > { %14769 = vmatprep.subr.bf16.mxu1 %v17098_v34  ;;  %v17111_v34 = vld [vmem:[%s19539_s29 + $0x38] sm:$0xff]  }
 0x8aa   : > { %14770 = vmatpush3.bf16.msra.mxu1 %v17099_v27 }
 0x8ab   : > { %14771 = vmatprep.subr.bf16.mxu1 %v17100_v20 }
 0x8ae   : > { %14772 = vmatpush3.bf16.msra.mxu1 %v17101_v38 }
 0x8af   : > { %14773 = vmatprep.subr.bf16.mxu1 %v17102_v31 }
 0x8b2   : > { %14774 = vmatpush3.bf16.msra.mxu1 %v17103_v41 }
 0x8b3   : > { %14775 = vmatprep.subr.bf16.mxu1 %v17104_v42 }
 0x8b6   : > { %14776 = vmatpush3.bf16.msra.mxu1 %v17105_v45 }
 0x8fa   : > { %v12081_v4 = vpop.f32.mrb[0].mxu0 }
 0x8fb   : > { %v14934_v7 = vadd.f32 %v12081_v4, %v11953_v24  ;;  %v12083_v6 = vpop.f32.mrb[1].mxu0  ;;  %v17092_v24 = vld [vmem:[#allocation14 + $0x1e4] ss:$8 sps:$4 sm:$0xff]   ;;  %v17095_v4 = vld [vmem:[#allocation14 + $0x1f4] ss:$8 sps:$4 sm:$0xff]  }
 0x8fc   : > { %v14936_v12 = vadd.f32 %v12083_v6, %v11955_v59  ;;  %v12085_v51 = vpop.f32.mrb[2].mxu0  ;;  %v17090_v59 = vld [vmem:[#allocation14 + $0x1e0] ss:$8 sps:$4 sm:$0xff]   ;;  %v10633_v6 = vrot.slane %v19394_v61, %v19124_v22  ;;  %v17106_v22 = vld [vmem:[%s19539_s29 + $0x68] sm:$0xff]  }
 0x8fd   : > { %v12262_v18 = vmul.f32 0.01, %v14934_v7  ;;  %v14938_v17 = vadd.f32 %v12085_v51, %v11957_v5  ;;  %v12087_v25 = vpop.f32.mrb[3].mxu0  ;;  %v17093_v5 = vld [vmem:[#allocation14 + $0x1f0] ss:$8 sps:$4 sm:$0xff]   ;;  %14777 = vmatprep.subr.bf16.mxu1 %v17106_v22 }
 0x8fe   : > { %v12263_v9 = vmul.f32 0.01, %v14936_v12  ;;  %v14940_v8 = vadd.f32 %v12087_v25, %v11959_v11 }
 0x8ff   : > { %v12266_v10 = vmul.f32 0.01, %v14938_v17  ;;  %v12270_v3 = vmax.f32 %v14934_v7, %v12262_v18  ;;  %v10629_v7 = vrot.slane %v19394_v61, %v19117_v15  ;;  %v17107_v61 = vld [vmem:[%s19539_s29 + $0x28] sm:$0xff]  }
 0x900   : > { %v12267_v2 = vmul.f32 0.01, %v14940_v8  ;;  %v12271_v21 = vmax.f32 %v14936_v12, %v12263_v9  ;;  %14778 = vmatpush3.bf16.msra.mxu1 %v17107_v61 }
 0x901   : > { %v12274_v26 = vmax.f32 %v14938_v17, %v12266_v10 }
 0x902   : > { %v12275_v28 = vmax.f32 %v14940_v8, %v12267_v2 }
 0x903   : > { %v12278_v29 = vpack.c.bf16 %v12274_v26, %v12270_v3 }
 0x904   : > { %v12279_v30 = vpack.c.bf16 %v12275_v28, %v12271_v21 }
 0x906   : > { %12710 = vmatprep.mubr.bf16.mxu0 %v12279_v30 }
 0x907   : > { %12711 = vmatmul.mubr.bf16.vlgmr.msra.gmra.mrb[4].mxu0 %v12278_v29 }
 0x908   : > { %12722 = vmatpush1.bf16.msra.mxu0 %v17048_v16 }
 0x909   : > { %12723 = vmatprep.subr.bf16.mxu0 %v17053_v23  ;;  %v17108_v23 = vld [vmem:[%s19539_s29 + $0x70] sm:$0xff]  }
 0x90a   : > { %14779 = vmatprep.subr.bf16.mxu1 %v17108_v23 }
 0x90b   : > { %14780 = vmatpush3.bf16.msra.mxu1 %v17109_v33 }
 0x90c   : > { %12724 = vmatpush1.bf16.msra.mxu0 %v17051_v63  ;;  %14781 = vmatprep.subr.bf16.mxu1 %v17110_v49  ;;  %v12346_v63 = vld [vmem:[#allocation15] sm:$0x3] }
 0x90d   : > { %12725 = vmatprep.subr.bf16.mxu0 %v17056_v62  ;;  %v12351_v62 = vrot.slane %v12346_v63, %v19114_v14  ;;  %v12355_v27 = vrot.slane %v12346_v63, %v19121_v19 }
 0x90f   : > { %14782 = vmatpush3.bf16.msra.mxu1 %v17111_v34 }
 0x910   : > { %12726 = vmatpush1.bf16.msra.mxu0 %v17054_v58 }
 0x911   : > { %12727 = vmatprep.subr.bf16.mxu0 %v17059_v37 }
 0x914   : > { %12728 = vmatpush1.bf16.msra.mxu0 %v17057_v55 }
 0x915   : > { %12729 = vmatprep.subr.bf16.mxu0 %v17062_v32 }
 0x918   : > { %12730 = vmatpush1.bf16.msra.mxu0 %v17060_v35 }
 0x919   : > { %12731 = vmatprep.subr.bf16.mxu0 %v17065_v36 }
 0x91c   : > { %12732 = vmatpush1.bf16.msra.mxu0 %v17063_v46 }
 0x91d   : > { %12733 = vmatprep.subr.bf16.mxu0 %v17068_v47 }
 0x920   : > { %12734 = vmatpush1.bf16.msra.mxu0 %v17066_v40 }
 0x921   : > { %12735 = vmatprep.subr.bf16.mxu0 %v17071_v43 }
 0x924   : > { %12736 = vmatpush1.bf16.msra.mxu0 %v17069_v44 }
 0x925   : > { %12737 = vmatprep.subr.bf16.mxu0 %v17074_v50  ;;  %v14744_v50 = vld [vmem:[#allocation3] ss:$0 sm:$0xff] }
 0x928   : > { %12738 = vmatpush1.bf16.msra.mxu0 %v17072_v52 }
 0x929   : > { %12739 = vmatprep.subr.bf16.mxu0 %v17077_v53 }
 0x92c   : > { %12740 = vmatpush1.bf16.msra.mxu0 %v17075_v48 }
 0x92d   : > { %12741 = vmatprep.subr.bf16.mxu0 %v17080_v0 }
 0x930   : > { %12742 = vmatpush1.bf16.msra.mxu0 %v17078_v39 }
 0x931   : > { %12743 = vmatprep.subr.bf16.mxu0 %v17083_v56 }
 0x934   : > { %12744 = vmatpush1.bf16.msra.mxu0 %v17081_v57 }
 0x935   : > { %12745 = vmatprep.subr.bf16.mxu0 %v17086_v60 }
 0x938   : > { %12746 = vmatpush1.bf16.msra.mxu0 %v17084_v13 }
 0x939   : > { %12747 = vmatprep.subr.bf16.mxu0 %v17089_v54 }
 0x93c   : > { %12748 = vmatpush1.bf16.msra.mxu0 %v17087_v1 }
 0x93d   : > { %12749 = vmatprep.subr.bf16.mxu0 %v17092_v24 }
 0x940   : > { %12750 = vmatpush1.bf16.msra.mxu0 %v17090_v59 }
 0x941   : > { %12751 = vmatprep.subr.bf16.mxu0 %v17095_v4 }
 0x944   : > { %12752 = vmatpush1.bf16.msra.mxu0 %v17093_v5 }
 0x978   : > { %v12253_v11 = vpop.f32.mrb[4].mxu1 }
 0x979   : > { %v14941_v12 = vadd.f32 %v12253_v11, %v10629_v7  ;;  %v12255_v51 = vpop.f32.mrb[5].mxu1 }
 0x97a   : > { %v14942_v18 = vadd.f32 %v12255_v51, %v10633_v6  ;;  %v12257_v17 = vpop.f32.mrb[6].mxu1 }
 0x97b   : > { %v12264_v25 = vmul.f32 0.01, %v14941_v12  ;;  %v14943_v9 = vadd.f32 %v12257_v17, %v10629_v7  ;;  %v12259_v8 = vpop.f32.mrb[7].mxu1 }
 0x97c   : > { %v12265_v10 = vmul.f32 0.01, %v14942_v18  ;;  %v14944_v2 = vadd.f32 %v12259_v8, %v10633_v6 }
 0x97d   : > { %v12268_v3 = vmul.f32 0.01, %v14943_v9  ;;  %v12272_v21 = vmax.f32 %v14941_v12, %v12264_v25 }
 0x97e   : > { %v12269_v26 = vmul.f32 0.01, %v14944_v2  ;;  %v12273_v29 = vmax.f32 %v14942_v18, %v12265_v10 }
 0x97f   : > { %v12276_v28 = vmax.f32 %v14943_v9, %v12268_v3 }
 0x980   : > { %v12277_v30 = vmax.f32 %v14944_v2, %v12269_v26 }
 0x981   : > { %v12280_v15 = vpack.c.bf16 %v12276_v28, %v12272_v21 }
 0x982   : > { %v12281_v16 = vpack.c.bf16 %v12277_v30, %v12273_v29 }
 0x984   : > { %12753 = vmatprep.mubr.bf16.mxu0 %v12281_v16 }
 0x985   : > { %12754 = vmatmul.mubr.bf16.vlgmr.msra.gmra.mrb[4].mxu0 %v12280_v15 }
 0xa58   : > { %v12755_v20 = vpop.f32.mrb[4].mxu0 }
 0xa59   : > { %v14945_v58 = vadd.f32 %v12755_v20, %v12351_v62  ;;  %v12757_v37 = vpop.f32.mrb[5].mxu0 }
 0xa5a   : > { %v14946_v38 = vadd.f32 %v12757_v37, %v12355_v27  ;;  %v12759_v31 = vpop.f32.mrb[6].mxu0 }
 0xa5b   : > { %v12764_v55 = vmul.f32 0.01, %v14945_v58  ;;  %v14947_v32 = vadd.f32 %v12759_v31, %v12351_v62  ;;  %v12761_v41 = vpop.f32.mrb[7].mxu0 }
 0xa5c   : > { %v12765_v42 = vmul.f32 0.01, %v14946_v38  ;;  %v14948_v35 = vadd.f32 %v12761_v41, %v12355_v27 }
 0xa5d   : > { %v12766_v36 = vmul.f32 0.01, %v14947_v32  ;;  %v12768_v46 = vmax.f32 %v14945_v58, %v12764_v55 }
 0xa5e   : > { %v12767_v45 = vmul.f32 0.01, %v14948_v35  ;;  %v12769_v40 = vmax.f32 %v14946_v38, %v12765_v42 }
 0xa5f   : > { %v12770_v47 = vmax.f32 %v14947_v32, %v12766_v36 }
 0xa60   : > { %v12771_v43 = vmax.f32 %v14948_v35, %v12767_v45 }
 0xa61   : > { %v12772_v44 = vpack.c.bf16 %v12770_v47, %v12768_v46 }
 0xa62   : > { %v12773_v14 = vpack.c.bf16 %v12771_v43, %v12769_v40 }
 0xa64   : > { %12941 = vmatprep.mubr.bf16.mxu1 %v12773_v14 }
 0xa65   : > { %12942 = vmatmul.mubr.bf16.vlgmr.msra.gmra.mrb[8].mxu1 %v12772_v44 }
 0xb38   : > { %v14783_v19 = vpop.f32.mrb[8].mxu1 }
 0xb39   : > { %v14784_v52 = vpop.f32.mrb[9].mxu1 }
 0xb3a   : > { %v14785_v53 = vadd.f32 %v14784_v52, %v14783_v19  ;;  %v14786_v48 = vpop.f32.mrb[10].mxu1 }
 0xb3b   : > { %v14787_v0 = vpop.f32.mrb[11].mxu1 }
 0xb3c   : > { %v12944_v39 = vadd.f32 %v14785_v53, %v14744_v50  ;;  %v14788_v56 = vadd.f32 %v14787_v0, %v14786_v48 }
 0xb3e   : > { %12951 = vst.msk [vmem:[%s19540_s27] sm:$0xff] %vm12950_vm0, %v12944_v39  ;;  %v12947_v57 = vadd.f32 %v14788_v56, %v14744_v50 }
 0xb40   : > { %12952 = vst.msk [vmem:[%s19540_s27 + $0x8] sm:$0xff] %vm12950_vm0, %v12947_v57 }
 0xb41 PF: > { %s19541_s22 = sld [smem:[#allocation23_spill]]  ;;  %s19542_s26 = sld [smem:[#allocation22_spill]] }
 0xb42   : > { %s19543_s21 = sld [smem:[#allocation24_spill]]  ;;  %s19544_s19 = smov %s17385_s20 }
 0xb47   : > { %p29_p7 = scmp.ge.s32.totalorder %s19541_s22, 6   ;;  %s19545_s20 = smov %s19542_s26 }
 0xb49   :  { %31 = sbr.rel (!%p29_p7) target bundleno = 15 (0xf), region = 152 }
 0xb50   :  { %12964 = vsyncpa [#allocation5], 1 }
 0xb51   :  { %12966 = vsyncpa [#allocation5 + $0x1], 1 }
 0xb52   :  { %12967 = vsyncpa [#allocation7], 1 }
 0xb53   :  { %12969 = vsyncpa [#allocation7 + $0x1], 1 }
 0xb54   :  { %12970 = vsyncpa [#allocation10], 1 }
 0xb55   :  { %12971 = vsyncpa [#allocation13], 1 }
 0xb56   :  { %12972 = vsyncpa [#allocation16], 1 }

</bundles_post_ra>
